<compile_context>
chip_gen: v5e
topology: v5e:2x2
jax: 0.10.0
libtpu: 0.0.40
codegen_flags: <defaults>
</compile_context>

<pallas_src>
import math

import jax
import jax.numpy as jnp
from jax import lax
from jax.experimental import pallas as pl
from jax.experimental.pallas import tpu as pltpu

# ---------------- small synthetic "ViT-B-16" hyper-parameters ----------------
IMG_SIZE = 32
PATCH = 16                     # vision_stride_size
IN_CH = 3
EMBED_DIM = 128                # stands in for in_planes = 768 (multiple of 128)
PROJ_DIM = 128                 # stands in for in_planes_proj = 512
NUM_HEADS = 2
HEAD_DIM = EMBED_DIM // NUM_HEADS
NUM_LAYERS = 2                 # last layer -> image_features, previous -> *_last
MLP_DIM = 4 * EMBED_DIM
NUM_CLASSES = 8
CLS_PAD = 128                  # classifier N padded to one full lane tile
CAMERA_NUM = 3
VIEW_NUM = 2
SIE_COE = 1.0
H_RES = (IMG_SIZE - 16) // PATCH + 1
W_RES = (IMG_SIZE - 16) // PATCH + 1
NUM_PATCHES = H_RES * W_RES
SEQ = NUM_PATCHES + 1          # 5
SEQ_PAD = 8                    # padded to a full sublane granule
PATCH_DIM = IN_CH * PATCH * PATCH          # 768, multiple of 128
ATTN_SCALE = 1.0 / math.sqrt(HEAD_DIM)
BATCH_TILE = 16                # samples per grid step (TB*SEQ_PAD = 128 rows)
BF16 = jnp.bfloat16
F32 = jnp.float32
LN_EPS = 1e-5
BN_EPS = 1e-5
VMEM_LIMIT = 48 * 1024 * 1024


# ------------------------------ in-kernel helpers -----------------------------
def _layer_norm(x, g, b):
    mu = jnp.mean(x, axis=-1, keepdims=True)
    var = jnp.mean(jnp.square(x - mu), axis=-1, keepdims=True)
    return (x - mu) * lax.rsqrt(var + LN_EPS) * g + b


def _batch_norm(x, g, b):
    # PyTorch BatchNorm1d, training mode: biased variance over the batch axis.
    mu = jnp.mean(x, axis=0, keepdims=True)
    var = jnp.mean(jnp.square(x - mu), axis=0, keepdims=True)
    return (x - mu) * lax.rsqrt(var + BN_EPS) * g + b


def _wspec(shape):
    zero = (0,) * len(shape)
    return pl.BlockSpec(shape, lambda i: zero)   # weight resident across grid


def _batch_tile(bsz):
    return math.gcd(bsz, BATCH_TILE)


# ------------------ kernel 1: patch embed + ln_pre (fused) --------------------
def _embed_kernel(patch_ref, convw_ref, clspos_ref, cv_ref, g_ref, b_ref, o_ref):
    tb, s, _ = patch_ref.shape
    # patch-embedding conv as one big bf16 matmul (M = tb*SEQ_PAD rows), f32 acc.
    # Padded rows (CLS slot + tail) of the patch slab are zero -> zero tokens.
    tok = jnp.dot(patch_ref[...].reshape(tb * s, PATCH_DIM).astype(BF16),
                  convw_ref[...], preferred_element_type=F32)
    tok = tok.reshape(tb, s, EMBED_DIM)
    row = lax.broadcasted_iota(jnp.int32, (1, s, 1), 1)
    # [CLS | patches] + pos emb (clspos already holds class_emb on row 0) and
    # SIE embedding added to the CLS row only.
    x = tok + clspos_ref[...] + (row == 0).astype(F32) * cv_ref[...]
    x = _layer_norm(x, g_ref[...], b_ref[...])
    valid = (row < SEQ).astype(F32)               # zero the padded rows
    o_ref[...] = (x * valid).astype(o_ref.dtype)


def embed_ln_pre(patches_padded, cv, cls_pos, vp):
    bsz = patches_padded.shape[0]
    tb = _batch_tile(bsz)
    return pl.pallas_call(
        _embed_kernel,
        grid=(bsz // tb,),
        in_specs=[
            pl.BlockSpec((tb, SEQ_PAD, PATCH_DIM), lambda i: (i, 0, 0)),
            _wspec((PATCH_DIM, EMBED_DIM)),
            _wspec((SEQ_PAD, EMBED_DIM)),
            pl.BlockSpec((tb, 1, EMBED_DIM), lambda i: (i, 0, 0)),
            _wspec((1, EMBED_DIM)),
            _wspec((1, EMBED_DIM)),
        ],
        out_specs=pl.BlockSpec((tb, SEQ_PAD, EMBED_DIM), lambda i: (i, 0, 0)),
        out_shape=jax.ShapeDtypeStruct((bsz, SEQ_PAD, EMBED_DIM), BF16),
        compiler_params=pltpu.CompilerParams(
            dimension_semantics=("parallel",), vmem_limit_bytes=VMEM_LIMIT),
    )(patches_padded, vp["conv_w"], cls_pos, cv, vp["ln_pre_g"], vp["ln_pre_b"])


# --------------- kernel 2: one fused residual-attention block -----------------
def _block_kernel(x_ref, ln1g_ref, ln1b_ref, qkvw_ref, qkvb_ref, projw_ref,
                  projb_ref, ln2g_ref, ln2b_ref, fc1w_ref, fc1b_ref, fc2w_ref,
                  fc2b_ref, o_ref):
    tb, s, d = x_ref.shape
    m_rows = tb * s
    x = x_ref[...].astype(F32)                                   # (TB, S, D)

    # ---- multi-head self-attention ----
    h2d = _layer_norm(x, ln1g_ref[...], ln1b_ref[...]).reshape(m_rows, d)
    # fused QKV: one (M, D) x (D, 3D) matmul
    qkv = (jnp.dot(h2d.astype(BF16), qkvw_ref[...], preferred_element_type=F32)
           + qkvb_ref[...]).reshape(tb, s, 3 * d)
    key_valid = lax.broadcasted_iota(jnp.int32, (1, 1, s), 2) < SEQ
    heads = []
    for hh in range(NUM_HEADS):                                  # per-head: only score/softmax/PV
        lo = hh * HEAD_DIM
        q = qkv[:, :, lo:lo + HEAD_DIM]
        k = qkv[:, :, d + lo:d + lo + HEAD_DIM]
        v = qkv[:, :, 2 * d + lo:2 * d + lo + HEAD_DIM]
        sc = jnp.einsum('bqd,bkd->bqk', q.astype(BF16), k.astype(BF16),
                        preferred_element_type=F32) * ATTN_SCALE
        sc = jnp.where(key_valid, sc, -1e30)                     # mask padded keys
        sc = sc - jnp.max(sc, axis=-1, keepdims=True)
        p = jnp.exp(sc)
        # approx reciprocal (EUP slot): ~2^-12 rel-err vs exact softmax, accepted.
        p = p * pl.reciprocal(jnp.sum(p, axis=-1, keepdims=True), approx=True)
        heads.append(jnp.einsum('bqk,bkd->bqd', p.astype(BF16), v.astype(BF16),
                                preferred_element_type=F32))
    attn = jnp.concatenate(heads, axis=-1).reshape(m_rows, d)
    # fused out-projection: one (M, D) x (D, D) matmul
    attn = (jnp.dot(attn.astype(BF16), projw_ref[...], preferred_element_type=F32)
            + projb_ref[...]).reshape(tb, s, d)
    x = x + attn

    # ---- MLP with QuickGELU (x * sigmoid(1.702 x)) ----
    h2 = _layer_norm(x, ln2g_ref[...], ln2b_ref[...]).reshape(m_rows, d)
    mlp = (jnp.dot(h2.astype(BF16), fc1w_ref[...], preferred_element_type=F32)
           + fc1b_ref[...])
    mlp = mlp * jax.nn.sigmoid(1.702 * mlp)
    mlp = (jnp.dot(mlp.astype(BF16), fc2w_ref[...], preferred_element_type=F32)
           + fc2b_ref[...]).reshape(tb, s, d)
    x = x + mlp

    row = lax.broadcasted_iota(jnp.int32, (1, s, 1), 1)
    o_ref[...] = (x * (row < SEQ).astype(F32)).astype(o_ref.dtype)   # keep pad rows zero


def transformer_block(x, bp):
    bsz = x.shape[0]
    tb = _batch_tile(bsz)
    # NOTE: input_output_aliases intentionally omitted: the layer-11 output
    # (image_features_last) must stay live after the following block call.
    return pl.pallas_call(
        _block_kernel,
        grid=(bsz // tb,),
        in_specs=[
            pl.BlockSpec((tb, SEQ_PAD, EMBED_DIM), lambda i: (i, 0, 0)),
            _wspec((1, EMBED_DIM)),
            _wspec((1, EMBED_DIM)),
            _wspec((EMBED_DIM, 3 * EMBED_DIM)),
            _wspec((1, 3 * EMBED_DIM)),
            _wspec((EMBED_DIM, EMBED_DIM)),
            _wspec((1, EMBED_DIM)),
            _wspec((1, EMBED_DIM)),
            _wspec((1, EMBED_DIM)),
            _wspec((EMBED_DIM, MLP_DIM)),
            _wspec((1, MLP_DIM)),
            _wspec((MLP_DIM, EMBED_DIM)),
            _wspec((1, EMBED_DIM)),
        ],
        out_specs=pl.BlockSpec((tb, SEQ_PAD, EMBED_DIM), lambda i: (i, 0, 0)),
        out_shape=jax.ShapeDtypeStruct((bsz, SEQ_PAD, EMBED_DIM), BF16),
        compiler_params=pltpu.CompilerParams(
            dimension_semantics=("parallel",), vmem_limit_bytes=VMEM_LIMIT),
    )(x, bp["ln1_g"], bp["ln1_b"], bp["qkv_w"], bp["qkv_b"], bp["proj_w"],
      bp["proj_b"], bp["ln2_g"], bp["ln2_b"], bp["fc1_w"], bp["fc1_b"],
      bp["fc2_w"], bp["fc2_b"])


# -------- kernel 3: epilogue (ln_post + proj + BN bottlenecks + classifiers) --
def _epilogue_kernel(cls_ref, lpg_ref, lpb_ref, proj_ref, bng_ref, bnb_ref,
                     bnpg_ref, bnpb_ref, clsw_ref, clspw_ref,
                     feat_ref, featp_ref, score_ref, scorep_ref):
    # ln_post / proj are per-row, so applying them to the CLS rows only is
    # exactly equivalent to the reference's full-sequence compute + [:, 0].
    x = cls_ref[...].astype(F32)                                  # (B, D)
    h = _layer_norm(x, lpg_ref[...], lpb_ref[...])
    feat_ref[...] = h.astype(feat_ref.dtype)                      # img_feature
    hp = jnp.dot(h.astype(BF16), proj_ref[...], preferred_element_type=F32)
    featp_ref[...] = hp.astype(featp_ref.dtype)                   # img_feature_proj
    fb = _batch_norm(h, bng_ref[...], bnb_ref[...])               # bottleneck
    fpb = _batch_norm(hp, bnpg_ref[...], bnpb_ref[...])           # bottleneck_proj
    score_ref[...] = jnp.dot(fb.astype(BF16), clsw_ref[...],
                             preferred_element_type=F32)
    scorep_ref[...] = jnp.dot(fpb.astype(BF16), clspw_ref[...],
                              preferred_element_type=F32)


def epilogue(cls_hidden, vp, params):
    bsz = cls_hidden.shape[0]
    out_shape = (
        jax.ShapeDtypeStruct((bsz, EMBED_DIM), F32),
        jax.ShapeDtypeStruct((bsz, PROJ_DIM), F32),
        jax.ShapeDtypeStruct((bsz, CLS_PAD), F32),
        jax.ShapeDtypeStruct((bsz, CLS_PAD), F32),
    )
    return pl.pallas_call(
        _epilogue_kernel, out_shape=out_shape,
        compiler_params=pltpu.CompilerParams(vmem_limit_bytes=VMEM_LIMIT),
    )(cls_hidden, vp["ln_post_g"], vp["ln_post_b"], vp["proj"],
      params["bn_g"], params["bn_b"], params["bnp_g"], params["bnp_b"],
      params["cls_w"], params["clsp_w"])


# --------------------------------- forward -----------------------------------
def forward(params, x, cam_label, view_label):
    """build_transformer_metareid.forward, ViT-B-16 branch, training=True,
    metadata=None (MetaAdapter skipped)."""
    bsz = x.shape[0]
    vp = params["visual"]

    # SIE embedding selection (tiny gather, plain JAX)
    index = cam_label * VIEW_NUM + view_label
    cv = (SIE_COE * params["cv_embed"][index]).reshape(bsz, 1, EMBED_DIM)

    # NCHW -> (B, P, C*kh*kw) patch slab matching Conv2d weight layout, then
    # pad to SEQ_PAD rows: row 0 = CLS slot (zeros), tail rows = padding.
    patches = x.reshape(bsz, IN_CH, H_RES, PATCH, W_RES, PATCH)
    patches = patches.transpose(0, 2, 4, 1, 3, 5).reshape(bsz, NUM_PATCHES, PATCH_DIM)
    patches = jnp.pad(patches, ((0, 0), (1, SEQ_PAD - 1 - NUM_PATCHES), (0, 0)))

    # positional embedding padded to SEQ_PAD with class embedding folded into row 0
    cls_pos = jnp.pad(vp["pos_emb"], ((0, SEQ_PAD - SEQ), (0, 0)))
    cls_pos = cls_pos.at[0].add(vp["class_emb"][0])

    h = embed_ln_pre(patches, cv, cls_pos, vp)   # fused conv+CLS+pos+SIE+ln_pre (bf16 out)
    x11 = None
    for layer in range(NUM_LAYERS):
        h = transformer_block(h, vp["blocks"][layer])
        if layer == NUM_LAYERS - 2:
            x11 = h                              # image_features_last (pre-ln_post)
    img_feature_last = x11[:, 0].astype(F32)     # CLS token of layer N-1
    cls_hidden = h[:, 0]                         # CLS token of final hidden state (bf16)

    # fused ln_post + visual.proj + bottleneck BNs + both classifiers
    img_feature, img_feature_proj, score, score_proj = epilogue(cls_hidden, vp, params)
    cls_score = score[:, :NUM_CLASSES]           # strip lane padding
    cls_score_proj = score_proj[:, :NUM_CLASSES]

    return ([cls_score, cls_score_proj],
            [img_feature_last, img_feature, img_feature_proj],
            img_feature_proj)


# ------------------------------ parameter init -------------------------------
def init_params(key):
    keys = iter(jax.random.split(key, 64))

    def nrm(shape, std):
        return std * jax.random.normal(next(keys), shape, dtype=F32)

    def block_params():
        return {
            "ln1_g": jnp.ones((1, EMBED_DIM), F32),
            "ln1_b": jnp.zeros((1, EMBED_DIM), F32),
            # fused QKV weight, columns ordered [q | k | v], each head contiguous
            "qkv_w": nrm((EMBED_DIM, 3 * EMBED_DIM), EMBED_DIM ** -0.5).astype(BF16),
            "qkv_b": jnp.zeros((1, 3 * EMBED_DIM), F32),
            "proj_w": nrm((EMBED_DIM, EMBED_DIM), EMBED_DIM ** -0.5).astype(BF16),
            "proj_b": jnp.zeros((1, EMBED_DIM), F32),
            "ln2_g": jnp.ones((1, EMBED_DIM), F32),
            "ln2_b": jnp.zeros((1, EMBED_DIM), F32),
            "fc1_w": nrm((EMBED_DIM, MLP_DIM), EMBED_DIM ** -0.5).astype(BF16),
            "fc1_b": jnp.zeros((1, MLP_DIM), F32),
            "fc2_w": nrm((MLP_DIM, EMBED_DIM), MLP_DIM ** -0.5).astype(BF16),
            "fc2_b": jnp.zeros((1, EMBED_DIM), F32),
        }

    def pad_cols(w, n):
        return jnp.pad(w, ((0, 0), (0, n - w.shape[1])))

    visual = {
        # conv weight stored pre-flattened (C*kh*kw, D), bf16, no bias
        "conv_w": nrm((PATCH_DIM, EMBED_DIM), 0.02).astype(BF16),
        "class_emb": nrm((1, EMBED_DIM), 0.02),
        "pos_emb": nrm((SEQ, EMBED_DIM), 0.02),
        "ln_pre_g": jnp.ones((1, EMBED_DIM), F32),
        "ln_pre_b": jnp.zeros((1, EMBED_DIM), F32),
        "ln_post_g": jnp.ones((1, EMBED_DIM), F32),
        "ln_post_b": jnp.zeros((1, EMBED_DIM), F32),
        "proj": nrm((EMBED_DIM, PROJ_DIM), EMBED_DIM ** -0.5).astype(BF16),
        "blocks": [block_params() for _ in range(NUM_LAYERS)],
    }

    return {
        "visual": visual,
        # trunc_normal_(std=0.02) approximated with plain normal (synthetic init)
        "cv_embed": nrm((CAMERA_NUM * VIEW_NUM, EMBED_DIM), 0.02),
        # weights_init_kaiming on BatchNorm: weight=1, bias=0
        "bn_g": jnp.ones((1, EMBED_DIM), F32),
        "bn_b": jnp.zeros((1, EMBED_DIM), F32),
        "bnp_g": jnp.ones((1, PROJ_DIM), F32),
        "bnp_b": jnp.zeros((1, PROJ_DIM), F32),
        # weights_init_classifier: normal std=0.001, no bias; N zero-padded to
        # 128 so classifier stores are lane-dense (wrapper strips the pad).
        "cls_w": pad_cols(nrm((EMBED_DIM, NUM_CLASSES), 0.001), CLS_PAD).astype(BF16),
        "clsp_w": pad_cols(nrm((PROJ_DIM, NUM_CLASSES), 0.001), CLS_PAD).astype(BF16),
    }


# ------------------------------------ main ------------------------------------
if __name__ == "__main__":
    key = jax.random.PRNGKey(0)
    pkey, xkey = jax.random.split(key)
    params = init_params(pkey)

    B = 32   # 2 batch tiles of 16 -> 2 "parallel" grid blocks (megacore-friendly)
    x = jax.random.normal(xkey, (B, IN_CH, IMG_SIZE, IMG_SIZE), dtype=F32)
    cam_label = (jnp.arange(B, dtype=jnp.int32) % CAMERA_NUM)
    view_label = (jnp.arange(B, dtype=jnp.int32) % VIEW_NUM)

    fwd = jax.jit(forward)
    out = fwd(params, x, cam_label, view_label)
    out = jax.tree_util.tree_map(jax.block_until_ready, out)

    (scores, feats, fproj) = out
    assert scores[0].shape == (B, NUM_CLASSES)
    assert scores[1].shape == (B, NUM_CLASSES)
    assert feats[0].shape == (B, EMBED_DIM)
    assert feats[1].shape == (B, EMBED_DIM)
    assert feats[2].shape == (B, PROJ_DIM)
    assert fproj.shape == (B, PROJ_DIM)
    for leaf in jax.tree_util.tree_leaves(out):
        assert bool(jnp.all(jnp.isfinite(leaf.astype(jnp.float32))))
    print("KERNEL_OK")
</pallas_src>

<mosaic_0001>
module attributes {stable_mosaic.version = 11 : i64} {
  func.func @_embed_kernel(%arg0: i32, %arg1: memref<16x8x768xf32, #tpu.memory_space<vmem>>, %arg2: memref<768x128xbf16, #tpu.memory_space<vmem>>, %arg3: memref<8x128xf32, #tpu.memory_space<vmem>>, %arg4: memref<16x1x128xf32, #tpu.memory_space<vmem>>, %arg5: memref<1x128xf32, #tpu.memory_space<vmem>>, %arg6: memref<1x128xf32, #tpu.memory_space<vmem>>, %arg7: memref<16x8x128xbf16, #tpu.memory_space<vmem>>) attributes {dimension_semantics = [#tpu.dimension_semantics<parallel>], iteration_bounds = array<i64: 2>, scalar_prefetch = 0 : i64, scratch_operands = 0 : i64, tpu.core_type = #tpu.core_type<tc>, window_params = [{transform_indices = @transform_0, window_bounds = array<i64: 16, 8, 768>}, {pipeline_mode = #tpu.pipeline_mode<synchronous>, transform_indices = @transform_1, window_bounds = array<i64: 768, 128>}, {pipeline_mode = #tpu.pipeline_mode<synchronous>, transform_indices = @transform_2, window_bounds = array<i64: 8, 128>}, {transform_indices = @transform_3, window_bounds = array<i64: 16, 1, 128>}, {pipeline_mode = #tpu.pipeline_mode<synchronous>, transform_indices = @transform_4, window_bounds = array<i64: 1, 128>}, {pipeline_mode = #tpu.pipeline_mode<synchronous>, transform_indices = @transform_5, window_bounds = array<i64: 1, 128>}, {transform_indices = @transform_6, window_bounds = array<i64: 16, 8, 128>}]} {
    %c0 = arith.constant 0 : index
    %c0_0 = arith.constant 0 : index
    %c0_1 = arith.constant 0 : index
    %0 = vector.load %arg1[%c0, %c0_0, %c0_1] : memref<16x8x768xf32, #tpu.memory_space<vmem>>, vector<16x8x768xf32>
    %1 = vector.shape_cast %0 : vector<16x8x768xf32> to vector<128x768xf32>
    %2 = arith.truncf %1 : vector<128x768xf32> to vector<128x768xbf16>
    %c0_2 = arith.constant 0 : index
    %c0_3 = arith.constant 0 : index
    %3 = vector.load %arg2[%c0_2, %c0_3] : memref<768x128xbf16, #tpu.memory_space<vmem>>, vector<768x128xbf16>
    %cst = arith.constant dense<0.000000e+00> : vector<128x128xf32>
    %4 = tpu.matmul %2, %3, %cst {dimension_numbers = #tpu.dot_dimension_numbers<[1], [0], [0], [1], [0, 0, 1, 1], [], []>} : vector<128x768xbf16>, vector<768x128xbf16>, vector<128x128xf32> -> vector<128x128xf32>
    %5 = vector.shape_cast %4 : vector<128x128xf32> to vector<16x8x128xf32>
    %6 = tpu.iota {dimensions = array<i32: 1>} : vector<1x8x1xi32>
    %c0_4 = arith.constant 0 : index
    %c0_5 = arith.constant 0 : index
    %7 = vector.load %arg3[%c0_4, %c0_5] : memref<8x128xf32, #tpu.memory_space<vmem>>, vector<8x128xf32>
    %8 = vector.shape_cast %7 : vector<8x128xf32> to vector<1x8x128xf32>
    %9 = vector.broadcast %8 : vector<1x8x128xf32> to vector<16x8x128xf32>
    %10 = arith.addf %5, %9 : vector<16x8x128xf32>
    %c0_i32 = arith.constant 0 : i32
    %11 = vector.broadcast %c0_i32 : i32 to vector<1x8x1xi32>
    %12 = arith.cmpi eq, %6, %11 : vector<1x8x1xi32>
    %13 = arith.extui %12 : vector<1x8x1xi1> to vector<1x8x1xi32>
    %14 = arith.sitofp %13 : vector<1x8x1xi32> to vector<1x8x1xf32>
    %c0_6 = arith.constant 0 : index
    %c0_7 = arith.constant 0 : index
    %c0_8 = arith.constant 0 : index
    %15 = vector.load %arg4[%c0_6, %c0_7, %c0_8] : memref<16x1x128xf32, #tpu.memory_space<vmem>>, vector<16x1x128xf32>
    %16 = vector.broadcast %14 : vector<1x8x1xf32> to vector<16x8x128xf32>
    %17 = vector.broadcast %15 : vector<16x1x128xf32> to vector<16x8x128xf32>
    %18 = arith.mulf %16, %17 : vector<16x8x128xf32>
    %19 = arith.addf %10, %18 : vector<16x8x128xf32>
    %c0_9 = arith.constant 0 : index
    %c0_10 = arith.constant 0 : index
    %20 = vector.load %arg5[%c0_9, %c0_10] : memref<1x128xf32, #tpu.memory_space<vmem>>, vector<1x128xf32>
    %c0_11 = arith.constant 0 : index
    %c0_12 = arith.constant 0 : index
    %21 = vector.load %arg6[%c0_11, %c0_12] : memref<1x128xf32, #tpu.memory_space<vmem>>, vector<1x128xf32>
    %cst_13 = arith.constant dense<0.000000e+00> : vector<16x8xf32>
    %22 = vector.multi_reduction <add>, %19, %cst_13 [2] : vector<16x8x128xf32> to vector<16x8xf32>
    %23 = vector.shape_cast %22 : vector<16x8xf32> to vector<16x8x1xf32>
    %cst_14 = arith.constant 1.280000e+02 : f32
    %24 = vector.broadcast %cst_14 : f32 to vector<16x8x1xf32>
    %25 = arith.divf %23, %24 : vector<16x8x1xf32>
    %26 = vector.broadcast %25 : vector<16x8x1xf32> to vector<16x8x128xf32>
    %27 = arith.subf %19, %26 : vector<16x8x128xf32>
    %28 = arith.mulf %27, %27 : vector<16x8x128xf32>
    %cst_15 = arith.constant dense<0.000000e+00> : vector<16x8xf32>
    %29 = vector.multi_reduction <add>, %28, %cst_15 [2] : vector<16x8x128xf32> to vector<16x8xf32>
    %30 = vector.shape_cast %29 : vector<16x8xf32> to vector<16x8x1xf32>
    %cst_16 = arith.constant 1.280000e+02 : f32
    %31 = vector.broadcast %cst_16 : f32 to vector<16x8x1xf32>
    %32 = arith.divf %30, %31 : vector<16x8x1xf32>
    %33 = vector.broadcast %25 : vector<16x8x1xf32> to vector<16x8x128xf32>
    %34 = arith.subf %19, %33 : vector<16x8x128xf32>
    %cst_17 = arith.constant 9.99999974E-6 : f32
    %35 = vector.broadcast %cst_17 : f32 to vector<16x8x1xf32>
    %36 = arith.addf %32, %35 : vector<16x8x1xf32>
    %37 = math.rsqrt %36 : vector<16x8x1xf32>
    %38 = vector.broadcast %37 : vector<16x8x1xf32> to vector<16x8x128xf32>
    %39 = arith.mulf %34, %38 : vector<16x8x128xf32>
    %40 = vector.shape_cast %20 : vector<1x128xf32> to vector<1x1x128xf32>
    %41 = vector.broadcast %40 : vector<1x1x128xf32> to vector<16x8x128xf32>
    %42 = arith.mulf %39, %41 : vector<16x8x128xf32>
    %43 = vector.shape_cast %21 : vector<1x128xf32> to vector<1x1x128xf32>
    %44 = vector.broadcast %43 : vector<1x1x128xf32> to vector<16x8x128xf32>
    %45 = arith.addf %42, %44 : vector<16x8x128xf32>
    %c5_i32 = arith.constant 5 : i32
    %46 = vector.broadcast %c5_i32 : i32 to vector<1x8x1xi32>
    %47 = arith.cmpi slt, %6, %46 : vector<1x8x1xi32>
    %48 = arith.extui %47 : vector<1x8x1xi1> to vector<1x8x1xi32>
    %49 = arith.sitofp %48 : vector<1x8x1xi32> to vector<1x8x1xf32>
    %50 = vector.broadcast %49 : vector<1x8x1xf32> to vector<16x8x128xf32>
    %51 = arith.mulf %45, %50 : vector<16x8x128xf32>
    %52 = arith.truncf %51 : vector<16x8x128xf32> to vector<16x8x128xbf16>
    %c0_18 = arith.constant 0 : index
    %c0_19 = arith.constant 0 : index
    %c0_20 = arith.constant 0 : index
    %53 = vector.load %arg7[%c0_18, %c0_19, %c0_20] : memref<16x8x128xbf16, #tpu.memory_space<vmem>>, vector<16x8x128xbf16>
    tpu.vector_store %arg7[%c0_18, %c0_19, %c0_20], %52 {strides = array<i32>} : memref<16x8x128xbf16, #tpu.memory_space<vmem>>, vector<16x8x128xbf16>,
    return
  }
  func.func @transform_0(%arg0: i32) -> (i32, i32, i32) {
    %c0_i32 = arith.constant 0 : i32
    %c0_i32_0 = arith.constant 0 : i32
    %c0_i32_1 = arith.constant 0 : i32
    return %arg0, %c0_i32, %c0_i32_0 : i32, i32, i32
  }
  func.func @transform_1(%arg0: i32) -> (i32, i32) {
    %c0_i32 = arith.constant 0 : i32
    %c0_i32_0 = arith.constant 0 : i32
    %c0_i32_1 = arith.constant 0 : i32
    return %c0_i32, %c0_i32_0 : i32, i32
  }
  func.func @transform_2(%arg0: i32) -> (i32, i32) {
    %c0_i32 = arith.constant 0 : i32
    %c0_i32_0 = arith.constant 0 : i32
    %c0_i32_1 = arith.constant 0 : i32
    return %c0_i32, %c0_i32_0 : i32, i32
  }
  func.func @transform_3(%arg0: i32) -> (i32, i32, i32) {
    %c0_i32 = arith.constant 0 : i32
    %c0_i32_0 = arith.constant 0 : i32
    %c0_i32_1 = arith.constant 0 : i32
    return %arg0, %c0_i32, %c0_i32_0 : i32, i32, i32
  }
  func.func @transform_4(%arg0: i32) -> (i32, i32) {
    %c0_i32 = arith.constant 0 : i32
    %c0_i32_0 = arith.constant 0 : i32
    %c0_i32_1 = arith.constant 0 : i32
    return %c0_i32, %c0_i32_0 : i32, i32
  }
  func.func @transform_5(%arg0: i32) -> (i32, i32) {
    %c0_i32 = arith.constant 0 : i32
    %c0_i32_0 = arith.constant 0 : i32
    %c0_i32_1 = arith.constant 0 : i32
    return %c0_i32, %c0_i32_0 : i32, i32
  }
  func.func @transform_6(%arg0: i32) -> (i32, i32, i32) {
    %c0_i32 = arith.constant 0 : i32
    %c0_i32_0 = arith.constant 0 : i32
    %c0_i32_1 = arith.constant 0 : i32
    return %arg0, %c0_i32, %c0_i32_0 : i32, i32, i32
  }
}

module attributes {stable_mosaic.version = 11 : i64} {
  func.func @_block_kernel(%arg0: i32, %arg1: memref<16x8x128xbf16, #tpu.memory_space<vmem>>, %arg2: memref<1x128xf32, #tpu.memory_space<vmem>>, %arg3: memref<1x128xf32, #tpu.memory_space<vmem>>, %arg4: memref<128x384xbf16, #tpu.memory_space<vmem>>, %arg5: memref<1x384xf32, #tpu.memory_space<vmem>>, %arg6: memref<128x128xbf16, #tpu.memory_space<vmem>>, %arg7: memref<1x128xf32, #tpu.memory_space<vmem>>, %arg8: memref<1x128xf32, #tpu.memory_space<vmem>>, %arg9: memref<1x128xf32, #tpu.memory_space<vmem>>, %arg10: memref<128x512xbf16, #tpu.memory_space<vmem>>, %arg11: memref<1x512xf32, #tpu.memory_space<vmem>>, %arg12: memref<512x128xbf16, #tpu.memory_space<vmem>>, %arg13: memref<1x128xf32, #tpu.memory_space<vmem>>, %arg14: memref<16x8x128xbf16, #tpu.memory_space<vmem>>) attributes {dimension_semantics = [#tpu.dimension_semantics<parallel>], iteration_bounds = array<i64: 2>, scalar_prefetch = 0 : i64, scratch_operands = 0 : i64, tpu.core_type = #tpu.core_type<tc>, window_params = [{transform_indices = @transform_0, window_bounds = array<i64: 16, 8, 128>}, {pipeline_mode = #tpu.pipeline_mode<synchronous>, transform_indices = @transform_1, window_bounds = array<i64: 1, 128>}, {pipeline_mode = #tpu.pipeline_mode<synchronous>, transform_indices = @transform_2, window_bounds = array<i64: 1, 128>}, {pipeline_mode = #tpu.pipeline_mode<synchronous>, transform_indices = @transform_3, window_bounds = array<i64: 128, 384>}, {pipeline_mode = #tpu.pipeline_mode<synchronous>, transform_indices = @transform_4, window_bounds = array<i64: 1, 384>}, {pipeline_mode = #tpu.pipeline_mode<synchronous>, transform_indices = @transform_5, window_bounds = array<i64: 128, 128>}, {pipeline_mode = #tpu.pipeline_mode<synchronous>, transform_indices = @transform_6, window_bounds = array<i64: 1, 128>}, {pipeline_mode = #tpu.pipeline_mode<synchronous>, transform_indices = @transform_7, window_bounds = array<i64: 1, 128>}, {pipeline_mode = #tpu.pipeline_mode<synchronous>, transform_indices = @transform_8, window_bounds = array<i64: 1, 128>}, {pipeline_mode = #tpu.pipeline_mode<synchronous>, transform_indices = @transform_9, window_bounds = array<i64: 128, 512>}, {pipeline_mode = #tpu.pipeline_mode<synchronous>, transform_indices = @transform_10, window_bounds = array<i64: 1, 512>}, {pipeline_mode = #tpu.pipeline_mode<synchronous>, transform_indices = @transform_11, window_bounds = array<i64: 512, 128>}, {pipeline_mode = #tpu.pipeline_mode<synchronous>, transform_indices = @transform_12, window_bounds = array<i64: 1, 128>}, {transform_indices = @transform_13, window_bounds = array<i64: 16, 8, 128>}]} {
    %c0 = arith.constant 0 : index
    %c0_0 = arith.constant 0 : index
    %c0_1 = arith.constant 0 : index
    %0 = vector.load %arg1[%c0, %c0_0, %c0_1] : memref<16x8x128xbf16, #tpu.memory_space<vmem>>, vector<16x8x128xbf16>
    %1 = arith.extf %0 : vector<16x8x128xbf16> to vector<16x8x128xf32>
    %c0_2 = arith.constant 0 : index
    %c0_3 = arith.constant 0 : index
    %2 = vector.load %arg2[%c0_2, %c0_3] : memref<1x128xf32, #tpu.memory_space<vmem>>, vector<1x128xf32>
    %c0_4 = arith.constant 0 : index
    %c0_5 = arith.constant 0 : index
    %3 = vector.load %arg3[%c0_4, %c0_5] : memref<1x128xf32, #tpu.memory_space<vmem>>, vector<1x128xf32>
    %cst = arith.constant dense<0.000000e+00> : vector<16x8xf32>
    %4 = vector.multi_reduction <add>, %1, %cst [2] : vector<16x8x128xf32> to vector<16x8xf32>
    %5 = vector.shape_cast %4 : vector<16x8xf32> to vector<16x8x1xf32>
    %cst_6 = arith.constant 1.280000e+02 : f32
    %6 = vector.broadcast %cst_6 : f32 to vector<16x8x1xf32>
    %7 = arith.divf %5, %6 : vector<16x8x1xf32>
    %8 = vector.broadcast %7 : vector<16x8x1xf32> to vector<16x8x128xf32>
    %9 = arith.subf %1, %8 : vector<16x8x128xf32>
    %10 = arith.mulf %9, %9 : vector<16x8x128xf32>
    %cst_7 = arith.constant dense<0.000000e+00> : vector<16x8xf32>
    %11 = vector.multi_reduction <add>, %10, %cst_7 [2] : vector<16x8x128xf32> to vector<16x8xf32>
    %12 = vector.shape_cast %11 : vector<16x8xf32> to vector<16x8x1xf32>
    %cst_8 = arith.constant 1.280000e+02 : f32
    %13 = vector.broadcast %cst_8 : f32 to vector<16x8x1xf32>
    %14 = arith.divf %12, %13 : vector<16x8x1xf32>
    %15 = vector.broadcast %7 : vector<16x8x1xf32> to vector<16x8x128xf32>
    %16 = arith.subf %1, %15 : vector<16x8x128xf32>
    %cst_9 = arith.constant 9.99999974E-6 : f32
    %17 = vector.broadcast %cst_9 : f32 to vector<16x8x1xf32>
    %18 = arith.addf %14, %17 : vector<16x8x1xf32>
    %19 = math.rsqrt %18 : vector<16x8x1xf32>
    %20 = vector.broadcast %19 : vector<16x8x1xf32> to vector<16x8x128xf32>
    %21 = arith.mulf %16, %20 : vector<16x8x128xf32>
    %22 = vector.shape_cast %2 : vector<1x128xf32> to vector<1x1x128xf32>
    %23 = vector.broadcast %22 : vector<1x1x128xf32> to vector<16x8x128xf32>
    %24 = arith.mulf %21, %23 : vector<16x8x128xf32>
    %25 = vector.shape_cast %3 : vector<1x128xf32> to vector<1x1x128xf32>
    %26 = vector.broadcast %25 : vector<1x1x128xf32> to vector<16x8x128xf32>
    %27 = arith.addf %24, %26 : vector<16x8x128xf32>
    %28 = vector.shape_cast %27 : vector<16x8x128xf32> to vector<128x128xf32>
    %29 = arith.truncf %28 : vector<128x128xf32> to vector<128x128xbf16>
    %c0_10 = arith.constant 0 : index
    %c0_11 = arith.constant 0 : index
    %30 = vector.load %arg4[%c0_10, %c0_11] : memref<128x384xbf16, #tpu.memory_space<vmem>>, vector<128x384xbf16>
    %cst_12 = arith.constant dense<0.000000e+00> : vector<128x384xf32>
    %31 = tpu.matmul %29, %30, %cst_12 {dimension_numbers = #tpu.dot_dimension_numbers<[1], [0], [0], [1], [0, 0, 1, 1], [], []>} : vector<128x128xbf16>, vector<128x384xbf16>, vector<128x384xf32> -> vector<128x384xf32>
    %c0_13 = arith.constant 0 : index
    %c0_14 = arith.constant 0 : index
    %32 = vector.load %arg5[%c0_13, %c0_14] : memref<1x384xf32, #tpu.memory_space<vmem>>, vector<1x384xf32>
    %33 = vector.broadcast %32 : vector<1x384xf32> to vector<128x384xf32>
    %34 = arith.addf %31, %33 : vector<128x384xf32>
    %35 = vector.shape_cast %34 : vector<128x384xf32> to vector<16x8x384xf32>
    %36 = tpu.iota {dimensions = array<i32: 2>} : vector<1x1x8xi32>
    %c5_i32 = arith.constant 5 : i32
    %37 = vector.broadcast %c5_i32 : i32 to vector<1x1x8xi32>
    %38 = arith.cmpi slt, %36, %37 : vector<1x1x8xi32>
    %39 = vector.extract_strided_slice %35 {offsets = [0, 0, 0], sizes = [16, 8, 64], strides = [1, 1, 1]} : vector<16x8x384xf32> to vector<16x8x64xf32>
    %40 = vector.extract_strided_slice %35 {offsets = [0, 0, 128], sizes = [16, 8, 64], strides = [1, 1, 1]} : vector<16x8x384xf32> to vector<16x8x64xf32>
    %41 = vector.extract_strided_slice %35 {offsets = [0, 0, 256], sizes = [16, 8, 64], strides = [1, 1, 1]} : vector<16x8x384xf32> to vector<16x8x64xf32>
    %42 = arith.truncf %39 : vector<16x8x64xf32> to vector<16x8x64xbf16>
    %43 = arith.truncf %40 : vector<16x8x64xf32> to vector<16x8x64xbf16>
    "tpu.trace_start"() <{level = 10 : i32, message = "bqd,bkd->bqk"}> : () -> ()
    %cst_15 = arith.constant dense<0.000000e+00> : vector<16x8x8xf32>
    %44 = tpu.matmul %42, %43, %cst_15 {dimension_numbers = #tpu.dot_dimension_numbers<[2], [2], [1], [1], [0, 0, 0, 1, 1, 1], [0], [0]>} : vector<16x8x64xbf16>, vector<16x8x64xbf16>, vector<16x8x8xf32> -> vector<16x8x8xf32>
    "tpu.trace_stop"() : () -> ()
    %cst_16 = arith.constant 1.250000e-01 : f32
    %45 = vector.broadcast %cst_16 : f32 to vector<16x8x8xf32>
    %46 = arith.mulf %44, %45 : vector<16x8x8xf32>
    %cst_17 = arith.constant -1.000000e+30 : f32
    %47 = vector.shape_cast %38 : vector<1x1x8xi1> to vector<1x1x8xi1>
    %48 = vector.broadcast %47 : vector<1x1x8xi1> to vector<16x8x8xi1>
    %49 = vector.broadcast %cst_17 : f32 to vector<16x8x8xf32>
    %50 = arith.select %48, %46, %49 : vector<16x8x8xi1>, vector<16x8x8xf32>
    %cst_18 = arith.constant dense<0xFF800000> : vector<16x8xf32>
    %51 = vector.multi_reduction <maximumf>, %50, %cst_18 [2] : vector<16x8x8xf32> to vector<16x8xf32>
    %52 = vector.shape_cast %51 : vector<16x8xf32> to vector<16x8x1xf32>
    %53 = vector.broadcast %52 : vector<16x8x1xf32> to vector<16x8x8xf32>
    %54 = arith.subf %50, %53 : vector<16x8x8xf32>
    %55 = math.exp %54 : vector<16x8x8xf32>
    %cst_19 = arith.constant dense<0.000000e+00> : vector<16x8xf32>
    %56 = vector.multi_reduction <add>, %55, %cst_19 [2] : vector<16x8x8xf32> to vector<16x8xf32>
    %57 = vector.shape_cast %56 : vector<16x8xf32> to vector<16x8x1xf32>
    %58 = tpu.reciprocal %57 {approx = true} : vector<16x8x1xf32> -> vector<16x8x1xf32>
    %59 = vector.broadcast %58 : vector<16x8x1xf32> to vector<16x8x8xf32>
    %60 = arith.mulf %55, %59 : vector<16x8x8xf32>
    %61 = arith.truncf %60 : vector<16x8x8xf32> to vector<16x8x8xbf16>
    %62 = arith.truncf %41 : vector<16x8x64xf32> to vector<16x8x64xbf16>
    "tpu.trace_start"() <{level = 10 : i32, message = "bqk,bkd->bqd"}> : () -> ()
    %cst_20 = arith.constant dense<0.000000e+00> : vector<16x8x64xf32>
    %63 = tpu.matmul %61, %62, %cst_20 {dimension_numbers = #tpu.dot_dimension_numbers<[2], [1], [1], [2], [0, 0, 0, 1, 1, 2], [0], [0]>} : vector<16x8x8xbf16>, vector<16x8x64xbf16>, vector<16x8x64xf32> -> vector<16x8x64xf32>
    "tpu.trace_stop"() : () -> ()
    %64 = vector.extract_strided_slice %35 {offsets = [0, 0, 64], sizes = [16, 8, 64], strides = [1, 1, 1]} : vector<16x8x384xf32> to vector<16x8x64xf32>
    %65 = vector.extract_strided_slice %35 {offsets = [0, 0, 192], sizes = [16, 8, 64], strides = [1, 1, 1]} : vector<16x8x384xf32> to vector<16x8x64xf32>
    %66 = vector.extract_strided_slice %35 {offsets = [0, 0, 320], sizes = [16, 8, 64], strides = [1, 1, 1]} : vector<16x8x384xf32> to vector<16x8x64xf32>
    %67 = arith.truncf %64 : vector<16x8x64xf32> to vector<16x8x64xbf16>
    %68 = arith.truncf %65 : vector<16x8x64xf32> to vector<16x8x64xbf16>
    "tpu.trace_start"() <{level = 10 : i32, message = "bqd,bkd->bqk"}> : () -> ()
    %cst_21 = arith.constant dense<0.000000e+00> : vector<16x8x8xf32>
    %69 = tpu.matmul %67, %68, %cst_21 {dimension_numbers = #tpu.dot_dimension_numbers<[2], [2], [1], [1], [0, 0, 0, 1, 1, 1], [0], [0]>} : vector<16x8x64xbf16>, vector<16x8x64xbf16>, vector<16x8x8xf32> -> vector<16x8x8xf32>
    "tpu.trace_stop"() : () -> ()
    %cst_22 = arith.constant 1.250000e-01 : f32
    %70 = vector.broadcast %cst_22 : f32 to vector<16x8x8xf32>
    %71 = arith.mulf %69, %70 : vector<16x8x8xf32>
    %cst_23 = arith.constant -1.000000e+30 : f32
    %72 = vector.shape_cast %38 : vector<1x1x8xi1> to vector<1x1x8xi1>
    %73 = vector.broadcast %72 : vector<1x1x8xi1> to vector<16x8x8xi1>
    %74 = vector.broadcast %cst_23 : f32 to vector<16x8x8xf32>
    %75 = arith.select %73, %71, %74 : vector<16x8x8xi1>, vector<16x8x8xf32>
    %cst_24 = arith.constant dense<0xFF800000> : vector<16x8xf32>
    %76 = vector.multi_reduction <maximumf>, %75, %cst_24 [2] : vector<16x8x8xf32> to vector<16x8xf32>
    %77 = vector.shape_cast %76 : vector<16x8xf32> to vector<16x8x1xf32>
    %78 = vector.broadcast %77 : vector<16x8x1xf32> to vector<16x8x8xf32>
    %79 = arith.subf %75, %78 : vector<16x8x8xf32>
    %80 = math.exp %79 : vector<16x8x8xf32>
    %cst_25 = arith.constant dense<0.000000e+00> : vector<16x8xf32>
    %81 = vector.multi_reduction <add>, %80, %cst_25 [2] : vector<16x8x8xf32> to vector<16x8xf32>
    %82 = vector.shape_cast %81 : vector<16x8xf32> to vector<16x8x1xf32>
    %83 = tpu.reciprocal %82 {approx = true} : vector<16x8x1xf32> -> vector<16x8x1xf32>
    %84 = vector.broadcast %83 : vector<16x8x1xf32> to vector<16x8x8xf32>
    %85 = arith.mulf %80, %84 : vector<16x8x8xf32>
    %86 = arith.truncf %85 : vector<16x8x8xf32> to vector<16x8x8xbf16>
    %87 = arith.truncf %66 : vector<16x8x64xf32> to vector<16x8x64xbf16>
    "tpu.trace_start"() <{level = 10 : i32, message = "bqk,bkd->bqd"}> : () -> ()
    %cst_26 = arith.constant dense<0.000000e+00> : vector<16x8x64xf32>
    %88 = tpu.matmul %86, %87, %cst_26 {dimension_numbers = #tpu.dot_dimension_numbers<[2], [1], [1], [2], [0, 0, 0, 1, 1, 2], [0], [0]>} : vector<16x8x8xbf16>, vector<16x8x64xbf16>, vector<16x8x64xf32> -> vector<16x8x64xf32>
    "tpu.trace_stop"() : () -> ()
    %89 = tpu.concatenate %63, %88 in 2 : vector<16x8x64xf32>, vector<16x8x64xf32> -> vector<16x8x128xf32>
    %90 = vector.shape_cast %89 : vector<16x8x128xf32> to vector<128x128xf32>
    %91 = arith.truncf %90 : vector<128x128xf32> to vector<128x128xbf16>
    %c0_27 = arith.constant 0 : index
    %c0_28 = arith.constant 0 : index
    %92 = vector.load %arg6[%c0_27, %c0_28] : memref<128x128xbf16, #tpu.memory_space<vmem>>, vector<128x128xbf16>
    %cst_29 = arith.constant dense<0.000000e+00> : vector<128x128xf32>
    %93 = tpu.matmul %91, %92, %cst_29 {dimension_numbers = #tpu.dot_dimension_numbers<[1], [0], [0], [1], [0, 0, 1, 1], [], []>} : vector<128x128xbf16>, vector<128x128xbf16>, vector<128x128xf32> -> vector<128x128xf32>
    %c0_30 = arith.constant 0 : index
    %c0_31 = arith.constant 0 : index
    %94 = vector.load %arg7[%c0_30, %c0_31] : memref<1x128xf32, #tpu.memory_space<vmem>>, vector<1x128xf32>
    %95 = vector.broadcast %94 : vector<1x128xf32> to vector<128x128xf32>
    %96 = arith.addf %93, %95 : vector<128x128xf32>
    %97 = vector.shape_cast %96 : vector<128x128xf32> to vector<16x8x128xf32>
    %98 = arith.addf %1, %97 : vector<16x8x128xf32>
    %c0_32 = arith.constant 0 : index
    %c0_33 = arith.constant 0 : index
    %99 = vector.load %arg8[%c0_32, %c0_33] : memref<1x128xf32, #tpu.memory_space<vmem>>, vector<1x128xf32>
    %c0_34 = arith.constant 0 : index
    %c0_35 = arith.constant 0 : index
    %100 = vector.load %arg9[%c0_34, %c0_35] : memref<1x128xf32, #tpu.memory_space<vmem>>, vector<1x128xf32>
    %cst_36 = arith.constant dense<0.000000e+00> : vector<16x8xf32>
    %101 = vector.multi_reduction <add>, %98, %cst_36 [2] : vector<16x8x128xf32> to vector<16x8xf32>
    %102 = vector.shape_cast %101 : vector<16x8xf32> to vector<16x8x1xf32>
    %cst_37 = arith.constant 1.280000e+02 : f32
    %103 = vector.broadcast %cst_37 : f32 to vector<16x8x1xf32>
    %104 = arith.divf %102, %103 : vector<16x8x1xf32>
    %105 = vector.broadcast %104 : vector<16x8x1xf32> to vector<16x8x128xf32>
    %106 = arith.subf %98, %105 : vector<16x8x128xf32>
    %107 = arith.mulf %106, %106 : vector<16x8x128xf32>
    %cst_38 = arith.constant dense<0.000000e+00> : vector<16x8xf32>
    %108 = vector.multi_reduction <add>, %107, %cst_38 [2] : vector<16x8x128xf32> to vector<16x8xf32>
    %109 = vector.shape_cast %108 : vector<16x8xf32> to vector<16x8x1xf32>
    %cst_39 = arith.constant 1.280000e+02 : f32
    %110 = vector.broadcast %cst_39 : f32 to vector<16x8x1xf32>
    %111 = arith.divf %109, %110 : vector<16x8x1xf32>
    %112 = vector.broadcast %104 : vector<16x8x1xf32> to vector<16x8x128xf32>
    %113 = arith.subf %98, %112 : vector<16x8x128xf32>
    %cst_40 = arith.constant 9.99999974E-6 : f32
    %114 = vector.broadcast %cst_40 : f32 to vector<16x8x1xf32>
    %115 = arith.addf %111, %114 : vector<16x8x1xf32>
    %116 = math.rsqrt %115 : vector<16x8x1xf32>
    %117 = vector.broadcast %116 : vector<16x8x1xf32> to vector<16x8x128xf32>
    %118 = arith.mulf %113, %117 : vector<16x8x128xf32>
    %119 = vector.shape_cast %99 : vector<1x128xf32> to vector<1x1x128xf32>
    %120 = vector.broadcast %119 : vector<1x1x128xf32> to vector<16x8x128xf32>
    %121 = arith.mulf %118, %120 : vector<16x8x128xf32>
    %122 = vector.shape_cast %100 : vector<1x128xf32> to vector<1x1x128xf32>
    %123 = vector.broadcast %122 : vector<1x1x128xf32> to vector<16x8x128xf32>
    %124 = arith.addf %121, %123 : vector<16x8x128xf32>
    %125 = vector.shape_cast %124 : vector<16x8x128xf32> to vector<128x128xf32>
    %126 = arith.truncf %125 : vector<128x128xf32> to vector<128x128xbf16>
    %c0_41 = arith.constant 0 : index
    %c0_42 = arith.constant 0 : index
    %127 = vector.load %arg10[%c0_41, %c0_42] : memref<128x512xbf16, #tpu.memory_space<vmem>>, vector<128x512xbf16>
    %cst_43 = arith.constant dense<0.000000e+00> : vector<128x512xf32>
    %128 = tpu.matmul %126, %127, %cst_43 {dimension_numbers = #tpu.dot_dimension_numbers<[1], [0], [0], [1], [0, 0, 1, 1], [], []>} : vector<128x128xbf16>, vector<128x512xbf16>, vector<128x512xf32> -> vector<128x512xf32>
    %c0_44 = arith.constant 0 : index
    %c0_45 = arith.constant 0 : index
    %129 = vector.load %arg11[%c0_44, %c0_45] : memref<1x512xf32, #tpu.memory_space<vmem>>, vector<1x512xf32>
    %130 = vector.broadcast %129 : vector<1x512xf32> to vector<128x512xf32>
    %131 = arith.addf %128, %130 : vector<128x512xf32>
    %cst_46 = arith.constant 1.702000e+00 : f32
    %132 = vector.broadcast %cst_46 : f32 to vector<128x512xf32>
    %133 = arith.mulf %132, %131 : vector<128x512xf32>
    %134 = arith.negf %133 : vector<128x512xf32>
    %135 = math.exp %134 : vector<128x512xf32>
    %cst_47 = arith.constant 1.000000e+00 : f32
    %136 = vector.broadcast %cst_47 : f32 to vector<128x512xf32>
    %137 = arith.addf %136, %135 : vector<128x512xf32>
    %138 = arith.divf %136, %137 : vector<128x512xf32>
    %139 = arith.mulf %131, %138 : vector<128x512xf32>
    %140 = arith.truncf %139 : vector<128x512xf32> to vector<128x512xbf16>
    %c0_48 = arith.constant 0 : index
    %c0_49 = arith.constant 0 : index
    %141 = vector.load %arg12[%c0_48, %c0_49] : memref<512x128xbf16, #tpu.memory_space<vmem>>, vector<512x128xbf16>
    %cst_50 = arith.constant dense<0.000000e+00> : vector<128x128xf32>
    %142 = tpu.matmul %140, %141, %cst_50 {dimension_numbers = #tpu.dot_dimension_numbers<[1], [0], [0], [1], [0, 0, 1, 1], [], []>} : vector<128x512xbf16>, vector<512x128xbf16>, vector<128x128xf32> -> vector<128x128xf32>
    %c0_51 = arith.constant 0 : index
    %c0_52 = arith.constant 0 : index
    %143 = vector.load %arg13[%c0_51, %c0_52] : memref<1x128xf32, #tpu.memory_space<vmem>>, vector<1x128xf32>
    %144 = vector.broadcast %143 : vector<1x128xf32> to vector<128x128xf32>
    %145 = arith.addf %142, %144 : vector<128x128xf32>
    %146 = vector.shape_cast %145 : vector<128x128xf32> to vector<16x8x128xf32>
    %147 = arith.addf %98, %146 : vector<16x8x128xf32>
    %148 = tpu.iota {dimensions = array<i32: 1>} : vector<1x8x1xi32>
    %c5_i32_53 = arith.constant 5 : i32
    %149 = vector.broadcast %c5_i32_53 : i32 to vector<1x8x1xi32>
    %150 = arith.cmpi slt, %148, %149 : vector<1x8x1xi32>
    %151 = arith.extui %150 : vector<1x8x1xi1> to vector<1x8x1xi32>
    %152 = arith.sitofp %151 : vector<1x8x1xi32> to vector<1x8x1xf32>
    %153 = vector.broadcast %152 : vector<1x8x1xf32> to vector<16x8x128xf32>
    %154 = arith.mulf %147, %153 : vector<16x8x128xf32>
    %155 = arith.truncf %154 : vector<16x8x128xf32> to vector<16x8x128xbf16>
    %c0_54 = arith.constant 0 : index
    %c0_55 = arith.constant 0 : index
    %c0_56 = arith.constant 0 : index
    %156 = vector.load %arg14[%c0_54, %c0_55, %c0_56] : memref<16x8x128xbf16, #tpu.memory_space<vmem>>, vector<16x8x128xbf16>
    tpu.vector_store %arg14[%c0_54, %c0_55, %c0_56], %155 {strides = array<i32>} : memref<16x8x128xbf16, #tpu.memory_space<vmem>>, vector<16x8x128xbf16>,
    return
  }
  func.func @transform_0(%arg0: i32) -> (i32, i32, i32) {
    %c0_i32 = arith.constant 0 : i32
    %c0_i32_0 = arith.constant 0 : i32
    %c0_i32_1 = arith.constant 0 : i32
    return %arg0, %c0_i32, %c0_i32_0 : i32, i32, i32
  }
  func.func @transform_1(%arg0: i32) -> (i32, i32) {
    %c0_i32 = arith.constant 0 : i32
    %c0_i32_0 = arith.constant 0 : i32
    %c0_i32_1 = arith.constant 0 : i32
    return %c0_i32, %c0_i32_0 : i32, i32
  }
  func.func @transform_2(%arg0: i32) -> (i32, i32) {
    %c0_i32 = arith.constant 0 : i32
    %c0_i32_0 = arith.constant 0 : i32
    %c0_i32_1 = arith.constant 0 : i32
    return %c0_i32, %c0_i32_0 : i32, i32
  }
  func.func @transform_3(%arg0: i32) -> (i32, i32) {
    %c0_i32 = arith.constant 0 : i32
    %c0_i32_0 = arith.constant 0 : i32
    %c0_i32_1 = arith.constant 0 : i32
    return %c0_i32, %c0_i32_0 : i32, i32
  }
  func.func @transform_4(%arg0: i32) -> (i32, i32) {
    %c0_i32 = arith.constant 0 : i32
    %c0_i32_0 = arith.constant 0 : i32
    %c0_i32_1 = arith.constant 0 : i32
    return %c0_i32, %c0_i32_0 : i32, i32
  }
  func.func @transform_5(%arg0: i32) -> (i32, i32) {
    %c0_i32 = arith.constant 0 : i32
    %c0_i32_0 = arith.constant 0 : i32
    %c0_i32_1 = arith.constant 0 : i32
    return %c0_i32, %c0_i32_0 : i32, i32
  }
  func.func @transform_6(%arg0: i32) -> (i32, i32) {
    %c0_i32 = arith.constant 0 : i32
    %c0_i32_0 = arith.constant 0 : i32
    %c0_i32_1 = arith.constant 0 : i32
    return %c0_i32, %c0_i32_0 : i32, i32
  }
  func.func @transform_7(%arg0: i32) -> (i32, i32) {
    %c0_i32 = arith.constant 0 : i32
    %c0_i32_0 = arith.constant 0 : i32
    %c0_i32_1 = arith.constant 0 : i32
    return %c0_i32, %c0_i32_0 : i32, i32
  }
  func.func @transform_8(%arg0: i32) -> (i32, i32) {
    %c0_i32 = arith.constant 0 : i32
    %c0_i32_0 = arith.constant 0 : i32
    %c0_i32_1 = arith.constant 0 : i32
    return %c0_i32, %c0_i32_0 : i32, i32
  }
  func.func @transform_9(%arg0: i32) -> (i32, i32) {
    %c0_i32 = arith.constant 0 : i32
    %c0_i32_0 = arith.constant 0 : i32
    %c0_i32_1 = arith.constant 0 : i32
    return %c0_i32, %c0_i32_0 : i32, i32
  }
  func.func @transform_10(%arg0: i32) -> (i32, i32) {
    %c0_i32 = arith.constant 0 : i32
    %c0_i32_0 = arith.constant 0 : i32
    %c0_i32_1 = arith.constant 0 : i32
    return %c0_i32, %c0_i32_0 : i32, i32
  }
  func.func @transform_11(%arg0: i32) -> (i32, i32) {
    %c0_i32 = arith.constant 0 : i32
    %c0_i32_0 = arith.constant 0 : i32
    %c0_i32_1 = arith.constant 0 : i32
    return %c0_i32, %c0_i32_0 : i32, i32
  }
  func.func @transform_12(%arg0: i32) -> (i32, i32) {
    %c0_i32 = arith.constant 0 : i32
    %c0_i32_0 = arith.constant 0 : i32
    %c0_i32_1 = arith.constant 0 : i32
    return %c0_i32, %c0_i32_0 : i32, i32
  }
  func.func @transform_13(%arg0: i32) -> (i32, i32, i32) {
    %c0_i32 = arith.constant 0 : i32
    %c0_i32_0 = arith.constant 0 : i32
    %c0_i32_1 = arith.constant 0 : i32
    return %arg0, %c0_i32, %c0_i32_0 : i32, i32, i32
  }
}

module attributes {stable_mosaic.version = 11 : i64} {
  func.func @_epilogue_kernel(%arg0: memref<32x128xbf16, #tpu.memory_space<vmem>>, %arg1: memref<1x128xf32, #tpu.memory_space<vmem>>, %arg2: memref<1x128xf32, #tpu.memory_space<vmem>>, %arg3: memref<128x128xbf16, #tpu.memory_space<vmem>>, %arg4: memref<1x128xf32, #tpu.memory_space<vmem>>, %arg5: memref<1x128xf32, #tpu.memory_space<vmem>>, %arg6: memref<1x128xf32, #tpu.memory_space<vmem>>, %arg7: memref<1x128xf32, #tpu.memory_space<vmem>>, %arg8: memref<128x128xbf16, #tpu.memory_space<vmem>>, %arg9: memref<128x128xbf16, #tpu.memory_space<vmem>>, %arg10: memref<32x128xf32, #tpu.memory_space<vmem>>, %arg11: memref<32x128xf32, #tpu.memory_space<vmem>>, %arg12: memref<32x128xf32, #tpu.memory_space<vmem>>, %arg13: memref<32x128xf32, #tpu.memory_space<vmem>>) attributes {dimension_semantics = [], scalar_prefetch = 0 : i64, scratch_operands = 0 : i64, tpu.core_type = #tpu.core_type<tc>} {
    %c0 = arith.constant 0 : index
    %c0_0 = arith.constant 0 : index
    %0 = vector.load %arg0[%c0, %c0_0] : memref<32x128xbf16, #tpu.memory_space<vmem>>, vector<32x128xbf16>
    %1 = arith.extf %0 : vector<32x128xbf16> to vector<32x128xf32>
    %c0_1 = arith.constant 0 : index
    %c0_2 = arith.constant 0 : index
    %2 = vector.load %arg1[%c0_1, %c0_2] : memref<1x128xf32, #tpu.memory_space<vmem>>, vector<1x128xf32>
    %c0_3 = arith.constant 0 : index
    %c0_4 = arith.constant 0 : index
    %3 = vector.load %arg2[%c0_3, %c0_4] : memref<1x128xf32, #tpu.memory_space<vmem>>, vector<1x128xf32>
    %cst = arith.constant dense<0.000000e+00> : vector<32xf32>
    %4 = vector.multi_reduction <add>, %1, %cst [1] : vector<32x128xf32> to vector<32xf32>
    %5 = vector.shape_cast %4 : vector<32xf32> to vector<32x1xf32>
    %cst_5 = arith.constant 1.280000e+02 : f32
    %6 = vector.broadcast %cst_5 : f32 to vector<32x1xf32>
    %7 = arith.divf %5, %6 : vector<32x1xf32>
    %8 = vector.broadcast %7 : vector<32x1xf32> to vector<32x128xf32>
    %9 = arith.subf %1, %8 : vector<32x128xf32>
    %10 = arith.mulf %9, %9 : vector<32x128xf32>
    %cst_6 = arith.constant dense<0.000000e+00> : vector<32xf32>
    %11 = vector.multi_reduction <add>, %10, %cst_6 [1] : vector<32x128xf32> to vector<32xf32>
    %12 = vector.shape_cast %11 : vector<32xf32> to vector<32x1xf32>
    %cst_7 = arith.constant 1.280000e+02 : f32
    %13 = vector.broadcast %cst_7 : f32 to vector<32x1xf32>
    %14 = arith.divf %12, %13 : vector<32x1xf32>
    %15 = vector.broadcast %7 : vector<32x1xf32> to vector<32x128xf32>
    %16 = arith.subf %1, %15 : vector<32x128xf32>
    %cst_8 = arith.constant 9.99999974E-6 : f32
    %17 = vector.broadcast %cst_8 : f32 to vector<32x1xf32>
    %18 = arith.addf %14, %17 : vector<32x1xf32>
    %19 = math.rsqrt %18 : vector<32x1xf32>
    %20 = vector.broadcast %19 : vector<32x1xf32> to vector<32x128xf32>
    %21 = arith.mulf %16, %20 : vector<32x128xf32>
    %22 = vector.broadcast %2 : vector<1x128xf32> to vector<32x128xf32>
    %23 = arith.mulf %21, %22 : vector<32x128xf32>
    %24 = vector.broadcast %3 : vector<1x128xf32> to vector<32x128xf32>
    %25 = arith.addf %23, %24 : vector<32x128xf32>
    %c0_9 = arith.constant 0 : index
    %c0_10 = arith.constant 0 : index
    %26 = vector.load %arg10[%c0_9, %c0_10] : memref<32x128xf32, #tpu.memory_space<vmem>>, vector<32x128xf32>
    tpu.vector_store %arg10[%c0_9, %c0_10], %25 {strides = array<i32>} : memref<32x128xf32, #tpu.memory_space<vmem>>, vector<32x128xf32>,
    %27 = arith.truncf %25 : vector<32x128xf32> to vector<32x128xbf16>
    %c0_11 = arith.constant 0 : index
    %c0_12 = arith.constant 0 : index
    %28 = vector.load %arg3[%c0_11, %c0_12] : memref<128x128xbf16, #tpu.memory_space<vmem>>, vector<128x128xbf16>
    %cst_13 = arith.constant dense<0.000000e+00> : vector<32x128xf32>
    %29 = tpu.matmul %27, %28, %cst_13 {dimension_numbers = #tpu.dot_dimension_numbers<[1], [0], [0], [1], [0, 0, 1, 1], [], []>} : vector<32x128xbf16>, vector<128x128xbf16>, vector<32x128xf32> -> vector<32x128xf32>
    %c0_14 = arith.constant 0 : index
    %c0_15 = arith.constant 0 : index
    %30 = vector.load %arg11[%c0_14, %c0_15] : memref<32x128xf32, #tpu.memory_space<vmem>>, vector<32x128xf32>
    tpu.vector_store %arg11[%c0_14, %c0_15], %29 {strides = array<i32>} : memref<32x128xf32, #tpu.memory_space<vmem>>, vector<32x128xf32>,
    %c0_16 = arith.constant 0 : index
    %c0_17 = arith.constant 0 : index
    %31 = vector.load %arg4[%c0_16, %c0_17] : memref<1x128xf32, #tpu.memory_space<vmem>>, vector<1x128xf32>
    %c0_18 = arith.constant 0 : index
    %c0_19 = arith.constant 0 : index
    %32 = vector.load %arg5[%c0_18, %c0_19] : memref<1x128xf32, #tpu.memory_space<vmem>>, vector<1x128xf32>
    %cst_20 = arith.constant dense<0.000000e+00> : vector<128xf32>
    %33 = vector.multi_reduction <add>, %25, %cst_20 [0] : vector<32x128xf32> to vector<128xf32>
    %34 = vector.shape_cast %33 : vector<128xf32> to vector<1x128xf32>
    %cst_21 = arith.constant 3.200000e+01 : f32
    %35 = vector.broadcast %cst_21 : f32 to vector<1x128xf32>
    %36 = arith.divf %34, %35 : vector<1x128xf32>
    %37 = vector.broadcast %36 : vector<1x128xf32> to vector<32x128xf32>
    %38 = arith.subf %25, %37 : vector<32x128xf32>
    %39 = arith.mulf %38, %38 : vector<32x128xf32>
    %cst_22 = arith.constant dense<0.000000e+00> : vector<128xf32>
    %40 = vector.multi_reduction <add>, %39, %cst_22 [0] : vector<32x128xf32> to vector<128xf32>
    %41 = vector.shape_cast %40 : vector<128xf32> to vector<1x128xf32>
    %cst_23 = arith.constant 3.200000e+01 : f32
    %42 = vector.broadcast %cst_23 : f32 to vector<1x128xf32>
    %43 = arith.divf %41, %42 : vector<1x128xf32>
    %44 = vector.broadcast %36 : vector<1x128xf32> to vector<32x128xf32>
    %45 = arith.subf %25, %44 : vector<32x128xf32>
    %cst_24 = arith.constant 9.99999974E-6 : f32
    %46 = vector.broadcast %cst_24 : f32 to vector<1x128xf32>
    %47 = arith.addf %43, %46 : vector<1x128xf32>
    %48 = math.rsqrt %47 : vector<1x128xf32>
    %49 = vector.broadcast %48 : vector<1x128xf32> to vector<32x128xf32>
    %50 = arith.mulf %45, %49 : vector<32x128xf32>
    %51 = vector.broadcast %31 : vector<1x128xf32> to vector<32x128xf32>
    %52 = arith.mulf %50, %51 : vector<32x128xf32>
    %53 = vector.broadcast %32 : vector<1x128xf32> to vector<32x128xf32>
    %54 = arith.addf %52, %53 : vector<32x128xf32>
    %c0_25 = arith.constant 0 : index
    %c0_26 = arith.constant 0 : index
    %55 = vector.load %arg6[%c0_25, %c0_26] : memref<1x128xf32, #tpu.memory_space<vmem>>, vector<1x128xf32>
    %c0_27 = arith.constant 0 : index
    %c0_28 = arith.constant 0 : index
    %56 = vector.load %arg7[%c0_27, %c0_28] : memref<1x128xf32, #tpu.memory_space<vmem>>, vector<1x128xf32>
    %cst_29 = arith.constant dense<0.000000e+00> : vector<128xf32>
    %57 = vector.multi_reduction <add>, %29, %cst_29 [0] : vector<32x128xf32> to vector<128xf32>
    %58 = vector.shape_cast %57 : vector<128xf32> to vector<1x128xf32>
    %cst_30 = arith.constant 3.200000e+01 : f32
    %59 = vector.broadcast %cst_30 : f32 to vector<1x128xf32>
    %60 = arith.divf %58, %59 : vector<1x128xf32>
    %61 = vector.broadcast %60 : vector<1x128xf32> to vector<32x128xf32>
    %62 = arith.subf %29, %61 : vector<32x128xf32>
    %63 = arith.mulf %62, %62 : vector<32x128xf32>
    %cst_31 = arith.constant dense<0.000000e+00> : vector<128xf32>
    %64 = vector.multi_reduction <add>, %63, %cst_31 [0] : vector<32x128xf32> to vector<128xf32>
    %65 = vector.shape_cast %64 : vector<128xf32> to vector<1x128xf32>
    %cst_32 = arith.constant 3.200000e+01 : f32
    %66 = vector.broadcast %cst_32 : f32 to vector<1x128xf32>
    %67 = arith.divf %65, %66 : vector<1x128xf32>
    %68 = vector.broadcast %60 : vector<1x128xf32> to vector<32x128xf32>
    %69 = arith.subf %29, %68 : vector<32x128xf32>
    %cst_33 = arith.constant 9.99999974E-6 : f32
    %70 = vector.broadcast %cst_33 : f32 to vector<1x128xf32>
    %71 = arith.addf %67, %70 : vector<1x128xf32>
    %72 = math.rsqrt %71 : vector<1x128xf32>
    %73 = vector.broadcast %72 : vector<1x128xf32> to vector<32x128xf32>
    %74 = arith.mulf %69, %73 : vector<32x128xf32>
    %75 = vector.broadcast %55 : vector<1x128xf32> to vector<32x128xf32>
    %76 = arith.mulf %74, %75 : vector<32x128xf32>
    %77 = vector.broadcast %56 : vector<1x128xf32> to vector<32x128xf32>
    %78 = arith.addf %76, %77 : vector<32x128xf32>
    %79 = arith.truncf %54 : vector<32x128xf32> to vector<32x128xbf16>
    %c0_34 = arith.constant 0 : index
    %c0_35 = arith.constant 0 : index
    %80 = vector.load %arg8[%c0_34, %c0_35] : memref<128x128xbf16, #tpu.memory_space<vmem>>, vector<128x128xbf16>
    %cst_36 = arith.constant dense<0.000000e+00> : vector<32x128xf32>
    %81 = tpu.matmul %79, %80, %cst_36 {dimension_numbers = #tpu.dot_dimension_numbers<[1], [0], [0], [1], [0, 0, 1, 1], [], []>} : vector<32x128xbf16>, vector<128x128xbf16>, vector<32x128xf32> -> vector<32x128xf32>
    %c0_37 = arith.constant 0 : index
    %c0_38 = arith.constant 0 : index
    %82 = vector.load %arg12[%c0_37, %c0_38] : memref<32x128xf32, #tpu.memory_space<vmem>>, vector<32x128xf32>
    tpu.vector_store %arg12[%c0_37, %c0_38], %81 {strides = array<i32>} : memref<32x128xf32, #tpu.memory_space<vmem>>, vector<32x128xf32>,
    %83 = arith.truncf %78 : vector<32x128xf32> to vector<32x128xbf16>
    %c0_39 = arith.constant 0 : index
    %c0_40 = arith.constant 0 : index
    %84 = vector.load %arg9[%c0_39, %c0_40] : memref<128x128xbf16, #tpu.memory_space<vmem>>, vector<128x128xbf16>
    %cst_41 = arith.constant dense<0.000000e+00> : vector<32x128xf32>
    %85 = tpu.matmul %83, %84, %cst_41 {dimension_numbers = #tpu.dot_dimension_numbers<[1], [0], [0], [1], [0, 0, 1, 1], [], []>} : vector<32x128xbf16>, vector<128x128xbf16>, vector<32x128xf32> -> vector<32x128xf32>
    %c0_42 = arith.constant 0 : index
    %c0_43 = arith.constant 0 : index
    %86 = vector.load %arg13[%c0_42, %c0_43] : memref<32x128xf32, #tpu.memory_space<vmem>>, vector<32x128xf32>
    tpu.vector_store %arg13[%c0_42, %c0_43], %85 {strides = array<i32>} : memref<32x128xf32, #tpu.memory_space<vmem>>, vector<32x128xf32>,
    return
  }
}

</mosaic_0001>

<bundles_post_ra>
// kernel: forward.7
= control target key start
LH: loop header
LB: loop body
LE: loop exit
PB: predicated region body
PF: predicated region fallthrough
CT: control target
= control target key end

     0   :  { %19 = vsyncpa [#allocation3], 0  ;;  %s1046_s0 = inlined_call_operand.vmem [shape: bf16[32,128], index: 0, kind: input, shape index: {}]   ;;  %s1047_s1 = inlined_call_operand.vmem [shape: f32[1,128], index: 1, kind: input, shape index: {}]   ;;  %s1048_s2 = inlined_call_operand.vmem [shape: f32[1,128], index: 2, kind: input, shape index: {}]   ;;  %s1049_s3 = inlined_call_operand.vmem [shape: bf16[128,128], index: 3, kind: input, shape index: {}]   ;;  %s1050_s4 = inlined_call_operand.vmem [shape: f32[1,128], index: 4, kind: input, shape index: {}]   ;;  %s1051_s5 = inlined_call_operand.vmem [shape: f32[1,128], index: 5, kind: input, shape index: {}]   ;;  %s1052_s6 = inlined_call_operand.vmem [shape: f32[1,128], index: 6, kind: input, shape index: {}]   ;;  %s1053_s7 = inlined_call_operand.hbm [shape: f32[1,128], index: 7, kind: input, shape index: {}]   ;;  %s1054_s8 = inlined_call_operand.vmem [shape: bf16[128,128], index: 8, kind: input, shape index: {}]   ;;  %s1055_s9 = inlined_call_operand.vmem [shape: bf16[128,128], index: 9, kind: input, shape index: {}]   ;;  %s1056_s10 = inlined_call_operand.hbm [shape: f32[32,128], index: 10, kind: output, shape index: {0}]   ;;  %s1057_s11 = inlined_call_operand.vmem [shape: f32[32,128], index: 11, kind: output, shape index: {1}]   ;;  %s1058_s12 = inlined_call_operand.vmem [shape: f32[32,128], index: 12, kind: output, shape index: {2}]   ;;  %s1059_s13 = inlined_call_operand.vmem [shape: f32[32,128], index: 13, kind: output, shape index: {3}]  }
   0x1   :  { %20 = vsyncpa [#allocation4], 0  ;;  %s40_s27 = sshll.u32 %s1053_s7, 4  ;;  %s809_s28 = smov [#allocation2]   ;;  %s41_s27 = int_to_ptr.hbm [resolvable:$true] %s40_s27 }
   0x2   :  { %s42_s29 = sshll.u32 %s809_s28, 4  ;;  %s43_s29 = int_to_ptr.vmem [resolvable:$true] %s42_s29 }
   0x3   :  { %45 = dma.hbm_to_vmem [thread:$0]  %s41_s27, 16, %s43_s29, [#allocation3]  }
   0x4   :  { %805 = dma.done.wait [#allocation3], 16  }
   0x5   :  { %806 = vsyncadd [#allocation3], 4294967280  ;;  %v720_v0 = vld [vmem:[%s1046_s0 + $0x8] sm:$0xff]   ;;  %v713_v1 = vld [vmem:[%s1046_s0] sm:$0xff]   ;;  %v810_v6 = vmov 128.0   ;;  %s812_s0 = smov [#allocation5]  }
   0x6   :  { %v718_v2 = vunpack.c.l.bf16 %v720_v0  ;;  %v714_v3 = vunpack.c.l.bf16 %v713_v1  ;;  %v719_v4 = vunpack.c.h.bf16 %v720_v0  ;;  %v715_v5 = vunpack.c.h.bf16 %v713_v1  ;;  %v695_v29 = vld [vmem:[%s1049_s3 + $0x38] sm:$0xff]  ;;  %v694_v30 = vld [vmem:[%s1049_s3 + $0x30] sm:$0xff]  ;;  %v693_v31 = vld [vmem:[%s1049_s3 + $0x28] sm:$0xff]  ;;  %s567_s18 = sshll.u32 %s1056_s10, 4  ;;  %s813_s19 = smov 128   ;;  %s568_s18 = int_to_ptr.hbm [resolvable:$true] %s567_s18 }
   0x7   :  { %741 = vrcp.f32 %v810_v6  ;;  %235 = vmatpush.bf16.msra.mxu0 %v695_v29  ;;  %721 = vmatpush.bf16.msra.mxu3 %v695_v29  ;;  %v692_v32 = vld [vmem:[%s1049_s3 + $0x20] sm:$0xff]  ;;  %v691_v33 = vld [vmem:[%s1049_s3 + $0x18] sm:$0xff]  ;;  %v690_v34 = vld [vmem:[%s1049_s3 + $0x10] sm:$0xff]  ;;  %s814_s20 = smov 8  }
   0x8   :  { %68 = vadd.xlane.f32.xlu0 %v718_v2  ;;  %64 = vadd.xlane.f32.xlu1 %v714_v3  ;;  %v689_v35 = vld [vmem:[%s1049_s3 + $0x8] sm:$0xff]  ;;  %v688_v40 = vld [vmem:[%s1049_s3] sm:$0xff] }
   0x9   :  { %v735_v1 = vld [vmem:[%s1047_s1] ss:$0 sm:$0xff] }
   0xb   :  { %236 = vmatpush.bf16.msra.mxu0 %v694_v30  ;;  %722 = vmatpush.bf16.msra.mxu3 %v694_v30 }
   0xd   :  { %v742_v7 = vpop.eup %741 }
   0xe   :  { %v73_v8 = vmul.f32 128.0, %v742_v7  ;;  %vm77_vm0 = vweird.f32 %v742_v7 }
   0xf   :  { %237 = vmatpush.bf16.msra.mxu0 %v693_v31  ;;  %723 = vmatpush.bf16.msra.mxu3 %v693_v31 }
  0x10   :  { %70 = vadd.xlane.f32.xlu0 %v719_v4  ;;  %66 = vadd.xlane.f32.xlu1 %v715_v5  ;;  %v74_v9 = vsub.f32 1.0, %v73_v8 }
  0x12   :  { %v75_v10 = vmul.f32 %v742_v7, %v74_v9 }
  0x13   :  { %238 = vmatpush.bf16.msra.mxu0 %v692_v32  ;;  %724 = vmatpush.bf16.msra.mxu3 %v692_v32 }
  0x14   :  { %v76_v11 = vadd.f32 %v742_v7, %v75_v10 }
  0x16   :  { %v78_v12 = vsel %vm77_vm0, %v742_v7, %v76_v11  ;;  %v736_v7 = vld [vmem:[%s1048_s2] ss:$0 sm:$0xff]  ;;  %s565_s2 = sshll.u32 %s812_s0, 4  ;;  %s566_s2 = int_to_ptr.vmem [resolvable:$true] %s565_s2 }
  0x17   :  { %239 = vmatpush.bf16.msra.mxu0 %v691_v33  ;;  %725 = vmatpush.bf16.msra.mxu3 %v691_v33 }
  0x1b   :  { %240 = vmatpush.bf16.msra.mxu0 %v690_v34  ;;  %726 = vmatpush.bf16.msra.mxu3 %v690_v34  ;;  %v700_v34 = vld [vmem:[%s1054_s8 + $0x20] sm:$0xff] }
  0x1f   :  { %241 = vmatpush.bf16.msra.mxu0 %v689_v35  ;;  %727 = vmatpush.bf16.msra.mxu3 %v689_v35 }
  0x23   :  { %242 = vmatpush.bf16.msra.mxu0 %v688_v40  ;;  %728 = vmatpush.bf16.msra.mxu3 %v688_v40 }
  0x7b   :  { %v69_v13 = vpop.xlane.xlu0 %68  ;;  %v65_v14 = vpop.xlane.xlu1 %64 }
  0x7c   :  { %v81_v15 = vmul.f32 %v78_v12, %v69_v13  ;;  %v79_v16 = vmul.f32 %v78_v12, %v65_v14  ;;  %v703_v14 = vld [vmem:[%s1054_s8 + $0x38] sm:$0xff] }
  0x7d   :  { %449 = vmatpush.bf16.msra.mxu1 %v703_v14 }
  0x7e   :  { %v894_v17 = vsub.f32 %v714_v3, %v79_v16  ;;  %v896_v18 = vsub.f32 %v718_v2, %v81_v15 }
  0x80   :  { %v89_v19 = vmul.f32 %v896_v18, %v896_v18  ;;  %v87_v20 = vmul.f32 %v894_v17, %v894_v17 }
  0x82   :  { %95 = vadd.xlane.f32.xlu2 %v89_v19  ;;  %91 = vadd.xlane.f32.xlu0 %v87_v20  ;;  %v811_v20 = vmov 32.0  }
  0x83   :  { %v71_v21 = vpop.xlane.xlu0 %70  ;;  %v67_v22 = vpop.xlane.xlu1 %66 }
  0x84   :  { %v82_v23 = vmul.f32 %v78_v12, %v71_v21  ;;  %v80_v24 = vmul.f32 %v78_v12, %v67_v22 }
  0x86   :  { %v902_v25 = vsub.f32 %v719_v4, %v82_v23  ;;  %v904_v26 = vsub.f32 %v715_v5, %v80_v24 }
  0x88   :  { %v90_v27 = vmul.f32 %v902_v25, %v902_v25  ;;  %v88_v28 = vmul.f32 %v904_v26, %v904_v26 }
  0x8a   :  { %97 = vadd.xlane.f32.xlu2 %v90_v27  ;;  %93 = vadd.xlane.f32.xlu1 %v88_v28  ;;  %v701_v28 = vld [vmem:[%s1054_s8 + $0x28] sm:$0xff] }
  0xf5   :  { %v96_v36 = vpop.xlane.xlu2 %95  ;;  %v92_v37 = vpop.xlane.xlu0 %91 }
  0xf6   :  { %v101_v38 = vmul.f32 %v96_v36, %v78_v12  ;;  %v99_v39 = vmul.f32 %v92_v37, %v78_v12 }
  0xf8   :  { %v105_v41 = vadd.f32 1e-05, %v101_v38  ;;  %v103_v42 = vadd.f32 1e-05, %v99_v39  ;;  %v699_v38 = vld [vmem:[%s1054_s8 + $0x18] sm:$0xff] }
  0xfa   :  { %743 = vrsqrt.f32 %v105_v41  ;;  %vm133_vm3 = vweird.f32 %v105_v41  ;;  %vm113_vm5 = vweird.f32 %v103_v42 }
  0xfb   :  { %745 = vrsqrt.f32 %v103_v42 }
  0xfd   :  { %v98_v43 = vpop.xlane.xlu2 %97  ;;  %v94_v44 = vpop.xlane.xlu1 %93 }
  0xfe   :  { %v102_v45 = vmul.f32 %v98_v43, %v78_v12  ;;  %v100_v46 = vmul.f32 %v94_v44, %v78_v12 }
 0x100   :  { %v744_v47 = vpop.eup %743  ;;  %v106_v48 = vadd.f32 1e-05, %v102_v45  ;;  %v104_v49 = vadd.f32 1e-05, %v100_v46  ;;  %v697_v46 = vld [vmem:[%s1054_s8 + $0x8] sm:$0xff] }
 0x101   :  { %v746_v50 = vpop.eup %745  ;;  %v128_v51 = vmul.f32 %v744_v47, %v105_v41  ;;  %vm134_vm1 = vweird.f32 %v744_v47 }
 0x102   :  { %v108_v52 = vmul.f32 %v746_v50, %v103_v42  ;;  %747 = vrsqrt.f32 %v106_v48  ;;  %vm114_vm2 = vweird.f32 %v746_v50  ;;  %vm135_vm4 = vmor %vm133_vm3, %vm134_vm1  ;;  %vm143_vm9 = vweird.f32 %v106_v48  ;;  %v698_v42 = vld [vmem:[%s1054_s8 + $0x10] sm:$0xff] }
 0x103   :  { %v129_v53 = vmul.f32 %v744_v47, %v128_v51  ;;  %749 = vrsqrt.f32 %v104_v49  ;;  %vm115_vm6 = vmor %vm113_vm5, %vm114_vm2  ;;  %vm123_vm11 = vweird.f32 %v104_v49 }
 0x104   :  { %v109_v54 = vmul.f32 %v746_v50, %v108_v52  ;;  %751 = vrcp.f32 %v811_v20  ;;  %v738_v20 = vld [vmem:[%s1051_s5] ss:$0 sm:$0xff] }
 0x105   :  { %v130_v55 = vmul.f32 0.5, %v129_v53 }
 0x106   :  { %v110_v56 = vmul.f32 0.5, %v109_v54 }
 0x107   :  { %v131_v57 = vsub.f32 1.5, %v130_v55 }
 0x108   :  { %v748_v58 = vpop.eup %747  ;;  %v111_v59 = vsub.f32 1.5, %v110_v56 }
 0x109   :  { %v750_v60 = vpop.eup %749  ;;  %v132_v61 = vmul.f32 %v744_v47, %v131_v57  ;;  %v138_v62 = vmul.f32 %v748_v58, %v106_v48  ;;  %vm144_vm7 = vweird.f32 %v748_v58 }
 0x10a   :  { %v112_v63 = vmul.f32 %v746_v50, %v111_v59  ;;  %v118_v0 = vmul.f32 %v750_v60, %v104_v49  ;;  %vm124_vm8 = vweird.f32 %v750_v60  ;;  %vm145_vm10 = vmor %vm143_vm9, %vm144_vm7  ;;  %v752_v30 = vpop.eup %751 }
 0x10b   :  { %v136_v2 = vsel %vm135_vm4, %v744_v47, %v132_v61  ;;  %v139_v3 = vmul.f32 %v748_v58, %v138_v62  ;;  %vm125_vm12 = vmor %vm123_vm11, %vm124_vm8  ;;  %v270_v35 = vmul.f32 32.0, %v752_v30  ;;  %vm274_vm13 = vweird.f32 %v752_v30 }
 0x10c   :  { %v149_v4 = vmul.f32 %v136_v2, %v896_v18  ;;  %v116_v5 = vsel %vm115_vm6, %v746_v50, %v112_v63  ;;  %v119_v6 = vmul.f32 %v750_v60, %v118_v0  ;;  %v696_v50 = vld [vmem:[%s1054_s8] sm:$0xff] }
 0x10d   :  { %v147_v8 = vmul.f32 %v116_v5, %v894_v17  ;;  %v140_v9 = vmul.f32 0.5, %v139_v3  ;;  %v702_v17 = vld [vmem:[%s1054_s8 + $0x30] sm:$0xff]  ;;  %v271_v39 = vsub.f32 1.0, %v270_v35 }
 0x10e   :  { %v120_v10 = vmul.f32 0.5, %v119_v6  ;;  %v156_v11 = vmul.f32 %v735_v1, %v149_v4  ;;  %450 = vmatpush.bf16.msra.mxu1 %v702_v17 }
 0x10f   :  { %v141_v12 = vsub.f32 1.5, %v140_v9  ;;  %v154_v13 = vmul.f32 %v735_v1, %v147_v8  ;;  %v272_v43 = vmul.f32 %v752_v30, %v271_v39 }
 0x110   :  { %v121_v15 = vsub.f32 1.5, %v120_v10  ;;  %v163_v16 = vadd.f32 %v736_v7, %v156_v11 }
 0x111   :  { %v142_v18 = vmul.f32 %v748_v58, %v141_v12  ;;  %v161_v19 = vadd.f32 %v736_v7, %v154_v13  ;;  %v273_v47 = vadd.f32 %v752_v30, %v272_v43 }
 0x112   :  { %v122_v21 = vmul.f32 %v750_v60, %v121_v15  ;;  %167 = vst [vmem:[#allocation5 + $0x10] sm:$0xff] %v163_v16  ;;  %451 = vmatpush.bf16.msra.mxu1 %v701_v28  ;;  %v737_v15 = vld [vmem:[%s1050_s4] ss:$0 sm:$0xff] }
 0x113   :  { %v146_v22 = vsel %vm145_vm10, %v748_v58, %v142_v18  ;;  %165 = vst [vmem:[#allocation5] sm:$0xff] %v161_v19  ;;  %v968_v51 = vsel %vm274_vm13, %v752_v30, %v273_v47  ;;  %v709_v47 = vld [vmem:[%s1055_s9 + $0x28] sm:$0xff] }
 0x114   :  { %v150_v23 = vmul.f32 %v146_v22, %v902_v25  ;;  %v126_v24 = vsel %vm125_vm12, %v750_v60, %v122_v21 }
 0x115   :  { %v148_v27 = vmul.f32 %v126_v24, %v904_v26 }
 0x116   :  { %v157_v29 = vmul.f32 %v735_v1, %v150_v23  ;;  %452 = vmatpush.bf16.msra.mxu1 %v700_v34 }
 0x117   :  { %v155_v31 = vmul.f32 %v735_v1, %v148_v27 }
 0x118   :  { %v164_v32 = vadd.f32 %v736_v7, %v157_v29 }
 0x119   :  { %v162_v33 = vadd.f32 %v736_v7, %v155_v31 }
 0x11a   :  { %168 = vst [vmem:[#allocation5 + $0x18] sm:$0xff] %v164_v32  ;;  %v170_v25 = vpack.c.bf16 %v164_v32, %v163_v16  ;;  %453 = vmatpush.bf16.msra.mxu1 %v699_v38 }
 0x11b   :  { %166 = vst [vmem:[#allocation5 + $0x8] sm:$0xff] %v162_v33  ;;  %v169_v26 = vpack.c.bf16 %v162_v33, %v161_v19  ;;  %v260_v36 = vadd.f32 %v162_v33, %v161_v19 }
 0x11c   :  { %248 = vmatmul.bf16.vlgmr.msra.gmra.mxu3 %v170_v25  ;;  %573 = dma.vmem_to_hbm [thread:$0]  %s566_s2, 512, %s568_s18, [#allocation4], %s813_s19, %s813_s19, %s814_s20  }
 0x11d   :  { %243 = vmatmul.bf16.vlgmr.msra.gmra.mxu0 %v169_v26  ;;  %v261_v37 = vadd.f32 %v260_v36, %v163_v16 }
 0x11e   :  { %454 = vmatpush.bf16.msra.mxu1 %v698_v42 }
 0x11f   :  { %v262_v40 = vadd.f32 %v261_v37, %v164_v32 }
 0x121   :  { %v263_v41 = vrot.slane %v262_v40, 4 }
 0x122   :  { %455 = vmatpush.bf16.msra.mxu1 %v697_v46 }
 0x123   :  { %v264_v44 = vadd.f32 %v263_v41, %v262_v40  ;;  %v711_v41 = vld [vmem:[%s1055_s9 + $0x38] sm:$0xff] }
 0x124   :  { %538 = vmatpush.bf16.msra.mxu2 %v711_v41 }
 0x125   :  { %v265_v45 = vrot.slane %v264_v44, 2 }
 0x126   :  { %456 = vmatpush.bf16.msra.mxu1 %v696_v50 }
 0x127   :  { %v266_v48 = vadd.f32 %v265_v45, %v264_v44  ;;  %v710_v44 = vld [vmem:[%s1055_s9 + $0x30] sm:$0xff] }
 0x128   :  { %539 = vmatpush.bf16.msra.mxu2 %v710_v44 }
 0x129   :  { %v267_v49 = vrot.slane %v266_v48, 1 }
 0x12b   :  { %v268_v52 = vadd.f32 %v267_v49, %v266_v48 }
 0x12c   :  { %540 = vmatpush.bf16.msra.mxu2 %v709_v47 }
 0x12d   :  { %v276_v53 = vmul.f32 %v968_v51, %v268_v52 }
 0x12f   :  { %v279_v54 = vsub.f32 %v163_v16, %v276_v53  ;;  %v277_v55 = vsub.f32 %v161_v19, %v276_v53  ;;  %v278_v56 = vsub.f32 %v162_v33, %v276_v53  ;;  %v280_v57 = vsub.f32 %v164_v32, %v276_v53  ;;  %v708_v53 = vld [vmem:[%s1055_s9 + $0x20] sm:$0xff] }
 0x130   :  { %541 = vmatpush.bf16.msra.mxu2 %v708_v53 }
 0x131   :  { %v281_v58 = vmul.f32 %v277_v55, %v277_v55  ;;  %v282_v59 = vmul.f32 %v278_v56, %v278_v56  ;;  %v283_v60 = vmul.f32 %v279_v54, %v279_v54  ;;  %v284_v62 = vmul.f32 %v280_v57, %v280_v57 }
 0x133   :  { %v285_v61 = vadd.f32 %v282_v59, %v281_v58  ;;  %v707_v59 = vld [vmem:[%s1055_s9 + $0x18] sm:$0xff] }
 0x134   :  { %542 = vmatpush.bf16.msra.mxu2 %v707_v59 }
 0x135   :  { %v286_v63 = vadd.f32 %v285_v61, %v283_v60 }
 0x137   :  { %v287_v0 = vadd.f32 %v286_v63, %v284_v62  ;;  %v706_v63 = vld [vmem:[%s1055_s9 + $0x10] sm:$0xff] }
 0x138   :  { %543 = vmatpush.bf16.msra.mxu2 %v706_v63 }
 0x139   :  { %v288_v1 = vrot.slane %v287_v0, 4 }
 0x13b   :  { %v289_v2 = vadd.f32 %v288_v1, %v287_v0 }
 0x13d   :  { %v290_v3 = vrot.slane %v289_v2, 2 }
 0x13f   :  { %v291_v4 = vadd.f32 %v290_v3, %v289_v2  ;;  %v705_v2 = vld [vmem:[%s1055_s9 + $0x8] sm:$0xff] }
 0x140   :  { %544 = vmatpush.bf16.msra.mxu2 %v705_v2 }
 0x141   :  { %v292_v5 = vrot.slane %v291_v4, 1 }
 0x143   :  { %v293_v6 = vadd.f32 %v292_v5, %v291_v4  ;;  %v704_v5 = vld [vmem:[%s1055_s9] sm:$0xff] }
 0x144   :  { %545 = vmatpush.bf16.msra.mxu2 %v704_v5 }
 0x145   :  { %v294_v7 = vmul.f32 %v293_v6, %v968_v51 }
 0x147   :  { %v295_v8 = vadd.f32 1e-05, %v294_v7 }
 0x149   :  { %753 = vrsqrt.f32 %v295_v8  ;;  %vm302_vm15 = vweird.f32 %v295_v8 }
 0x14f   :  { %v754_v9 = vpop.eup %753 }
 0x150   :  { %v297_v10 = vmul.f32 %v754_v9, %v295_v8  ;;  %vm303_vm14 = vweird.f32 %v754_v9 }
 0x151   :  { %vm304_vm0 = vmor %vm302_vm15, %vm303_vm14 }
 0x152   :  { %v298_v11 = vmul.f32 %v754_v9, %v297_v10 }
 0x154   :  { %v299_v12 = vmul.f32 0.5, %v298_v11 }
 0x156   :  { %v300_v13 = vsub.f32 1.5, %v299_v12 }
 0x158   :  { %v301_v14 = vmul.f32 %v754_v9, %v300_v13 }
 0x15a   :  { %v305_v16 = vsel %vm304_vm0, %v754_v9, %v301_v14 }
 0x15b   :  { %v306_v18 = vmul.f32 %v305_v16, %v277_v55  ;;  %v307_v19 = vmul.f32 %v305_v16, %v278_v56  ;;  %v308_v27 = vmul.f32 %v305_v16, %v279_v54  ;;  %v309_v28 = vmul.f32 %v305_v16, %v280_v57 }
 0x15d   :  { %v313_v17 = vmul.f32 %v737_v15, %v306_v18  ;;  %v314_v21 = vmul.f32 %v737_v15, %v307_v19  ;;  %v315_v29 = vmul.f32 %v737_v15, %v308_v27  ;;  %v316_v30 = vmul.f32 %v737_v15, %v309_v28 }
 0x15f   :  { %v320_v22 = vadd.f32 %v738_v20, %v313_v17  ;;  %v321_v23 = vadd.f32 %v738_v20, %v314_v21  ;;  %v322_v31 = vadd.f32 %v738_v20, %v315_v29  ;;  %v323_v32 = vadd.f32 %v738_v20, %v316_v30  ;;  %v740_v17 = vld [vmem:[#allocation2] ss:$0 sm:$0xff] }
 0x161   :  { %v383_v24 = vpack.c.bf16 %v321_v23, %v320_v22  ;;  %v384_v33 = vpack.c.bf16 %v323_v32, %v322_v31 }
 0x163   :  { %457 = vmatmul.bf16.vlgmr.msra.gmra.mxu1 %v383_v24 }
 0x173   :  { %462 = vmatmul.bf16.gmra.mxu1 %v384_v33 }
 0x19a   :  { %v244_v34 = vpop.f32.mrf.mxu0 }
 0x19b   :  { %254 = vst [vmem:[%s1057_s11] sm:$0xff] %v244_v34 }
 0x19f   :  { %v249_v25 = vpop.f32.mrf.mxu3 }
 0x1a0   :  { %256 = vst [vmem:[%s1057_s11 + $0x10] sm:$0xff] %v249_v25 }
 0x1a2   :  { %v246_v35 = vpop.f32.mrf.mxu0 }
 0x1a3   :  { %255 = vst [vmem:[%s1057_s11 + $0x8] sm:$0xff] %v246_v35  ;;  %v326_v26 = vadd.f32 %v246_v35, %v244_v34 }
 0x1a5   :  { %v327_v36 = vadd.f32 %v326_v26, %v249_v25 }
 0x1a7   :  { %v251_v37 = vpop.f32.mrf.mxu3 }
 0x1a8   :  { %257 = vst [vmem:[%s1057_s11 + $0x18] sm:$0xff] %v251_v37  ;;  %v328_v38 = vadd.f32 %v327_v36, %v251_v37 }
 0x1aa   :  { %v329_v39 = vrot.slane %v328_v38, 4 }
 0x1ac   :  { %v330_v40 = vadd.f32 %v329_v39, %v328_v38 }
 0x1ae   :  { %v331_v42 = vrot.slane %v330_v40, 2 }
 0x1b0   :  { %v332_v43 = vadd.f32 %v331_v42, %v330_v40 }
 0x1b2   :  { %v333_v45 = vrot.slane %v332_v43, 1 }
 0x1b4   :  { %v334_v46 = vadd.f32 %v333_v45, %v332_v43 }
 0x1b6   :  { %v335_v48 = vmul.f32 %v334_v46, %v968_v51 }
 0x1b8   :  { %v336_v49 = vsub.f32 %v244_v34, %v335_v48  ;;  %v337_v50 = vsub.f32 %v246_v35, %v335_v48  ;;  %v338_v52 = vsub.f32 %v249_v25, %v335_v48  ;;  %v339_v54 = vsub.f32 %v251_v37, %v335_v48 }
 0x1ba   :  { %v340_v55 = vmul.f32 %v336_v49, %v336_v49  ;;  %v341_v56 = vmul.f32 %v337_v50, %v337_v50  ;;  %v342_v57 = vmul.f32 %v338_v52, %v338_v52  ;;  %v343_v60 = vmul.f32 %v339_v54, %v339_v54 }
 0x1bc   :  { %v344_v58 = vadd.f32 %v341_v56, %v340_v55 }
 0x1be   :  { %v345_v61 = vadd.f32 %v344_v58, %v342_v57 }
 0x1c0   :  { %v346_v62 = vadd.f32 %v345_v61, %v343_v60 }
 0x1c2   :  { %v347_v0 = vrot.slane %v346_v62, 4 }
 0x1c4   :  { %v348_v1 = vadd.f32 %v347_v0, %v346_v62 }
 0x1c6   :  { %v349_v3 = vrot.slane %v348_v1, 2 }
 0x1c8   :  { %v350_v4 = vadd.f32 %v349_v3, %v348_v1 }
 0x1ca   :  { %v351_v6 = vrot.slane %v350_v4, 1 }
 0x1cc   :  { %v352_v7 = vadd.f32 %v351_v6, %v350_v4 }
 0x1ce   :  { %v353_v8 = vmul.f32 %v352_v7, %v968_v51  ;;  %v739_v51 = vld [vmem:[%s1052_s6] ss:$0 sm:$0xff] }
 0x1d0   :  { %v354_v9 = vadd.f32 1e-05, %v353_v8 }
 0x1d2   :  { %755 = vrsqrt.f32 %v354_v9  ;;  %vm361_vm2 = vweird.f32 %v354_v9 }
 0x1d8   :  { %v756_v10 = vpop.eup %755 }
 0x1d9   :  { %v356_v11 = vmul.f32 %v756_v10, %v354_v9  ;;  %vm362_vm1 = vweird.f32 %v756_v10 }
 0x1da   :  { %vm363_vm3 = vmor %vm361_vm2, %vm362_vm1 }
 0x1db   :  { %v357_v12 = vmul.f32 %v756_v10, %v356_v11 }
 0x1dd   :  { %v358_v13 = vmul.f32 0.5, %v357_v12 }
 0x1df   :  { %v359_v14 = vsub.f32 1.5, %v358_v13 }
 0x1e0   :  { %v458_v15 = vpop.f32.mrf.mxu1 }
 0x1e1   :  { %v360_v16 = vmul.f32 %v756_v10, %v359_v14  ;;  %468 = vst [vmem:[%s1058_s12] sm:$0xff] %v458_v15 }
 0x1e3   :  { %v364_v18 = vsel %vm363_vm3, %v756_v10, %v360_v16 }
 0x1e4   :  { %v365_v19 = vmul.f32 %v364_v18, %v336_v49  ;;  %v366_v20 = vmul.f32 %v364_v18, %v337_v50  ;;  %v368_v29 = vmul.f32 %v364_v18, %v339_v54  ;;  %v367_v30 = vmul.f32 %v364_v18, %v338_v52 }
 0x1e6   :  { %v372_v21 = vmul.f32 %v739_v51, %v365_v19  ;;  %v373_v22 = vmul.f32 %v739_v51, %v366_v20  ;;  %v374_v32 = vmul.f32 %v739_v51, %v367_v30  ;;  %v375_v33 = vmul.f32 %v739_v51, %v368_v29 }
 0x1e8   :  { %v460_v23 = vpop.f32.mrf.mxu1  ;;  %v379_v24 = vadd.f32 %v740_v17, %v372_v21  ;;  %v380_v27 = vadd.f32 %v740_v17, %v373_v22  ;;  %v381_v34 = vadd.f32 %v740_v17, %v374_v32  ;;  %v382_v25 = vadd.f32 %v740_v17, %v375_v33 }
 0x1e9   :  { %469 = vst [vmem:[%s1058_s12 + $0x8] sm:$0xff] %v460_v23 }
 0x1ea   :  { %v472_v28 = vpack.c.bf16 %v380_v27, %v379_v24  ;;  %v473_v26 = vpack.c.bf16 %v382_v25, %v381_v34 }
 0x1ec   :  { %546 = vmatmul.bf16.vlgmr.msra.gmra.mxu2 %v472_v28 }
 0x1f0   :  { %v463_v31 = vpop.f32.mrf.mxu1 }
 0x1f1   :  { %470 = vst [vmem:[%s1058_s12 + $0x10] sm:$0xff] %v463_v31 }
 0x1f8   :  { %v465_v35 = vpop.f32.mrf.mxu1 }
 0x1f9   :  { %471 = vst [vmem:[%s1058_s12 + $0x18] sm:$0xff] %v465_v35 }
 0x1fc   :  { %551 = vmatmul.bf16.gmra.mxu2 %v473_v26 }
 0x26f   :  { %v547_v36 = vpop.f32.mrf.mxu2 }
 0x270   :  { %557 = vst [vmem:[%s1059_s13] sm:$0xff] %v547_v36 }
 0x277   :  { %v549_v37 = vpop.f32.mrf.mxu2 }
 0x278   :  { %558 = vst [vmem:[%s1059_s13 + $0x8] sm:$0xff] %v549_v37 }
 0x27f   :  { %v552_v38 = vpop.f32.mrf.mxu2 }
 0x280   :  { %559 = vst [vmem:[%s1059_s13 + $0x10] sm:$0xff] %v552_v38 }
 0x287   :  { %v554_v39 = vpop.f32.mrf.mxu2 }
 0x288   :  { %560 = vst [vmem:[%s1059_s13 + $0x18] sm:$0xff] %v554_v39 }
 0x289   :  { %807 = dma.done.wait [#allocation4], 512  }
 0x28a   :  { %808 = vsyncadd [#allocation4], 4294966784 }
 0x28b   :  { %590 = vsyncpa [#allocation3], 1 }
 0x28c   :  { %591 = vsyncpa [#allocation4], 1 }

// kernel: forward.4
= control target key start
LH: loop header
LB: loop body
LE: loop exit
PB: predicated region body
PF: predicated region fallthrough
CT: control target
= control target key end

     0   :  { %s2125_s21 = smov 0   ;;  %s2769_s0 = inlined_call_operand.vmem [shape: f32[32,8,768], index: 0, kind: input, shape index: {}]   ;;  %s2770_s1 = inlined_call_operand.vmem [shape: bf16[768,128], index: 1, kind: input, shape index: {}]   ;;  %s2771_s2 = inlined_call_operand.vmem [shape: f32[8,128], index: 2, kind: input, shape index: {}]   ;;  %s2772_s3 = inlined_call_operand.vmem [shape: f32[32,1,128], index: 3, kind: input, shape index: {}]   ;;  %s2773_s4 = inlined_call_operand.vmem [shape: f32[1,128], index: 4, kind: input, shape index: {}]   ;;  %s2774_s5 = inlined_call_operand.vmem [shape: f32[1,128], index: 5, kind: input, shape index: {}]   ;;  %s2775_s6 = inlined_call_operand.vmem [shape: bf16[32,8,128], index: 6, kind: output, shape index: {}]  }
   0x1 LB: > { %s1700_s22 = sadd.s32 4294967295, %s2086_s21   ;;  %p1704_p0 = scmp.ge.s32.totalorder %s2086_s21, 1  ;;  %s2086_s21 = sphi %s2125_s21, %s16_s21  }
   0x2   : > { %p224_p1 = scmp.lt.s32.totalorder %s2086_s21, 3 }
   0x4   : > { %p225_p2 = pnand %p1704_p0, %p224_p1 }
   0x5   : > { %s1705_s11 = sshll.u32 (!%p225_p2), %s1700_s22, 4 }
   0x6   : > { %228 = sbr.rel (%p225_p2) target bundleno = 642 (0x282), region = 44  ;;  %p260_p3 = scmp.lt.s32.totalorder (!%p225_p2), %s1705_s11, 31 }
   0xb   : > { %v1913_v0 = vld [vmem:[%s2770_s1 + $0x38] sm:$0xff]  ;;  %v1912_v2 = vld [vmem:[%s2770_s1 + $0x30] sm:$0xff]  ;;  %v1911_v4 = vld [vmem:[%s2770_s1 + $0x28] sm:$0xff]  ;;  %s2777_s11 = smov (!%p260_p3, %s1705_s11), 31 }
   0xc   : > { %v1921_v1 = vld [vmem:[%s2770_s1 + $0x78] sm:$0xff]  ;;  %2001 = vmatpush.bf16.msra.mxu2 %v1913_v0  ;;  %v1920_v3 = vld [vmem:[%s2770_s1 + $0x70] sm:$0xff]  ;;  %805 = vmatpush.bf16.msra.mxu0 %v1913_v0  ;;  %v1919_v5 = vld [vmem:[%s2770_s1 + $0x68] sm:$0xff]  ;;  %s2017_s25 = smul.u32 48, %s2777_s11  ;;  %s2337_s17 = scalar_lea.vmem %s2772_s3, %s2777_s11 }
   0xd   : > { %2009 = vmatpush.bf16.msra.mxu3 %v1921_v1  ;;  %854 = vmatpush.bf16.msra.mxu1 %v1921_v1  ;;  %v1910_v6 = vld [vmem:[%s2770_s1 + $0x20] sm:$0xff]  ;;  %v1909_v8 = vld [vmem:[%s2770_s1 + $0x18] sm:$0xff]  ;;  %v1908_v10 = vld [vmem:[%s2770_s1 + $0x10] sm:$0xff]  ;;  %s1709_s24 = sshll.u32 %s2777_s11, 2 }
   0xe   : > { %v1918_v7 = vld [vmem:[%s2770_s1 + $0x60] sm:$0xff]  ;;  %v1917_v9 = vld [vmem:[%s2770_s1 + $0x58] sm:$0xff]  ;;  %v1916_v11 = vld [vmem:[%s2770_s1 + $0x50] sm:$0xff]  ;;  %s2181_s8 = scalar_lea.vmem %s2769_s0, %s2017_s25  ;;  %s2689_s27 = scalar_lea.vmem %s2775_s6, %s1709_s24 }
   0xf   : > { %v1907_v12 = vld [vmem:[%s2770_s1 + $0x8] sm:$0xff]  ;;  %v1906_v14 = vld [vmem:[%s2770_s1] sm:$0xff]  ;;  %v331_v17 = vld [vmem:[%s2181_s8 + $0x1b0] sm:$0xff] }
  0x10   : > { %2002 = vmatpush.bf16.msra.mxu2 %v1912_v2  ;;  %806 = vmatpush.bf16.msra.mxu0 %v1912_v2  ;;  %v1915_v13 = vld [vmem:[%s2770_s1 + $0x48] sm:$0xff]  ;;  %v1914_v15 = vld [vmem:[%s2770_s1 + $0x40] sm:$0xff]  ;;  %v332_v19 = vld [vmem:[%s2181_s8 + $0x1b8] sm:$0xff] }
  0x11   : > { %2010 = vmatpush.bf16.msra.mxu3 %v1920_v3  ;;  %855 = vmatpush.bf16.msra.mxu1 %v1920_v3  ;;  %v325_v16 = vld [vmem:[%s2181_s8 + $0x180] sm:$0xff]  ;;  %v326_v18 = vld [vmem:[%s2181_s8 + $0x188] sm:$0xff]  ;;  %v283_v21 = vld [vmem:[%s2181_s8 + $0x30] sm:$0xff] }
  0x12   : > { %v277_v20 = vld [vmem:[%s2181_s8] sm:$0xff]  ;;  %v278_v22 = vld [vmem:[%s2181_s8 + $0x8] sm:$0xff]  ;;  %v284_v23 = vld [vmem:[%s2181_s8 + $0x38] sm:$0xff]  ;;  %v397_v26 = vpack.c.bf16 %v331_v17, %v325_v16  ;;  %v398_v27 = vpack.c.bf16 %v332_v19, %v326_v18 }
  0x13   : > { %v1929_v24 = vld [vmem:[%s2770_s1 + $0xb8] sm:$0xff]  ;;  %v373_v28 = vpack.c.bf16 %v283_v21, %v277_v20  ;;  %v374_v29 = vpack.c.bf16 %v284_v23, %v278_v22  ;;  %v1928_v32 = vld [vmem:[%s2770_s1 + $0xb0] sm:$0xff]  ;;  %v1927_v36 = vld [vmem:[%s2770_s1 + $0xa8] sm:$0xff] }
  0x14   : > { %2003 = vmatpush.bf16.msra.mxu2 %v1911_v4  ;;  %807 = vmatpush.bf16.msra.mxu0 %v1911_v4  ;;  %v1937_v25 = vld [vmem:[%s2770_s1 + $0xf8] sm:$0xff]  ;;  %v1936_v33 = vld [vmem:[%s2770_s1 + $0xf0] sm:$0xff]  ;;  %v1935_v37 = vld [vmem:[%s2770_s1 + $0xe8] sm:$0xff] }
  0x15   : > { %2011 = vmatpush.bf16.msra.mxu3 %v1919_v5  ;;  %856 = vmatpush.bf16.msra.mxu1 %v1919_v5  ;;  %v1945_v30 = vld [vmem:[%s2770_s1 + $0x138] sm:$0xff]  ;;  %v1944_v34 = vld [vmem:[%s2770_s1 + $0x130] sm:$0xff]  ;;  %v1943_v38 = vld [vmem:[%s2770_s1 + $0x128] sm:$0xff] }
  0x16   : > { %v1953_v31 = vld [vmem:[%s2770_s1 + $0x178] sm:$0xff]  ;;  %v1952_v35 = vld [vmem:[%s2770_s1 + $0x170] sm:$0xff]  ;;  %v1951_v39 = vld [vmem:[%s2770_s1 + $0x168] sm:$0xff] }
  0x17   : > { %v337_v40 = vld [vmem:[%s2181_s8 + $0x1e0] sm:$0xff]  ;;  %v343_v43 = vld [vmem:[%s2181_s8 + $0x210] sm:$0xff]  ;;  %v338_v44 = vld [vmem:[%s2181_s8 + $0x1e8] sm:$0xff] }
  0x18   : > { %2004 = vmatpush.bf16.msra.mxu2 %v1910_v6  ;;  %808 = vmatpush.bf16.msra.mxu0 %v1910_v6  ;;  %v1926_v41 = vld [vmem:[%s2770_s1 + $0xa0] sm:$0xff]  ;;  %v344_v45 = vld [vmem:[%s2181_s8 + $0x218] sm:$0xff]  ;;  %v295_v47 = vld [vmem:[%s2181_s8 + $0x90] sm:$0xff]  ;;  %v403_v54 = vpack.c.bf16 %v343_v43, %v337_v40 }
  0x19   : > { %2012 = vmatpush.bf16.msra.mxu3 %v1918_v7  ;;  %857 = vmatpush.bf16.msra.mxu1 %v1918_v7  ;;  %v1934_v42 = vld [vmem:[%s2770_s1 + $0xe0] sm:$0xff]  ;;  %v290_v48 = vld [vmem:[%s2181_s8 + $0x68] sm:$0xff]  ;;  %v296_v49 = vld [vmem:[%s2181_s8 + $0x98] sm:$0xff]  ;;  %v404_v55 = vpack.c.bf16 %v344_v45, %v338_v44 }
  0x1a   : > { %v289_v46 = vld [vmem:[%s2181_s8 + $0x60] sm:$0xff]  ;;  %v1925_v52 = vld [vmem:[%s2770_s1 + $0x98] sm:$0xff]  ;;  %v380_v57 = vpack.c.bf16 %v296_v49, %v290_v48  ;;  %v1924_v60 = vld [vmem:[%s2770_s1 + $0x90] sm:$0xff] }
  0x1b   : > { %v1942_v50 = vld [vmem:[%s2770_s1 + $0x120] sm:$0xff]  ;;  %v1933_v53 = vld [vmem:[%s2770_s1 + $0xd8] sm:$0xff]  ;;  %v379_v56 = vpack.c.bf16 %v295_v47, %v289_v46  ;;  %v1932_v61 = vld [vmem:[%s2770_s1 + $0xd0] sm:$0xff] }
  0x1c   : > { %2005 = vmatpush.bf16.msra.mxu2 %v1909_v8  ;;  %809 = vmatpush.bf16.msra.mxu0 %v1909_v8  ;;  %v1950_v51 = vld [vmem:[%s2770_s1 + $0x160] sm:$0xff]  ;;  %v1941_v58 = vld [vmem:[%s2770_s1 + $0x118] sm:$0xff]  ;;  %v1940_v62 = vld [vmem:[%s2770_s1 + $0x110] sm:$0xff] }
  0x1d   : > { %2013 = vmatpush.bf16.msra.mxu3 %v1917_v9  ;;  %858 = vmatpush.bf16.msra.mxu1 %v1917_v9  ;;  %v1949_v59 = vld [vmem:[%s2770_s1 + $0x158] sm:$0xff]  ;;  %v1948_v63 = vld [vmem:[%s2770_s1 + $0x150] sm:$0xff]  ;;  %v1923_v0 = vld [vmem:[%s2770_s1 + $0x88] sm:$0xff] }
  0x1e   : > { %v1931_v1 = vld [vmem:[%s2770_s1 + $0xc8] sm:$0xff]  ;;  %v1922_v4 = vld [vmem:[%s2770_s1 + $0x80] sm:$0xff]  ;;  %v355_v7 = vld [vmem:[%s2181_s8 + $0x270] sm:$0xff] }
  0x1f   : > { %v1939_v2 = vld [vmem:[%s2770_s1 + $0x108] sm:$0xff]  ;;  %v1930_v5 = vld [vmem:[%s2770_s1 + $0xc0] sm:$0xff]  ;;  %v356_v9 = vld [vmem:[%s2181_s8 + $0x278] sm:$0xff] }
  0x20   : > { %2006 = vmatpush.bf16.msra.mxu2 %v1908_v10  ;;  %810 = vmatpush.bf16.msra.mxu0 %v1908_v10  ;;  %v1947_v3 = vld [vmem:[%s2770_s1 + $0x148] sm:$0xff]  ;;  %v349_v6 = vld [vmem:[%s2181_s8 + $0x240] sm:$0xff]  ;;  %v367_v21 = vld [vmem:[%s2181_s8 + $0x2d0] sm:$0xff] }
  0x21   : > { %2014 = vmatpush.bf16.msra.mxu3 %v1916_v11  ;;  %859 = vmatpush.bf16.msra.mxu1 %v1916_v11  ;;  %v350_v8 = vld [vmem:[%s2181_s8 + $0x248] sm:$0xff]  ;;  %v301_v10 = vld [vmem:[%s2181_s8 + $0xc0] sm:$0xff]  ;;  %v307_v11 = vld [vmem:[%s2181_s8 + $0xf0] sm:$0xff] }
  0x22   : > { %v410_v16 = vpack.c.bf16 %v356_v9, %v350_v8  ;;  %v385_v17 = vpack.c.bf16 %v307_v11, %v301_v10  ;;  %v1946_v19 = vld [vmem:[%s2770_s1 + $0x140] sm:$0xff]  ;;  %v362_v22 = vld [vmem:[%s2181_s8 + $0x2a8] sm:$0xff]  ;;  %v368_v23 = vld [vmem:[%s2181_s8 + $0x2d8] sm:$0xff] }
  0x23   : > { %v361_v20 = vld [vmem:[%s2181_s8 + $0x2a0] sm:$0xff]  ;;  %v291_v44 = vld [vmem:[%s2181_s8 + $0x70] sm:$0xff]  ;;  %v292_v46 = vld [vmem:[%s2181_s8 + $0x78] sm:$0xff] }
  0x24   : > { %2007 = vmatpush.bf16.msra.mxu2 %v1907_v12  ;;  %811 = vmatpush.bf16.msra.mxu0 %v1907_v12  ;;  %v302_v12 = vld [vmem:[%s2181_s8 + $0xc8] sm:$0xff]  ;;  %v297_v45 = vld [vmem:[%s2181_s8 + $0xa0] sm:$0xff]  ;;  %v299_v49 = vld [vmem:[%s2181_s8 + $0xb0] sm:$0xff] }
  0x25   : > { %2015 = vmatpush.bf16.msra.mxu3 %v1915_v13  ;;  %860 = vmatpush.bf16.msra.mxu1 %v1915_v13  ;;  %v308_v13 = vld [vmem:[%s2181_s8 + $0xf8] sm:$0xff]  ;;  %v298_v47 = vld [vmem:[%s2181_s8 + $0xa8] sm:$0xff]  ;;  %v293_v48 = vld [vmem:[%s2181_s8 + $0x80] sm:$0xff] }
  0x26   : > { %v386_v18 = vpack.c.bf16 %v308_v13, %v302_v12  ;;  %v317_v8 = vld [vmem:[%s2181_s8 + $0x140] sm:$0xff]  ;;  %v323_v9 = vld [vmem:[%s2181_s8 + $0x170] sm:$0xff]  ;;  %v318_v10 = vld [vmem:[%s2181_s8 + $0x148] sm:$0xff] }
  0x27   : > { %v324_v11 = vld [vmem:[%s2181_s8 + $0x178] sm:$0xff] }
  0x28   : > { %2008 = vmatpush.bf16.msra.mxu2 %v1906_v14  ;;  %812 = vmatpush.bf16.msra.mxu0 %v1906_v14  ;;  %v1938_v14 = vld [vmem:[%s2770_s1 + $0x100] sm:$0xff] }
  0x29   : > { %2016 = vmatpush.bf16.msra.mxu3 %v1914_v15  ;;  %861 = vmatpush.bf16.msra.mxu1 %v1914_v15  ;;  %v409_v15 = vpack.c.bf16 %v355_v7, %v349_v6  ;;  %v316_v6 = vld [vmem:[%s2181_s8 + $0x138] sm:$0xff]  ;;  %v322_v7 = vld [vmem:[%s2181_s8 + $0x168] sm:$0xff] }
  0x2a   : > { %v394_v13 = vpack.c.bf16 %v322_v7, %v316_v6 }
  0x2b   : > { %833 = vmatmul.bf16.vlgmr.msra.gmra.mxu2 %v397_v26  ;;  %813 = vmatmul.bf16.vlgmr.msra.gmra.mxu0 %v373_v28  ;;  %v314_v26 = vld [vmem:[%s2181_s8 + $0x128] sm:$0xff]  ;;  %v415_v28 = vpack.c.bf16 %v367_v21, %v361_v20  ;;  %v329_v20 = vld [vmem:[%s2181_s8 + $0x1a0] sm:$0xff]  ;;  %v335_v21 = vld [vmem:[%s2181_s8 + $0x1d0] sm:$0xff] }
  0x2c   : > { %903 = vmatpush.bf16.msrb.mxu2 %v1929_v24  ;;  %882 = vmatmul.bf16.vlgmr.msra.gmra.mxu3 %v398_v27  ;;  %v313_v24 = vld [vmem:[%s2181_s8 + $0x120] sm:$0xff]  ;;  %v320_v27 = vld [vmem:[%s2181_s8 + $0x158] sm:$0xff] }
  0x2d   : > { %952 = vmatpush.bf16.msrb.mxu3 %v1937_v25  ;;  %862 = vmatmul.bf16.vlgmr.msra.gmra.mxu1 %v374_v29  ;;  %v319_v25 = vld [vmem:[%s2181_s8 + $0x150] sm:$0xff]  ;;  %v416_v29 = vpack.c.bf16 %v368_v23, %v362_v22  ;;  %v330_v22 = vld [vmem:[%s2181_s8 + $0x1a8] sm:$0xff]  ;;  %v336_v23 = vld [vmem:[%s2181_s8 + $0x1d8] sm:$0xff] }
  0x2e   : > { %1001 = vmatpush.bf16.msrb.mxu0 %v1945_v30  ;;  %1050 = vmatpush.bf16.msrb.mxu1 %v1953_v31  ;;  %v391_v30 = vpack.c.bf16 %v319_v25, %v313_v24  ;;  %v392_v31 = vpack.c.bf16 %v320_v27, %v314_v26  ;;  %v401_v26 = vpack.c.bf16 %v335_v21, %v329_v20  ;;  %v371_v20 = vld [vmem:[%s2181_s8 + $0x2f0] sm:$0xff]  ;;  %v366_v21 = vld [vmem:[%s2181_s8 + $0x2c8] sm:$0xff] }
  0x2f   : > { %v402_v27 = vpack.c.bf16 %v336_v23, %v330_v22  ;;  %v372_v22 = vld [vmem:[%s2181_s8 + $0x2f8] sm:$0xff] }
  0x30   : > { %904 = vmatpush.bf16.msrb.mxu2 %v1928_v32  ;;  %v279_v32 = vld [vmem:[%s2181_s8 + $0x10] sm:$0xff] }
  0x31   : > { %953 = vmatpush.bf16.msrb.mxu3 %v1936_v33  ;;  %v285_v33 = vld [vmem:[%s2181_s8 + $0x40] sm:$0xff] }
  0x32   : > { %1002 = vmatpush.bf16.msrb.mxu0 %v1944_v34  ;;  %1051 = vmatpush.bf16.msrb.mxu1 %v1952_v35  ;;  %v280_v34 = vld [vmem:[%s2181_s8 + $0x18] sm:$0xff]  ;;  %v286_v35 = vld [vmem:[%s2181_s8 + $0x48] sm:$0xff]  ;;  %v375_v40 = vpack.c.bf16 %v285_v33, %v279_v32 }
  0x34   : > { %905 = vmatpush.bf16.msrb.mxu2 %v1927_v36  ;;  %v281_v36 = vld [vmem:[%s2181_s8 + $0x20] sm:$0xff] }
  0x35   : > { %954 = vmatpush.bf16.msrb.mxu3 %v1935_v37  ;;  %v287_v37 = vld [vmem:[%s2181_s8 + $0x50] sm:$0xff] }
  0x36   : > { %1003 = vmatpush.bf16.msrb.mxu0 %v1943_v38  ;;  %1052 = vmatpush.bf16.msrb.mxu1 %v1951_v39  ;;  %v282_v38 = vld [vmem:[%s2181_s8 + $0x28] sm:$0xff]  ;;  %v288_v39 = vld [vmem:[%s2181_s8 + $0x58] sm:$0xff] }
  0x37   : > { %v378_v43 = vpack.c.bf16 %v288_v39, %v282_v38  ;;  %v346_v38 = vld [vmem:[%s2181_s8 + $0x228] sm:$0xff]  ;;  %v341_v39 = vld [vmem:[%s2181_s8 + $0x200] sm:$0xff] }
  0x38   : > { %906 = vmatpush.bf16.msrb.mxu2 %v1926_v41  ;;  %v376_v41 = vpack.c.bf16 %v286_v35, %v280_v34  ;;  %v339_v35 = vld [vmem:[%s2181_s8 + $0x1f0] sm:$0xff] }
  0x39   : > { %955 = vmatpush.bf16.msrb.mxu3 %v1934_v42  ;;  %v377_v42 = vpack.c.bf16 %v287_v37, %v281_v36  ;;  %v345_v36 = vld [vmem:[%s2181_s8 + $0x220] sm:$0xff]  ;;  %v340_v37 = vld [vmem:[%s2181_s8 + $0x1f8] sm:$0xff] }
  0x3a   : > { %1004 = vmatpush.bf16.msrb.mxu0 %v1942_v50  ;;  %1053 = vmatpush.bf16.msrb.mxu1 %v1950_v51  ;;  %v294_v50 = vld [vmem:[%s2181_s8 + $0x88] sm:$0xff]  ;;  %v300_v51 = vld [vmem:[%s2181_s8 + $0xb8] sm:$0xff] }
  0x3b   : > { %838 = vmatmul.bf16.gmra.mxu2 %v403_v54  ;;  %818 = vmatmul.bf16.gmra.mxu0 %v379_v56  ;;  %v383_v54 = vpack.c.bf16 %v299_v49, %v293_v48  ;;  %v303_v56 = vld [vmem:[%s2181_s8 + $0xd0] sm:$0xff] }
  0x3c   : > { %907 = vmatpush.bf16.msrb.mxu2 %v1925_v52  ;;  %887 = vmatmul.bf16.gmra.mxu3 %v404_v55  ;;  %v381_v52 = vpack.c.bf16 %v297_v45, %v291_v44  ;;  %v384_v55 = vpack.c.bf16 %v300_v51, %v294_v50 }
  0x3d   : > { %956 = vmatpush.bf16.msrb.mxu3 %v1933_v53  ;;  %867 = vmatmul.bf16.gmra.mxu1 %v380_v57  ;;  %v382_v53 = vpack.c.bf16 %v298_v47, %v292_v46  ;;  %v309_v57 = vld [vmem:[%s2181_s8 + $0x100] sm:$0xff]  ;;  %v405_v46 = vpack.c.bf16 %v345_v36, %v339_v35  ;;  %v406_v47 = vpack.c.bf16 %v346_v38, %v340_v37 }
  0x3e   : > { %1005 = vmatpush.bf16.msrb.mxu0 %v1941_v58  ;;  %1054 = vmatpush.bf16.msrb.mxu1 %v1949_v59  ;;  %v304_v58 = vld [vmem:[%s2181_s8 + $0xd8] sm:$0xff]  ;;  %v310_v59 = vld [vmem:[%s2181_s8 + $0x108] sm:$0xff]  ;;  %v420_v35 = vpack.c.bf16 %v372_v22, %v366_v21 }
  0x40   : > { %908 = vmatpush.bf16.msrb.mxu2 %v1924_v60  ;;  %v305_v60 = vld [vmem:[%s2181_s8 + $0xe0] sm:$0xff] }
  0x41   : > { %957 = vmatpush.bf16.msrb.mxu3 %v1932_v61  ;;  %v311_v61 = vld [vmem:[%s2181_s8 + $0x110] sm:$0xff] }
  0x42   : > { %1006 = vmatpush.bf16.msrb.mxu0 %v1940_v62  ;;  %1055 = vmatpush.bf16.msrb.mxu1 %v1948_v63  ;;  %v306_v62 = vld [vmem:[%s2181_s8 + $0xe8] sm:$0xff]  ;;  %v312_v63 = vld [vmem:[%s2181_s8 + $0x118] sm:$0xff] }
  0x44   : > { %909 = vmatpush.bf16.msrb.mxu2 %v1923_v0  ;;  %v387_v0 = vpack.c.bf16 %v309_v57, %v303_v56  ;;  %v351_v57 = vld [vmem:[%s2181_s8 + $0x250] sm:$0xff] }
  0x45   : > { %958 = vmatpush.bf16.msrb.mxu3 %v1931_v1  ;;  %v388_v1 = vpack.c.bf16 %v310_v59, %v304_v58  ;;  %v357_v58 = vld [vmem:[%s2181_s8 + $0x280] sm:$0xff]  ;;  %v352_v59 = vld [vmem:[%s2181_s8 + $0x258] sm:$0xff] }
  0x46   : > { %1007 = vmatpush.bf16.msrb.mxu0 %v1939_v2  ;;  %1056 = vmatpush.bf16.msrb.mxu1 %v1947_v3  ;;  %v389_v2 = vpack.c.bf16 %v311_v61, %v305_v60  ;;  %v390_v3 = vpack.c.bf16 %v312_v63, %v306_v62  ;;  %v358_v60 = vld [vmem:[%s2181_s8 + $0x288] sm:$0xff]  ;;  %v353_v61 = vld [vmem:[%s2181_s8 + $0x260] sm:$0xff]  ;;  %v359_v62 = vld [vmem:[%s2181_s8 + $0x290] sm:$0xff] }
  0x47   : > { %v354_v63 = vld [vmem:[%s2181_s8 + $0x268] sm:$0xff]  ;;  %v413_v6 = vpack.c.bf16 %v359_v62, %v353_v61 }
  0x48   : > { %910 = vmatpush.bf16.msrb.mxu2 %v1922_v4  ;;  %v315_v4 = vld [vmem:[%s2181_s8 + $0x130] sm:$0xff] }
  0x49   : > { %959 = vmatpush.bf16.msrb.mxu3 %v1930_v5  ;;  %v321_v5 = vld [vmem:[%s2181_s8 + $0x160] sm:$0xff] }
  0x4a   : > { %1008 = vmatpush.bf16.msrb.mxu0 %v1938_v14  ;;  %1057 = vmatpush.bf16.msrb.mxu1 %v1946_v19  ;;  %v393_v12 = vpack.c.bf16 %v321_v5, %v315_v4  ;;  %v395_v14 = vpack.c.bf16 %v323_v9, %v317_v8  ;;  %v334_v19 = vld [vmem:[%s2181_s8 + $0x1c8] sm:$0xff]  ;;  %v411_v4 = vpack.c.bf16 %v357_v58, %v351_v57 }
  0x4b   : > { %843 = vmatmul.bf16.gmra.mxu2 %v409_v15  ;;  %823 = vmatmul.bf16.gmra.mxu0 %v385_v17  ;;  %v396_v15 = vpack.c.bf16 %v324_v11, %v318_v10  ;;  %v333_v17 = vld [vmem:[%s2181_s8 + $0x1c0] sm:$0xff]  ;;  %v412_v5 = vpack.c.bf16 %v358_v60, %v352_v59 }
  0x4c   : > { %892 = vmatmul.bf16.gmra.mxu3 %v410_v16  ;;  %v327_v16 = vld [vmem:[%s2181_s8 + $0x190] sm:$0xff] }
  0x4d   : > { %872 = vmatmul.bf16.gmra.mxu1 %v386_v18  ;;  %v328_v18 = vld [vmem:[%s2181_s8 + $0x198] sm:$0xff]  ;;  %v399_v24 = vpack.c.bf16 %v333_v17, %v327_v16  ;;  %v369_v16 = vld [vmem:[%s2181_s8 + $0x2e0] sm:$0xff] }
  0x4e   : > { %v400_v25 = vpack.c.bf16 %v334_v19, %v328_v18  ;;  %v364_v17 = vld [vmem:[%s2181_s8 + $0x2b8] sm:$0xff]  ;;  %v370_v18 = vld [vmem:[%s2181_s8 + $0x2e8] sm:$0xff]  ;;  %v365_v19 = vld [vmem:[%s2181_s8 + $0x2c0] sm:$0xff] }
  0x5b   : > { %848 = vmatmul.bf16.gmra.mxu2 %v415_v28  ;;  %828 = vmatmul.bf16.gmra.mxu0 %v391_v30 }
  0x5c   : > { %897 = vmatmul.bf16.gmra.mxu3 %v416_v29 }
  0x5d   : > { %877 = vmatmul.bf16.gmra.mxu1 %v392_v31 }
  0x6b   : > { %911 = vmatmul.bf16.vlgmr.msrb.gmra.mxu2 %v375_v40  ;;  %1009 = vmatmul.bf16.vlgmr.msrb.gmra.mxu0 %v377_v42  ;;  %v347_v40 = vld [vmem:[%s2181_s8 + $0x230] sm:$0xff]  ;;  %v348_v42 = vld [vmem:[%s2181_s8 + $0x238] sm:$0xff] }
  0x6c   : > { %960 = vmatmul.bf16.vlgmr.msrb.gmra.mxu3 %v376_v41  ;;  %v342_v41 = vld [vmem:[%s2181_s8 + $0x208] sm:$0xff]  ;;  %v407_v48 = vpack.c.bf16 %v347_v40, %v341_v39 }
  0x6d   : > { %1058 = vmatmul.bf16.vlgmr.msrb.gmra.mxu1 %v378_v43  ;;  %v408_v49 = vpack.c.bf16 %v348_v42, %v342_v41  ;;  %v2088_v41 = vmov 0.0  }
  0x7b   : > { %916 = vmatmul.bf16.gmra.mxu2 %v381_v52  ;;  %1014 = vmatmul.bf16.gmra.mxu0 %v383_v54 }
  0x7c   : > { %965 = vmatmul.bf16.gmra.mxu3 %v382_v53 }
  0x7d   : > { %1063 = vmatmul.bf16.gmra.mxu1 %v384_v55 }
  0x8b   : > { %921 = vmatmul.bf16.gmra.mxu2 %v387_v0  ;;  %1019 = vmatmul.bf16.gmra.mxu0 %v389_v2  ;;  %v360_v0 = vld [vmem:[%s2181_s8 + $0x298] sm:$0xff] }
  0x8c   : > { %970 = vmatmul.bf16.gmra.mxu3 %v388_v1  ;;  %v414_v7 = vpack.c.bf16 %v360_v0, %v354_v63  ;;  %v2028_v0 = vld [vmem:[%s2337_s17] ss:$0 sm:$0xff] }
  0x8d   : > { %1068 = vmatmul.bf16.gmra.mxu1 %v390_v3 }
  0x9b   : > { %926 = vmatmul.bf16.gmra.mxu2 %v393_v12  ;;  %1024 = vmatmul.bf16.gmra.mxu0 %v395_v14 }
  0x9c   : > { %975 = vmatmul.bf16.gmra.mxu3 %v394_v13 }
  0x9d   : > { %1073 = vmatmul.bf16.gmra.mxu1 %v396_v15  ;;  %v363_v15 = vld [vmem:[%s2181_s8 + $0x2b0] sm:$0xff] }
  0xa8   : > { %v2363_v28 = vpop.f32.mrf.mxu0 }
  0xaa   : > { %v2365_v29 = vpop.f32.mrf.mxu1 }
  0xab   : > { %931 = vmatmul.bf16.gmra.mxu2 %v399_v24  ;;  %1029 = vmatmul.bf16.gmra.mxu0 %v401_v26  ;;  %v417_v26 = vpack.c.bf16 %v369_v16, %v363_v15  ;;  %v864_v57 = vadd.f32 %v2365_v29, %v2363_v28 }
  0xac   : > { %980 = vmatmul.bf16.gmra.mxu3 %v400_v25 }
  0xad   : > { %1078 = vmatmul.bf16.gmra.mxu1 %v402_v27  ;;  %v418_v27 = vpack.c.bf16 %v370_v18, %v364_v17 }
  0xae   : > { %v834_v30 = vpop.f32.mrf.mxu2 }
  0xaf   : > { %v883_v31 = vpop.f32.mrf.mxu3 }
  0xb0   : > { %v2367_v32 = vadd.f32 %v883_v31, %v834_v30  ;;  %v2369_v33 = vpop.f32.mrf.mxu0  ;;  %v1099_v30 = vlaneseq  ;;  %v419_v31 = vpack.c.bf16 %v371_v20, %v365_v19  ;;  %v2029_v19 = vld [vmem:[%s2337_s17 + $0x1] ss:$0 sm:$0xff] }
  0xb2   : > { %v2371_v34 = vpop.f32.mrf.mxu1  ;;  %v1100_v38 = vshrl.u32 %v1099_v30, 7 }
  0xb3   : > { %v866_v28 = vadd.f32 %v2371_v34, %v2369_v33 }
  0xb4   : > { %vm1584_vm0 = vcmp.lt.s32.totalorder %v1100_v38, 5  ;;  %vm1118_vm1 = vcmp.eq.s32.totalorder %v1100_v38, 0  ;;  %v2030_v38 = vld [vmem:[%s2337_s17 + $0x2] ss:$0 sm:$0xff] }
  0xb5   : > { %v2427_v42 = vsel %vm1584_vm0, 1.0, %v2088_v41 }
  0xb6   : > { %v836_v43 = vpop.f32.mrf.mxu2 }
  0xb7   : > { %v885_v44 = vpop.f32.mrf.mxu3 }
  0xb8   : > { %v2381_v45 = vadd.f32 %v885_v44, %v836_v43  ;;  %v2383_v50 = vpop.f32.mrf.mxu0 }
  0xba   : > { %v2385_v51 = vpop.f32.mrf.mxu1 }
  0xbb   : > { %936 = vmatmul.bf16.gmra.mxu2 %v405_v46  ;;  %1034 = vmatmul.bf16.gmra.mxu0 %v407_v48  ;;  %v869_v33 = vadd.f32 %v2385_v51, %v2383_v50 }
  0xbc   : > { %985 = vmatmul.bf16.gmra.mxu3 %v406_v47 }
  0xbd   : > { %1083 = vmatmul.bf16.gmra.mxu1 %v408_v49 }
  0xbe   : > { %v839_v52 = vpop.f32.mrf.mxu2 }
  0xbf   : > { %v888_v53 = vpop.f32.mrf.mxu3 }
  0xc0   : > { %v2387_v54 = vadd.f32 %v888_v53, %v839_v52  ;;  %v2389_v55 = vpop.f32.mrf.mxu0 }
  0xc2   : > { %v2391_v56 = vpop.f32.mrf.mxu1 }
  0xc3   : > { %v871_v50 = vadd.f32 %v2391_v56, %v2389_v55 }
  0xc6   : > { %v841_v1 = vpop.f32.mrf.mxu2 }
  0xc7   : > { %v890_v2 = vpop.f32.mrf.mxu3 }
  0xc8   : > { %v2401_v3 = vadd.f32 %v890_v2, %v841_v1  ;;  %v2403_v8 = vpop.f32.mrf.mxu0  ;;  %v2440_v1 = vsel %vm1118_vm1, 1.0, %v2088_v41 }
  0xc9   : > { %v1186_v21 = vmul.f32 %v2029_v19, %v2440_v1 }
  0xca   : > { %v2405_v9 = vpop.f32.mrf.mxu1 }
  0xcb   : > { %941 = vmatmul.bf16.gmra.mxu2 %v411_v4  ;;  %1039 = vmatmul.bf16.gmra.mxu0 %v413_v6  ;;  %v2445_v4 = vld [vmem:[%s2771_s2] sm:$0xff]  ;;  %v874_v55 = vadd.f32 %v2405_v9, %v2403_v8 }
  0xcc   : > { %990 = vmatmul.bf16.gmra.mxu3 %v412_v5  ;;  %v1185_v5 = vmul.f32 %v2028_v0, %v2440_v1 }
  0xcd   : > { %1088 = vmatmul.bf16.gmra.mxu1 %v414_v7 }
  0xce   : > { %v844_v10 = vpop.f32.mrf.mxu2 }
  0xcf   : > { %v893_v11 = vpop.f32.mrf.mxu3 }
  0xd0   : > { %v2407_v12 = vadd.f32 %v893_v11, %v844_v10  ;;  %v2409_v13 = vpop.f32.mrf.mxu0 }
  0xd2   : > { %v2411_v14 = vpop.f32.mrf.mxu1 }
  0xd3   : > { %v876_v8 = vadd.f32 %v2411_v14, %v2409_v13 }
  0xd6   : > { %v846_v23 = vpop.f32.mrf.mxu2 }
  0xd7   : > { %v895_v24 = vpop.f32.mrf.mxu3 }
  0xd8   : > { %v2421_v25 = vadd.f32 %v895_v24, %v846_v23  ;;  %v2423_v36 = vpop.f32.mrf.mxu0 }
  0xda   : > { %v2425_v37 = vpop.f32.mrf.mxu1 }
  0xdb   : > { %946 = vmatmul.bf16.gmra.mxu2 %v417_v26  ;;  %1044 = vmatmul.bf16.gmra.mxu0 %v419_v31  ;;  %v879_v13 = vadd.f32 %v2425_v37, %v2423_v36 }
  0xdc   : > { %995 = vmatmul.bf16.gmra.mxu3 %v418_v27 }
  0xdd   : > { %1093 = vmatmul.bf16.gmra.mxu1 %v420_v35 }
  0xde   : > { %v849_v39 = vpop.f32.mrf.mxu2 }
  0xdf   : > { %v898_v40 = vpop.f32.mrf.mxu3 }
  0xe0   : > { %v2429_v43 = vadd.f32 %v898_v40, %v849_v39  ;;  %v2431_v44 = vpop.f32.mrf.mxu0  ;;  %v1187_v40 = vmul.f32 %v2030_v38, %v2440_v1 }
  0xe2   : > { %v2433_v46 = vpop.f32.mrf.mxu1 }
  0xe3   : > { %v881_v36 = vadd.f32 %v2433_v46, %v2431_v44 }
  0xe6   : > { %v851_v47 = vpop.f32.mrf.mxu2 }
  0xe7   : > { %v900_v48 = vpop.f32.mrf.mxu3 }
  0xe8   : > { %v2435_v49 = vadd.f32 %v900_v48, %v851_v47  ;;  %v1010_v52 = vpop.f32.mrf.mxu0 }
  0xea   : > { %v1059_v53 = vpop.f32.mrf.mxu1 }
  0xee   : > { %v912_v58 = vpop.f32.mrf.mxu2 }
  0xef   : > { %v961_v59 = vpop.f32.mrf.mxu3  ;;  %v913_v60 = vadd.f32 %v912_v58, %v864_v57 }
  0xf0   : > { %v1012_v62 = vpop.f32.mrf.mxu0 }
  0xf1   : > { %v962_v61 = vadd.f32 %v961_v59, %v913_v60  ;;  %v2031_v60 = vld [vmem:[%s2337_s17 + $0x3] ss:$0 sm:$0xff] }
  0xf2   : > { %v1061_v63 = vpop.f32.mrf.mxu1 }
  0xf3   : > { %v1011_v2 = vadd.f32 %v1010_v52, %v962_v61 }
  0xf5   : > { %v1060_v29 = vadd.f32 %v1059_v53, %v1011_v2 }
  0xf6   : > { %v914_v6 = vpop.f32.mrf.mxu2 }
  0xf7   : > { %v963_v7 = vpop.f32.mrf.mxu3  ;;  %v915_v10 = vadd.f32 %v914_v6, %v866_v28  ;;  %v1102_v11 = vadd.f32 %v2445_v4, %v1060_v29 }
  0xf8   : > { %v1015_v16 = vpop.f32.mrf.mxu0 }
  0xf9   : > { %v964_v15 = vadd.f32 %v963_v7, %v915_v10  ;;  %v2451_v17 = vadd.f32 %v1185_v5, %v1102_v11  ;;  %v2032_v10 = vld [vmem:[%s2337_s17 + $0x4] ss:$0 sm:$0xff] }
  0xfa   : > { %v1064_v18 = vpop.f32.mrf.mxu1 }
  0xfb   : > { %v1013_v20 = vadd.f32 %v1012_v62, %v964_v15  ;;  %1219 = vadd.xlane.f32.xlu0 %v2451_v17  ;;  %v1188_v62 = vmul.f32 %v2031_v60, %v2440_v1  ;;  %v1189_v15 = vmul.f32 %v2032_v10, %v2440_v1 }
  0xfd   : > { %v1062_v34 = vadd.f32 %v1061_v63, %v1013_v20 }
  0xfe   : > { %v917_v22 = vpop.f32.mrf.mxu2 }
  0xff   : > { %v966_v23 = vpop.f32.mrf.mxu3  ;;  %v918_v24 = vadd.f32 %v917_v22, %v869_v33  ;;  %v1103_v26 = vadd.f32 %v2445_v4, %v1062_v34 }
 0x100   : > { %v1017_v30 = vpop.f32.mrf.mxu0 }
 0x101   : > { %v967_v27 = vadd.f32 %v966_v23, %v918_v24  ;;  %v2459_v31 = vadd.f32 %v1186_v21, %v1103_v26  ;;  %v2033_v23 = vld [vmem:[%s2337_s17 + $0x5] ss:$0 sm:$0xff] }
 0x102   : > { %v1066_v35 = vpop.f32.mrf.mxu1  ;;  %v1190_v26 = vmul.f32 %v2033_v23, %v2440_v1 }
 0x103   : > { %v1016_v39 = vadd.f32 %v1015_v16, %v967_v27  ;;  %1221 = vadd.xlane.f32.xlu0 %v2459_v31 }
 0x105   : > { %v1065_v51 = vadd.f32 %v1064_v18, %v1016_v39 }
 0x106   : > { %v919_v41 = vpop.f32.mrf.mxu2 }
 0x107   : > { %v968_v47 = vpop.f32.mrf.mxu3  ;;  %v920_v48 = vadd.f32 %v919_v41, %v871_v50  ;;  %v1104_v52 = vadd.f32 %v2445_v4, %v1065_v51  ;;  %v2034_v41 = vld [vmem:[%s2337_s17 + $0x6] ss:$0 sm:$0xff] }
 0x108   : > { %v1020_v57 = vpop.f32.mrf.mxu0 }
 0x109   : > { %v969_v53 = vadd.f32 %v968_v47, %v920_v48  ;;  %v2467_v58 = vadd.f32 %v1187_v40, %v1104_v52  ;;  %v1191_v48 = vmul.f32 %v2034_v41, %v2440_v1 }
 0x10a   : > { %v1069_v59 = vpop.f32.mrf.mxu1 }
 0x10b   : > { %v1018_v61 = vadd.f32 %v1017_v30, %v969_v53  ;;  %1223 = vadd.xlane.f32.xlu1 %v2467_v58 }
 0x10d   : > { %v1067_v56 = vadd.f32 %v1066_v35, %v1018_v61 }
 0x10e   : > { %v922_v63 = vpop.f32.mrf.mxu2 }
 0x10f   : > { %v971_v0 = vpop.f32.mrf.mxu3  ;;  %v923_v2 = vadd.f32 %v922_v63, %v874_v55  ;;  %v1105_v28 = vadd.f32 %v2445_v4, %v1067_v56 }
 0x110   : > { %v1022_v5 = vpop.f32.mrf.mxu0 }
 0x111   : > { %v972_v29 = vadd.f32 %v971_v0, %v923_v2  ;;  %v2475_v6 = vadd.f32 %v1188_v62, %v1105_v28  ;;  %v2035_v62 = vld [vmem:[%s2337_s17 + $0x7] ss:$0 sm:$0xff] }
 0x112   : > { %v1071_v7 = vpop.f32.mrf.mxu1  ;;  %v1192_v44 = vmul.f32 %v2035_v62, %v2440_v1 }
 0x113   : > { %v1021_v11 = vadd.f32 %v1020_v57, %v972_v29  ;;  %1225 = vadd.xlane.f32.xlu1 %v2475_v6 }
 0x115   : > { %v1070_v9 = vadd.f32 %v1069_v59, %v1021_v11 }
 0x116   : > { %v924_v16 = vpop.f32.mrf.mxu2 }
 0x117   : > { %v973_v18 = vpop.f32.mrf.mxu3  ;;  %v925_v19 = vadd.f32 %v924_v16, %v876_v8  ;;  %v1106_v20 = vadd.f32 %v2445_v4, %v1070_v9  ;;  %v2036_v8 = vld [vmem:[%s2337_s17 + $0x8] ss:$0 sm:$0xff] }
 0x118   : > { %v1025_v34 = vpop.f32.mrf.mxu0  ;;  %v1193_v16 = vmul.f32 %v2036_v8, %v2440_v1 }
 0x119   : > { %v974_v33 = vadd.f32 %v973_v18, %v925_v19  ;;  %v2483_v21 = vadd.f32 %v1189_v15, %v1106_v20 }
 0x11a   : > { %v1074_v22 = vpop.f32.mrf.mxu1 }
 0x11b   : > { %v1023_v24 = vadd.f32 %v1022_v5, %v974_v33  ;;  %1227 = vadd.xlane.f32.xlu2 %v2483_v21 }
 0x11d   : > { %v1072_v14 = vadd.f32 %v1071_v7, %v1023_v24  ;;  %v2037_v24 = vld [vmem:[%s2337_s17 + $0x9] ss:$0 sm:$0xff] }
 0x11e   : > { %v927_v27 = vpop.f32.mrf.mxu2 }
 0x11f   : > { %v976_v30 = vpop.f32.mrf.mxu3  ;;  %v928_v35 = vadd.f32 %v927_v27, %v879_v13  ;;  %v1107_v38 = vadd.f32 %v2445_v4, %v1072_v14 }
 0x120   : > { %v1027_v50 = vpop.f32.mrf.mxu0 }
 0x121   : > { %v977_v39 = vadd.f32 %v976_v30, %v928_v35  ;;  %v2491_v51 = vadd.f32 %v1190_v26, %v1107_v38  ;;  %v1194_v26 = vmul.f32 %v2037_v24, %v2440_v1 }
 0x122   : > { %v1076_v40 = vpop.f32.mrf.mxu1 }
 0x123   : > { %v1026_v47 = vadd.f32 %v1025_v34, %v977_v39  ;;  %1229 = vadd.xlane.f32.xlu2 %v2491_v51 }
 0x125   : > { %v1075_v37 = vadd.f32 %v1074_v22, %v1026_v47 }
 0x126   : > { %v929_v52 = vpop.f32.mrf.mxu2 }
 0x127   : > { %v978_v53 = vpop.f32.mrf.mxu3  ;;  %v930_v57 = vadd.f32 %v929_v52, %v881_v36  ;;  %v1108_v59 = vadd.f32 %v2445_v4, %v1075_v37 }
 0x128   : > { %v1030_v61 = vpop.f32.mrf.mxu0 }
 0x129   : > { %v979_v60 = vadd.f32 %v978_v53, %v930_v57  ;;  %v2499_v55 = vadd.f32 %v1191_v48, %v1108_v59 }
 0x12a   : > { %v1079_v56 = vpop.f32.mrf.mxu1 }
 0x12b   : > { %v1028_v63 = vadd.f32 %v1027_v50, %v979_v60  ;;  %1231 = vadd.xlane.f32.xlu0 %v2499_v55  ;;  %v2039_v60 = vld [vmem:[%s2337_s17 + $0xb] ss:$0 sm:$0xff] }
 0x12d   : > { %v1077_v0 = vadd.f32 %v1076_v40, %v1028_v63  ;;  %v2038_v40 = vld [vmem:[%s2337_s17 + $0xa] ss:$0 sm:$0xff] }
 0x12e   : > { %v932_v46 = vpop.f32.mrf.mxu2  ;;  %v1195_v37 = vmul.f32 %v2038_v40, %v2440_v1 }
 0x12f   : > { %v981_v2 = vpop.f32.mrf.mxu3  ;;  %v933_v28 = vadd.f32 %v932_v46, %v2367_v32  ;;  %v1109_v29 = vadd.f32 %v2445_v4, %v1077_v0  ;;  %v1196_v0 = vmul.f32 %v2039_v60, %v2440_v1 }
 0x130   : > { %v1032_v7 = vpop.f32.mrf.mxu0 }
 0x131   : > { %v982_v5 = vadd.f32 %v981_v2, %v933_v28  ;;  %v2506_v10 = vadd.f32 %v1192_v44, %v1109_v29 }
 0x132   : > { %v1081_v11 = vpop.f32.mrf.mxu1 }
 0x133   : > { %v1031_v9 = vadd.f32 %v1030_v61, %v982_v5  ;;  %1233 = vadd.xlane.f32.xlu1 %v2506_v10  ;;  %v2040_v5 = vld [vmem:[%s2337_s17 + $0xc] ss:$0 sm:$0xff] }
 0x135   : > { %v1080_v15 = vadd.f32 %v1079_v56, %v1031_v9 }
 0x136   : > { %v934_v18 = vpop.f32.mrf.mxu2 }
 0x137   : > { %v983_v19 = vpop.f32.mrf.mxu3  ;;  %v935_v20 = vadd.f32 %v934_v18, %v2381_v45  ;;  %v1110_v32 = vadd.f32 %v2445_v4, %v1080_v15  ;;  %v1197_v15 = vmul.f32 %v2040_v5, %v2440_v1 }
 0x138   : > { %v1035_v34 = vpop.f32.mrf.mxu0 }
 0x139   : > { %v984_v33 = vadd.f32 %v983_v19, %v935_v20  ;;  %v2513_v22 = vadd.f32 %v1193_v16, %v1110_v32 }
 0x13a   : > { %v1084_v23 = vpop.f32.mrf.mxu1 }
 0x13b   : > { %v1033_v13 = vadd.f32 %v1032_v7, %v984_v33  ;;  %1235 = vadd.xlane.f32.xlu2 %v2513_v22 }
 0x13d   : > { %v1082_v14 = vadd.f32 %v1081_v11, %v1033_v13  ;;  %v2089_v11 = vmov 128.0  }
 0x13e   : > { %v937_v27 = vpop.f32.mrf.mxu2  ;;  %2046 = vrcp.f32 %v2089_v11 }
 0x13f   : > { %v986_v30 = vpop.f32.mrf.mxu3  ;;  %v938_v35 = vadd.f32 %v937_v27, %v2387_v54  ;;  %v1111_v45 = vadd.f32 %v2445_v4, %v1082_v14 }
 0x140   : > { %v1037_v39 = vpop.f32.mrf.mxu0 }
 0x141   : > { %v987_v38 = vadd.f32 %v986_v30, %v938_v35  ;;  %v2520_v50 = vadd.f32 %v1194_v26, %v1111_v45 }
 0x142   : > { %v1086_v47 = vpop.f32.mrf.mxu1 }
 0x143   : > { %v1036_v41 = vadd.f32 %v1035_v34, %v987_v38  ;;  %1237 = vadd.xlane.f32.xlu0 %v2520_v50 }
 0x144   : > { %v2047_v32 = vpop.eup %2046 }
 0x145   : > { %v1085_v36 = vadd.f32 %v1084_v23, %v1036_v41  ;;  %v2041_v23 = vld [vmem:[%s2337_s17 + $0xd] ss:$0 sm:$0xff]  ;;  %v1252_v13 = vmul.f32 128.0, %v2047_v32  ;;  %v2042_v41 = vld [vmem:[%s2337_s17 + $0xe] ss:$0 sm:$0xff]  ;;  %vm1256_vm2 = vweird.f32 %v2047_v32 }
 0x146   : > { %v939_v48 = vpop.f32.mrf.mxu2  ;;  %v1198_v26 = vmul.f32 %v2041_v23, %v2440_v1 }
 0x147   : > { %v988_v52 = vpop.f32.mrf.mxu3  ;;  %v940_v53 = vadd.f32 %v939_v48, %v2401_v3  ;;  %v1112_v54 = vadd.f32 %v2445_v4, %v1085_v36  ;;  %v1253_v38 = vsub.f32 1.0, %v1252_v13 }
 0x148   : > { %v1040_v56 = vpop.f32.mrf.mxu0 }
 0x149   : > { %v989_v57 = vadd.f32 %v988_v52, %v940_v53  ;;  %v2527_v59 = vadd.f32 %v1195_v37, %v1112_v54  ;;  %v1254_v37 = vmul.f32 %v2047_v32, %v1253_v38  ;;  %v1199_v52 = vmul.f32 %v2042_v41, %v2440_v1 }
 0x14a   : > { %v1089_v63 = vpop.f32.mrf.mxu1 }
 0x14b   : > { %v1038_v61 = vadd.f32 %v1037_v39, %v989_v57  ;;  %1239 = vadd.xlane.f32.xlu1 %v2527_v59  ;;  %v1255_v60 = vadd.f32 %v2047_v32, %v1254_v37 }
 0x14d   : > { %v1087_v62 = vadd.f32 %v1086_v47, %v1038_v61 }
 0x14e   : > { %v942_v44 = vpop.f32.mrf.mxu2 }
 0x14f   : > { %v991_v46 = vpop.f32.mrf.mxu3  ;;  %v943_v2 = vadd.f32 %v942_v44, %v2407_v12  ;;  %v1113_v3 = vadd.f32 %v2445_v4, %v1087_v62  ;;  %v2043_v62 = vld [vmem:[%s2337_s17 + $0xf] ss:$0 sm:$0xff] }
 0x150   : > { %v1042_v9 = vpop.f32.mrf.mxu0 }
 0x151   : > { %v992_v28 = vadd.f32 %v991_v46, %v943_v2  ;;  %v2534_v29 = vadd.f32 %v1196_v0, %v1113_v3  ;;  %v2559_v46 = vsel %vm1256_vm2, %v2047_v32, %v1255_v60  ;;  %v1200_v3 = vmul.f32 %v2043_v62, %v2440_v1 }
 0x152   : > { %v1091_v20 = vpop.f32.mrf.mxu1 }
 0x153   : > { %v1041_v7 = vadd.f32 %v1040_v56, %v992_v28  ;;  %1241 = vadd.xlane.f32.xlu2 %v2534_v29 }
 0x155   : > { %v1090_v8 = vadd.f32 %v1089_v63, %v1041_v7 }
 0x156   : > { %v944_v16 = vpop.f32.mrf.mxu2 }
 0x157   : > { %v993_v18 = vpop.f32.mrf.mxu3  ;;  %v945_v12 = vadd.f32 %v944_v16, %v2421_v25  ;;  %v1114_v19 = vadd.f32 %v2445_v4, %v1090_v8 }
 0x158   : > { %v1045_v45 = vpop.f32.mrf.mxu0 }
 0x159   : > { %v994_v33 = vadd.f32 %v993_v18, %v945_v12  ;;  %v2541_v34 = vadd.f32 %v1197_v15, %v1114_v19 }
 0x15a   : > { %v1094_v47 = vpop.f32.mrf.mxu1 }
 0x15b   : > { %v1043_v24 = vadd.f32 %v1042_v9, %v994_v33  ;;  %1243 = vadd.xlane.f32.xlu0 %v2541_v34 }
 0x15d   : > { %v1092_v14 = vadd.f32 %v1091_v20, %v1043_v24 }
 0x15e   : > { %v947_v27 = vpop.f32.mrf.mxu2 }
 0x15f   : > { %v996_v30 = vpop.f32.mrf.mxu3  ;;  %v948_v25 = vadd.f32 %v947_v27, %v2429_v43  ;;  %v1115_v35 = vadd.f32 %v2445_v4, %v1092_v14 }
 0x160   : > { %v1047_v63 = vpop.f32.mrf.mxu0 }
 0x161   : > { %v997_v39 = vadd.f32 %v996_v30, %v948_v25  ;;  %v2548_v40 = vadd.f32 %v1198_v26, %v1115_v35 }
 0x162   : > { %v1096_v44 = vpop.f32.mrf.mxu1 }
 0x163   : > { %v1046_v36 = vadd.f32 %v1045_v45, %v997_v39  ;;  %1245 = vadd.xlane.f32.xlu1 %v2548_v40 }
 0x165   : > { %v1095_v48 = vadd.f32 %v1094_v47, %v1046_v36 }
 0x166   : > { %v949_v53 = vpop.f32.mrf.mxu2 }
 0x167   : > { %v950_v43 = vadd.f32 %v949_v53, %v2435_v49  ;;  %v1116_v54 = vadd.f32 %v2445_v4, %v1095_v48  ;;  %v998_v57 = vpop.f32.mrf.mxu3 }
 0x169   : > { %v999_v61 = vadd.f32 %v998_v57, %v950_v43  ;;  %v2555_v56 = vadd.f32 %v1199_v52, %v1116_v54 }
 0x16b   : > { %v1048_v0 = vadd.f32 %v1047_v63, %v999_v61  ;;  %1247 = vadd.xlane.f32.xlu2 %v2555_v56 }
 0x16d   : > { %v1097_v2 = vadd.f32 %v1096_v44, %v1048_v0 }
 0x16e   : > { %v1220_v49 = vpop.xlane.xlu0 %1219 }
 0x16f   : > { %v1258_v28 = vmul.f32 %v2559_v46, %v1220_v49  ;;  %v1117_v5 = vadd.f32 %v2445_v4, %v1097_v2 }
 0x171   : > { %v2565_v7 = vsub.f32 %v2451_v17, %v1258_v28  ;;  %v2567_v11 = vadd.f32 %v1200_v3, %v1117_v5 }
 0x173   : > { %1249 = vadd.xlane.f32.xlu0 %v2567_v11  ;;  %v1290_v8 = vmul.f32 %v2565_v7, %v2565_v7 }
 0x175   : > { %1306 = vadd.xlane.f32.xlu1 %v1290_v8 }
 0x176   : > { %v1222_v9 = vpop.xlane.xlu0 %1221 }
 0x177   : > { %v1259_v15 = vmul.f32 %v2559_v46, %v1222_v9 }
 0x179   : > { %v2574_v1 = vsub.f32 %v2459_v31, %v1259_v15 }
 0x17b   : > { %v1291_v4 = vmul.f32 %v2574_v1, %v2574_v1 }
 0x17d   : > { %1308 = vadd.xlane.f32.xlu2 %v1291_v4 }
 0x17e   : > { %v1224_v17 = vpop.xlane.xlu1 %1223 }
 0x17f   : > { %v1260_v16 = vmul.f32 %v2559_v46, %v1224_v17 }
 0x181   : > { %v2580_v18 = vsub.f32 %v2467_v58, %v1260_v16 }
 0x183   : > { %v1292_v12 = vmul.f32 %v2580_v18, %v2580_v18 }
 0x185   : > { %1310 = vadd.xlane.f32.xlu0 %v1292_v12 }
 0x186   : > { %v1226_v19 = vpop.xlane.xlu1 %1225 }
 0x187   : > { %v1261_v20 = vmul.f32 %v2559_v46, %v1226_v19 }
 0x189   : > { %v2586_v31 = vsub.f32 %v2475_v6, %v1261_v20 }
 0x18b   : > { %v1293_v32 = vmul.f32 %v2586_v31, %v2586_v31 }
 0x18d   : > { %1312 = vadd.xlane.f32.xlu1 %v1293_v32 }
 0x18e   : > { %v1228_v33 = vpop.xlane.xlu2 %1227 }
 0x18f   : > { %v1262_v23 = vmul.f32 %v2559_v46, %v1228_v33 }
 0x191   : > { %v2592_v58 = vsub.f32 %v2483_v21, %v1262_v23 }
 0x193   : > { %v1294_v24 = vmul.f32 %v2592_v58, %v2592_v58 }
 0x195   : > { %1314 = vadd.xlane.f32.xlu2 %v1294_v24 }
 0x196   : > { %v1230_v13 = vpop.xlane.xlu2 %1229 }
 0x197   : > { %v1263_v14 = vmul.f32 %v2559_v46, %v1230_v13 }
 0x199   : > { %v2598_v6 = vsub.f32 %v2491_v51, %v1263_v14 }
 0x19b   : > { %v1295_v26 = vmul.f32 %v2598_v6, %v2598_v6 }
 0x19d   : > { %1316 = vadd.xlane.f32.xlu0 %v1295_v26 }
 0x19e   : > { %v1232_v27 = vpop.xlane.xlu0 %1231 }
 0x19f   : > { %v1264_v30 = vmul.f32 %v2559_v46, %v1232_v27 }
 0x1a1   : > { %v2604_v21 = vsub.f32 %v2499_v55, %v1264_v30 }
 0x1a3   : > { %v1296_v25 = vmul.f32 %v2604_v21, %v2604_v21 }
 0x1a5   : > { %1318 = vadd.xlane.f32.xlu1 %v1296_v25 }
 0x1a6   : > { %v1234_v35 = vpop.xlane.xlu1 %1233 }
 0x1a7   : > { %v1265_v45 = vmul.f32 %v2559_v46, %v1234_v35 }
 0x1a9   : > { %v2610_v51 = vsub.f32 %v2506_v10, %v1265_v45 }
 0x1ab   : > { %v1297_v38 = vmul.f32 %v2610_v51, %v2610_v51 }
 0x1ad   : > { %1320 = vadd.xlane.f32.xlu2 %v1297_v38  ;;  %v2668_v38 = vld [vmem:[%s2773_s4] ss:$0 sm:$0xff] }
 0x1ae   : > { %v1236_v39 = vpop.xlane.xlu2 %1235 }
 0x1af   : > { %v1266_v41 = vmul.f32 %v2559_v46, %v1236_v39 }
 0x1b1   : > { %v2616_v55 = vsub.f32 %v2513_v22, %v1266_v41 }
 0x1b3   : > { %v1298_v47 = vmul.f32 %v2616_v55, %v2616_v55 }
 0x1b5   : > { %1322 = vadd.xlane.f32.xlu0 %v1298_v47 }
 0x1b6   : > { %v1238_v36 = vpop.xlane.xlu0 %1237 }
 0x1b7   : > { %v1267_v37 = vmul.f32 %v2559_v46, %v1238_v36 }
 0x1b9   : > { %v2622_v10 = vsub.f32 %v2520_v50, %v1267_v37 }
 0x1bb   : > { %v1299_v48 = vmul.f32 %v2622_v10, %v2622_v10 }
 0x1bd   : > { %1324 = vadd.xlane.f32.xlu1 %v1299_v48 }
 0x1be   : > { %v1240_v52 = vpop.xlane.xlu1 %1239 }
 0x1bf   : > { %v1268_v53 = vmul.f32 %v2559_v46, %v1240_v52 }
 0x1c1   : > { %v2628_v22 = vsub.f32 %v2527_v59, %v1268_v53  ;;  %v2675_v53 = vld [vmem:[%s2774_s5] ss:$0 sm:$0xff] }
 0x1c3   : > { %v1300_v43 = vmul.f32 %v2628_v22, %v2628_v22 }
 0x1c5   : > { %1326 = vadd.xlane.f32.xlu2 %v1300_v43 }
 0x1c6   : > { %v1242_v54 = vpop.xlane.xlu2 %1241 }
 0x1c7   : > { %v1269_v57 = vmul.f32 %v2559_v46, %v1242_v54 }
 0x1c9   : > { %v2634_v50 = vsub.f32 %v2534_v29, %v1269_v57 }
 0x1cb   : > { %v1301_v60 = vmul.f32 %v2634_v50, %v2634_v50 }
 0x1cd   : > { %1328 = vadd.xlane.f32.xlu0 %v1301_v60 }
 0x1ce   : > { %v1244_v61 = vpop.xlane.xlu0 %1243 }
 0x1cf   : > { %v1270_v62 = vmul.f32 %v2559_v46, %v1244_v61 }
 0x1d1   : > { %v2640_v59 = vsub.f32 %v2541_v34, %v1270_v62 }
 0x1d3   : > { %v1302_v63 = vmul.f32 %v2640_v59, %v2640_v59 }
 0x1d5   : > { %1330 = vadd.xlane.f32.xlu1 %v1302_v63 }
 0x1d6   : > { %v1246_v0 = vpop.xlane.xlu1 %1245 }
 0x1d7   : > { %v1271_v44 = vmul.f32 %v2559_v46, %v1246_v0 }
 0x1d9   : > { %v2646_v29 = vsub.f32 %v2548_v40, %v1271_v44 }
 0x1db   : > { %v1303_v2 = vmul.f32 %v2646_v29, %v2646_v29 }
 0x1dd   : > { %1332 = vadd.xlane.f32.xlu2 %v1303_v2 }
 0x1de   : > { %v1248_v3 = vpop.xlane.xlu2 %1247 }
 0x1df   : > { %v1272_v49 = vmul.f32 %v2559_v46, %v1248_v3 }
 0x1e1   : > { %v2652_v34 = vsub.f32 %v2555_v56, %v1272_v49 }
 0x1e3   : > { %v1304_v28 = vmul.f32 %v2652_v34, %v2652_v34 }
 0x1e5   : > { %1334 = vadd.xlane.f32.xlu0 %v1304_v28 }
 0x1e6   : > { %v1250_v5 = vpop.xlane.xlu0 %1249 }
 0x1e7   : > { %v1273_v8 = vmul.f32 %v2559_v46, %v1250_v5 }
 0x1e8   : > { %v1307_v9 = vpop.xlane.xlu1 %1306 }
 0x1e9   : > { %v2658_v40 = vsub.f32 %v2567_v11, %v1273_v8  ;;  %v1338_v15 = vmul.f32 %v1307_v9, %v2559_v46 }
 0x1eb   : > { %v1354_v4 = vadd.f32 1e-05, %v1338_v15  ;;  %v1305_v17 = vmul.f32 %v2658_v40, %v2658_v40 }
 0x1ed   : > { %2048 = vrsqrt.f32 %v1354_v4  ;;  %1336 = vadd.xlane.f32.xlu1 %v1305_v17  ;;  %vm1376_vm4 = vweird.f32 %v1354_v4 }
 0x1f0   : > { %v1309_v56 = vpop.xlane.xlu2 %1308 }
 0x1f1   : > { %v1339_v16 = vmul.f32 %v1309_v56, %v2559_v46 }
 0x1f3   : > { %v2049_v12 = vpop.eup %2048  ;;  %v1355_v19 = vadd.f32 1e-05, %v1339_v16 }
 0x1f4   : > { %v1371_v20 = vmul.f32 %v2049_v12, %v1354_v4  ;;  %vm1377_vm3 = vweird.f32 %v2049_v12 }
 0x1f5   : > { %2050 = vrsqrt.f32 %v1355_v19  ;;  %vm1378_vm5 = vmor %vm1376_vm4, %vm1377_vm3  ;;  %vm1386_vm7 = vweird.f32 %v1355_v19 }
 0x1f6   : > { %v1372_v32 = vmul.f32 %v2049_v12, %v1371_v20 }
 0x1f8   : > { %v1373_v33 = vmul.f32 0.5, %v1372_v32  ;;  %v1311_v23 = vpop.xlane.xlu0 %1310 }
 0x1f9   : > { %v1340_v11 = vmul.f32 %v1311_v23, %v2559_v46 }
 0x1fa   : > { %v1374_v24 = vsub.f32 1.5, %v1373_v33 }
 0x1fb   : > { %v2051_v13 = vpop.eup %2050  ;;  %v1356_v14 = vadd.f32 1e-05, %v1340_v11 }
 0x1fc   : > { %v1375_v26 = vmul.f32 %v2049_v12, %v1374_v24  ;;  %v1381_v27 = vmul.f32 %v2051_v13, %v1355_v19  ;;  %vm1387_vm6 = vweird.f32 %v2051_v13 }
 0x1fd   : > { %2052 = vrsqrt.f32 %v1356_v14  ;;  %vm1388_vm8 = vmor %vm1386_vm7, %vm1387_vm6  ;;  %vm1396_vm10 = vweird.f32 %v1356_v14 }
 0x1fe   : > { %v1379_v30 = vsel %vm1378_vm5, %v2049_v12, %v1375_v26  ;;  %v1382_v25 = vmul.f32 %v2051_v13, %v1381_v27 }
 0x1ff   : > { %v1530_v39 = vmul.f32 %v1379_v30, %v2565_v7 }
 0x200   : > { %v1383_v35 = vmul.f32 0.5, %v1382_v25  ;;  %v1313_v45 = vpop.xlane.xlu1 %1312 }
 0x201   : > { %v1341_v41 = vmul.f32 %v1313_v45, %v2559_v46  ;;  %v1549_v43 = vmul.f32 %v2668_v38, %v1530_v39 }
 0x202   : > { %v1384_v47 = vsub.f32 1.5, %v1383_v35 }
 0x203   : > { %v2053_v36 = vpop.eup %2052  ;;  %v1357_v37 = vadd.f32 1e-05, %v1341_v41  ;;  %v1568_v62 = vadd.f32 %v2675_v53, %v1549_v43 }
 0x204   : > { %v1385_v48 = vmul.f32 %v2051_v13, %v1384_v47  ;;  %v1391_v52 = vmul.f32 %v2053_v36, %v1356_v14  ;;  %vm1397_vm9 = vweird.f32 %v2053_v36 }
 0x205   : > { %2054 = vrsqrt.f32 %v1357_v37  ;;  %vm1398_vm11 = vmor %vm1396_vm10, %vm1397_vm9  ;;  %vm1406_vm13 = vweird.f32 %v1357_v37 }
 0x206   : > { %v1389_v7 = vsel %vm1388_vm8, %v2051_v13, %v1385_v48  ;;  %v1392_v54 = vmul.f32 %v2053_v36, %v1391_v52 }
 0x207   : > { %v1531_v57 = vmul.f32 %v1389_v7, %v2574_v1  ;;  %v1587_v1 = vmul.f32 %v2427_v42, %v1568_v62 }
 0x208   : > { %v1393_v60 = vmul.f32 0.5, %v1392_v54  ;;  %v1315_v61 = vpop.xlane.xlu2 %1314 }
 0x209   : > { %v1550_v63 = vmul.f32 %v2668_v38, %v1531_v57  ;;  %v1342_v0 = vmul.f32 %v1315_v61, %v2559_v46 }
 0x20a   : > { %v1394_v44 = vsub.f32 1.5, %v1393_v60 }
 0x20b   : > { %v2055_v2 = vpop.eup %2054  ;;  %v1569_v3 = vadd.f32 %v2675_v53, %v1550_v63  ;;  %v1358_v49 = vadd.f32 1e-05, %v1342_v0 }
 0x20c   : > { %v1395_v28 = vmul.f32 %v2053_v36, %v1394_v44  ;;  %v1401_v5 = vmul.f32 %v2055_v2, %v1357_v37  ;;  %vm1407_vm12 = vweird.f32 %v2055_v2 }
 0x20d   : > { %v1588_v8 = vmul.f32 %v2427_v42, %v1569_v3  ;;  %2056 = vrsqrt.f32 %v1358_v49  ;;  %vm1408_vm14 = vmor %vm1406_vm13, %vm1407_vm12  ;;  %vm1416_vm0 = vweird.f32 %v1358_v49 }
 0x20e   : > { %v1399_v9 = vsel %vm1398_vm11, %v2053_v36, %v1395_v28  ;;  %v1402_v15 = vmul.f32 %v2055_v2, %v1401_v5 }
 0x20f   : > { %v1957_v4 = vpack.c.bf16 %v1588_v8, %v1587_v1  ;;  %v1532_v16 = vmul.f32 %v1399_v9, %v2580_v18 }
 0x210   : > { %v1403_v17 = vmul.f32 0.5, %v1402_v15  ;;  %v1317_v56 = vpop.xlane.xlu0 %1316 }
 0x211   : > { %1958 = vst [vmem:[%s2689_s27] sm:$0xff] %v1957_v4   ;;  %v1343_v12 = vmul.f32 %v1317_v56, %v2559_v46  ;;  %v1551_v11 = vmul.f32 %v2668_v38, %v1532_v16 }
 0x212   : > { %v1404_v19 = vsub.f32 1.5, %v1403_v17 }
 0x213   : > { %v2057_v20 = vpop.eup %2056  ;;  %v1359_v32 = vadd.f32 1e-05, %v1343_v12  ;;  %v1570_v18 = vadd.f32 %v2675_v53, %v1551_v11 }
 0x214   : > { %v1405_v33 = vmul.f32 %v2055_v2, %v1404_v19  ;;  %v1411_v23 = vmul.f32 %v2057_v20, %v1358_v49  ;;  %vm1417_vm15 = vweird.f32 %v2057_v20 }
 0x215   : > { %2058 = vrsqrt.f32 %v1359_v32  ;;  %vm1418_vm1 = vmor %vm1416_vm0, %vm1417_vm15  ;;  %vm1426_vm3 = vweird.f32 %v1359_v32 }
 0x216   : > { %v1409_v24 = vsel %vm1408_vm14, %v2055_v2, %v1405_v33  ;;  %v1412_v13 = vmul.f32 %v2057_v20, %v1411_v23 }
 0x217   : > { %v1533_v14 = vmul.f32 %v1409_v24, %v2586_v31  ;;  %v1589_v31 = vmul.f32 %v2427_v42, %v1570_v18 }
 0x218   : > { %v1413_v26 = vmul.f32 0.5, %v1412_v13  ;;  %v1319_v27 = vpop.xlane.xlu1 %1318 }
 0x219   : > { %v1552_v30 = vmul.f32 %v2668_v38, %v1533_v14  ;;  %v1344_v25 = vmul.f32 %v1319_v27, %v2559_v46 }
 0x21a   : > { %v1414_v35 = vsub.f32 1.5, %v1413_v26 }
 0x21b   : > { %v2059_v45 = vpop.eup %2058  ;;  %v1571_v39 = vadd.f32 %v2675_v53, %v1552_v30  ;;  %v1360_v41 = vadd.f32 1e-05, %v1344_v25 }
 0x21c   : > { %v1415_v47 = vmul.f32 %v2057_v20, %v1414_v35  ;;  %v1421_v36 = vmul.f32 %v2059_v45, %v1359_v32  ;;  %vm1427_vm2 = vweird.f32 %v2059_v45 }
 0x21d   : > { %v1590_v37 = vmul.f32 %v2427_v42, %v1571_v39  ;;  %2060 = vrsqrt.f32 %v1360_v41  ;;  %vm1428_vm4 = vmor %vm1426_vm3, %vm1427_vm2  ;;  %vm1436_vm6 = vweird.f32 %v1360_v41 }
 0x21e   : > { %v1419_v48 = vsel %vm1418_vm1, %v2057_v20, %v1415_v47  ;;  %v1422_v52 = vmul.f32 %v2059_v45, %v1421_v36 }
 0x21f   : > { %v1962_v43 = vpack.c.bf16 %v1590_v37, %v1589_v31  ;;  %v1534_v57 = vmul.f32 %v1419_v48, %v2592_v58 }
 0x220   : > { %v1423_v7 = vmul.f32 0.5, %v1422_v52  ;;  %v1321_v54 = vpop.xlane.xlu2 %1320 }
 0x221   : > { %1994 = vst [vmem:[%s2689_s27 + $0x8] sm:$0xff] %v1962_v43   ;;  %v1345_v60 = vmul.f32 %v1321_v54, %v2559_v46  ;;  %v1553_v2 = vmul.f32 %v2668_v38, %v1534_v57 }
 0x222   : > { %v1424_v61 = vsub.f32 1.5, %v1423_v7 }
 0x223   : > { %v2061_v62 = vpop.eup %2060  ;;  %v1361_v63 = vadd.f32 1e-05, %v1345_v60  ;;  %v1572_v58 = vadd.f32 %v2675_v53, %v1553_v2 }
 0x224   : > { %v1425_v0 = vmul.f32 %v2059_v45, %v1424_v61  ;;  %v1431_v44 = vmul.f32 %v2061_v62, %v1360_v41  ;;  %vm1437_vm5 = vweird.f32 %v2061_v62 }
 0x225   : > { %2062 = vrsqrt.f32 %v1361_v63  ;;  %vm1438_vm7 = vmor %vm1436_vm6, %vm1437_vm5  ;;  %vm1446_vm9 = vweird.f32 %v1361_v63 }
 0x226   : > { %v1429_v3 = vsel %vm1428_vm4, %v2059_v45, %v1425_v0  ;;  %v1432_v49 = vmul.f32 %v2061_v62, %v1431_v44 }
 0x227   : > { %v1535_v28 = vmul.f32 %v1429_v3, %v2598_v6  ;;  %v1591_v6 = vmul.f32 %v2427_v42, %v1572_v58 }
 0x228   : > { %v1433_v5 = vmul.f32 0.5, %v1432_v49  ;;  %v1323_v1 = vpop.xlane.xlu0 %1322 }
 0x229   : > { %v1554_v8 = vmul.f32 %v2668_v38, %v1535_v28  ;;  %v1346_v9 = vmul.f32 %v1323_v1, %v2559_v46 }
 0x22a   : > { %v1434_v15 = vsub.f32 1.5, %v1433_v5 }
 0x22b   : > { %v2063_v4 = vpop.eup %2062  ;;  %v1573_v17 = vadd.f32 %v2675_v53, %v1554_v8  ;;  %v1362_v56 = vadd.f32 1e-05, %v1346_v9 }
 0x22c   : > { %v1435_v16 = vmul.f32 %v2061_v62, %v1434_v15  ;;  %v1441_v12 = vmul.f32 %v2063_v4, %v1361_v63  ;;  %vm1447_vm8 = vweird.f32 %v2063_v4 }
 0x22d   : > { %v1592_v19 = vmul.f32 %v2427_v42, %v1573_v17  ;;  %2064 = vrsqrt.f32 %v1362_v56  ;;  %vm1448_vm10 = vmor %vm1446_vm9, %vm1447_vm8  ;;  %vm1456_vm12 = vweird.f32 %v1362_v56 }
 0x22e   : > { %v1439_v20 = vsel %vm1438_vm7, %v2061_v62, %v1435_v16  ;;  %v1442_v32 = vmul.f32 %v2063_v4, %v1441_v12 }
 0x22f   : > { %v1967_v33 = vpack.c.bf16 %v1592_v19, %v1591_v6  ;;  %v1536_v24 = vmul.f32 %v1439_v20, %v2604_v21 }
 0x230   : > { %v1443_v23 = vmul.f32 0.5, %v1442_v32  ;;  %v1325_v11 = vpop.xlane.xlu1 %1324 }
 0x231   : > { %1995 = vst [vmem:[%s2689_s27 + $0x10] sm:$0xff] %v1967_v33   ;;  %v1347_v13 = vmul.f32 %v1325_v11, %v2559_v46  ;;  %v1555_v25 = vmul.f32 %v2668_v38, %v1536_v24 }
 0x232   : > { %v1444_v14 = vsub.f32 1.5, %v1443_v23 }
 0x233   : > { %v2065_v26 = vpop.eup %2064  ;;  %v1363_v27 = vadd.f32 1e-05, %v1347_v13  ;;  %v1574_v21 = vadd.f32 %v2675_v53, %v1555_v25 }
 0x234   : > { %v1445_v18 = vmul.f32 %v2063_v4, %v1444_v14  ;;  %v1451_v30 = vmul.f32 %v2065_v26, %v1362_v56  ;;  %vm1457_vm11 = vweird.f32 %v2065_v26 }
 0x235   : > { %2066 = vrsqrt.f32 %v1363_v27  ;;  %vm1458_vm13 = vmor %vm1456_vm12, %vm1457_vm11  ;;  %vm1466_vm15 = vweird.f32 %v1363_v27 }
 0x236   : > { %v1449_v35 = vsel %vm1448_vm10, %v2063_v4, %v1445_v18  ;;  %v1452_v45 = vmul.f32 %v2065_v26, %v1451_v30 }
 0x237   : > { %v1537_v39 = vmul.f32 %v1449_v35, %v2610_v51  ;;  %v1593_v51 = vmul.f32 %v2427_v42, %v1574_v21 }
 0x238   : > { %v1453_v41 = vmul.f32 0.5, %v1452_v45  ;;  %v1327_v47 = vpop.xlane.xlu2 %1326 }
 0x239   : > { %v1556_v36 = vmul.f32 %v2668_v38, %v1537_v39  ;;  %v1348_v31 = vmul.f32 %v1327_v47, %v2559_v46 }
 0x23a   : > { %v1454_v37 = vsub.f32 1.5, %v1453_v41 }
 0x23b   : > { %v2067_v48 = vpop.eup %2066  ;;  %v1575_v52 = vadd.f32 %v2675_v53, %v1556_v36  ;;  %v1364_v43 = vadd.f32 1e-05, %v1348_v31 }
 0x23c   : > { %v1455_v7 = vmul.f32 %v2065_v26, %v1454_v37  ;;  %v1461_v54 = vmul.f32 %v2067_v48, %v1363_v27  ;;  %vm1467_vm14 = vweird.f32 %v2067_v48 }
 0x23d   : > { %v1594_v57 = vmul.f32 %v2427_v42, %v1575_v52  ;;  %2068 = vrsqrt.f32 %v1364_v43  ;;  %vm1468_vm0 = vmor %vm1466_vm15, %vm1467_vm14  ;;  %vm1476_vm2 = vweird.f32 %v1364_v43 }
 0x23e   : > { %v1459_v60 = vsel %vm1458_vm13, %v2065_v26, %v1455_v7  ;;  %v1462_v61 = vmul.f32 %v2067_v48, %v1461_v54 }
 0x23f   : > { %v1972_v62 = vpack.c.bf16 %v1594_v57, %v1593_v51  ;;  %v1538_v44 = vmul.f32 %v1459_v60, %v2616_v55 }
 0x240   : > { %v1463_v63 = vmul.f32 0.5, %v1462_v61  ;;  %v1329_v0 = vpop.xlane.xlu0 %1328 }
 0x241   : > { %1996 = vst [vmem:[%s2689_s27 + $0x18] sm:$0xff] %v1972_v62   ;;  %v1349_v2 = vmul.f32 %v1329_v0, %v2559_v46  ;;  %v1557_v58 = vmul.f32 %v2668_v38, %v1538_v44 }
 0x242   : > { %v1464_v3 = vsub.f32 1.5, %v1463_v63 }
 0x243   : > { %v2069_v49 = vpop.eup %2068  ;;  %v1365_v28 = vadd.f32 1e-05, %v1349_v2  ;;  %v1576_v55 = vadd.f32 %v2675_v53, %v1557_v58 }
 0x244   : > { %v1465_v5 = vmul.f32 %v2067_v48, %v1464_v3  ;;  %v1471_v1 = vmul.f32 %v2069_v49, %v1364_v43  ;;  %vm1477_vm1 = vweird.f32 %v2069_v49 }
 0x245   : > { %2070 = vrsqrt.f32 %v1365_v28  ;;  %vm1478_vm3 = vmor %vm1476_vm2, %vm1477_vm1  ;;  %vm1486_vm5 = vweird.f32 %v1365_v28 }
 0x246   : > { %v1469_v8 = vsel %vm1468_vm0, %v2067_v48, %v1465_v5  ;;  %v1472_v9 = vmul.f32 %v2069_v49, %v1471_v1 }
 0x247   : > { %v1539_v15 = vmul.f32 %v1469_v8, %v2622_v10  ;;  %v1595_v10 = vmul.f32 %v2427_v42, %v1576_v55 }
 0x248   : > { %v1473_v4 = vmul.f32 0.5, %v1472_v9  ;;  %v1331_v17 = vpop.xlane.xlu1 %1330 }
 0x249   : > { %v1558_v56 = vmul.f32 %v2668_v38, %v1539_v15  ;;  %v1350_v16 = vmul.f32 %v1331_v17, %v2559_v46 }
 0x24a   : > { %v1474_v12 = vsub.f32 1.5, %v1473_v4 }
 0x24b   : > { %v2071_v6 = vpop.eup %2070  ;;  %v1577_v19 = vadd.f32 %v2675_v53, %v1558_v56  ;;  %v1366_v20 = vadd.f32 1e-05, %v1350_v16 }
 0x24c   : > { %v1475_v32 = vmul.f32 %v2069_v49, %v1474_v12  ;;  %v1481_v33 = vmul.f32 %v2071_v6, %v1365_v28  ;;  %vm1487_vm4 = vweird.f32 %v2071_v6 }
 0x24d   : > { %v1596_v23 = vmul.f32 %v2427_v42, %v1577_v19  ;;  %2072 = vrsqrt.f32 %v1366_v20  ;;  %vm1488_vm6 = vmor %vm1486_vm5, %vm1487_vm4  ;;  %vm1496_vm8 = vweird.f32 %v1366_v20 }
 0x24e   : > { %v1479_v11 = vsel %vm1478_vm3, %v2069_v49, %v1475_v32  ;;  %v1482_v24 = vmul.f32 %v2071_v6, %v1481_v33 }
 0x24f   : > { %v1977_v13 = vpack.c.bf16 %v1596_v23, %v1595_v10  ;;  %v1540_v27 = vmul.f32 %v1479_v11, %v2628_v22 }
 0x250   : > { %v1483_v14 = vmul.f32 0.5, %v1482_v24  ;;  %v1333_v26 = vpop.xlane.xlu2 %1332 }
 0x251   : > { %1997 = vst [vmem:[%s2689_s27 + $0x20] sm:$0xff] %v1977_v13   ;;  %v1351_v18 = vmul.f32 %v1333_v26, %v2559_v46  ;;  %v1559_v41 = vmul.f32 %v2668_v38, %v1540_v27 }
 0x252   : > { %v1484_v30 = vsub.f32 1.5, %v1483_v14 }
 0x253   : > { %v2073_v25 = vpop.eup %2072  ;;  %v1367_v35 = vadd.f32 1e-05, %v1351_v18  ;;  %v1578_v22 = vadd.f32 %v2675_v53, %v1559_v41 }
 0x254   : > { %v1485_v45 = vmul.f32 %v2071_v6, %v1484_v30  ;;  %v1491_v39 = vmul.f32 %v2073_v25, %v1366_v20  ;;  %vm1497_vm7 = vweird.f32 %v2073_v25 }
 0x255   : > { %2074 = vrsqrt.f32 %v1367_v35  ;;  %vm1498_vm9 = vmor %vm1496_vm8, %vm1497_vm7  ;;  %vm1506_vm11 = vweird.f32 %v1367_v35 }
 0x256   : > { %v1489_v47 = vsel %vm1488_vm6, %v2071_v6, %v1485_v45  ;;  %v1492_v21 = vmul.f32 %v2073_v25, %v1491_v39 }
 0x257   : > { %v1541_v36 = vmul.f32 %v1489_v47, %v2634_v50  ;;  %v1597_v50 = vmul.f32 %v2427_v42, %v1578_v22 }
 0x258   : > { %v1493_v31 = vmul.f32 0.5, %v1492_v21  ;;  %v1335_v37 = vpop.xlane.xlu0 %1334 }
 0x259   : > { %v1560_v48 = vmul.f32 %v2668_v38, %v1541_v36  ;;  %v1352_v52 = vmul.f32 %v1335_v37, %v2559_v46 }
 0x25a   : > { %v1494_v43 = vsub.f32 1.5, %v1493_v31 }
 0x25b   : > { %v2075_v7 = vpop.eup %2074  ;;  %v1579_v54 = vadd.f32 %v2675_v53, %v1560_v48  ;;  %v1368_v51 = vadd.f32 1e-05, %v1352_v52 }
 0x25c   : > { %v1495_v57 = vmul.f32 %v2073_v25, %v1494_v43  ;;  %v1501_v60 = vmul.f32 %v2075_v7, %v1367_v35  ;;  %vm1507_vm10 = vweird.f32 %v2075_v7 }
 0x25d   : > { %v1598_v61 = vmul.f32 %v2427_v42, %v1579_v54  ;;  %2076 = vrsqrt.f32 %v1368_v51  ;;  %vm1508_vm12 = vmor %vm1506_vm11, %vm1507_vm10  ;;  %vm1516_vm14 = vweird.f32 %v1368_v51 }
 0x25e   : > { %v1499_v62 = vsel %vm1498_vm9, %v2073_v25, %v1495_v57  ;;  %v1502_v63 = vmul.f32 %v2075_v7, %v1501_v60 }
 0x25f   : > { %v1982_v0 = vpack.c.bf16 %v1598_v61, %v1597_v50  ;;  %v1542_v3 = vmul.f32 %v1499_v62, %v2640_v59 }
 0x260   : > { %v1503_v44 = vmul.f32 0.5, %v1502_v63  ;;  %v1337_v2 = vpop.xlane.xlu1 %1336 }
 0x261   : > { %1998 = vst [vmem:[%s2689_s27 + $0x28] sm:$0xff] %v1982_v0   ;;  %v1353_v49 = vmul.f32 %v1337_v2, %v2559_v46  ;;  %v1561_v9 = vmul.f32 %v2668_v38, %v1542_v3 }
 0x262   : > { %v1504_v28 = vsub.f32 1.5, %v1503_v44 }
 0x263   : > { %v2077_v5 = vpop.eup %2076  ;;  %v1369_v1 = vadd.f32 1e-05, %v1353_v49  ;;  %v1580_v59 = vadd.f32 %v2675_v53, %v1561_v9 }
 0x264   : > { %v1505_v58 = vmul.f32 %v2075_v7, %v1504_v28  ;;  %v1511_v8 = vmul.f32 %v2077_v5, %v1368_v51  ;;  %vm1517_vm13 = vweird.f32 %v2077_v5 }
 0x265   : > { %2078 = vrsqrt.f32 %v1369_v1  ;;  %v1599_v20 = vmul.f32 %v2427_v42, %v1580_v59  ;;  %vm1518_vm15 = vmor %vm1516_vm14, %vm1517_vm13  ;;  %vm1526_vm1 = vweird.f32 %v1369_v1 }
 0x266   : > { %v1509_v15 = vsel %vm1508_vm12, %v2075_v7, %v1505_v58  ;;  %v1512_v4 = vmul.f32 %v2077_v5, %v1511_v8 }
 0x267   : > { %v1543_v17 = vmul.f32 %v1509_v15, %v2646_v29 }
 0x268   : > { %v1513_v55 = vmul.f32 0.5, %v1512_v4 }
 0x269   : > { %v1562_v46 = vmul.f32 %v2668_v38, %v1543_v17 }
 0x26a   : > { %v1514_v56 = vsub.f32 1.5, %v1513_v55 }
 0x26b   : > { %v2079_v16 = vpop.eup %2078  ;;  %v1581_v12 = vadd.f32 %v2675_v53, %v1562_v46 }
 0x26c   : > { %v1515_v6 = vmul.f32 %v2077_v5, %v1514_v56  ;;  %v1521_v19 = vmul.f32 %v2079_v16, %v1369_v1  ;;  %vm1527_vm0 = vweird.f32 %v2079_v16 }
 0x26d   : > { %v1600_v32 = vmul.f32 %v2427_v42, %v1581_v12  ;;  %vm1528_vm2 = vmor %vm1526_vm1, %vm1527_vm0 }
 0x26e   : > { %v1519_v29 = vsel %vm1518_vm15, %v2077_v5, %v1515_v6  ;;  %v1522_v33 = vmul.f32 %v2079_v16, %v1521_v19 }
 0x26f   : > { %v1987_v10 = vpack.c.bf16 %v1600_v32, %v1599_v20  ;;  %v1544_v11 = vmul.f32 %v1519_v29, %v2652_v34 }
 0x270   : > { %v1523_v23 = vmul.f32 0.5, %v1522_v33 }
 0x271   : > { %1999 = vst [vmem:[%s2689_s27 + $0x30] sm:$0xff] %v1987_v10   ;;  %v1563_v14 = vmul.f32 %v2668_v38, %v1544_v11 }
 0x272   : > { %v1524_v24 = vsub.f32 1.5, %v1523_v23 }
 0x273   : > { %v1582_v18 = vadd.f32 %v2675_v53, %v1563_v14 }
 0x274   : > { %v1525_v13 = vmul.f32 %v2079_v16, %v1524_v24 }
 0x275   : > { %v1601_v35 = vmul.f32 %v2427_v42, %v1582_v18 }
 0x276   : > { %v1529_v26 = vsel %vm1528_vm2, %v2079_v16, %v1525_v13 }
 0x277   : > { %v1545_v27 = vmul.f32 %v1529_v26, %v2658_v40 }
 0x279   : > { %v1564_v30 = vmul.f32 %v2668_v38, %v1545_v27 }
 0x27b   : > { %v1583_v25 = vadd.f32 %v2675_v53, %v1564_v30 }
 0x27d   : > { %v1602_v34 = vmul.f32 %v2427_v42, %v1583_v25 }
 0x27f   : > { %v1992_v45 = vpack.c.bf16 %v1602_v34, %v1601_v35 }
 0x281   : > { %2000 = vst [vmem:[%s2689_s27 + $0x38] sm:$0xff] %v1992_v45  }
 0x282 PF: > { %s16_s21 = sadd.s32 1, %s2086_s21  }
 0x283   : > { %p13_p4 = scmp.ge.s32.totalorder %s16_s21, 4  }
 0x285   :  { %15 = sbr.rel (!%p13_p4) target bundleno = 1 (0x1), region = 77 }

// kernel: forward.5
= control target key start
LH: loop header
LB: loop body
LE: loop exit
PB: predicated region body
PF: predicated region fallthrough
CT: control target
= control target key end

     0   :  { %s7383_s25 = smov 0   ;;  %s11964_s0 = inlined_call_operand.vmem [shape: bf16[32,8,128], index: 0, kind: input, shape index: {}]   ;;  %s11965_s1 = inlined_call_operand.vmem [shape: f32[1,128], index: 1, kind: input, shape index: {}]   ;;  %s11966_s2 = inlined_call_operand.vmem [shape: f32[1,128], index: 2, kind: input, shape index: {}]   ;;  %s11967_s3 = inlined_call_operand.vmem [shape: bf16[128,384], index: 3, kind: input, shape index: {}]   ;;  %s11968_s4 = inlined_call_operand.vmem [shape: f32[1,384], index: 4, kind: input, shape index: {}]   ;;  %s11969_s5 = inlined_call_operand.vmem [shape: bf16[128,128], index: 5, kind: input, shape index: {}]   ;;  %s11970_s6 = inlined_call_operand.vmem [shape: f32[1,128], index: 6, kind: input, shape index: {}]   ;;  %s11971_s7 = inlined_call_operand.vmem [shape: f32[1,128], index: 7, kind: input, shape index: {}]   ;;  %s11972_s8 = inlined_call_operand.vmem [shape: f32[1,128], index: 8, kind: input, shape index: {}]   ;;  %s11973_s9 = inlined_call_operand.vmem [shape: bf16[128,512], index: 9, kind: input, shape index: {}]   ;;  %s11974_s10 = inlined_call_operand.vmem [shape: f32[1,512], index: 10, kind: input, shape index: {}]   ;;  %s11975_s11 = inlined_call_operand.vmem [shape: bf16[512,128], index: 11, kind: input, shape index: {}]   ;;  %s11976_s12 = inlined_call_operand.vmem [shape: f32[1,128], index: 12, kind: input, shape index: {}]   ;;  %s11977_s13 = inlined_call_operand.vmem [shape: bf16[32,8,128], index: 13, kind: output, shape index: {}]  }
   0x1 LB: > { %s6071_s26 = sadd.s32 4294967295, %s7308_s25   ;;  %p6075_p0 = scmp.ge.s32.totalorder %s7308_s25, 1  ;;  %s7308_s25 = sphi %s7383_s25, %s23_s25  }
   0x2   : > { %p388_p1 = scmp.lt.s32.totalorder %s7308_s25, 3 }
   0x4   : > { %p389_p2 = pnand %p6075_p0, %p388_p1 }
   0x6   : > { %392 = sbr.rel (%p389_p2) target bundleno = 2857 (0xb29), region = 72 }
   0xb   : > { %s6076_s27 = sshll.u32 %s6071_s26, 4  ;;  %v7310_v11 = vmov 128.0   ;;  %v6166_v56 = vld [vmem:[%s11967_s3 + $0xa8] sm:$0xf]  ;;  %v6617_v57 = vld [vmem:[%s11967_s3 + $0xb0] sm:$0xf0] }
   0xc   : > { %p433_p3 = scmp.lt.s32.totalorder %s6076_s27, 31  ;;  %6850 = vrcp.f32 %v7310_v11  ;;  %v6616_v58 = vld [vmem:[%s11967_s3 + $0xac] sm:$0xf]  ;;  %v6167_v59 = vor.u32 %v6617_v57, %v6166_v56  ;;  %v6168_v60 = vld [vmem:[%s11967_s3 + $0xb4] sm:$0xf0]  ;;  %s7311_s26 = smov 64  }
   0xd   : > { %v6174_v61 = vld [vmem:[%s11967_s3 + $0xb0] sm:$0xf]  ;;  %v6618_v62 = vld [vmem:[%s11967_s3 + $0xb8] sm:$0xf0]  ;;  %v6171_v63 = vor.u32 %v6616_v58, %v6168_v60 }
   0xe   : > { %s12472_s27 = smov (!%p433_p3, %s6076_s27), 31  ;;  %1020 = vmatpush.bf16.msra.mxu0 %v6167_v59  ;;  %v6606_v56 = vld [vmem:[%s11967_s3 + $0x58] sm:$0xf0]  ;;  %v6106_v59 = vld [vmem:[%s11967_s3 + $0x30] sm:$0xf] }
   0xf   : > { %s6077_s28 = sshll.u32 %s12472_s27, 2  ;;  %1069 = vmatpush.bf16.msra.mxu1 %v6171_v63  ;;  %v6602_v60 = vld [vmem:[%s11967_s3 + $0x38] sm:$0xf0]  ;;  %v6108_v63 = vld [vmem:[%s11967_s3 + $0x3c] sm:$0xf0] }
  0x10   : > { %s7399_s14 = scalar_lea.vmem %s11964_s0, %s6077_s28  ;;  %s11888_s30 = scalar_lea.vmem %s11977_s13, %s6077_s28 }
  0x11   : > { %v6763_v0 = vld [vmem:[%s7399_s14 + $0x8] sm:$0xff]   ;;  %v6692_v1 = vld [vmem:[%s7399_s14] sm:$0xff]   ;;  %v6764_v6 = vld [vmem:[%s7399_s14 + $0x10] sm:$0xff]  }
  0x12   : > { %v7403_v2 = vunpack.c.l.bf16 %v6763_v0  ;;  %v7405_v3 = vunpack.c.l.bf16 %v6692_v1  ;;  %v7409_v4 = vunpack.c.h.bf16 %v6763_v0  ;;  %v7411_v5 = vunpack.c.h.bf16 %v6692_v1  ;;  %v6765_v9 = vld [vmem:[%s7399_s14 + $0x18] sm:$0xff]   ;;  %v6851_v12 = vpop.eup %6850  ;;  %v6767_v42 = vld [vmem:[%s7399_s14 + $0x28] sm:$0xff]   ;;  %v6766_v43 = vld [vmem:[%s7399_s14 + $0x20] sm:$0xff]  }
  0x13   : > { %v7416_v7 = vunpack.c.h.bf16 %v6764_v6  ;;  %v7418_v8 = vunpack.c.l.bf16 %v6764_v6  ;;  %v7423_v10 = vunpack.c.l.bf16 %v6765_v9  ;;  %v512_v13 = vmul.f32 128.0, %v6851_v12  ;;  %v6768_v52 = vld [vmem:[%s7399_s14 + $0x30] sm:$0xff]   ;;  %v6614_v6 = vld [vmem:[%s11967_s3 + $0x98] sm:$0xf0] }
  0x14   : > { %12057 = vst [vmem:[#allocation2_spill] sm:$0xff] %v7403_v2  ;;  %483 = vadd.xlane.f32.xlu1 %v7403_v2  ;;  %479 = vadd.xlane.f32.xlu0 %v7405_v3  ;;  %vm516_vm0 = vweird.f32 %v6851_v12  ;;  %v7466_v45 = vunpack.c.l.bf16 %v6767_v42  ;;  %v7468_v46 = vunpack.c.h.bf16 %v6765_v9  ;;  %v7470_v47 = vunpack.c.h.bf16 %v6766_v43  ;;  %v6154_v1 = vld [vmem:[%s11967_s3 + $0x90] sm:$0xf]  ;;  %v6613_v9 = vld [vmem:[%s11967_s3 + $0x94] sm:$0xf] }
  0x15   : > { %12058 = vst [vmem:[#allocation3_spill] sm:$0xff] %v7405_v3  ;;  %v513_v14 = vsub.f32 1.0, %v512_v13  ;;  %v7479_v50 = vunpack.c.l.bf16 %v6766_v43  ;;  %v7485_v53 = vunpack.c.h.bf16 %v6767_v42  ;;  %v7487_v54 = vunpack.c.h.bf16 %v6768_v52  ;;  %v6162_v13 = vld [vmem:[%s11967_s3 + $0x98] sm:$0xf]  ;;  %v6118_v42 = vld [vmem:[%s11967_s3 + $0x48] sm:$0xf] }
  0x16   : > { %12059 = vst [vmem:[#allocation4_spill] sm:$0xff] %v7409_v4  ;;  %v7491_v55 = vunpack.c.l.bf16 %v6768_v52  ;;  %v6175_v0 = vor.u32 %v6618_v62, %v6174_v61  ;;  %v6155_v11 = vor.u32 %v6614_v6, %v6154_v1  ;;  %v6605_v43 = vld [vmem:[%s11967_s3 + $0x50] sm:$0xf0]  ;;  %v6126_v52 = vld [vmem:[%s11967_s3 + $0x50] sm:$0xf]  ;;  %v6107_v62 = vor.u32 %v6602_v60, %v6106_v59 }
  0x17   : > { %12060 = vst [vmem:[#allocation5_spill] sm:$0xff] %v7411_v5  ;;  %v514_v15 = vmul.f32 %v6851_v12, %v513_v14  ;;  %v6615_v14 = vld [vmem:[%s11967_s3 + $0xa0] sm:$0xf0]  ;;  %v6127_v58 = vor.u32 %v6606_v56, %v6126_v52  ;;  %v6601_v61 = vld [vmem:[%s11967_s3 + $0x34] sm:$0xf] }
  0x18   : > { %12061 = vst [vmem:[#allocation6_spill] sm:$0xff] %v7416_v7  ;;  %1118 = vmatpush.bf16.msra.mxu2 %v6175_v0  ;;  %1021 = vmatpush.bf16.msra.mxu0 %v6155_v11  ;;  %v6114_v0 = vld [vmem:[%s11967_s3 + $0x38] sm:$0xf]  ;;  %v6603_v1 = vld [vmem:[%s11967_s3 + $0x40] sm:$0xf0]  ;;  %v6111_v6 = vor.u32 %v6601_v61, %v6108_v63 }
  0x19   : > { %12062 = vst [vmem:[#allocation7_spill] sm:$0xff] %v7418_v8  ;;  %v515_v16 = vadd.f32 %v6851_v12, %v514_v15  ;;  %v6094_v11 = vld [vmem:[%s11967_s3 + $0x18] sm:$0xf] }
  0x1a   : > { %12063 = vst [vmem:[#allocation8_spill] sm:$0xff] %v7423_v10 }
  0x1b   : > { %v7426_v17 = vsel %vm516_vm0, %v6851_v12, %v515_v16  ;;  %12065 = vst [vmem:[#allocation10_spill] sm:$0xff] %v7466_v45  ;;  %v6156_v12 = vld [vmem:[%s11967_s3 + $0x9c] sm:$0xf0]  ;;  %v6163_v16 = vor.u32 %v6615_v14, %v6162_v13  ;;  %v6598_v13 = vld [vmem:[%s11967_s3 + $0x1c] sm:$0xf] }
  0x1c   : > { %485 = vadd.xlane.f32.xlu1 %v7409_v4  ;;  %481 = vadd.xlane.f32.xlu0 %v7411_v5  ;;  %12064 = vst [vmem:[#allocation9_spill] sm:$0xff] %v7426_v17  ;;  %v6159_v15 = vor.u32 %v6613_v9, %v6156_v12  ;;  %v6115_v9 = vor.u32 %v6603_v1, %v6114_v0  ;;  %v6599_v12 = vld [vmem:[%s11967_s3 + $0x20] sm:$0xf0] }
  0x1d   : > { %12066 = vst [vmem:[#allocation11_spill] sm:$0xff] %v7468_v46  ;;  %1119 = vmatpush.bf16.msra.mxu2 %v6163_v16  ;;  %v6096_v16 = vld [vmem:[%s11967_s3 + $0x24] sm:$0xf0] }
  0x1e   : > { %12067 = vst [vmem:[#allocation12_spill] sm:$0xff] %v7470_v47  ;;  %1070 = vmatpush.bf16.msra.mxu1 %v6159_v15  ;;  %v6095_v15 = vor.u32 %v6599_v12, %v6094_v11 }
  0x1f   : > { %12068 = vst [vmem:[#allocation13_spill] sm:$0xff] %v7479_v50 }
  0x20   : > { %12069 = vst [vmem:[#allocation14_spill] sm:$0xff] %v7485_v53 }
  0x21   : > { %12070 = vst [vmem:[#allocation15_spill] sm:$0xff] %v7487_v54 }
  0x22   : > { %12071 = vst [vmem:[#allocation16_spill] sm:$0xff] %v7491_v55 }
  0x24   : > { %489 = vadd.xlane.f32.xlu1 %v7416_v7  ;;  %487 = vadd.xlane.f32.xlu0 %v7418_v8 }
  0x2c   : > { %491 = vadd.xlane.f32.xlu1 %v7423_v10 }
  0x87   : > { %v484_v18 = vpop.xlane.xlu1 %483  ;;  %v480_v19 = vpop.xlane.xlu0 %479 }
  0x88   : > { %v518_v20 = vmul.f32 %v7426_v17, %v480_v19  ;;  %v520_v29 = vmul.f32 %v7426_v17, %v484_v18  ;;  %v6142_v18 = vld [vmem:[%s11967_s3 + $0x78] sm:$0xf]  ;;  %v6611_v19 = vld [vmem:[%s11967_s3 + $0x80] sm:$0xf0] }
  0x8a   : > { %v7430_v21 = vsub.f32 %v7405_v3, %v518_v20  ;;  %v7450_v36 = vsub.f32 %v7403_v2, %v520_v29  ;;  %v6610_v20 = vld [vmem:[%s11967_s3 + $0x7c] sm:$0xf] }
  0x8c   : > { %v550_v22 = vmul.f32 %v7430_v21, %v7430_v21  ;;  %v552_v40 = vmul.f32 %v7450_v36, %v7450_v36 }
  0x8e   : > { %566 = vadd.xlane.f32.xlu2 %v550_v22  ;;  %v6143_v22 = vor.u32 %v6611_v19, %v6142_v18  ;;  %v6102_v18 = vld [vmem:[%s11967_s3 + $0x20] sm:$0xf]  ;;  %v6600_v19 = vld [vmem:[%s11967_s3 + $0x28] sm:$0xf0] }
  0x8f   : > { %v486_v23 = vpop.xlane.xlu1 %485  ;;  %v482_v24 = vpop.xlane.xlu0 %481 }
  0x90   : > { %v521_v25 = vmul.f32 %v7426_v17, %v486_v23  ;;  %v519_v26 = vmul.f32 %v7426_v17, %v482_v24  ;;  %v6144_v23 = vld [vmem:[%s11967_s3 + $0x84] sm:$0xf0]  ;;  %v6150_v24 = vld [vmem:[%s11967_s3 + $0x80] sm:$0xf]  ;;  %1022 = vmatpush.bf16.msra.mxu0 %v6143_v22  ;;  %v6099_v22 = vor.u32 %v6598_v13, %v6096_v16 }
  0x92   : > { %v7437_v27 = vsub.f32 %v7409_v4, %v521_v25  ;;  %v7440_v28 = vsub.f32 %v7411_v5, %v519_v26  ;;  %v6612_v25 = vld [vmem:[%s11967_s3 + $0x88] sm:$0xf0]  ;;  %v6147_v26 = vor.u32 %v6610_v20, %v6144_v23  ;;  %v6103_v23 = vor.u32 %v6600_v19, %v6102_v18 }
  0x93   : > { %v6151_v29 = vor.u32 %v6612_v25, %v6150_v24  ;;  %v6082_v25 = vld [vmem:[%s11967_s3] sm:$0xf] }
  0x94   : > { %v553_v30 = vmul.f32 %v7437_v27, %v7437_v27  ;;  %v551_v31 = vmul.f32 %v7440_v28, %v7440_v28  ;;  %1071 = vmatpush.bf16.msra.mxu1 %v6147_v26  ;;  %v6596_v26 = vld [vmem:[%s11967_s3 + $0x8] sm:$0xf0] }
  0x95   : > { %1120 = vmatpush.bf16.msra.mxu2 %v6151_v29  ;;  %v6083_v29 = vor.u32 %v6596_v26, %v6082_v25 }
  0x96   : > { %572 = vadd.xlane.f32.xlu0 %v553_v30  ;;  %568 = vadd.xlane.f32.xlu2 %v551_v31  ;;  %v6130_v30 = vld [vmem:[%s11967_s3 + $0x60] sm:$0xf]  ;;  %v6608_v31 = vld [vmem:[%s11967_s3 + $0x68] sm:$0xf0] }
  0x97   : > { %v490_v32 = vpop.xlane.xlu1 %489  ;;  %v488_v33 = vpop.xlane.xlu0 %487 }
  0x98   : > { %v523_v34 = vmul.f32 %v7426_v17, %v490_v32  ;;  %v522_v35 = vmul.f32 %v7426_v17, %v488_v33  ;;  %v6607_v32 = vld [vmem:[%s11967_s3 + $0x64] sm:$0xf]  ;;  %v6131_v33 = vor.u32 %v6608_v31, %v6130_v30  ;;  %v6084_v31 = vld [vmem:[%s11967_s3 + $0xc] sm:$0xf0] }
  0x99   : > { %v6595_v30 = vld [vmem:[%s11967_s3 + $0x4] sm:$0xf] }
  0x9a   : > { %v7453_v37 = vsub.f32 %v7416_v7, %v523_v34  ;;  %v7456_v38 = vsub.f32 %v7418_v8, %v522_v35  ;;  %v6132_v34 = vld [vmem:[%s11967_s3 + $0x6c] sm:$0xf0]  ;;  %v6138_v35 = vld [vmem:[%s11967_s3 + $0x68] sm:$0xf]  ;;  %1023 = vmatpush.bf16.msra.mxu0 %v6131_v33  ;;  %v6087_v33 = vor.u32 %v6595_v30, %v6084_v31 }
  0x9c   : > { %v555_v39 = vmul.f32 %v7453_v37, %v7453_v37  ;;  %v554_v41 = vmul.f32 %v7456_v38, %v7456_v38 }
  0x9e   : > { %576 = vadd.xlane.f32.xlu1 %v555_v39  ;;  %570 = vadd.xlane.f32.xlu2 %v552_v40  ;;  %v6609_v39 = vld [vmem:[%s11967_s3 + $0x70] sm:$0xf0]  ;;  %v6135_v40 = vor.u32 %v6607_v32, %v6132_v34  ;;  %v6090_v32 = vld [vmem:[%s11967_s3 + $0x8] sm:$0xf] }
  0x9f   : > { %574 = vadd.xlane.f32.xlu0 %v554_v41  ;;  %v492_v44 = vpop.xlane.xlu1 %491  ;;  %v6139_v41 = vor.u32 %v6609_v39, %v6138_v35  ;;  %v6597_v34 = vld [vmem:[%s11967_s3 + $0x10] sm:$0xf0] }
  0xa0   : > { %v524_v48 = vmul.f32 %v7426_v17, %v492_v44  ;;  %1072 = vmatpush.bf16.msra.mxu1 %v6135_v40  ;;  %v6604_v44 = vld [vmem:[%s11967_s3 + $0x4c] sm:$0xf]  ;;  %v6091_v35 = vor.u32 %v6597_v34, %v6090_v32 }
  0xa1   : > { %1121 = vmatpush.bf16.msra.mxu2 %v6139_v41 }
  0xa2   : > { %v7477_v49 = vsub.f32 %v7423_v10, %v524_v48  ;;  %v6119_v48 = vor.u32 %v6605_v43, %v6118_v42 }
  0xa4   : > { %v556_v51 = vmul.f32 %v7477_v49, %v7477_v49  ;;  %1024 = vmatpush.bf16.msra.mxu0 %v6119_v48 }
  0xa5   : > { %1122 = vmatpush.bf16.msra.mxu2 %v6127_v58 }
  0xa6   : > { %499 = vadd.xlane.f32.xlu1 %v7466_v45  ;;  %493 = vadd.xlane.f32.xlu2 %v7468_v46 }
  0xa7   : > { %497 = vadd.xlane.f32.xlu0 %v7470_v47 }
  0xa8   : > { %1025 = vmatpush.bf16.msra.mxu0 %v6107_v62 }
  0xa9   : > { %1123 = vmatpush.bf16.msra.mxu2 %v6115_v9 }
  0xac   : > { %1026 = vmatpush.bf16.msra.mxu0 %v6095_v15 }
  0xad   : > { %1124 = vmatpush.bf16.msra.mxu2 %v6103_v23 }
  0xae   : > { %495 = vadd.xlane.f32.xlu2 %v7479_v50 }
  0xaf   : > { %578 = vadd.xlane.f32.xlu0 %v556_v51  ;;  %v6120_v51 = vld [vmem:[%s11967_s3 + $0x54] sm:$0xf0] }
  0xb0   : > { %v6123_v57 = vor.u32 %v6604_v44, %v6120_v51  ;;  %1027 = vmatpush.bf16.msra.mxu0 %v6083_v29 }
  0xb1   : > { %1125 = vmatpush.bf16.msra.mxu2 %v6091_v35 }
  0xb2   : > { %1073 = vmatpush.bf16.msra.mxu1 %v6123_v57 }
  0xb6   : > { %501 = vadd.xlane.f32.xlu2 %v7485_v53  ;;  %1074 = vmatpush.bf16.msra.mxu1 %v6111_v6 }
  0xb7   : > { %505 = vadd.xlane.f32.xlu0 %v7487_v54 }
  0xba   : > { %1075 = vmatpush.bf16.msra.mxu1 %v6099_v22 }
  0xbe   : > { %503 = vadd.xlane.f32.xlu2 %v7491_v55  ;;  %1076 = vmatpush.bf16.msra.mxu1 %v6087_v33 }
 0x101   : > { %v567_v14 = vpop.xlane.xlu2 %566 }
 0x102   : > { %v598_v20 = vmul.f32 %v567_v14, %v7426_v17 }
 0x104   : > { %v614_v24 = vadd.f32 1e-05, %v598_v20 }
 0x106   : > { %6852 = vrsqrt.f32 %v614_v24  ;;  %vm636_vm2 = vweird.f32 %v614_v24 }
 0x109   : > { %v569_v39 = vpop.xlane.xlu2 %568  ;;  %v573_v40 = vpop.xlane.xlu0 %572 }
 0x10a   : > { %v599_v41 = vmul.f32 %v569_v39, %v7426_v17  ;;  %v601_v42 = vmul.f32 %v573_v40, %v7426_v17 }
 0x10c   : > { %v6853_v43 = vpop.eup %6852  ;;  %v615_v44 = vadd.f32 1e-05, %v599_v41  ;;  %v7641_v48 = vadd.f32 1e-05, %v601_v42  ;;  %v7690_v42 = vld [vmem:[%s11965_s1] ss:$0 sm:$0xff] }
 0x10d   : > { %v631_v51 = vmul.f32 %v6853_v43, %v614_v24  ;;  %vm637_vm1 = vweird.f32 %v6853_v43 }
 0x10e   : > { %6854 = vrsqrt.f32 %v615_v44  ;;  %vm7658_vm3 = vmor %vm636_vm2, %vm637_vm1  ;;  %vm646_vm5 = vweird.f32 %v615_v44  ;;  %vm666_vm11 = vweird.f32 %v7641_v48 }
 0x10f   : > { %v632_v52 = vmul.f32 %v6853_v43, %v631_v51  ;;  %6856 = vrsqrt.f32 %v7641_v48 }
 0x111   : > { %v633_v56 = vmul.f32 0.5, %v632_v52  ;;  %v577_v57 = vpop.xlane.xlu1 %576  ;;  %v571_v58 = vpop.xlane.xlu2 %570 }
 0x112   : > { %v603_v59 = vmul.f32 %v577_v57, %v7426_v17  ;;  %v600_v60 = vmul.f32 %v571_v58, %v7426_v17  ;;  %v575_v61 = vpop.xlane.xlu0 %574 }
 0x113   : > { %v634_v62 = vsub.f32 1.5, %v633_v56  ;;  %v602_v1 = vmul.f32 %v575_v61, %v7426_v17 }
 0x114   : > { %v6855_v63 = vpop.eup %6854  ;;  %v7646_v0 = vadd.f32 1e-05, %v600_v60  ;;  %v7651_v11 = vadd.f32 1e-05, %v603_v59 }
 0x115   : > { %v7649_v6 = vpop.eup %6856  ;;  %v641_v9 = vmul.f32 %v6855_v63, %v615_v44  ;;  %v635_v12 = vmul.f32 %v6853_v43, %v634_v62  ;;  %v7656_v15 = vadd.f32 1e-05, %v602_v1  ;;  %vm647_vm4 = vweird.f32 %v6855_v63  ;;  %v7709_v1 = vld [vmem:[%s11966_s2] ss:$0 sm:$0xff] }
 0x116   : > { %v661_v14 = vmul.f32 %v7649_v6, %v7641_v48  ;;  %6858 = vrsqrt.f32 %v7646_v0  ;;  %vm648_vm6 = vmor %vm646_vm5, %vm647_vm4  ;;  %vm667_vm8 = vweird.f32 %v7649_v6  ;;  %vm656_vm9 = vweird.f32 %v7646_v0 }
 0x117   : > { %v642_v13 = vmul.f32 %v6855_v63, %v641_v9  ;;  %6860 = vrsqrt.f32 %v7651_v11  ;;  %v639_v26 = vsel %vm7658_vm3, %v6853_v43, %v635_v12  ;;  %vm7743_vm12 = vmor %vm666_vm11, %vm667_vm8  ;;  %vm686_vm15 = vweird.f32 %v7651_v11 }
 0x118   : > { %v662_v24 = vmul.f32 %v7649_v6, %v661_v14  ;;  %6862 = vrsqrt.f32 %v7656_v15  ;;  %v790_v41 = vmul.f32 %v639_v26, %v7430_v21  ;;  %v6769_v14 = vld [vmem:[%s7399_s14 + $0x38] sm:$0xff]   ;;  %vm676_vm1 = vweird.f32 %v7656_v15 }
 0x119   : > { %v643_v16 = vmul.f32 0.5, %v642_v13  ;;  %v500_v18 = vpop.xlane.xlu1 %499  ;;  %v494_v19 = vpop.xlane.xlu2 %493  ;;  %v7729_v26 = vunpack.c.h.bf16 %v6769_v14 }
 0x11a   : > { %v528_v22 = vmul.f32 %v7426_v17, %v500_v18  ;;  %v525_v23 = vmul.f32 %v7426_v17, %v494_v19  ;;  %v498_v25 = vpop.xlane.xlu0 %497  ;;  %v663_v44 = vmul.f32 0.5, %v662_v24 }
 0x11b   : > { %v644_v29 = vsub.f32 1.5, %v643_v16  ;;  %v527_v30 = vmul.f32 %v7426_v17, %v498_v25  ;;  %12074 = vst [vmem:[#allocation17_spill] sm:$0xff] %v7729_v26 }
 0x11c   : > { %v7671_v31 = vsub.f32 %v7468_v46, %v525_v23  ;;  %v7674_v32 = vsub.f32 %v7466_v45, %v528_v22  ;;  %v7676_v33 = vpop.eup %6858  ;;  %v664_v9 = vsub.f32 1.5, %v663_v44 }
 0x11d   : > { %v645_v34 = vmul.f32 %v6855_v63, %v644_v29  ;;  %v7679_v35 = vsub.f32 %v7470_v47, %v527_v30  ;;  %v651_v39 = vmul.f32 %v7676_v33, %v7646_v0  ;;  %v7692_v51 = vpop.eup %6860  ;;  %vm657_vm7 = vweird.f32 %v7676_v33 }
 0x11e   : > { %v557_v40 = vmul.f32 %v7671_v31, %v7671_v31  ;;  %v560_v56 = vmul.f32 %v7674_v32, %v7674_v32  ;;  %v7700_v59 = vpop.eup %6862  ;;  %v681_v16 = vmul.f32 %v7692_v51, %v7651_v11  ;;  %v665_v25 = vmul.f32 %v7649_v6, %v664_v9  ;;  %vm7731_vm10 = vmor %vm656_vm9, %vm657_vm7 }
 0x11f   : > { %v649_v43 = vsel %vm648_vm6, %v6855_v63, %v645_v34  ;;  %v652_v52 = vmul.f32 %v7676_v33, %v651_v39  ;;  %v559_v57 = vmul.f32 %v7679_v35, %v7679_v35  ;;  %v809_v63 = vmul.f32 %v7690_v42, %v790_v41 }
 0x120   : > { %580 = vadd.xlane.f32.xlu1 %v557_v40  ;;  %v791_v58 = vmul.f32 %v649_v43, %v7440_v28  ;;  %586 = vadd.xlane.f32.xlu0 %v560_v56  ;;  %v671_v18 = vmul.f32 %v7700_v59, %v7656_v15  ;;  %v7735_v30 = vunpack.c.l.bf16 %v6769_v14  ;;  %v682_v34 = vmul.f32 %v7692_v51, %v681_v16 }
 0x121   : > { %v496_v21 = vpop.xlane.xlu2 %495  ;;  %v653_v60 = vmul.f32 0.5, %v652_v52  ;;  %584 = vadd.xlane.f32.xlu2 %v559_v57  ;;  %v828_v22 = vadd.f32 %v7709_v1, %v809_v63  ;;  %v669_v48 = vsel %vm7743_vm12, %v7649_v6, %v665_v25  ;;  %vm687_vm13 = vweird.f32 %v7692_v51 }
 0x122   : > { %v526_v61 = vmul.f32 %v7426_v17, %v496_v21  ;;  %v7703_v62 = vpop.xlane.xlu0 %578  ;;  %v810_v12 = vmul.f32 %v7690_v42, %v791_v58  ;;  %12077 = vst [vmem:[#allocation18_spill] sm:$0xff] %v7735_v30  ;;  %v672_v0 = vmul.f32 %v7700_v59, %v671_v18  ;;  %v683_v57 = vmul.f32 0.5, %v682_v34  ;;  %vm688_vm0 = vmor %vm686_vm15, %vm687_vm13 }
 0x123   : > { %v654_v28 = vsub.f32 1.5, %v653_v60  ;;  %v793_v60 = vmul.f32 %v669_v48, %v7437_v27  ;;  %vm677_vm14 = vweird.f32 %v7700_v59  ;;  %vm1202_vm9 = vcmask 523264  }
 0x124   : > { %v7713_v13 = vsub.f32 %v7479_v50, %v526_v61  ;;  %v829_v19 = vadd.f32 %v7709_v1, %v810_v12  ;;  %v673_v21 = vmul.f32 0.5, %v672_v0  ;;  %v684_v9 = vsub.f32 1.5, %v683_v57  ;;  %vm678_vm2 = vmor %vm676_vm1, %vm677_vm14 }
 0x125   : > { %v655_v20 = vmul.f32 %v7676_v33, %v654_v28  ;;  %v812_v14 = vmul.f32 %v7690_v42, %v793_v60 }
 0x126   : > { %v558_v23 = vmul.f32 %v7713_v13, %v7713_v13  ;;  %v844_v24 = vpack.c.bf16 %v829_v19, %v828_v22  ;;  %v674_v12 = vsub.f32 1.5, %v673_v21  ;;  %v685_v18 = vmul.f32 %v7692_v51, %v684_v9 }
 0x127   : > { %v659_v39 = vsel %vm7731_vm10, %v7676_v33, %v655_v20  ;;  %v831_v22 = vadd.f32 %v7709_v1, %v812_v14 }
 0x128   : > { %582 = vadd.xlane.f32.xlu1 %v558_v23  ;;  %1028 = vmatmul.bf16.vlgmr.msra.gmra.mxu0 %v844_v24  ;;  %v792_v56 = vmul.f32 %v659_v39, %v7450_v36  ;;  %v675_v19 = vmul.f32 %v7700_v59, %v674_v12  ;;  %v689_v25 = vsel %vm688_vm0, %v7692_v51, %v685_v18 }
 0x129   : > { %v502_v40 = vpop.xlane.xlu2 %501  ;;  %1077 = vmatmul.bf16.vlgmr.msra.gmra.mxu1 %v844_v24  ;;  %1126 = vmatmul.bf16.vlgmr.msra.gmra.mxu2 %v844_v24  ;;  %v795_v24 = vmul.f32 %v689_v25, %v7453_v37  ;;  %v604_v51 = vmul.f32 %v7703_v62, %v7426_v17 }
 0x12a   : > { %v529_v43 = vmul.f32 %v7426_v17, %v502_v40  ;;  %v506_v44 = vpop.xlane.xlu0 %505  ;;  %509 = vadd.xlane.f32.xlu0 %v7729_v26  ;;  %507 = vadd.xlane.f32.xlu2 %v7735_v30  ;;  %v811_v63 = vmul.f32 %v7690_v42, %v792_v56  ;;  %v679_v29 = vsel %vm678_vm2, %v7700_v59, %v675_v19 }
 0x12b   : > { %v531_v33 = vmul.f32 %v7426_v17, %v506_v44  ;;  %v794_v11 = vmul.f32 %v679_v29, %v7456_v38  ;;  %v814_v39 = vmul.f32 %v7690_v42, %v795_v24  ;;  %v620_v59 = vadd.f32 1e-05, %v604_v51 }
 0x12c   : > { %v7755_v52 = vsub.f32 %v7485_v53, %v529_v43  ;;  %v830_v27 = vadd.f32 %v7709_v1, %v811_v63 }
 0x12d   : > { %v7759_v58 = vsub.f32 %v7487_v54, %v531_v33  ;;  %v813_v34 = vmul.f32 %v7690_v42, %v794_v11  ;;  %v833_v0 = vadd.f32 %v7709_v1, %v814_v39  ;;  %6864 = vrsqrt.f32 %v620_v59 }
 0x12e   : > { %v561_v6 = vmul.f32 %v7755_v52, %v7755_v52  ;;  %v845_v23 = vpack.c.bf16 %v831_v22, %v830_v27  ;;  %vm696_vm3 = vweird.f32 %v620_v59 }
 0x12f   : > { %v563_v61 = vmul.f32 %v7759_v58, %v7759_v58  ;;  %v832_v15 = vadd.f32 %v7709_v1, %v813_v34 }
 0x130   : > { %588 = vadd.xlane.f32.xlu1 %v561_v6 }
 0x131   : > { %v504_v28 = vpop.xlane.xlu2 %503  ;;  %v846_v40 = vpack.c.bf16 %v833_v0, %v832_v15  ;;  %v7823_v15 = vld [vmem:[%s11968_s4] sm:$0x7] }
 0x132   : > { %v530_v36 = vmul.f32 %v7426_v17, %v504_v28  ;;  %592 = vadd.xlane.f32.xlu2 %v563_v61 }
 0x133   : > { %v6865_v38 = vpop.eup %6864 }
 0x134   : > { %v7771_v16 = vsub.f32 %v7491_v55, %v530_v36  ;;  %v691_v41 = vmul.f32 %v6865_v38, %v620_v59  ;;  %vm697_vm4 = vweird.f32 %v6865_v38 }
 0x135   : > { %vm7814_vm5 = vmor %vm696_vm3, %vm697_vm4 }
 0x136   : > { %v562_v20 = vmul.f32 %v7771_v16, %v7771_v16  ;;  %v692_v33 = vmul.f32 %v6865_v38, %v691_v41 }
 0x138   : > { %590 = vadd.xlane.f32.xlu1 %v562_v20  ;;  %1033 = vmatmul.bf16.gmra.mxu0 %v845_v23  ;;  %v693_v6 = vmul.f32 0.5, %v692_v33 }
 0x139   : > { %1082 = vmatmul.bf16.gmra.mxu1 %v845_v23  ;;  %1131 = vmatmul.bf16.gmra.mxu2 %v845_v23 }
 0x13a   : > { %v694_v63 = vsub.f32 1.5, %v693_v6 }
 0x13c   : > { %v695_v23 = vmul.f32 %v6865_v38, %v694_v63 }
 0x148   : > { %1038 = vmatmul.bf16.gmra.mxu0 %v846_v40 }
 0x149   : > { %1087 = vmatmul.bf16.gmra.mxu1 %v846_v40  ;;  %1136 = vmatmul.bf16.gmra.mxu2 %v846_v40 }
 0x193   : > { %v581_v37 = vpop.xlane.xlu1 %580  ;;  %v587_v48 = vpop.xlane.xlu0 %586 }
 0x194   : > { %v605_v43 = vmul.f32 %v581_v37, %v7426_v17  ;;  %v585_v44 = vpop.xlane.xlu2 %584  ;;  %v608_v20 = vmul.f32 %v587_v48, %v7426_v17  ;;  %v699_v37 = vsel %vm7814_vm5, %v6865_v38, %v695_v23  ;;  %v7838_v48 = vperm.slane %v7823_v15, 1 }
 0x195   : > { %v607_v57 = vmul.f32 %v585_v44, %v7426_v17 }
 0x196   : > { %v621_v56 = vadd.f32 1e-05, %v605_v43  ;;  %v7828_v59 = vadd.f32 1e-05, %v608_v20 }
 0x197   : > { %v7794_v21 = vadd.f32 1e-05, %v607_v57 }
 0x198   : > { %6866 = vrsqrt.f32 %v621_v56  ;;  %vm706_vm6 = vweird.f32 %v621_v56  ;;  %vm736_vm4 = vweird.f32 %v7828_v59 }
 0x199   : > { %6868 = vrsqrt.f32 %v7794_v21  ;;  %vm726_vm14 = vweird.f32 %v7794_v21 }
 0x19b   : > { %v583_v62 = vpop.xlane.xlu1 %582 }
 0x19c   : > { %v606_v60 = vmul.f32 %v583_v62, %v7426_v17  ;;  %v796_v62 = vmul.f32 %v699_v37, %v7477_v49 }
 0x19d   : > { %v510_v12 = vpop.xlane.xlu0 %509  ;;  %v508_v36 = vpop.xlane.xlu2 %507 }
 0x19e   : > { %v6867_v61 = vpop.eup %6866  ;;  %v7798_v9 = vadd.f32 1e-05, %v606_v60  ;;  %v533_v14 = vmul.f32 %v7426_v17, %v510_v12  ;;  %v532_v18 = vmul.f32 %v7426_v17, %v508_v36 }
 0x19f   : > { %v701_v28 = vmul.f32 %v6867_v61, %v621_v56  ;;  %v7801_v27 = vpop.eup %6868  ;;  %vm707_vm7 = vweird.f32 %v6867_v61 }
 0x1a0   : > { %6870 = vrsqrt.f32 %v7798_v9  ;;  %v7807_v22 = vsub.f32 %v7729_v26, %v533_v14  ;;  %v721_v25 = vmul.f32 %v7801_v27, %v7794_v21  ;;  %v7812_v29 = vsub.f32 %v7735_v30, %v532_v18  ;;  %vm708_vm8 = vmor %vm706_vm6, %vm707_vm7 }
 0x1a1   : > { %v702_v19 = vmul.f32 %v6867_v61, %v701_v28  ;;  %vm716_vm10 = vweird.f32 %v7798_v9  ;;  %vm727_vm13 = vweird.f32 %v7801_v27 }
 0x1a2   : > { %v565_v34 = vmul.f32 %v7807_v22, %v7807_v22  ;;  %v564_v0 = vmul.f32 %v7812_v29, %v7812_v29  ;;  %v722_v43 = vmul.f32 %v7801_v27, %v721_v25  ;;  %vm7887_vm15 = vmor %vm726_vm14, %vm727_vm13 }
 0x1a3   : > { %v703_v24 = vmul.f32 0.5, %v702_v19  ;;  %v589_v39 = vpop.xlane.xlu1 %588 }
 0x1a4   : > { %v609_v40 = vmul.f32 %v589_v39, %v7426_v17  ;;  %596 = vadd.xlane.f32.xlu1 %v565_v34  ;;  %594 = vadd.xlane.f32.xlu0 %v564_v0  ;;  %v723_v60 = vmul.f32 0.5, %v722_v43 }
 0x1a5   : > { %v704_v51 = vsub.f32 1.5, %v703_v24  ;;  %v7848_v36 = vpop.f32.mrf.mxu0 }
 0x1a6   : > { %v7830_v41 = vpop.eup %6870  ;;  %v7835_v44 = vadd.f32 1e-05, %v609_v40  ;;  %v1078_v57 = vpop.f32.mrf.mxu1  ;;  %v724_v49 = vsub.f32 1.5, %v723_v60 }
 0x1a7   : > { %v705_v33 = vmul.f32 %v6867_v61, %v704_v51  ;;  %v711_v56 = vmul.f32 %v7830_v41, %v7798_v9  ;;  %v1079_v63 = vadd.f32 %v1078_v57, %v7838_v48  ;;  %vm717_vm11 = vweird.f32 %v7830_v41 }
 0x1a8   : > { %6872 = vrsqrt.f32 %v7835_v44  ;;  %vm7866_vm12 = vmor %vm716_vm10, %vm717_vm11  ;;  %vm746_vm0 = vweird.f32 %v7835_v44 }
 0x1a9   : > { %v709_v6 = vsel %vm708_vm8, %v6867_v61, %v705_v33  ;;  %6874 = vrsqrt.f32 %v7828_v59  ;;  %v712_v38 = vmul.f32 %v7830_v41, %v711_v56  ;;  %v7850_v14 = vpack.c.bf16 %v1079_v63, %v1079_v63 }
 0x1aa   : > { %v797_v12 = vmul.f32 %v709_v6, %v7671_v31  ;;  %v815_v61 = vmul.f32 %v7690_v42, %v796_v62  ;;  %v593_v31 = vpop.xlane.xlu2 %592  ;;  %v725_v33 = vmul.f32 %v7801_v27, %v724_v49 }
 0x1ab   : > { %v713_v28 = vmul.f32 0.5, %v712_v38  ;;  %v591_v18 = vpop.xlane.xlu1 %590  ;;  %v1207_v25 = vsel %vm1202_vm9, %v7850_v14, 0  ;;  %v611_v9 = vmul.f32 %v593_v31, %v7426_v17 }
 0x1ac   : > { %v816_v20 = vmul.f32 %v7690_v42, %v797_v12  ;;  %1216 = vmatpush.bf16.xpose.msrb.mxu1 %v1207_v25  ;;  %v610_v24 = vmul.f32 %v591_v18, %v7426_v17  ;;  %v834_v37 = vadd.f32 %v7709_v1, %v815_v61  ;;  %v729_v21 = vsel %vm7887_vm15, %v7801_v27, %v725_v33 }
 0x1ad   : > { %v714_v19 = vsub.f32 1.5, %v713_v28  ;;  %v7891_v12 = vadd.f32 1e-05, %v611_v9  ;;  %v1031_v28 = vpop.f32.mrf.mxu0  ;;  %v799_v27 = vmul.f32 %v729_v21, %v7679_v35 }
 0x1ae   : > { %v7854_v23 = vpop.eup %6872  ;;  %v1080_v0 = vpop.f32.mrf.mxu1  ;;  %v835_v43 = vadd.f32 %v7709_v1, %v816_v20  ;;  %v7878_v57 = vadd.f32 1e-05, %v610_v24 }
 0x1af   : > { %v7860_v11 = vpop.eup %6874  ;;  %v715_v34 = vmul.f32 %v7830_v41, %v714_v19  ;;  %v741_v39 = vmul.f32 %v7854_v23, %v7835_v44  ;;  %v1081_v51 = vadd.f32 %v1080_v0, %v7838_v48  ;;  %vm747_vm1 = vweird.f32 %v7854_v23 }
 0x1b0   : > { %v731_v56 = vmul.f32 %v7860_v11, %v7828_v59  ;;  %v847_v6 = vpack.c.bf16 %v835_v43, %v834_v37  ;;  %6876 = vrsqrt.f32 %v7878_v57  ;;  %vm7928_vm2 = vmor %vm746_vm0, %vm747_vm1  ;;  %vm737_vm3 = vweird.f32 %v7860_v11 }
 0x1b1   : > { %v719_v38 = vsel %vm7866_vm12, %v7830_v41, %v715_v34  ;;  %v742_v62 = vmul.f32 %v7854_v23, %v741_v39  ;;  %v7885_v60 = vpack.c.bf16 %v1081_v51, %v1081_v51  ;;  %v7898_v41 = vperm.slane %v7823_v15, 0  ;;  %vm738_vm5 = vmor %vm736_vm4, %vm737_vm3 }
 0x1b2   : > { %1043 = vmatmul.bf16.gmra.mxu0 %v847_v6  ;;  %1092 = vmatmul.bf16.gmra.mxu1 %v847_v6  ;;  %v732_v18 = vmul.f32 %v7860_v11, %v731_v56  ;;  %v798_v61 = vmul.f32 %v719_v38, %v7713_v13  ;;  %6878 = vrsqrt.f32 %v7891_v12  ;;  %v818_v13 = vmul.f32 %v7690_v42, %v799_v27 }
 0x1b3   : > { %1141 = vmatmul.bf16.gmra.mxu2 %v847_v6  ;;  %v1226_v19 = vsel %vm1202_vm9, %v7885_v60, 0  ;;  %v743_v20 = vmul.f32 0.5, %v742_v62  ;;  %v1032_v49 = vadd.f32 %v1031_v28, %v7898_v41  ;;  %vm756_vm6 = vweird.f32 %v7878_v57 }
 0x1b4   : > { %1235 = vmatpush.bf16.xpose.msra.mxu3 %v1226_v19  ;;  %v733_v25 = vmul.f32 0.5, %v732_v18  ;;  %v817_v34 = vmul.f32 %v7690_v42, %v798_v61  ;;  %v837_v62 = vadd.f32 %v7709_v1, %v818_v13  ;;  %vm766_vm8 = vweird.f32 %v7891_v12 }
 0x1b5   : > { %v744_v39 = vsub.f32 1.5, %v743_v20  ;;  %v7909_v0 = vpack.c.bf16 %v1032_v49, %v1032_v49  ;;  %v1034_v20 = vpop.f32.mrf.mxu0  ;;  %vm1541_vm4 = vcmask 64512  }
 0x1b6   : > { %v1083_v31 = vpop.f32.mrf.mxu1  ;;  %v7913_v9 = vpop.eup %6876  ;;  %v734_v51 = vsub.f32 1.5, %v733_v25  ;;  %v836_v43 = vadd.f32 %v7709_v1, %v817_v34 }
 0x1b7   : > { %v1084_v24 = vadd.f32 %v1083_v31, %v7838_v48  ;;  %v745_v33 = vmul.f32 %v7854_v23, %v744_v39  ;;  %v751_v56 = vmul.f32 %v7913_v9, %v7878_v57  ;;  %vm757_vm7 = vweird.f32 %v7913_v9 }
 0x1b8   : > { %v7922_v37 = vpop.eup %6878  ;;  %v735_v63 = vmul.f32 %v7860_v11, %v734_v51  ;;  %v848_v18 = vpack.c.bf16 %v837_v62, %v836_v43  ;;  %vm758_vm11 = vmor %vm756_vm6, %vm757_vm7 }
 0x1b9   : > { %v7911_v40 = vpack.c.bf16 %v1084_v24, %v1084_v24  ;;  %v761_v28 = vmul.f32 %v7922_v37, %v7891_v12  ;;  %v749_v19 = vsel %vm7928_vm2, %v7854_v23, %v745_v33  ;;  %v752_v61 = vmul.f32 %v7913_v9, %v751_v56 }
 0x1ba   : > { %v739_v31 = vsel %vm738_vm5, %v7860_v11, %v735_v63  ;;  %v801_v59 = vmul.f32 %v749_v19, %v7755_v52  ;;  %v1035_v23 = vadd.f32 %v1034_v20, %v7898_v41  ;;  %vm767_vm10 = vweird.f32 %v7922_v37 }
 0x1bb   : > { %6177 = vmatmul.msk.bf16.vlgmr.msra.gmra.mxu3 %vm1202_vm9, %v7909_v0  ;;  %v1245_v35 = vsel %vm1202_vm9, %v7911_v40, 0  ;;  %v762_v27 = vmul.f32 %v7922_v37, %v761_v28  ;;  %v753_v25 = vmul.f32 0.5, %v752_v61  ;;  %v800_v39 = vmul.f32 %v739_v31, %v7674_v32  ;;  %vm768_vm12 = vmor %vm766_vm8, %vm767_vm10 }
 0x1bc   : > { %1254 = vmatpush.bf16.xpose.msrb.mxu3 %v1245_v35  ;;  %v820_v35 = vmul.f32 %v7690_v42, %v801_v59  ;;  %v7956_v43 = vpack.c.bf16 %v1035_v23, %v1035_v23  ;;  %vm1753_vm5 = vcmask 1043456  }
 0x1bd   : > { %v763_v13 = vmul.f32 0.5, %v762_v27  ;;  %v754_v11 = vsub.f32 1.5, %v753_v25  ;;  %v819_v52 = vmul.f32 %v7690_v42, %v800_v39  ;;  %v1036_v28 = vpop.f32.mrf.mxu0 }
 0x1be   : > { %v1085_v6 = vpop.f32.mrf.mxu1  ;;  %v839_v32 = vadd.f32 %v7709_v1, %v820_v35  ;;  %v1037_v61 = vadd.f32 %v1036_v28, %v7898_v41 }
 0x1bf   : > { %v1086_v38 = vadd.f32 %v1085_v6, %v7838_v48  ;;  %v764_v56 = vsub.f32 1.5, %v763_v13  ;;  %v755_v6 = vmul.f32 %v7913_v9, %v754_v11  ;;  %v838_v44 = vadd.f32 %v7709_v1, %v819_v52 }
 0x1c0   : > { %v7980_v27 = vpack.c.bf16 %v1037_v61, %v1037_v61 }
 0x1c1   : > { %v7938_v21 = vpack.c.bf16 %v1086_v38, %v1086_v38  ;;  %v765_v38 = vmul.f32 %v7922_v37, %v764_v56  ;;  %v849_v62 = vpack.c.bf16 %v839_v32, %v838_v44  ;;  %v759_v63 = vsel %vm758_vm11, %v7913_v9, %v755_v6 }
 0x1c2   : > { %1048 = vmatmul.bf16.gmra.mxu0 %v848_v18  ;;  %1097 = vmatmul.bf16.gmra.mxu1 %v848_v18  ;;  %v802_v19 = vmul.f32 %v759_v63, %v7771_v16 }
 0x1c3   : > { %v1264_v49 = vsel %vm1202_vm9, %v7938_v21, 0  ;;  %1146 = vmatmul.bf16.gmra.mxu2 %v848_v18  ;;  %v769_v18 = vsel %vm768_vm12, %v7922_v37, %v765_v38 }
 0x1c4   : > { %1273 = vmatpush.bf16.xpose.msra.mxu3 %v1264_v49  ;;  %v803_v20 = vmul.f32 %v769_v18, %v7759_v58  ;;  %v821_v31 = vmul.f32 %v7690_v42, %v802_v19 }
 0x1c5   : > { %v1039_v25 = vpop.f32.mrf.mxu0 }
 0x1c6   : > { %v1088_v24 = vpop.f32.mrf.mxu1  ;;  %v822_v9 = vmul.f32 %v7690_v42, %v803_v20  ;;  %v840_v16 = vadd.f32 %v7709_v1, %v821_v31  ;;  %v1040_v23 = vadd.f32 %v1039_v25, %v7898_v41 }
 0x1c7   : > { %v1089_v34 = vadd.f32 %v1088_v24, %v7838_v48 }
 0x1c8   : > { %v841_v59 = vadd.f32 %v7709_v1, %v822_v9  ;;  %v7990_v24 = vpack.c.bf16 %v1040_v23, %v1040_v23 }
 0x1c9   : > { %v7953_v51 = vpack.c.bf16 %v1089_v34, %v1089_v34 }
 0x1ca   : > { %v850_v58 = vpack.c.bf16 %v841_v59, %v840_v16 }
 0x1cb   : > { %v1283_v33 = vsel %vm1202_vm9, %v7953_v51, 0  ;;  %6178 = vmatmul.msk.bf16.vlgmr.msrb.gmra.mxu3 %vm1202_vm9, %v7956_v43 }
 0x1cc   : > { %1292 = vmatpush.bf16.xpose.msrb.mxu3 %v1283_v33 }
 0x1cd   : > { %v1041_v34 = vpop.f32.mrf.mxu0 }
 0x1ce   : > { %v1090_v57 = vpop.f32.mrf.mxu1  ;;  %v1042_v39 = vadd.f32 %v1041_v34, %v7898_v41 }
 0x1cf   : > { %v1091_v12 = vadd.f32 %v1090_v57, %v7838_v48 }
 0x1d0   : > { %v7995_v13 = vpack.c.bf16 %v1042_v39, %v1042_v39 }
 0x1d1   : > { %v7977_v49 = vpack.c.bf16 %v1091_v12, %v1091_v12 }
 0x1d2   : > { %1053 = vmatmul.bf16.gmra.mxu0 %v849_v62  ;;  %1102 = vmatmul.bf16.gmra.mxu1 %v849_v62 }
 0x1d3   : > { %1151 = vmatmul.bf16.gmra.mxu2 %v849_v62  ;;  %v1302_v37 = vsel %vm1202_vm9, %v7977_v49, 0 }
 0x1db   : > { %6179 = vmatmul.msk.bf16.vlgmr.msra.gmra.mxu3 %vm1202_vm9, %v7980_v27 }
 0x1dc   : > { %1311 = vmatpush.bf16.xpose.msra.mxu3 %v1302_v37 }
 0x1e2   : > { %1058 = vmatmul.bf16.gmra.mxu0 %v850_v58  ;;  %1107 = vmatmul.bf16.gmra.mxu1 %v850_v58 }
 0x1e3   : > { %1156 = vmatmul.bf16.gmra.mxu2 %v850_v58 }
 0x1eb   : > { %6180 = vmatmul.msk.bf16.vlgmr.msrb.gmra.mxu3 %vm1202_vm9, %v7990_v24 }
 0x1fb   : > { %6181 = vmatmul.msk.bf16.vlgmr.msra.gmra.mxu3 %vm1202_vm9, %v7995_v13 }
 0x217   : > { %v597_v35 = vpop.xlane.xlu1 %596  ;;  %v595_v33 = vpop.xlane.xlu0 %594 }
 0x218   : > { %v613_v11 = vmul.f32 %v597_v35, %v7426_v17  ;;  %v612_v52 = vmul.f32 %v595_v33, %v7426_v17 }
 0x21a   : > { %v629_v56 = vadd.f32 1e-05, %v613_v11  ;;  %v628_v32 = vadd.f32 1e-05, %v612_v52 }
 0x21c   : > { %6880 = vrsqrt.f32 %v629_v56  ;;  %vm786_vm15 = vweird.f32 %v629_v56  ;;  %vm776_vm1 = vweird.f32 %v628_v32 }
 0x21d   : > { %6882 = vrsqrt.f32 %v628_v32 }
 0x222   : > { %v6881_v6 = vpop.eup %6880 }
 0x223   : > { %v6883_v44 = vpop.eup %6882  ;;  %v781_v38 = vmul.f32 %v6881_v6, %v629_v56  ;;  %vm787_vm13 = vweird.f32 %v6881_v6 }
 0x224   : > { %v771_v57 = vmul.f32 %v6883_v44, %v628_v32  ;;  %vm777_vm14 = vweird.f32 %v6883_v44  ;;  %vm788_vm0 = vmor %vm786_vm15, %vm787_vm13 }
 0x225   : > { %v782_v62 = vmul.f32 %v6881_v6, %v781_v38  ;;  %vm778_vm2 = vmor %vm776_vm1, %vm777_vm14 }
 0x226   : > { %v772_v63 = vmul.f32 %v6883_v44, %v771_v57 }
 0x227   : > { %v783_v28 = vmul.f32 0.5, %v782_v62 }
 0x228   : > { %v773_v18 = vmul.f32 0.5, %v772_v63  ;;  %v1030_v63 = vadd.f32 %v7848_v36, %v7898_v41 }
 0x229   : > { %v784_v12 = vsub.f32 1.5, %v783_v28 }
 0x22a   : > { %v774_v19 = vsub.f32 1.5, %v773_v18 }
 0x22b   : > { %v785_v61 = vmul.f32 %v6881_v6, %v784_v12 }
 0x22c   : > { %v775_v20 = vmul.f32 %v6883_v44, %v774_v19 }
 0x22d   : > { %v789_v31 = vsel %vm788_vm0, %v6881_v6, %v785_v61  ;;  %v1127_v6 = vpop.f32.mrf.mxu2 }
 0x22e   : > { %v779_v9 = vsel %vm778_vm2, %v6883_v44, %v775_v20  ;;  %v805_v37 = vmul.f32 %v789_v31, %v7807_v22 }
 0x22f   : > { %v804_v16 = vmul.f32 %v779_v9, %v7812_v29  ;;  %v1044_v58 = vpop.f32.mrf.mxu0  ;;  %v1093_v25 = vpop.f32.mrf.mxu1  ;;  %v11978_v29 = vlaneseq  ;;  %v8037_v9 = vpack.c.bf16 %v1030_v63, %v1030_v63 }
 0x230   : > { %v824_v59 = vmul.f32 %v7690_v42, %v805_v37  ;;  %v1094_v34 = vadd.f32 %v1093_v25, %v7838_v48  ;;  %v1045_v52 = vadd.f32 %v1044_v58, %v7898_v41 }
 0x231   : > { %v823_v23 = vmul.f32 %v7690_v42, %v804_v16 }
 0x232   : > { %v843_v39 = vadd.f32 %v7709_v1, %v824_v59  ;;  %v8008_v11 = vpack.c.bf16 %v1094_v34, %v1094_v34  ;;  %v8019_v38 = vpack.c.bf16 %v1045_v52, %v1045_v52 }
 0x233   : > { %v842_v35 = vadd.f32 %v7709_v1, %v823_v23  ;;  %v8017_v1 = vand.u32 127, %v11978_v29 }
 0x234   : > { %v1321_v22 = vsel %vm1202_vm9, %v8008_v11, 0 }
 0x235   : > { %v851_v33 = vpack.c.bf16 %v843_v39, %v842_v35  ;;  %1330 = vmatpush.bf16.xpose.msrb.mxu3 %v1321_v22  ;;  %vm1169_vm3 = vcmp.lt.s32.totalorder %v8017_v1, 5  ;;  %v1129_v37 = vpop.f32.mrf.mxu2 }
 0x237   : > { %1063 = vmatmul.bf16.gmra.mxu0 %v851_v33  ;;  %1112 = vmatmul.bf16.gmra.mxu1 %v851_v33  ;;  %v1046_v42 = vpop.f32.mrf.mxu0  ;;  %v1095_v56 = vpop.f32.mrf.mxu1 }
 0x238   : > { %1161 = vmatmul.bf16.gmra.mxu2 %v851_v33  ;;  %v1096_v32 = vadd.f32 %v1095_v56, %v7838_v48  ;;  %v1047_v59 = vadd.f32 %v1046_v42, %v7898_v41 }
 0x23a   : > { %v8014_v44 = vpack.c.bf16 %v1096_v32, %v1096_v32  ;;  %v8047_v39 = vpack.c.bf16 %v1047_v59, %v1047_v59 }
 0x23c   : > { %v1340_v57 = vsel %vm1202_vm9, %v8014_v44, 0  ;;  %6182 = vmatmul.msk.bf16.vlgmr.msrb.gmra.mxu3 %vm1202_vm9, %v8019_v38 }
 0x23d   : > { %1349 = vmatpush.bf16.xpose.msra.mxu3 %v1340_v57  ;;  %v8051_v33 = vpop.f32.mrf.mxu2 }
 0x23e   : > { %v1237_v62 = vpop.f32.mrf.mxu3 }
 0x23f   : > { %v1508_v28 = vmul.f32 0.125, %v1237_v62  ;;  %v1049_v18 = vpop.f32.mrf.mxu0  ;;  %v1098_v12 = vpop.f32.mrf.mxu1 }
 0x240   : > { %v1099_v19 = vadd.f32 %v1098_v12, %v7838_v48 }
 0x241   : > { %v8031_v61 = vsel %vm1169_vm3, %v1508_v28, -1e+30 }
 0x242   : > { %v8033_v20 = vpack.c.bf16 %v1099_v19, %v1099_v19  ;;  %v1545_v31 = vsel %vm1541_vm4, %v8031_v61, -inf }
 0x243   : > { %1546 = vmax.xlane.f32.xlu0 %v1545_v31 }
 0x244   : > { %v1359_v36 = vsel %vm1202_vm9, %v8033_v20, 0 }
 0x245   : > { %1368 = vmatpush.bf16.xpose.msrb.mxu3 %v1359_v36  ;;  %v8067_v31 = vpop.f32.mrf.mxu2  ;;  %v1050_v36 = vadd.f32 %v1049_v18, %v7898_v41 }
 0x246   : > { %v1239_v16 = vpop.f32.mrf.mxu3 }
 0x247   : > { %6176 = vmatmul.msk.bf16.vlgmr.msrb.gmra.mxu1 %vm1202_vm9, %v8037_v9  ;;  %v1051_v58 = vpop.f32.mrf.mxu0  ;;  %v1100_v25 = vpop.f32.mrf.mxu1 }
 0x248   : > { %v1101_v23 = vadd.f32 %v1100_v25, %v7838_v48  ;;  %v8072_v25 = vperm.slane %v7823_v15, 2 }
 0x24a   : > { %v8045_v34 = vpack.c.bf16 %v1101_v23, %v1101_v23  ;;  %v1128_v18 = vadd.f32 %v1127_v6, %v8072_v25 }
 0x24c   : > { %v1378_v35 = vsel %vm1202_vm9, %v8045_v34, 0  ;;  %6183 = vmatmul.msk.bf16.vlgmr.msra.gmra.mxu3 %vm1202_vm9, %v8047_v39 }
 0x24d   : > { %1387 = vmatpush.bf16.xpose.msra.mxu3 %v1378_v35 }
 0x24e   : > { %v1256_v22 = vpop.f32.mrf.mxu3 }
 0x24f   : > { %v1509_v52 = vmul.f32 0.125, %v1256_v22  ;;  %v1054_v42 = vpop.f32.mrf.mxu0  ;;  %v1103_v56 = vpop.f32.mrf.mxu1 }
 0x250   : > { %v1104_v32 = vadd.f32 %v1103_v56, %v7838_v48  ;;  %v1055_v12 = vadd.f32 %v1054_v42, %v7898_v41 }
 0x251   : > { %v8058_v57 = vsel %vm1169_vm3, %v1509_v52, -1e+30  ;;  %v8078_v52 = vpack.c.bf16 %v1050_v36, %v1050_v36 }
 0x252   : > { %v8060_v62 = vpack.c.bf16 %v1104_v32, %v1104_v32  ;;  %v1548_v63 = vsel %vm1541_vm4, %v8058_v57, -inf  ;;  %v8074_v35 = vpack.c.bf16 %v1055_v12, %v1055_v12  ;;  %v8089_v12 = vpack.c.bf16 %v1128_v18, %v1128_v18 }
 0x253   : > { %1549 = vmax.xlane.f32.xlu0 %v1548_v63 }
 0x254   : > { %v1397_v28 = vsel %vm1202_vm9, %v8060_v62, 0  ;;  %12088 = vst [vmem:[#allocation19_spill] sm:$0xff] %v8074_v35 }
 0x255   : > { %1406 = vmatpush.bf16.xpose.msrb.mxu0 %v1397_v28  ;;  %12090 = vst [vmem:[#allocation21_spill] sm:$0xff] %v8089_v12 }
 0x256   : > { %v1258_v19 = vpop.f32.mrf.mxu3 }
 0x257   : > { %v1105_v16 = vpop.f32.mrf.mxu1  ;;  %v1056_v23 = vpop.f32.mrf.mxu0 }
 0x258   : > { %v1106_v59 = vadd.f32 %v1105_v16, %v7838_v48  ;;  %v1057_v15 = vadd.f32 %v1056_v23, %v7898_v41  ;;  %v1137_v19 = vpop.f32.mrf.mxu2 }
 0x25a   : > { %v8076_v22 = vpack.c.bf16 %v1106_v59, %v1106_v59  ;;  %v8095_v6 = vpack.c.bf16 %v1057_v15, %v1057_v15  ;;  %v1130_v15 = vadd.f32 %v1129_v37, %v8072_v25 }
 0x25c   : > { %12089 = vst [vmem:[#allocation20_spill] sm:$0xff] %v8076_v22  ;;  %6186 = vmatmul.msk.bf16.vlgmr.msrb.gmra.mxu0 %vm1202_vm9, %v8074_v35  ;;  %v1416_v42 = vsel %vm1202_vm9, %v8076_v22, 0  ;;  %6184 = vmatmul.msk.bf16.vlgmr.msrb.gmra.mxu3 %vm1202_vm9, %v8078_v52  ;;  %v8114_v26 = vpack.c.bf16 %v1130_v15, %v1130_v15 }
 0x25d   : > { %1425 = vmatpush.bf16.xpose.msra.mxu1 %v1416_v42  ;;  %v1138_v42 = vadd.f32 %v1137_v19, %v8072_v25 }
 0x25e   : > { %v1275_v56 = vpop.f32.mrf.mxu3  ;;  %12092 = vst [vmem:[#allocation23_spill] sm:$0xff] %v8114_v26 }
 0x25f   : > { %v1510_v32 = vmul.f32 0.125, %v1275_v56  ;;  %v1108_v63 = vpop.f32.mrf.mxu1  ;;  %v1059_v23 = vpop.f32.mrf.mxu0  ;;  %v1755_v56 = vsel %vm1753_vm5, %v8089_v12, 0  ;;  %v8111_v19 = vpack.c.bf16 %v1138_v42, %v1138_v42 }
 0x260   : > { %v1109_v28 = vadd.f32 %v1108_v63, %v7838_v48  ;;  %v1139_v15 = vpop.f32.mrf.mxu2 }
 0x261   : > { %v8093_v36 = vsel %vm1169_vm3, %v1510_v32, -1e+30  ;;  %v1060_v32 = vadd.f32 %v1059_v23, %v7898_v41  ;;  %12091 = vst [vmem:[#allocation22_spill] sm:$0xff] %v8111_v19  ;;  %v1831_v37 = vsel %vm1753_vm5, %v8111_v19, 0 }
 0x262   : > { %v8097_v16 = vpack.c.bf16 %v1109_v28, %v1109_v28  ;;  %v1551_v59 = vsel %vm1541_vm4, %v8093_v36, -inf  ;;  %v1052_v28 = vadd.f32 %v1051_v58, %v7898_v41 }
 0x263   : > { %1552 = vmax.xlane.f32.xlu1 %v1551_v59  ;;  %v8116_v30 = vpack.c.bf16 %v1060_v32, %v1060_v32 }
 0x264   : > { %6187 = vmatmul.msk.bf16.vlgmr.msra.gmra.mxu1 %vm1202_vm9, %v8095_v6  ;;  %v1435_v18 = vsel %vm1202_vm9, %v8097_v16, 0 }
 0x265   : > { %1444 = vmatpush.bf16.xpose.msrb.mxu2 %v1435_v18  ;;  %12093 = vst [vmem:[#allocation24_spill] sm:$0xff] %v8116_v30  ;;  %v8120_v18 = vpack.c.bf16 %v1052_v28, %v1052_v28  ;;  %v1140_v28 = vadd.f32 %v1139_v15, %v8072_v25 }
 0x266   : > { %v1277_v63 = vpop.f32.mrf.mxu3 }
 0x267   : > { %v1110_v59 = vpop.f32.mrf.mxu1  ;;  %v1061_v63 = vpop.f32.mrf.mxu0 }
 0x268   : > { %v1111_v29 = vadd.f32 %v1110_v59, %v7838_v48 }
 0x26a   : > { %v8118_v54 = vpack.c.bf16 %v1111_v29, %v1111_v29  ;;  %v1774_v29 = vsel %vm1753_vm5, %v8114_v26, 0 }
 0x26c   : > { %6188 = vmatmul.msk.bf16.vlgmr.msrb.gmra.mxu2 %vm1202_vm9, %v8116_v30  ;;  %v1454_v58 = vsel %vm1202_vm9, %v8118_v54, 0  ;;  %6185 = vmatmul.msk.bf16.vlgmr.msra.gmra.mxu3 %vm1202_vm9, %v8120_v18 }
 0x26d   : > { %1764 = vmatpush.bf16.msra.mxu2 %v1755_v56  ;;  %1463 = vmatpush.bf16.xpose.msrb.mxu3 %v1454_v58  ;;  %v8140_v58 = vpack.c.bf16 %v1140_v28, %v1140_v28 }
 0x26e   : > { %v1294_v23 = vpop.f32.mrf.mxu3 }
 0x26f   : > { %v1511_v42 = vmul.f32 0.125, %v1294_v23  ;;  %12094 = vst [vmem:[#allocation25_spill] sm:$0xff] %v8140_v58  ;;  %v1850_v23 = vsel %vm1753_vm5, %v8140_v58, 0 }
 0x271   : > { %1840 = vmatpush.bf16.msrb.mxu2 %v1831_v37  ;;  %v8134_v56 = vsel %vm1169_vm3, %v1511_v42, -1e+30  ;;  %v1062_v37 = vadd.f32 %v1061_v63, %v7898_v41  ;;  %v1133_v63 = vadd.f32 %v8051_v33, %v8072_v25  ;;  %v1135_v33 = vadd.f32 %v8067_v31, %v8072_v25 }
 0x272   : > { %v1554_v32 = vsel %vm1541_vm4, %v8134_v56, -inf }
 0x273   : > { %1555 = vmax.xlane.f32.xlu1 %v1554_v32  ;;  %v8142_v55 = vpack.c.bf16 %v1062_v37, %v1062_v37  ;;  %v1142_v32 = vpop.f32.mrf.mxu2  ;;  %v8155_v37 = vpack.c.bf16 %v1133_v63, %v1133_v63  ;;  %v8172_v10 = vpack.c.bf16 %v1135_v33, %v1135_v33 }
 0x275   : > { %1783 = vmatpush.bf16.msra.mxu3 %v1774_v29  ;;  %12095 = vst [vmem:[#allocation26_spill] sm:$0xff] %v8142_v55  ;;  %v1793_v17 = vsel %vm1753_vm5, %v8155_v37, 0 }
 0x276   : > { %v1296_v59 = vpop.f32.mrf.mxu3  ;;  %12096 = vst [vmem:[#allocation27_spill] sm:$0xff] %v8155_v37 }
 0x277   : > { %12099 = vst [vmem:[#allocation30_spill] sm:$0xff] %v8172_v10 }
 0x27b   : > { %v1144_v53 = vpop.f32.mrf.mxu2 }
 0x27c   : > { %6189 = vmatmul.msk.bf16.vlgmr.msrb.gmra.mxu3 %vm1202_vm9, %v8142_v55 }
 0x27d   : > { %1859 = vmatpush.bf16.msrb.mxu3 %v1850_v23  ;;  %v1143_v23 = vadd.f32 %v1142_v32, %v8072_v25 }
 0x27e   : > { %v1313_v29 = vpop.f32.mrf.mxu3 }
 0x283   : > { %v8148_v45 = vpop.f32.mrf.mxu2 }
 0x286   : > { %v1315_v42 = vpop.f32.mrf.mxu3 }
 0x28b   : > { %v8150_v15 = vpop.f32.mrf.mxu2 }
 0x293   : > { %v8160_v42 = vpop.f32.mrf.mxu2 }
 0x29b   : > { %v8187_v31 = vpop.f32.mrf.mxu2 }
 0x2b4   : > { %v1113_v28 = vpop.f32.mrf.mxu1  ;;  %v1064_v47 = vpop.f32.mrf.mxu0 }
 0x2b5   : > { %v1114_v59 = vadd.f32 %v1113_v28, %v7838_v48  ;;  %v1065_v63 = vadd.f32 %v1064_v47, %v7898_v41 }
 0x2b7   : > { %v8157_v50 = vpack.c.bf16 %v1114_v59, %v1114_v59  ;;  %v8169_v59 = vpack.c.bf16 %v1143_v23, %v1143_v23  ;;  %v8174_v7 = vpack.c.bf16 %v1065_v63, %v1065_v63 }
 0x2b9   : > { %12097 = vst [vmem:[#allocation28_spill] sm:$0xff] %v8157_v50  ;;  %v1473_v46 = vsel %vm1202_vm9, %v8157_v50, 0  ;;  %v1869_v2 = vsel %vm1753_vm5, %v8169_v59, 0 }
 0x2ba   : > { %1482 = vmatpush.bf16.xpose.msra.mxu0 %v1473_v46  ;;  %12098 = vst [vmem:[#allocation29_spill] sm:$0xff] %v8169_v59  ;;  %v1145_v46 = vadd.f32 %v1144_v53, %v8072_v25 }
 0x2bb   : > { %12100 = vst [vmem:[#allocation31_spill] sm:$0xff] %v8174_v7 }
 0x2bc   : > { %v1115_v28 = vpop.f32.mrf.mxu1  ;;  %v1066_v8 = vpop.f32.mrf.mxu0  ;;  %v8190_v63 = vpack.c.bf16 %v1145_v46, %v1145_v46 }
 0x2bd   : > { %v1116_v32 = vadd.f32 %v1115_v28, %v7838_v48  ;;  %v1812_v48 = vsel %vm1753_vm5, %v8172_v10, 0  ;;  %v1067_v23 = vadd.f32 %v1066_v8, %v7898_v41 }
 0x2be   : > { %12102 = vst [vmem:[#allocation33_spill] sm:$0xff] %v8190_v63  ;;  %v1888_v8 = vsel %vm1753_vm5, %v8190_v63, 0 }
 0x2bf   : > { %v8176_v4 = vpack.c.bf16 %v1116_v32, %v1116_v32  ;;  %v1332_v47 = vpop.f32.mrf.mxu3  ;;  %v8192_v28 = vpack.c.bf16 %v1067_v23, %v1067_v23 }
 0x2c1   : > { %12101 = vst [vmem:[#allocation32_spill] sm:$0xff] %v8176_v4  ;;  %6190 = vmatmul.msk.bf16.vlgmr.msra.gmra.mxu0 %vm1202_vm9, %v8174_v7  ;;  %v1547_v7 = vpop.xlane.xlu0 %1546 }
 0x2c2   : > { %1802 = vmatpush.bf16.msrb.mxu0 %v1793_v17  ;;  %v1492_v17 = vsel %vm1202_vm9, %v8176_v4, 0  ;;  %12103 = vst [vmem:[#allocation34_spill] sm:$0xff] %v8192_v28 }
 0x2c3   : > { %1501 = vmatpush.bf16.xpose.msrb.mxu1 %v1492_v17  ;;  %v1512_v17 = vmul.f32 0.125, %v1313_v29 }
 0x2c4   : > { %v1218_v33 = vpop.f32.mrf.mxu1 }
 0x2c5   : > { %v1507_v53 = vmul.f32 0.125, %v1218_v33  ;;  %v8208_v23 = vsel %vm1169_vm3, %v1512_v17, -1e+30 }
 0x2c6   : > { %1878 = vmatpush.bf16.msra.mxu0 %v1869_v2  ;;  %v1557_v33 = vsel %vm1541_vm4, %v8208_v23, -inf }
 0x2c7   : > { %v8196_v32 = vsel %vm1169_vm3, %v1507_v53, -1e+30  ;;  %v1334_v41 = vpop.f32.mrf.mxu3 }
 0x2c8   : > { %v1542_v2 = vsel %vm1541_vm4, %v8196_v32, -inf }
 0x2c9   : > { %1543 = vmax.xlane.f32.xlu2 %v1542_v2 }
 0x2ca   : > { %6191 = vmatmul.msk.bf16.vlgmr.msrb.gmra.mxu1 %vm1202_vm9, %v8192_v28 }
 0x2cb   : > { %1821 = vmatpush.bf16.msra.mxu1 %v1812_v48  ;;  %v8204_v48 = vpop.f32.mrf.mxu2 }
 0x2cc   : > { %v1220_v46 = vpop.f32.mrf.mxu1 }
 0x2cd   : > { %v1513_v46 = vmul.f32 0.125, %v1332_v47 }
 0x2cf   : > { %1897 = vmatpush.bf16.msrb.mxu1 %v1888_v8  ;;  %v1351_v29 = vpop.f32.mrf.mxu3 }
 0x2d0   : > { %v1514_v47 = vmul.f32 0.125, %v1351_v29 }
 0x2d1   : > { %1558 = vmax.xlane.f32.xlu2 %v1557_v33 }
 0x2d3   : > { %v8212_v53 = vpop.f32.mrf.mxu2 }
 0x2d7   : > { %v1353_v2 = vpop.f32.mrf.mxu3 }
 0x2d8   : > { %v8224_v2 = vsel %vm1169_vm3, %v1513_v46, -1e+30  ;;  %v8238_v46 = vsel %vm1169_vm3, %v1514_v47, -1e+30  ;;  %v1550_v47 = vpop.xlane.xlu0 %1549 }
 0x2d9   : > { %v1408_v5 = vpop.f32.mrf.mxu0  ;;  %v1560_v26 = vsel %vm1541_vm4, %v8224_v2, -inf }
 0x2da   : > { %v1517_v3 = vmul.f32 0.125, %v1408_v5 }
 0x2db   : > { %v8218_v41 = vpop.f32.mrf.mxu2 }
 0x2dc   : > { %v8216_v8 = vsel %vm1169_vm3, %v1517_v3, -1e+30 }
 0x2dd   : > { %v1572_v17 = vsel %vm1541_vm4, %v8216_v8, -inf }
 0x2de   : > { %1573 = vmax.xlane.f32.xlu1 %v1572_v17 }
 0x2df   : > { %v1370_v63 = vpop.f32.mrf.mxu3 }
 0x2e0   : > { %v1515_v28 = vmul.f32 0.125, %v1370_v63 }
 0x2e1   : > { %v1410_v58 = vpop.f32.mrf.mxu0  ;;  %v1427_v33 = vpop.f32.mrf.mxu1 }
 0x2e2   : > { %v1518_v59 = vmul.f32 0.125, %v1427_v33 }
 0x2e3   : > { %v8234_v58 = vpop.f32.mrf.mxu2 }
 0x2e4   : > { %v8228_v5 = vsel %vm1169_vm3, %v1518_v59, -1e+30  ;;  %v1563_v59 = vsel %vm1541_vm4, %v8238_v46, -inf }
 0x2e5   : > { %v1575_v3 = vsel %vm1541_vm4, %v8228_v5, -inf }
 0x2e6   : > { %1576 = vmax.xlane.f32.xlu2 %v1575_v3  ;;  %1561 = vmax.xlane.f32.xlu1 %v1560_v26 }
 0x2e7   : > { %v1372_v17 = vpop.f32.mrf.mxu3 }
 0x2e9   : > { %v1429_v33 = vpop.f32.mrf.mxu1 }
 0x2ee   : > { %1564 = vmax.xlane.f32.xlu2 %v1563_v59  ;;  %v1592_v59 = vsub.f32 %v8058_v57, %v1550_v47 }
 0x2ef   : > { %v1446_v10 = vpop.f32.mrf.mxu2  ;;  %v1389_v19 = vpop.f32.mrf.mxu3 }
 0x2f0   : > { %v1519_v12 = vmul.f32 0.125, %v1446_v10  ;;  %v1516_v3 = vmul.f32 0.125, %v1389_v19 }
 0x2f2   : > { %v8244_v29 = vsel %vm1169_vm3, %v1519_v12, -1e+30  ;;  %v8250_v55 = vsel %vm1169_vm3, %v1516_v3, -1e+30  ;;  %v1610_v12 = vmul.f32 1.442695, %v1592_v59  ;;  %v1591_v59 = vsub.f32 %v8031_v61, %v1547_v7 }
 0x2f3   : > { %v1578_v26 = vsel %vm1541_vm4, %v8244_v29, -inf  ;;  %v1569_v10 = vsel %vm1541_vm4, %v8250_v55, -inf }
 0x2f4   : > { %1579 = vmax.xlane.f32.xlu0 %v1578_v26  ;;  %6884 = vpow2.f32 %v1610_v12 }
 0x2f7   : > { %v1448_v17 = vpop.f32.mrf.mxu2  ;;  %v1391_v33 = vpop.f32.mrf.mxu3 }
 0x2f8   : > { %v8265_v33 = vpop.xlane.xlu1 %1552 }
 0x2fa   : > { %v8261_v17 = vpop.eup %6884 }
 0x2fb   : > { %v1644_v57 = vsel %vm1541_vm4, %v8261_v17, 0.0 }
 0x2fc   : > { %1570 = vmax.xlane.f32.xlu0 %v1569_v10 }
 0x2ff   : > { %v1465_v37 = vpop.f32.mrf.mxu3 }
 0x300   : > { %v1520_v4 = vmul.f32 0.125, %v1465_v37  ;;  %v1556_v30 = vpop.xlane.xlu1 %1555 }
 0x302   : > { %v8257_v19 = vsel %vm1169_vm3, %v1520_v4, -1e+30 }
 0x303   : > { %v1581_v26 = vsel %vm1541_vm4, %v8257_v19, -inf }
 0x304   : > { %1582 = vmax.xlane.f32.xlu1 %v1581_v26 }
 0x307   : > { %v1467_v3 = vpop.f32.mrf.mxu3 }
 0x308   : > { %v1608_v3 = vmul.f32 1.442695, %v1591_v59 }
 0x30a   : > { %6886 = vpow2.f32 %v1608_v3 }
 0x30c   : > { %1645 = vadd.xlane.f32.xlu1 %v1644_v57 }
 0x33c   : > { %v1544_v47 = vpop.xlane.xlu2 %1543 }
 0x33d   : > { %v1590_v4 = vsub.f32 %v8196_v32, %v1544_v47  ;;  %v8278_v47 = vsel %vm1169_vm3, %v1515_v28, -1e+30 }
 0x33e   : > { %v1484_v37 = vpop.f32.mrf.mxu0 }
 0x33f   : > { %v1521_v10 = vmul.f32 0.125, %v1484_v37  ;;  %v1606_v57 = vmul.f32 1.442695, %v1590_v4  ;;  %v1594_v37 = vsub.f32 %v8134_v56, %v1556_v30 }
 0x341   : > { %v8271_v12 = vsel %vm1169_vm3, %v1521_v10, -1e+30  ;;  %6888 = vpow2.f32 %v1606_v57  ;;  %v1614_v28 = vmul.f32 1.442695, %v1594_v37 }
 0x342   : > { %v1584_v26 = vsel %vm1541_vm4, %v8271_v12, -inf }
 0x343   : > { %1585 = vmax.xlane.f32.xlu2 %v1584_v26 }
 0x344   : > { %v1559_v35 = vpop.xlane.xlu2 %1558 }
 0x345   : > { %v1595_v50 = vsub.f32 %v8208_v23, %v1559_v35 }
 0x346   : > { %v1486_v22 = vpop.f32.mrf.mxu0 }
 0x347   : > { %v1503_v7 = vpop.f32.mrf.mxu1  ;;  %v1616_v61 = vmul.f32 1.442695, %v1595_v50  ;;  %v1566_v22 = vsel %vm1541_vm4, %v8278_v47, -inf  ;;  %v8289_v50 = vpop.eup %6886 }
 0x348   : > { %v1522_v32 = vmul.f32 0.125, %v1503_v7  ;;  %v8291_v23 = vpop.eup %6888  ;;  %v1641_v4 = vsel %vm1541_vm4, %v8289_v50, 0.0 }
 0x349   : > { %6890 = vpow2.f32 %v1616_v61  ;;  %v1638_v10 = vsel %vm1541_vm4, %v8291_v23, 0.0 }
 0x34a   : > { %v8283_v63 = vsel %vm1169_vm3, %v1522_v32, -1e+30  ;;  %6892 = vpow2.f32 %v1614_v28 }
 0x34b   : > { %v1587_v35 = vsel %vm1541_vm4, %v8283_v63, -inf  ;;  %1567 = vmax.xlane.f32.xlu2 %v1566_v22 }
 0x34c   : > { %1588 = vmax.xlane.f32.xlu0 %v1587_v35 }
 0x34f   : > { %v1505_v59 = vpop.f32.mrf.mxu1  ;;  %v8293_v30 = vpop.eup %6890 }
 0x350   : > { %v1653_v56 = vsel %vm1541_vm4, %v8293_v30, 0.0  ;;  %v8302_v7 = vpop.eup %6892 }
 0x351   : > { %1654 = vadd.xlane.f32.xlu1 %v1653_v56  ;;  %v1574_v26 = vpop.xlane.xlu1 %1573  ;;  %v1650_v61 = vsel %vm1541_vm4, %v8302_v7, 0.0  ;;  %v2061_v56 = vunpack.c.l.b16 %v7850_v14 }
 0x352   : > { %v1600_v3 = vsub.f32 %v8216_v8, %v1574_v26 }
 0x353   : > { %1639 = vadd.xlane.f32.xlu2 %v1638_v10 }
 0x354   : > { %1642 = vadd.xlane.f32.xlu0 %v1641_v4  ;;  %v1626_v57 = vmul.f32 1.442695, %v1600_v3 }
 0x356   : > { %6894 = vpow2.f32 %v1626_v57 }
 0x359   : > { %v1577_v32 = vpop.xlane.xlu2 %1576 }
 0x35a   : > { %v1601_v37 = vsub.f32 %v8228_v5, %v1577_v32  ;;  %v2062_v5 = vpack.c.b16 %v2061_v56, %v2061_v56 }
 0x35c   : > { %1651 = vadd.xlane.f32.xlu0 %v1650_v61  ;;  %v1628_v35 = vmul.f32 1.442695, %v1601_v37  ;;  %v8307_v22 = vpop.eup %6894 }
 0x35d   : > { %v1668_v28 = vsel %vm1541_vm4, %v8307_v22, 0.0 }
 0x35e   : > { %6896 = vpow2.f32 %v1628_v35 }
 0x361   : > { %v1565_v8 = vpop.xlane.xlu2 %1564 }
 0x362   : > { %v1597_v59 = vsub.f32 %v8238_v46, %v1565_v8  ;;  %v1562_v46 = vpop.xlane.xlu1 %1561 }
 0x364   : > { %1669 = vadd.xlane.f32.xlu0 %v1668_v28  ;;  %v8313_v10 = vpop.eup %6896  ;;  %v1620_v4 = vmul.f32 1.442695, %v1597_v59  ;;  %v1153_v59 = vadd.f32 %v8160_v42, %v8072_v25 }
 0x365   : > { %v1671_v26 = vsel %vm1541_vm4, %v8313_v10, 0.0 }
 0x366   : > { %6898 = vpow2.f32 %v1620_v4  ;;  %1672 = vadd.xlane.f32.xlu1 %v1671_v26  ;;  %v8331_v26 = vpack.c.bf16 %v1153_v59, %v1153_v59 }
 0x367   : > { %v1580_v3 = vpop.xlane.xlu0 %1579 }
 0x368   : > { %v1602_v57 = vsub.f32 %v8244_v29, %v1580_v3  ;;  %v1593_v29 = vsub.f32 %v8093_v36, %v8265_v33 }
 0x36a   : > { %v1630_v61 = vmul.f32 1.442695, %v1602_v57  ;;  %v1612_v56 = vmul.f32 1.442695, %v1593_v29 }
 0x36b   : > { %2063 = vrot.lane.b32.xlu2 %v2062_v5, %s7311_s26  ;;  %v1596_v5 = vsub.f32 %v8224_v2, %v1562_v46 }
 0x36c   : > { %v8319_v32 = vpop.eup %6898  ;;  %6900 = vpow2.f32 %v1630_v61  ;;  %v1945_v61 = vsel %vm1753_vm5, %v8331_v26, 0 }
 0x36d   : > { %v1659_v14 = vsel %vm1541_vm4, %v8319_v32, 0.0 }
 0x36e   : > { %1660 = vadd.xlane.f32.xlu0 %v1659_v14  ;;  %v1618_v14 = vmul.f32 1.442695, %v1596_v5 }
 0x372   : > { %v8323_v37 = vpop.eup %6900 }
 0x373   : > { %v1674_v35 = vsel %vm1541_vm4, %v8323_v37, 0.0 }
 0x374   : > { %1675 = vadd.xlane.f32.xlu1 %v1674_v35  ;;  %v1571_v35 = vpop.xlane.xlu0 %1570 }
 0x375   : > { %v1599_v59 = vsub.f32 %v8250_v55, %v1571_v35 }
 0x377   : > { %v1583_v28 = vpop.xlane.xlu1 %1582 }
 0x378   : > { %v1603_v35 = vsub.f32 %v8257_v19, %v1583_v28 }
 0x37f   : > { %v1646_v8 = vpop.xlane.xlu1 %1645 }
 0x380   : > { %6902 = vrcp.f32 %v1646_v8 }
 0x381   : > { %6904 = vpow2.f32 %v1612_v56 }
 0x382   : > { %6906 = vpow2.f32 %v1618_v14 }
 0x386   : > { %v6903_v4 = vpop.eup %6902 }
 0x387   : > { %v1704_v3 = vmul.f32 %v6903_v4, %v8261_v17  ;;  %v8338_v36 = vpop.eup %6904  ;;  %v2085_v17 = vunpack.c.l.b16 %v7909_v0  ;;  %v1624_v4 = vmul.f32 1.442695, %v1599_v59 }
 0x388   : > { %v1647_v42 = vsel %vm1541_vm4, %v8338_v36, 0.0  ;;  %v8342_v33 = vpop.eup %6906 }
 0x389   : > { %v1720_v57 = vpack.c.bf16 %v1704_v3, %v1704_v3  ;;  %v1656_v2 = vsel %vm1541_vm4, %v8342_v33, 0.0  ;;  %v2086_v46 = vpack.c.b16 %v2085_v17, %v2085_v17 }
 0x38b   : > { %6194 = vmatmul.msk.bf16.vlgmr.msrb.gmra.mxu0 %vm1541_vm4, %v1720_v57 }
 0x38c   : > { %1954 = vmatpush.bf16.msrb.mxu0 %v1945_v61 }
 0x394   : > { %1648 = vadd.xlane.f32.xlu2 %v1647_v42 }
 0x39c   : > { %1657 = vadd.xlane.f32.xlu2 %v1656_v2 }
 0x3b4   : > { %2087 = vrot.lane.b32.xlu2 %v2086_v46, %s7311_s26 }
 0x3b6   : > { %v1586_v29 = vpop.xlane.xlu2 %1585 }
 0x3b7   : > { %v1604_v8 = vsub.f32 %v8271_v12, %v1586_v29 }
 0x3b9   : > { %v1634_v56 = vmul.f32 1.442695, %v1604_v8  ;;  %v1150_v8 = vadd.f32 %v8150_v15, %v8072_v25 }
 0x3bb   : > { %6908 = vpow2.f32 %v1634_v56  ;;  %v8372_v19 = vpack.c.bf16 %v1150_v8, %v1150_v8 }
 0x3bc   : > { %6910 = vpow2.f32 %v1624_v4 }
 0x3be   : > { %v1568_v5 = vpop.xlane.xlu2 %1567 }
 0x3bf   : > { %v1589_v3 = vpop.xlane.xlu0 %1588  ;;  %v1598_v57 = vsub.f32 %v8278_v47, %v1568_v5  ;;  %v1148_v47 = vadd.f32 %v8148_v45, %v8072_v25  ;;  %v1632_v5 = vmul.f32 1.442695, %v1603_v35  ;;  %v1158_v35 = vadd.f32 %v8204_v48, %v8072_v25 }
 0x3c0   : > { %v1605_v14 = vsub.f32 %v8283_v63, %v1589_v3  ;;  %v2177_v48 = vunpack.c.l.b16 %v7953_v51  ;;  %v2119_v51 = vunpack.c.l.b16 %v7911_v40  ;;  %v2148_v40 = vunpack.c.l.b16 %v7938_v21 }
 0x3c1   : > { %v8351_v61 = vpop.eup %6908  ;;  %v1622_v0 = vmul.f32 1.442695, %v1598_v57  ;;  %v8369_v4 = vpack.c.bf16 %v1148_v47, %v1148_v47  ;;  %v2293_v21 = vunpack.c.l.b16 %v8033_v20  ;;  %v1155_v20 = vadd.f32 %v8187_v31, %v8072_v25 }
 0x3c2   : > { %v1680_v42 = vsel %vm1541_vm4, %v8351_v61, 0.0  ;;  %v1636_v12 = vmul.f32 1.442695, %v1605_v14  ;;  %v8356_v17 = vpop.eup %6910  ;;  %v2351_v31 = vunpack.c.l.b16 %v8060_v62 }
 0x3c3   : > { %6912 = vpow2.f32 %v1622_v0  ;;  %1681 = vadd.xlane.f32.xlu1 %v1680_v42  ;;  %v1665_v29 = vsel %vm1541_vm4, %v8356_v17, 0.0  ;;  %v1907_v15 = vsel %vm1753_vm5, %v8369_v4, 0 }
 0x3c4   : > { %v1655_v14 = vpop.xlane.xlu1 %1654 }
 0x3c6   : > { %v1640_v55 = vpop.xlane.xlu2 %1639 }
 0x3c7   : > { %v1643_v2 = vpop.xlane.xlu0 %1642  ;;  %6914 = vrcp.f32 %v1640_v55 }
 0x3c8   : > { %6916 = vrcp.f32 %v1643_v2  ;;  %v2090_v2 = vunpack.c.l.b16 %v7885_v60 }
 0x3c9   : > { %v8358_v46 = vpop.eup %6912  ;;  %6918 = vpow2.f32 %v1636_v12 }
 0x3ca   : > { %v1662_v63 = vsel %vm1541_vm4, %v8358_v46, 0.0  ;;  %6920 = vpow2.f32 %v1632_v5  ;;  %v8396_v5 = vpack.c.bf16 %v1158_v35, %v1158_v35  ;;  %v2201_v35 = vunpack.c.l.b16 %v7995_v13 }
 0x3cb   : > { %1663 = vadd.xlane.f32.xlu0 %v1662_v63  ;;  %1666 = vadd.xlane.f32.xlu1 %v1665_v29  ;;  %v1160_v63 = vadd.f32 %v8212_v53, %v8072_v25 }
 0x3cc   : > { %v1983_v53 = vsel %vm1753_vm5, %v8396_v5, 0 }
 0x3cd   : > { %v6915_v59 = vpop.eup %6914 }
 0x3ce   : > { %v6917_v56 = vpop.eup %6916  ;;  %v1702_v45 = vmul.f32 %v6915_v59, %v8291_v23  ;;  %v1926_v23 = vsel %vm1753_vm5, %v8372_v19, 0 }
 0x3cf   : > { %v1703_v28 = vmul.f32 %v6917_v56, %v8289_v50  ;;  %v8375_v3 = vpop.eup %6918  ;;  %v1652_v0 = vpop.xlane.xlu0 %1651  ;;  %v2091_v56 = vpack.c.b16 %v2090_v2, %v2090_v2 }
 0x3d0   : > { %v1718_v57 = vpack.c.bf16 %v1702_v45, %v1702_v45  ;;  %6922 = vrcp.f32 %v1652_v0  ;;  %v1683_v50 = vsel %vm1541_vm4, %v8375_v3, 0.0  ;;  %v8385_v12 = vpop.eup %6920  ;;  %v8398_v45 = vpack.c.bf16 %v1160_v63, %v1160_v63 }
 0x3d1   : > { %v1719_v42 = vpack.c.bf16 %v1703_v28, %v1703_v28  ;;  %6924 = vrcp.f32 %v1655_v14  ;;  %v1677_v8 = vsel %vm1541_vm4, %v8385_v12, 0.0  ;;  %v2120_v14 = vpack.c.b16 %v2119_v51, %v2119_v51 }
 0x3d2   : > { %6192 = vmatmul.msk.bf16.vlgmr.msra.gmra.mxu2 %vm1541_vm4, %v1718_v57  ;;  %v2056_v57 = vunpack.c.l.b16 %v8037_v9  ;;  %v2264_v9 = vunpack.c.l.b16 %v8014_v44  ;;  %v2230_v63 = vunpack.c.l.b16 %v8019_v38  ;;  %v2259_v38 = vunpack.c.l.b16 %v8047_v39 }
 0x3d3   : > { %6193 = vmatmul.msk.bf16.vlgmr.msra.gmra.mxu3 %vm1541_vm4, %v1719_v42  ;;  %1916 = vmatpush.bf16.msra.mxu2 %v1907_v15  ;;  %v2114_v42 = vunpack.c.l.b16 %v7956_v43  ;;  %v2206_v15 = vunpack.c.l.b16 %v7977_v49  ;;  %v2143_v43 = vunpack.c.l.b16 %v7980_v27  ;;  %v2294_v27 = vpack.c.b16 %v2293_v21, %v2293_v21 }
 0x3d4   : > { %1935 = vmatpush.bf16.msra.mxu3 %v1926_v23  ;;  %1684 = vadd.xlane.f32.xlu1 %v1683_v50  ;;  %v2057_v0 = vpack.c.b16 %v2056_v57, %v2056_v57  ;;  %v2172_v23 = vunpack.c.l.b16 %v7990_v24  ;;  %v2265_v49 = vpack.c.b16 %v2264_v9, %v2264_v9  ;;  %v2231_v44 = vpack.c.b16 %v2230_v63, %v2230_v63  ;;  %v12105_v63 = vld [vmem:[#allocation28_spill] sm:$0xff] }
 0x3d5   : > { %v2115_v50 = vpack.c.b16 %v2114_v42, %v2114_v42  ;;  %v2144_v24 = vpack.c.b16 %v2143_v43, %v2143_v43  ;;  %v2409_v39 = vunpack.c.l.b16 %v8097_v16  ;;  %v2467_v21 = vunpack.c.l.b16 %v12105_v63 }
 0x3d6   : > { %v6923_v55 = vpop.eup %6922  ;;  %v2173_v2 = vpack.c.b16 %v2172_v23, %v2172_v23 }
 0x3d7   : > { %v6925_v47 = vpop.eup %6924  ;;  %v1706_v29 = vmul.f32 %v6923_v55, %v8302_v7  ;;  %v2178_v7 = vpack.c.b16 %v2177_v48, %v2177_v48  ;;  %v2207_v55 = vpack.c.b16 %v2206_v15, %v2206_v15  ;;  %v2410_v42 = vpack.c.b16 %v2409_v39, %v2409_v39 }
 0x3d8   : > { %v1707_v59 = vmul.f32 %v6925_v47, %v8293_v30  ;;  %v2002_v30 = vsel %vm1753_vm5, %v8398_v45, 0  ;;  %v2149_v47 = vpack.c.b16 %v2148_v40, %v2148_v40  ;;  %v1163_v15 = vadd.f32 %v8218_v41, %v8072_v25 }
 0x3d9   : > { %v1722_v60 = vpack.c.bf16 %v1706_v29, %v1706_v29  ;;  %v8426_v29 = vpop.permute.xlu2 %2063  ;;  %v2438_v40 = vunpack.c.l.b16 %v8118_v54 }
 0x3da   : > { %v1723_v28 = vpack.c.bf16 %v1707_v59, %v1707_v59  ;;  %v2235_v59 = vunpack.c.l.b16 %v8008_v11  ;;  %v2260_v11 = vpack.c.b16 %v2259_v38, %v2259_v38  ;;  %v8458_v41 = vpack.c.bf16 %v1163_v15, %v1163_v15 }
 0x3db   : > { %v2439_v54 = vpack.c.b16 %v2438_v40, %v2438_v40  ;;  %v12113_v40 = vld [vmem:[#allocation22_spill] sm:$0xff] }
 0x3dc   : > { %v2236_v48 = vpack.c.b16 %v2235_v59, %v2235_v59 }
 0x3dd   : > { %1678 = vadd.xlane.f32.xlu2 %v1677_v8  ;;  %v2202_v8 = vpack.c.b16 %v2201_v35, %v2201_v35 }
 0x3df   : > { %2092 = vrot.lane.b32.xlu0 %v2091_v56, %s7311_s26  ;;  %v2317_v56 = vunpack.c.l.b16 %v8120_v18 }
 0x3e2   : > { %6196 = vmatmul.msk.bf16.vlgmr.msrb.gmra.mxu2 %vm1541_vm4, %v1722_v60  ;;  %v1670_v60 = vpop.xlane.xlu0 %1669 }
 0x3e3   : > { %6197 = vmatmul.msk.bf16.vlgmr.msrb.gmra.mxu3 %vm1541_vm4, %v1723_v28  ;;  %1992 = vmatpush.bf16.msrb.mxu2 %v1983_v53  ;;  %v2318_v53 = vpack.c.b16 %v2317_v56, %v2317_v56  ;;  %v2468_v56 = vpack.c.b16 %v2467_v21, %v2467_v21 }
 0x3e4   : > { %2011 = vmatpush.bf16.msrb.mxu3 %v2002_v30  ;;  %v2322_v30 = vunpack.c.l.b16 %v8045_v34 }
 0x3e6   : > { %v2323_v16 = vpack.c.b16 %v2322_v30, %v2322_v30 }
 0x3e7   : > { %2179 = vrot.lane.b32.xlu0 %v2178_v7, %s7311_s26  ;;  %v8443_v7 = vpack.c.bf16 %v1155_v20, %v1155_v20 }
 0x3e9   : > { %v1964_v34 = vsel %vm1753_vm5, %v8443_v7, 0 }
 0x3ed   : > { %2058 = vrot.lane.b32.xlu1 %v2057_v0, %s7311_s26  ;;  %v1661_v0 = vpop.xlane.xlu0 %1660 }
 0x3ef   : > { %2121 = vrot.lane.b32.xlu0 %v2120_v14, %s7311_s26 }
 0x3f5   : > { %2116 = vrot.lane.b32.xlu1 %v2115_v50, %s7311_s26  ;;  %2208 = vrot.lane.b32.xlu2 %v2207_v55, %s7311_s26  ;;  %v2288_v50 = vunpack.c.l.b16 %v8078_v52  ;;  %v2375_v55 = vunpack.c.l.b16 %v8095_v6 }
 0x3f7   : > { %2174 = vrot.lane.b32.xlu0 %v2173_v2, %s7311_s26  ;;  %v2376_v52 = vpack.c.b16 %v2375_v55, %v2375_v55 }
 0x3fd   : > { %2266 = vrot.lane.b32.xlu1 %v2265_v49, %s7311_s26  ;;  %2150 = vrot.lane.b32.xlu2 %v2149_v47, %s7311_s26  ;;  %v2289_v49 = vpack.c.b16 %v2288_v50, %v2288_v50  ;;  %v2021_v47 = vsel %vm1753_vm5, %v8458_v41, 0 }
 0x3ff   : > { %2145 = vrot.lane.b32.xlu0 %v2144_v24, %s7311_s26  ;;  %v1165_v24 = vadd.f32 %v8234_v58, %v8072_v25  ;;  %v12106_v25 = vld [vmem:[#allocation24_spill] sm:$0xff] }
 0x400   : > { %v2404_v58 = vunpack.c.l.b16 %v12106_v25  ;;  %v12116_v25 = vld [vmem:[#allocation23_spill] sm:$0xff] }
 0x402   : > { %v2405_v38 = vpack.c.b16 %v2404_v58, %v2404_v58  ;;  %v2768_v58 = vunpack.c.l.b16 %v12116_v25 }
 0x405   : > { %2232 = vrot.lane.b32.xlu1 %v2231_v44, %s7311_s26  ;;  %2203 = vrot.lane.b32.xlu2 %v2202_v8, %s7311_s26  ;;  %v8473_v44 = vpack.c.bf16 %v1165_v24, %v1165_v24  ;;  %v1673_v8 = vpop.xlane.xlu1 %1672 }
 0x407   : > { %v1649_v13 = vpop.xlane.xlu2 %1648  ;;  %2295 = vrot.lane.b32.xlu0 %v2294_v27, %s7311_s26 }
 0x408   : > { %6926 = vrcp.f32 %v1649_v13  ;;  %v8438_v28 = vpop.f32.mrf.mxu0 }
 0x40d   : > { %2319 = vrot.lane.b32.xlu1 %v2318_v53, %s7311_s26  ;;  %2237 = vrot.lane.b32.xlu2 %v2236_v48, %s7311_s26  ;;  %v12107_v48 = vld [vmem:[#allocation19_spill] sm:$0xff]  ;;  %v12108_v53 = vld [vmem:[#allocation34_spill] sm:$0xff] }
 0x40e   : > { %v6927_v18 = vpop.eup %6926  ;;  %v2346_v20 = vunpack.c.l.b16 %v12107_v48 }
 0x40f   : > { %v1705_v57 = vmul.f32 %v6927_v18, %v8338_v36  ;;  %v1658_v51 = vpop.xlane.xlu2 %1657  ;;  %2261 = vrot.lane.b32.xlu0 %v2260_v11, %s7311_s26  ;;  %v2352_v36 = vpack.c.b16 %v2351_v31, %v2351_v31  ;;  %v2491_v11 = vunpack.c.l.b16 %v12108_v53  ;;  %v12109_v18 = vld [vmem:[#allocation32_spill] sm:$0xff] }
 0x410   : > { %6928 = vrcp.f32 %v1658_v51  ;;  %v1806_v23 = vpop.f32.mrf.mxu0  ;;  %v2496_v30 = vunpack.c.l.b16 %v12109_v18  ;;  %v2347_v51 = vpack.c.b16 %v2346_v20, %v2346_v20 }
 0x411   : > { %v1721_v14 = vpack.c.bf16 %v1705_v57, %v1705_v57  ;;  %6930 = vrcp.f32 %v1661_v0  ;;  %v2492_v31 = vpack.c.b16 %v2491_v11, %v2491_v11  ;;  %v12111_v23 = vld [vmem:[#allocation26_spill] sm:$0xff] }
 0x412   : > { %6932 = vrcp.f32 %v1670_v60  ;;  %v2497_v0 = vpack.c.b16 %v2496_v30, %v2496_v30 }
 0x413   : > { %6195 = vmatmul.msk.bf16.vlgmr.msra.gmra.mxu1 %vm1541_vm4, %v1721_v14  ;;  %6934 = vrcp.f32 %v1673_v8  ;;  %v1676_v14 = vpop.xlane.xlu1 %1675  ;;  %v12117_v8 = vld [vmem:[#allocation29_spill] sm:$0xff] }
 0x414   : > { %1973 = vmatpush.bf16.msra.mxu1 %v1964_v34  ;;  %v2433_v34 = vunpack.c.l.b16 %v12111_v23 }
 0x415   : > { %2411 = vrot.lane.b32.xlu1 %v2410_v42, %s7311_s26  ;;  %2324 = vrot.lane.b32.xlu2 %v2323_v16, %s7311_s26  ;;  %v12110_v42 = vld [vmem:[#allocation27_spill] sm:$0xff]  ;;  %v12112_v16 = vld [vmem:[#allocation21_spill] sm:$0xff] }
 0x416   : > { %v6929_v62 = vpop.eup %6928  ;;  %v2792_v15 = vunpack.c.l.b16 %v12110_v42  ;;  %v2434_v55 = vpack.c.b16 %v2433_v34, %v2433_v34  ;;  %v2960_v34 = vunpack.c.l.b16 %v8372_v19 }
 0x417   : > { %v1708_v2 = vmul.f32 %v6929_v62, %v8342_v33  ;;  %2353 = vrot.lane.b32.xlu0 %v2352_v36, %s7311_s26  ;;  %v6931_v43 = vpop.eup %6930  ;;  %v12104_v33 = vld [vmem:[#allocation20_spill] sm:$0xff]  ;;  %v2744_v36 = vunpack.c.l.b16 %v12112_v16  ;;  %v2088_v11 = vpop.permute.xlu2 %2087 }
 0x418   : > { %v1709_v6 = vmul.f32 %v6931_v43, %v8319_v32  ;;  %v2380_v35 = vunpack.c.l.b16 %v12104_v33  ;;  %v6933_v59 = vpop.eup %6932  ;;  %v2040_v32 = vsel %vm1753_vm5, %v8473_v44, 0  ;;  %v2793_v50 = vpack.c.b16 %v2792_v15, %v2792_v15  ;;  %v12114_v43 = vld [vmem:[#allocation31_spill] sm:$0xff] }
 0x419   : > { %v1724_v9 = vpack.c.bf16 %v1708_v2, %v1708_v2  ;;  %v1712_v60 = vmul.f32 %v6933_v59, %v8307_v22  ;;  %v6935_v57 = vpop.eup %6934 }
 0x41a   : > { %v1725_v27 = vpack.c.bf16 %v1709_v6, %v1709_v6  ;;  %v2381_v13 = vpack.c.b16 %v2380_v35, %v2380_v35  ;;  %v1713_v22 = vmul.f32 %v6935_v57, %v8313_v10  ;;  %v2745_v10 = vpack.c.b16 %v2744_v36, %v2744_v36 }
 0x41b   : > { %6198 = vmatmul.msk.bf16.vlgmr.msra.gmra.mxu0 %vm1541_vm4, %v1724_v9  ;;  %v1728_v39 = vpack.c.bf16 %v1712_v60, %v1712_v60  ;;  %v2840_v9 = vunpack.c.l.b16 %v12113_v40  ;;  %v12118_v60 = vld [vmem:[#allocation25_spill] sm:$0xff] }
 0x41c   : > { %2030 = vmatpush.bf16.msra.mxu0 %v2021_v47  ;;  %v1729_v62 = vpack.c.bf16 %v1713_v22, %v1713_v22  ;;  %v12115_v47 = vld [vmem:[#allocation30_spill] sm:$0xff]  ;;  %v2864_v48 = vunpack.c.l.b16 %v12118_v60 }
 0x41d   : > { %2377 = vrot.lane.b32.xlu1 %v2376_v52, %s7311_s26  ;;  %2290 = vrot.lane.b32.xlu2 %v2289_v49, %s7311_s26  ;;  %v2462_v49 = vunpack.c.l.b16 %v12114_v43  ;;  %v2816_v24 = vunpack.c.l.b16 %v12115_v47  ;;  %v2841_v52 = vpack.c.b16 %v2840_v9, %v2840_v9 }
 0x41e   : > { %v2865_v57 = vpack.c.b16 %v2864_v48, %v2864_v48 }
 0x41f   : > { %2440 = vrot.lane.b32.xlu0 %v2439_v54, %s7311_s26  ;;  %v2463_v6 = vpack.c.b16 %v2462_v49, %v2462_v49  ;;  %v2817_v33 = vpack.c.b16 %v2816_v24, %v2816_v24 }
 0x423   : > { %6199 = vmatmul.msk.bf16.vlgmr.msrb.gmra.mxu1 %vm1541_vm4, %v1725_v27  ;;  %v2888_v27 = vunpack.c.l.b16 %v12117_v8 }
 0x424   : > { %2049 = vmatpush.bf16.msrb.mxu1 %v2040_v32  ;;  %v2769_v32 = vpack.c.b16 %v2768_v58, %v2768_v58 }
 0x425   : > { %2469 = vrot.lane.b32.xlu1 %v2468_v56, %s7311_s26  ;;  %2382 = vrot.lane.b32.xlu2 %v2381_v13, %s7311_s26  ;;  %v2889_v56 = vpack.c.b16 %v2888_v27, %v2888_v27 }
 0x427   : > { %2406 = vrot.lane.b32.xlu0 %v2405_v38, %s7311_s26 }
 0x42b   : > { %6202 = vmatmul.msk.bf16.vlgmr.msrb.gmra.mxu0 %vm1541_vm4, %v1728_v39  ;;  %v2069_v39 = vsel %vm1202_vm9, %v8426_v29, 0 }
 0x42d   : > { %2493 = vrot.lane.b32.xlu1 %v2492_v31, %s7311_s26  ;;  %2348 = vrot.lane.b32.xlu2 %v2347_v51, %s7311_s26 }
 0x42f   : > { %2498 = vrot.lane.b32.xlu0 %v2497_v0, %s7311_s26 }
 0x433   : > { %6203 = vmatmul.msk.bf16.vlgmr.msra.gmra.mxu1 %vm1541_vm4, %v1729_v62 }
 0x435   : > { %2794 = vrot.lane.b32.xlu1 %v2793_v50, %s7311_s26  ;;  %2435 = vrot.lane.b32.xlu2 %v2434_v55, %s7311_s26 }
 0x436   : > { %v1682_v2 = vpop.xlane.xlu1 %1681 }
 0x437   : > { %6936 = vrcp.f32 %v1682_v2  ;;  %2746 = vrot.lane.b32.xlu0 %v2745_v10, %s7311_s26 }
 0x43d   : > { %v6937_v54 = vpop.eup %6936  ;;  %2842 = vrot.lane.b32.xlu1 %v2841_v52, %s7311_s26  ;;  %2464 = vrot.lane.b32.xlu2 %v2463_v6, %s7311_s26 }
 0x43e   : > { %v1716_v35 = vmul.f32 %v6937_v54, %v8351_v61  ;;  %v1667_v63 = vpop.xlane.xlu1 %1666  ;;  %v1664_v21 = vpop.xlane.xlu0 %1663 }
 0x43f   : > { %6938 = vrcp.f32 %v1667_v63  ;;  %2818 = vrot.lane.b32.xlu0 %v2817_v33, %s7311_s26 }
 0x440   : > { %v1732_v59 = vpack.c.bf16 %v1716_v35, %v1716_v35  ;;  %6940 = vrcp.f32 %v1664_v21 }
 0x442   : > { %6206 = vmatmul.msk.bf16.vlgmr.msra.gmra.mxu0 %vm1541_vm4, %v1732_v59 }
 0x445   : > { %v6939_v13 = vpop.eup %6938  ;;  %2890 = vrot.lane.b32.xlu1 %v2889_v56, %s7311_s26  ;;  %2770 = vrot.lane.b32.xlu2 %v2769_v32, %s7311_s26 }
 0x446   : > { %v6941_v61 = vpop.eup %6940  ;;  %v1711_v38 = vmul.f32 %v6939_v13, %v8356_v17 }
 0x447   : > { %v1710_v20 = vmul.f32 %v6941_v61, %v8358_v46  ;;  %v1685_v53 = vpop.xlane.xlu1 %1684  ;;  %v2936_v46 = vunpack.c.l.b16 %v8369_v4 }
 0x448   : > { %v1727_v18 = vpack.c.bf16 %v1711_v38, %v1711_v38  ;;  %6942 = vrcp.f32 %v1685_v53 }
 0x449   : > { %v1726_v30 = vpack.c.bf16 %v1710_v20, %v1710_v20  ;;  %6944 = vrcp.f32 %v1676_v14  ;;  %v2937_v29 = vpack.c.b16 %v2936_v46, %v2936_v46 }
 0x44a   : > { %6201 = vmatmul.msk.bf16.vlgmr.msra.gmra.mxu3 %vm1541_vm4, %v1727_v18 }
 0x44b   : > { %6200 = vmatmul.msk.bf16.vlgmr.msra.gmra.mxu2 %vm1541_vm4, %v1726_v30 }
 0x44c   : > { %2078 = vmatpush.bf16.xpose.msra.mxu2 %v2069_v39 }
 0x44d   : > { %2866 = vrot.lane.b32.xlu2 %v2865_v57, %s7311_s26 }
 0x44e   : > { %v6943_v17 = vpop.eup %6942 }
 0x44f   : > { %v1717_v51 = vmul.f32 %v6943_v17, %v8375_v3  ;;  %v6945_v42 = vpop.eup %6944 }
 0x450   : > { %v1679_v31 = vpop.xlane.xlu2 %1678  ;;  %v1714_v14 = vmul.f32 %v6945_v42, %v8323_v37  ;;  %v2961_v37 = vpack.c.b16 %v2960_v34, %v2960_v34 }
 0x451   : > { %v1733_v22 = vpack.c.bf16 %v1717_v51, %v1717_v51  ;;  %6946 = vrcp.f32 %v1679_v31  ;;  %v2093_v0 = vpop.permute.xlu0 %2092 }
 0x452   : > { %v2098_v15 = vsel %vm1202_vm9, %v2093_v0, 0  ;;  %v1730_v62 = vpack.c.bf16 %v1714_v14, %v1714_v14 }
 0x453   : > { %6207 = vmatmul.msk.bf16.vlgmr.msrb.gmra.mxu1 %vm1541_vm4, %v1733_v22  ;;  %2107 = vmatpush.bf16.xpose.msra.mxu3 %v2098_v15 }
 0x455   : > { %2938 = vrot.lane.b32.xlu2 %v2937_v29, %s7311_s26  ;;  %v8525_v23 = vpop.f32.mrf.mxu2 }
 0x456   : > { %v8527_v4 = vpop.f32.mrf.mxu3 }
 0x457   : > { %v6947_v3 = vpop.eup %6946 }
 0x458   : > { %v1715_v16 = vmul.f32 %v6947_v3, %v8385_v12  ;;  %v2209_v36 = vpop.permute.xlu2 %2208 }
 0x459   : > { %v2180_v50 = vpop.permute.xlu0 %2179  ;;  %v2214_v2 = vsel %vm1202_vm9, %v2209_v36, 0 }
 0x45a   : > { %v1731_v55 = vpack.c.bf16 %v1715_v16, %v1715_v16  ;;  %v2185_v10 = vsel %vm1202_vm9, %v2180_v50, 0 }
 0x45b   : > { %6204 = vmatmul.msk.bf16.vlgmr.msrb.gmra.mxu2 %vm1541_vm4, %v1730_v62 }
 0x45c   : > { %2194 = vmatpush.bf16.xpose.msrb.mxu2 %v2185_v10  ;;  %6205 = vmatmul.msk.bf16.vlgmr.msrb.gmra.mxu3 %vm1541_vm4, %v1731_v55 }
 0x45d   : > { %2223 = vmatpush.bf16.xpose.msrb.mxu3 %v2214_v2  ;;  %2962 = vrot.lane.b32.xlu2 %v2961_v37, %s7311_s26  ;;  %v1768_v19 = vpop.f32.mrf.mxu2 }
 0x45e   : > { %v1787_v40 = vpop.f32.mrf.mxu3 }
 0x45f   : > { %v2059_v12 = vpop.permute.xlu1 %2058 }
 0x460   : > { %v2151_v9 = vpop.permute.xlu2 %2150 }
 0x461   : > { %v2156_v43 = vsel %vm1202_vm9, %v2151_v9, 0  ;;  %v2122_v49 = vpop.permute.xlu0 %2121 }
 0x462   : > { %v2127_v47 = vsel %vm1202_vm9, %v2122_v49, 0  ;;  %2165 = vmatpush.bf16.xpose.msra.mxu1 %v2156_v43 }
 0x463   : > { %2136 = vmatpush.bf16.xpose.msrb.mxu0 %v2127_v47 }
 0x465   : > { %v8538_v24 = vpop.f32.mrf.mxu2 }
 0x466   : > { %v8540_v52 = vpop.f32.mrf.mxu3 }
 0x467   : > { %v2117_v6 = vpop.permute.xlu1 %2116 }
 0x468   : > { %v2204_v54 = vpop.permute.xlu2 %2203 }
 0x469   : > { %v2175_v33 = vpop.permute.xlu0 %2174 }
 0x46a   : > { %6210 = vmatmul.msk.bf16.vlgmr.msrb.gmra.mxu0 %vm1202_vm9, %v2117_v6 }
 0x46b   : > { %6208 = vmatmul.msk.bf16.vlgmr.msra.gmra.mxu2 %vm1202_vm9, %v2059_v12 }
 0x46c   : > { %6209 = vmatmul.msk.bf16.vlgmr.msra.gmra.mxu3 %vm1202_vm9, %v2088_v11 }
 0x46d   : > { %v1844_v35 = vpop.f32.mrf.mxu2 }
 0x46e   : > { %v1863_v63 = vpop.f32.mrf.mxu3 }
 0x46f   : > { %v2267_v21 = vpop.permute.xlu1 %2266 }
 0x470   : > { %v2272_v25 = vsel %vm1202_vm9, %v2267_v21, 0  ;;  %v2238_v58 = vpop.permute.xlu2 %2237 }
 0x471   : > { %v2243_v8 = vsel %vm1202_vm9, %v2238_v58, 0  ;;  %2281 = vmatpush.bf16.xpose.msrb.mxu1 %v2272_v25  ;;  %v2146_v27 = vpop.permute.xlu0 %2145 }
 0x472   : > { %6211 = vmatmul.msk.bf16.vlgmr.msra.gmra.mxu1 %vm1202_vm9, %v2146_v27  ;;  %2252 = vmatpush.bf16.xpose.msra.mxu0 %v2243_v8 }
 0x477   : > { %v2233_v59 = vpop.permute.xlu1 %2232 }
 0x478   : > { %v2325_v56 = vpop.permute.xlu2 %2324 }
 0x479   : > { %v2330_v32 = vsel %vm1202_vm9, %v2325_v56, 0  ;;  %v2296_v13 = vpop.permute.xlu0 %2295 }
 0x47a   : > { %v2301_v61 = vsel %vm1202_vm9, %v2296_v13, 0  ;;  %6214 = vmatmul.msk.bf16.vlgmr.msra.gmra.mxu0 %vm1202_vm9, %v2233_v59  ;;  %2339 = vmatpush.bf16.xpose.msra.mxu3 %v2330_v32 }
 0x47b   : > { %6212 = vmatmul.msk.bf16.vlgmr.msrb.gmra.mxu2 %vm1202_vm9, %v2175_v33 }
 0x47c   : > { %2310 = vmatpush.bf16.xpose.msra.mxu2 %v2301_v61  ;;  %6213 = vmatmul.msk.bf16.vlgmr.msrb.gmra.mxu3 %vm1202_vm9, %v2204_v54 }
 0x47f   : > { %v2320_v38 = vpop.permute.xlu1 %2319 }
 0x480   : > { %v2291_v60 = vpop.permute.xlu2 %2290 }
 0x481   : > { %v2262_v48 = vpop.permute.xlu0 %2261 }
 0x482   : > { %6215 = vmatmul.msk.bf16.vlgmr.msrb.gmra.mxu1 %vm1202_vm9, %v2262_v48 }
 0x487   : > { %v2412_v20 = vpop.permute.xlu1 %2411 }
 0x488   : > { %v2417_v53 = vsel %vm1202_vm9, %v2412_v20, 0  ;;  %v2383_v11 = vpop.permute.xlu2 %2382 }
 0x489   : > { %v2388_v18 = vsel %vm1202_vm9, %v2383_v11, 0  ;;  %2426 = vmatpush.bf16.xpose.msrb.mxu2 %v2417_v53  ;;  %v2354_v30 = vpop.permute.xlu0 %2353 }
 0x48a   : > { %v2359_v39 = vsel %vm1202_vm9, %v2354_v30, 0  ;;  %2397 = vmatpush.bf16.xpose.msra.mxu1 %v2388_v18 }
 0x48b   : > { %6216 = vmatmul.msk.bf16.vlgmr.msra.gmra.mxu2 %vm1202_vm9, %v2291_v60  ;;  %2368 = vmatpush.bf16.xpose.msrb.mxu0 %v2359_v39 }
 0x48c   : > { %6217 = vmatmul.msk.bf16.vlgmr.msra.gmra.mxu3 %vm1202_vm9, %v2320_v38 }
 0x48f   : > { %v2378_v57 = vpop.permute.xlu1 %2377 }
 0x490   : > { %v8559_v17 = vpop.f32.mrf.mxu1  ;;  %v2349_v46 = vpop.permute.xlu2 %2348 }
 0x491   : > { %v2441_v51 = vpop.permute.xlu0 %2440 }
 0x492   : > { %v2446_v31 = vsel %vm1202_vm9, %v2441_v51, 0  ;;  %6218 = vmatmul.msk.bf16.vlgmr.msrb.gmra.mxu0 %vm1202_vm9, %v2349_v46  ;;  %6219 = vmatmul.msk.bf16.vlgmr.msra.gmra.mxu1 %vm1202_vm9, %v2378_v57 }
 0x493   : > { %2455 = vmatpush.bf16.xpose.msrb.mxu3 %v2446_v31 }
 0x497   : > { %v2470_v22 = vpop.permute.xlu1 %2469 }
 0x498   : > { %v2475_v0 = vsel %vm1202_vm9, %v2470_v22, 0  ;;  %v1825_v42 = vpop.f32.mrf.mxu1  ;;  %v2436_v15 = vpop.permute.xlu2 %2435 }
 0x499   : > { %v8565_v29 = vpop.f32.mrf.mxu0  ;;  %2484 = vmatpush.bf16.xpose.msra.mxu0 %v2475_v0  ;;  %v2407_v14 = vpop.permute.xlu0 %2406 }
 0x49b   : > { %6220 = vmatmul.msk.bf16.vlgmr.msrb.gmra.mxu2 %vm1202_vm9, %v2407_v14 }
 0x49c   : > { %6221 = vmatmul.msk.bf16.vlgmr.msrb.gmra.mxu3 %vm1202_vm9, %v2436_v15 }
 0x49f   : > { %v2494_v3 = vpop.permute.xlu1 %2493 }
 0x4a0   : > { %v2465_v34 = vpop.permute.xlu2 %2464  ;;  %v8569_v16 = vpop.f32.mrf.mxu1 }
 0x4a1   : > { %v1882_v36 = vpop.f32.mrf.mxu0  ;;  %v2499_v62 = vpop.permute.xlu0 %2498 }
 0x4a2   : > { %v2504_v50 = vsel %vm1202_vm9, %v2499_v62, 0  ;;  %6222 = vmatmul.msk.bf16.vlgmr.msra.gmra.mxu0 %vm1202_vm9, %v2465_v34 }
 0x4a3   : > { %2513 = vmatpush.bf16.xpose.msrb.mxu1 %v2504_v50 }
 0x4a7   : > { %v2795_v55 = vpop.permute.xlu1 %2794 }
 0x4a8   : > { %v2800_v10 = vsel %vm1753_vm5, %v2795_v55, 0  ;;  %v2771_v37 = vpop.permute.xlu2 %2770  ;;  %v1901_v2 = vpop.f32.mrf.mxu1 }
 0x4a9   : > { %v2776_v19 = vsel %vm1753_vm5, %v2771_v37, 0  ;;  %v8575_v40 = vpop.f32.mrf.mxu0  ;;  %2809 = vmatpush.bf16.msrb.mxu0 %v2800_v10  ;;  %v2747_v12 = vpop.permute.xlu0 %2746 }
 0x4aa   : > { %v2752_v9 = vsel %vm1753_vm5, %v2747_v12, 0  ;;  %6223 = vmatmul.msk.bf16.vlgmr.msrb.gmra.mxu1 %vm1202_vm9, %v2494_v3  ;;  %2785 = vmatpush.bf16.msra.mxu3 %v2776_v19 }
 0x4ab   : > { %2761 = vmatpush.bf16.msra.mxu2 %v2752_v9 }
 0x4af   : > { %v2843_v43 = vpop.permute.xlu1 %2842 }
 0x4b0   : > { %v2848_v49 = vsel %vm1753_vm5, %v2843_v43, 0  ;;  %v2867_v47 = vpop.permute.xlu2 %2866  ;;  %v8580_v6 = vpop.f32.mrf.mxu1 }
 0x4b1   : > { %v2872_v54 = vsel %vm1753_vm5, %v2867_v47, 0  ;;  %v1958_v33 = vpop.f32.mrf.mxu0  ;;  %2857 = vmatpush.bf16.msrb.mxu2 %v2848_v49  ;;  %v2819_v35 = vpop.permute.xlu0 %2818 }
 0x4b2   : > { %v2824_v63 = vsel %vm1753_vm5, %v2819_v35, 0  ;;  %2881 = vmatpush.bf16.msrb.mxu3 %v2872_v54 }
 0x4b3   : > { %2833 = vmatpush.bf16.msra.mxu1 %v2824_v63 }
 0x4b7   : > { %v2891_v21 = vpop.permute.xlu1 %2890 }
 0x4b8   : > { %v2896_v25 = vsel %vm1753_vm5, %v2891_v21, 0  ;;  %v1977_v58 = vpop.f32.mrf.mxu1 }
 0x4b9   : > { %2905 = vmatpush.bf16.msra.mxu0 %v2896_v25 }
 0x4bf   : > { %v8585_v8 = vpop.f32.mrf.mxu0 }
 0x4c7   : > { %v2034_v27 = vpop.f32.mrf.mxu0 }
 0x4cd   : > { %v8587_v59 = vpop.f32.mrf.mxu3 }
 0x4ce   : > { %v8589_v56 = vpop.f32.mrf.mxu2 }
 0x4d0   : > { %v8591_v32 = vpop.f32.mrf.mxu1 }
 0x4d5   : > { %v1939_v13 = vpop.f32.mrf.mxu3 }
 0x4d6   : > { %v1920_v61 = vpop.f32.mrf.mxu2 }
 0x4d8   : > { %v2053_v38 = vpop.f32.mrf.mxu1 }
 0x4d9   : > { %v12119_v38 = vld [vmem:[#allocation33_spill] sm:$0xff] }
 0x4de   : > { %v8593_v60 = vpop.f32.mrf.mxu2 }
 0x4df   : > { %v8595_v48 = vpop.f32.mrf.mxu3 }
 0x4e6   : > { %v1996_v20 = vpop.f32.mrf.mxu2 }
 0x4e7   : > { %v2015_v53 = vpop.f32.mrf.mxu3  ;;  %v2138_v11 = vpop.f32.mrf.mxu0  ;;  %v2912_v20 = vunpack.c.l.b16 %v12119_v38 }
 0x4e8   : > { %v2521_v18 = vmul.f32 0.125, %v2138_v11 }
 0x4ea   : > { %v8599_v30 = vsel %vm1169_vm3, %v2521_v18, -1e+30 }
 0x4eb   : > { %v2557_v39 = vsel %vm1541_vm4, %v8599_v30, -inf }
 0x4ec   : > { %2558 = vmax.xlane.f32.xlu1 %v2557_v39 }
 0x4ee   : > { %v2080_v57 = vpop.f32.mrf.mxu2 }
 0x4ef   : > { %v2109_v46 = vpop.f32.mrf.mxu3  ;;  %v2140_v51 = vpop.f32.mrf.mxu0  ;;  %v2519_v55 = vmul.f32 0.125, %v2080_v57 }
 0x4f0   : > { %v2167_v31 = vpop.f32.mrf.mxu1  ;;  %v2520_v18 = vmul.f32 0.125, %v2109_v46 }
 0x4f1   : > { %v2522_v22 = vmul.f32 0.125, %v2167_v31  ;;  %v8617_v9 = vsel %vm1169_vm3, %v2519_v55, -1e+30 }
 0x4f2   : > { %v2551_v49 = vsel %vm1541_vm4, %v8617_v9, -inf }
 0x4f3   : > { %v8605_v0 = vsel %vm1169_vm3, %v2522_v22, -1e+30 }
 0x4f4   : > { %v2560_v42 = vsel %vm1541_vm4, %v8605_v0, -inf }
 0x4f5   : > { %2561 = vmax.xlane.f32.xlu0 %v2560_v42  ;;  %v2913_v42 = vpack.c.b16 %v2912_v20, %v2912_v20 }
 0x4f6   : > { %v2082_v15 = vpop.f32.mrf.mxu2 }
 0x4f7   : > { %v2111_v14 = vpop.f32.mrf.mxu3  ;;  %v2254_v3 = vpop.f32.mrf.mxu0 }
 0x4f8   : > { %v2169_v34 = vpop.f32.mrf.mxu1  ;;  %v2525_v36 = vmul.f32 0.125, %v2254_v3  ;;  %v8642_v14 = vsel %vm1169_vm3, %v2520_v18, -1e+30 }
 0x4f9   : > { %v2554_v3 = vsel %vm1541_vm4, %v8642_v14, -inf }
 0x4fa   : > { %v8611_v62 = vsel %vm1169_vm3, %v2525_v36, -1e+30 }
 0x4fb   : > { %v2569_v50 = vsel %vm1541_vm4, %v8611_v62, -inf }
 0x4fd   : > { %2570 = vmax.xlane.f32.xlu0 %v2569_v50 }
 0x4fe   : > { %v2196_v10 = vpop.f32.mrf.mxu2 }
 0x4ff   : > { %v2225_v37 = vpop.f32.mrf.mxu3  ;;  %v2256_v2 = vpop.f32.mrf.mxu0  ;;  %v2523_v34 = vmul.f32 0.125, %v2196_v10 }
 0x500   : > { %v2283_v19 = vpop.f32.mrf.mxu1  ;;  %v2524_v57 = vmul.f32 0.125, %v2225_v37 }
 0x501   : > { %v2526_v12 = vmul.f32 0.125, %v2283_v19  ;;  %v8655_v2 = vsel %vm1169_vm3, %v2523_v34, -1e+30 }
 0x502   : > { %v8647_v46 = vsel %vm1169_vm3, %v2524_v57, -1e+30  ;;  %v2563_v19 = vsel %vm1541_vm4, %v8655_v2, -inf }
 0x503   : > { %v8621_v43 = vsel %vm1169_vm3, %v2526_v12, -1e+30  ;;  %v2566_v36 = vsel %vm1541_vm4, %v8647_v46, -inf }
 0x504   : > { %v2572_v47 = vsel %vm1541_vm4, %v8621_v43, -inf }
 0x505   : > { %2552 = vmax.xlane.f32.xlu0 %v2551_v49  ;;  %2573 = vmax.xlane.f32.xlu2 %v2572_v47 }
 0x506   : > { %v2198_v54 = vpop.f32.mrf.mxu2 }
 0x507   : > { %v2227_v33 = vpop.f32.mrf.mxu3 }
 0x508   : > { %v2285_v35 = vpop.f32.mrf.mxu1 }
 0x50e   : > { %v2312_v63 = vpop.f32.mrf.mxu2 }
 0x50f   : > { %v2341_v21 = vpop.f32.mrf.mxu3  ;;  %v2370_v25 = vpop.f32.mrf.mxu0  ;;  %v2527_v12 = vmul.f32 0.125, %v2312_v63 }
 0x510   : > { %v2529_v58 = vmul.f32 0.125, %v2370_v25  ;;  %v2399_v27 = vpop.f32.mrf.mxu1 }
 0x511   : > { %v2530_v13 = vmul.f32 0.125, %v2399_v27  ;;  %v8661_v33 = vsel %vm1169_vm3, %v2527_v12, -1e+30  ;;  %v2528_v27 = vmul.f32 0.125, %v2341_v21 }
 0x512   : > { %v8629_v61 = vsel %vm1169_vm3, %v2529_v58, -1e+30  ;;  %v2575_v25 = vsel %vm1541_vm4, %v8661_v33, -inf }
 0x513   : > { %v8634_v53 = vsel %vm1169_vm3, %v2530_v13, -1e+30  ;;  %v2581_v11 = vsel %vm1541_vm4, %v8629_v61, -inf  ;;  %v8673_v38 = vsel %vm1169_vm3, %v2528_v27, -1e+30 }
 0x514   : > { %v2584_v39 = vsel %vm1541_vm4, %v8634_v53, -inf  ;;  %2582 = vmax.xlane.f32.xlu2 %v2581_v11  ;;  %v2578_v20 = vsel %vm1541_vm4, %v8673_v38, -inf }
 0x515   : > { %2585 = vmax.xlane.f32.xlu1 %v2584_v39 }
 0x516   : > { %v2314_v51 = vpop.f32.mrf.mxu2 }
 0x517   : > { %v2343_v31 = vpop.f32.mrf.mxu3  ;;  %v2372_v22 = vpop.f32.mrf.mxu0 }
 0x518   : > { %v2401_v15 = vpop.f32.mrf.mxu1 }
 0x519   : > { %2914 = vrot.lane.b32.xlu0 %v2913_v42, %s7311_s26 }
 0x51c   : > { %2555 = vmax.xlane.f32.xlu2 %v2554_v3 }
 0x51d   : > { %2567 = vmax.xlane.f32.xlu1 %v2566_v36  ;;  %v8696_v36 = vpop.permute.xlu2 %2938 }
 0x51e   : > { %v2428_v50 = vpop.f32.mrf.mxu2 }
 0x51f   : > { %v2457_v55 = vpop.f32.mrf.mxu3  ;;  %v2486_v37 = vpop.f32.mrf.mxu0  ;;  %v2531_v11 = vmul.f32 0.125, %v2428_v50 }
 0x520   : > { %v2533_v39 = vmul.f32 0.125, %v2486_v37  ;;  %v2532_v31 = vmul.f32 0.125, %v2457_v55 }
 0x521   : > { %v8679_v18 = vsel %vm1169_vm3, %v2531_v11, -1e+30 }
 0x522   : > { %v2587_v57 = vsel %vm1541_vm4, %v8679_v18, -inf  ;;  %v8685_v21 = vsel %vm1169_vm3, %v2533_v39, -1e+30  ;;  %v8691_v22 = vsel %vm1169_vm3, %v2532_v31, -1e+30 }
 0x523   : > { %v2593_v51 = vsel %vm1541_vm4, %v8685_v21, -inf  ;;  %v2590_v42 = vsel %vm1541_vm4, %v8691_v22, -inf }
 0x524   : > { %2564 = vmax.xlane.f32.xlu2 %v2563_v19 }
 0x526   : > { %v2430_v49 = vpop.f32.mrf.mxu2 }
 0x527   : > { %v2459_v47 = vpop.f32.mrf.mxu3  ;;  %v2488_v10 = vpop.f32.mrf.mxu0 }
 0x528   : > { %v2515_v54 = vpop.f32.mrf.mxu1  ;;  %v8703_v49 = vpop.permute.xlu2 %2962 }
 0x529   : > { %v2534_v35 = vmul.f32 0.125, %v2515_v54 }
 0x52b   : > { %v8667_v58 = vsel %vm1169_vm3, %v2534_v35, -1e+30 }
 0x52c   : > { %2576 = vmax.xlane.f32.xlu2 %v2575_v25  ;;  %v2596_v63 = vsel %vm1541_vm4, %v8667_v58, -inf }
 0x52d   : > { %2597 = vmax.xlane.f32.xlu1 %v2596_v63 }
 0x530   : > { %v2517_v13 = vpop.f32.mrf.mxu1 }
 0x535   : > { %2579 = vmax.xlane.f32.xlu1 %v2578_v20 }
 0x53d   : > { %2588 = vmax.xlane.f32.xlu1 %v2587_v57 }
 0x543   : > { %2594 = vmax.xlane.f32.xlu0 %v2593_v51 }
 0x54b   : > { %2591 = vmax.xlane.f32.xlu0 %v2590_v42 }
 0x55f   : > { %v2559_v15 = vpop.xlane.xlu1 %2558 }
 0x560   : > { %v2601_v3 = vsub.f32 %v8599_v30, %v2559_v15 }
 0x562   : > { %v2619_v34 = vmul.f32 1.442695, %v2601_v3 }
 0x564   : > { %6948 = vpow2.f32 %v2619_v34 }
 0x568   : > { %v2562_v50 = vpop.xlane.xlu0 %2561 }
 0x569   : > { %v2602_v37 = vsub.f32 %v8605_v0, %v2562_v50 }
 0x56a   : > { %v8699_v55 = vpop.eup %6948 }
 0x56b   : > { %v2621_v19 = vmul.f32 1.442695, %v2602_v37  ;;  %v2653_v1 = vsel %vm1541_vm4, %v8699_v55, 0.0 }
 0x56c   : > { %2654 = vadd.xlane.f32.xlu1 %v2653_v1 }
 0x56d   : > { %6950 = vpow2.f32 %v2621_v19 }
 0x570   : > { %v2571_v12 = vpop.xlane.xlu0 %2570 }
 0x571   : > { %v2605_v30 = vsub.f32 %v8611_v62, %v2571_v12 }
 0x573   : > { %v8706_v47 = vpop.eup %6950  ;;  %v2627_v10 = vmul.f32 1.442695, %v2605_v30 }
 0x574   : > { %v2656_v54 = vsel %vm1541_vm4, %v8706_v47, 0.0 }
 0x575   : > { %6952 = vpow2.f32 %v2627_v10  ;;  %2657 = vadd.xlane.f32.xlu1 %v2656_v54 }
 0x578   : > { %v2553_v0 = vpop.xlane.xlu0 %2552  ;;  %v2574_v35 = vpop.xlane.xlu2 %2573 }
 0x579   : > { %v2599_v25 = vsub.f32 %v8617_v9, %v2553_v0  ;;  %v2606_v13 = vsub.f32 %v8621_v43, %v2574_v35 }
 0x57b   : > { %v8711_v63 = vpop.eup %6952  ;;  %v2615_v27 = vmul.f32 1.442695, %v2599_v25  ;;  %v2629_v20 = vmul.f32 1.442695, %v2606_v13 }
 0x57c   : > { %v2665_v62 = vsel %vm1541_vm4, %v8711_v63, 0.0 }
 0x57d   : > { %2666 = vadd.xlane.f32.xlu2 %v2665_v62  ;;  %6954 = vpow2.f32 %v2615_v27 }
 0x57e   : > { %6956 = vpow2.f32 %v2629_v20 }
 0x583   : > { %v8716_v11 = vpop.eup %6954 }
 0x584   : > { %v2647_v39 = vsel %vm1541_vm4, %v8716_v11, 0.0  ;;  %v8721_v31 = vpop.eup %6956 }
 0x585   : > { %2648 = vadd.xlane.f32.xlu1 %v2647_v39  ;;  %v2668_v3 = vsel %vm1541_vm4, %v8721_v31, 0.0 }
 0x587   : > { %v2583_v57 = vpop.xlane.xlu2 %2582 }
 0x588   : > { %v2586_v9 = vpop.xlane.xlu1 %2585  ;;  %v2609_v51 = vsub.f32 %v8629_v61, %v2583_v57 }
 0x589   : > { %v2610_v35 = vsub.f32 %v8634_v53, %v2586_v9  ;;  %v3032_v53 = vunpack.c.l.b16 %v8396_v5  ;;  %v2984_v9 = vunpack.c.l.b16 %v8331_v26 }
 0x58a   : > { %v2635_v43 = vmul.f32 1.442695, %v2609_v51 }
 0x58b   : > { %v2915_v42 = vpop.permute.xlu0 %2914  ;;  %v2637_v13 = vmul.f32 1.442695, %v2610_v35  ;;  %v3033_v39 = vpack.c.b16 %v3032_v53, %v3032_v53  ;;  %v2985_v51 = vpack.c.b16 %v2984_v9, %v2984_v9 }
 0x58c   : > { %6958 = vpow2.f32 %v2635_v43  ;;  %v2920_v15 = vsel %vm1753_vm5, %v2915_v42, 0  ;;  %v3008_v43 = vunpack.c.l.b16 %v8443_v7 }
 0x58d   : > { %2929 = vmatpush.bf16.msrb.mxu1 %v2920_v15  ;;  %2669 = vadd.xlane.f32.xlu1 %v2668_v3 }
 0x58e   : > { %v3009_v15 = vpack.c.b16 %v3008_v43, %v3008_v43 }
 0x58f   : > { %v2556_v34 = vpop.xlane.xlu2 %2555 }
 0x590   : > { %v2568_v50 = vpop.xlane.xlu1 %2567  ;;  %v2600_v37 = vsub.f32 %v8642_v14, %v2556_v34 }
 0x591   : > { %v2604_v19 = vsub.f32 %v8647_v46, %v2568_v50 }
 0x592   : > { %v8728_v1 = vpop.eup %6958  ;;  %v2617_v61 = vmul.f32 1.442695, %v2600_v37 }
 0x593   : > { %v2625_v12 = vmul.f32 1.442695, %v2604_v19  ;;  %v2677_v30 = vsel %vm1541_vm4, %v8728_v1, 0.0 }
 0x594   : > { %6960 = vpow2.f32 %v2617_v61  ;;  %2678 = vadd.xlane.f32.xlu2 %v2677_v30 }
 0x595   : > { %6962 = vpow2.f32 %v2625_v12 }
 0x597   : > { %v2565_v10 = vpop.xlane.xlu2 %2564 }
 0x598   : > { %v2603_v54 = vsub.f32 %v8655_v2, %v2565_v10 }
 0x59a   : > { %v8733_v0 = vpop.eup %6960  ;;  %v2623_v14 = vmul.f32 1.442695, %v2603_v54 }
 0x59b   : > { %v8736_v25 = vpop.eup %6962  ;;  %v2650_v46 = vsel %vm1541_vm4, %v8733_v0, 0.0 }
 0x59c   : > { %6964 = vpow2.f32 %v2623_v14  ;;  %2651 = vadd.xlane.f32.xlu0 %v2650_v46  ;;  %v2662_v27 = vsel %vm1541_vm4, %v8736_v25, 0.0 }
 0x59d   : > { %2663 = vadd.xlane.f32.xlu1 %v2662_v27  ;;  %6966 = vpow2.f32 %v2637_v13 }
 0x59f   : > { %v2577_v5 = vpop.xlane.xlu2 %2576 }
 0x5a0   : > { %v8755_v42 = vpop.xlane.xlu1 %2597  ;;  %v2607_v3 = vsub.f32 %v8661_v33, %v2577_v5  ;;  %v3056_v5 = vunpack.c.l.b16 %v8398_v45  ;;  %v3104_v45 = vunpack.c.l.b16 %v8473_v44 }
 0x5a2   : > { %v8742_v62 = vpop.eup %6964  ;;  %v2631_v34 = vmul.f32 1.442695, %v2607_v3 }
 0x5a3   : > { %v2659_v2 = vsel %vm1541_vm4, %v8742_v62, 0.0  ;;  %v8747_v20 = vpop.eup %6966 }
 0x5a4   : > { %2660 = vadd.xlane.f32.xlu0 %v2659_v2  ;;  %v2680_v57 = vsel %vm1541_vm4, %v8747_v20, 0.0  ;;  %6968 = vpow2.f32 %v2631_v34 }
 0x5a8   : > { %v2580_v50 = vpop.xlane.xlu1 %2579 }
 0x5a9   : > { %v2608_v19 = vsub.f32 %v8673_v38, %v2580_v50  ;;  %v3057_v50 = vpack.c.b16 %v3056_v5, %v3056_v5 }
 0x5aa   : > { %v8761_v12 = vpop.eup %6968 }
 0x5ab   : > { %v2633_v61 = vmul.f32 1.442695, %v2608_v19  ;;  %v2671_v54 = vsel %vm1541_vm4, %v8761_v12, 0.0  ;;  %v3080_v19 = vunpack.c.l.b16 %v8458_v41 }
 0x5ac   : > { %2681 = vadd.xlane.f32.xlu0 %v2680_v57  ;;  %3034 = vrot.lane.b32.xlu2 %v3033_v39, %s7311_s26 }
 0x5ad   : > { %6970 = vpow2.f32 %v2633_v61 }
 0x5b0   : > { %v2589_v30 = vpop.xlane.xlu1 %2588 }
 0x5b1   : > { %v2611_v33 = vsub.f32 %v8679_v18, %v2589_v30  ;;  %v3081_v30 = vpack.c.b16 %v3080_v19, %v3080_v19 }
 0x5b3   : > { %v8767_v14 = vpop.eup %6970  ;;  %v2639_v38 = vmul.f32 1.442695, %v2611_v33 }
 0x5b4   : > { %v2674_v27 = vsel %vm1541_vm4, %v8767_v14, 0.0 }
 0x5b6   : > { %2986 = vrot.lane.b32.xlu1 %v2985_v51, %s7311_s26  ;;  %v2595_v37 = vpop.xlane.xlu0 %2594 }
 0x5b7   : > { %v2613_v26 = vsub.f32 %v8685_v21, %v2595_v37 }
 0x5b9   : > { %v2643_v7 = vmul.f32 1.442695, %v2613_v26 }
 0x5bb   : > { %6972 = vpow2.f32 %v2643_v7 }
 0x5bc   : > { %6974 = vpow2.f32 %v2639_v38 }
 0x5be   : > { %v2592_v10 = vpop.xlane.xlu0 %2591 }
 0x5bf   : > { %v2612_v35 = vsub.f32 %v8691_v22, %v2592_v10 }
 0x5c0   : > { %3010 = vrot.lane.b32.xlu0 %v3009_v15, %s7311_s26 }
 0x5c1   : > { %v2641_v21 = vmul.f32 1.442695, %v2612_v35  ;;  %v8769_v46 = vpop.eup %6972 }
 0x5c2   : > { %v2689_v2 = vsel %vm1541_vm4, %v8769_v46, 0.0  ;;  %v8775_v18 = vpop.eup %6974 }
 0x5c3   : > { %6976 = vpow2.f32 %v2641_v21  ;;  %v2683_v57 = vsel %vm1541_vm4, %v8775_v18, 0.0  ;;  %v2614_v21 = vsub.f32 %v8667_v58, %v8755_v42 }
 0x5c9   : > { %v8777_v22 = vpop.eup %6976 }
 0x5ca   : > { %v2686_v43 = vsel %vm1541_vm4, %v8777_v22, 0.0 }
 0x5d5   : > { %2672 = vadd.xlane.f32.xlu2 %v2671_v54 }
 0x5dd   : > { %2675 = vadd.xlane.f32.xlu2 %v2674_v27  ;;  %v2645_v27 = vmul.f32 1.442695, %v2614_v21 }
 0x5df   : > { %v2655_v13 = vpop.xlane.xlu1 %2654 }
 0x5e0   : > { %6978 = vrcp.f32 %v2655_v13  ;;  %2690 = vadd.xlane.f32.xlu1 %v2689_v2 }
 0x5e6   : > { %v6979_v53 = vpop.eup %6978 }
 0x5e7   : > { %v2713_v39 = vmul.f32 %v6979_v53, %v8699_v55 }
 0x5e8   : > { %v2658_v9 = vpop.xlane.xlu1 %2657  ;;  %2684 = vadd.xlane.f32.xlu1 %v2683_v57 }
 0x5e9   : > { %v2729_v51 = vpack.c.bf16 %v2713_v39, %v2713_v39  ;;  %6980 = vrcp.f32 %v2658_v9 }
 0x5ea   : > { %2687 = vadd.xlane.f32.xlu0 %v2686_v43 }
 0x5eb   : > { %6226 = vmatmul.msk.bf16.vlgmr.msrb.gmra.mxu0 %vm1541_vm4, %v2729_v51 }
 0x5ef   : > { %v6981_v15 = vpop.eup %6980 }
 0x5f0   : > { %v2714_v3 = vmul.f32 %v6981_v15, %v8706_v47  ;;  %v2667_v34 = vpop.xlane.xlu2 %2666  ;;  %v3105_v47 = vpack.c.b16 %v3104_v45, %v3104_v45 }
 0x5f1   : > { %6982 = vrcp.f32 %v2667_v34 }
 0x5f2   : > { %v2730_v55 = vpack.c.bf16 %v2714_v3, %v2714_v3 }
 0x5f4   : > { %6227 = vmatmul.msk.bf16.vlgmr.msra.gmra.mxu1 %vm1541_vm4, %v2730_v55 }
 0x5f5   : > { %3058 = vrot.lane.b32.xlu2 %v3057_v50, %s7311_s26 }
 0x5f7   : > { %v6983_v37 = vpop.eup %6982 }
 0x5f8   : > { %v2717_v26 = vmul.f32 %v6983_v37, %v8711_v63  ;;  %v2649_v61 = vpop.xlane.xlu1 %2648  ;;  %v2944_v63 = vsel %vm1753_vm5, %v8696_v36, 0 }
 0x5f9   : > { %6984 = vrcp.f32 %v2649_v61 }
 0x5fa   : > { %v2733_v7 = vpack.c.bf16 %v2717_v26, %v2717_v26 }
 0x5fc   : > { %6230 = vmatmul.msk.bf16.vlgmr.msra.gmra.mxu0 %vm1541_vm4, %v2733_v7 }
 0x5fe   : > { %3082 = vrot.lane.b32.xlu0 %v3081_v30, %s7311_s26 }
 0x5ff   : > { %v6985_v10 = vpop.eup %6984 }
 0x600   : > { %v2711_v54 = vmul.f32 %v6985_v10, %v8716_v11  ;;  %v2670_v33 = vpop.xlane.xlu1 %2669 }
 0x601   : > { %3106 = vrot.lane.b32.xlu1 %v3105_v47, %s7311_s26  ;;  %6986 = vrcp.f32 %v2670_v33 }
 0x602   : > { %v2727_v41 = vpack.c.bf16 %v2711_v54, %v2711_v54 }
 0x604   : > { %6224 = vmatmul.msk.bf16.vlgmr.msra.gmra.mxu2 %vm1541_vm4, %v2727_v41 }
 0x605   : > { %2953 = vmatpush.bf16.msra.mxu2 %v2944_v63 }
 0x607   : > { %v6987_v44 = vpop.eup %6986  ;;  %v2679_v2 = vpop.xlane.xlu2 %2678 }
 0x608   : > { %v2718_v35 = vmul.f32 %v6987_v44, %v8721_v31  ;;  %v2968_v31 = vsel %vm1753_vm5, %v8703_v49, 0 }
 0x60a   : > { %v2734_v38 = vpack.c.bf16 %v2718_v35, %v2718_v35 }
 0x60c   : > { %6231 = vmatmul.msk.bf16.vlgmr.msrb.gmra.mxu1 %vm1541_vm4, %v2734_v38 }
 0x60f   : > { %v2652_v11 = vpop.xlane.xlu0 %2651  ;;  %v3035_v51 = vpop.permute.xlu2 %3034 }
 0x610   : > { %6988 = vrcp.f32 %v2652_v11  ;;  %v2664_v39 = vpop.xlane.xlu1 %2663  ;;  %v3040_v5 = vsel %vm1753_vm5, %v3035_v51, 0 }
 0x611   : > { %6990 = vpow2.f32 %v2645_v27 }
 0x616   : > { %v6989_v13 = vpop.eup %6988 }
 0x617   : > { %v2712_v36 = vmul.f32 %v6989_v13, %v8733_v0  ;;  %v2661_v53 = vpop.xlane.xlu0 %2660  ;;  %v8804_v9 = vpop.eup %6990 }
 0x618   : > { %6992 = vrcp.f32 %v2661_v53  ;;  %v2692_v58 = vsel %vm1541_vm4, %v8804_v9, 0.0 }
 0x619   : > { %v2728_v57 = vpack.c.bf16 %v2712_v36, %v2712_v36  ;;  %6994 = vrcp.f32 %v2664_v39 }
 0x61a   : > { %6996 = vrcp.f32 %v2679_v2 }
 0x61b   : > { %6225 = vmatmul.msk.bf16.vlgmr.msra.gmra.mxu3 %vm1541_vm4, %v2728_v57 }
 0x61c   : > { %2977 = vmatpush.bf16.msra.mxu3 %v2968_v31 }
 0x61e   : > { %v6993_v42 = vpop.eup %6992  ;;  %2693 = vadd.xlane.f32.xlu2 %v2692_v58 }
 0x61f   : > { %v2715_v0 = vmul.f32 %v6993_v42, %v8742_v62  ;;  %v6995_v15 = vpop.eup %6994  ;;  %v2682_v34 = vpop.xlane.xlu0 %2681 }
 0x620   : > { %v6997_v49 = vpop.eup %6996  ;;  %v2716_v3 = vmul.f32 %v6995_v15, %v8736_v25  ;;  %6998 = vrcp.f32 %v2682_v34 }
 0x621   : > { %v2731_v43 = vpack.c.bf16 %v2715_v0, %v2715_v0  ;;  %v2721_v55 = vmul.f32 %v6997_v49, %v8728_v1 }
 0x622   : > { %v2732_v37 = vpack.c.bf16 %v2716_v3, %v2716_v3 }
 0x623   : > { %6228 = vmatmul.msk.bf16.vlgmr.msrb.gmra.mxu2 %vm1541_vm4, %v2731_v43  ;;  %v2737_v62 = vpack.c.bf16 %v2721_v55, %v2721_v55 }
 0x624   : > { %3049 = vmatpush.bf16.msrb.mxu2 %v3040_v5 }
 0x626   : > { %v6999_v26 = vpop.eup %6998 }
 0x627   : > { %v2722_v61 = vmul.f32 %v6999_v26, %v8747_v20 }
 0x628   : > { %v2987_v50 = vpop.permute.xlu1 %2986 }
 0x629   : > { %v2992_v19 = vsel %vm1753_vm5, %v2987_v50, 0  ;;  %v2738_v45 = vpack.c.bf16 %v2722_v61, %v2722_v61 }
 0x62a   : > { %3001 = vmatpush.bf16.msrb.mxu0 %v2992_v19 }
 0x62b   : > { %6229 = vmatmul.msk.bf16.vlgmr.msrb.gmra.mxu3 %vm1541_vm4, %v2732_v37 }
 0x62d   : > { %6234 = vmatmul.msk.bf16.vlgmr.msrb.gmra.mxu0 %vm1541_vm4, %v2737_v62 }
 0x632   : > { %v3011_v7 = vpop.permute.xlu0 %3010 }
 0x633   : > { %v3016_v25 = vsel %vm1753_vm5, %v3011_v7, 0 }
 0x634   : > { %3025 = vmatpush.bf16.msra.mxu1 %v3016_v25 }
 0x637   : > { %6235 = vmatmul.msk.bf16.vlgmr.msra.gmra.mxu1 %vm1541_vm4, %v2738_v45 }
 0x648   : > { %v2673_v1 = vpop.xlane.xlu2 %2672 }
 0x649   : > { %7000 = vrcp.f32 %v2673_v1 }
 0x64f   : > { %v7001_v30 = vpop.eup %7000 }
 0x650   : > { %v2719_v47 = vmul.f32 %v7001_v30, %v8761_v12  ;;  %v2676_v10 = vpop.xlane.xlu2 %2675 }
 0x651   : > { %7002 = vrcp.f32 %v2676_v10 }
 0x652   : > { %v2735_v54 = vpack.c.bf16 %v2719_v47, %v2719_v47 }
 0x653   : > { %v2691_v33 = vpop.xlane.xlu1 %2690 }
 0x654   : > { %6232 = vmatmul.msk.bf16.vlgmr.msra.gmra.mxu2 %vm1541_vm4, %v2735_v54 }
 0x657   : > { %v7003_v41 = vpop.eup %7002 }
 0x658   : > { %v2720_v20 = vmul.f32 %v7003_v41, %v8767_v14  ;;  %v3059_v63 = vpop.permute.xlu2 %3058 }
 0x659   : > { %v3064_v44 = vsel %vm1753_vm5, %v3059_v63, 0  ;;  %v6626_v63 = vld [vmem:[%s11969_s5 + $0x38] sm:$0xff] }
 0x65a   : > { %v2736_v35 = vpack.c.bf16 %v2720_v20, %v2720_v20  ;;  %3073 = vmatpush.bf16.msrb.mxu3 %v3064_v44  ;;  %v6625_v44 = vld [vmem:[%s11969_s5 + $0x30] sm:$0xff]  ;;  %6777 = vmatpush.bf16.msra.mxu2 %v6626_v63 }
 0x65b   : > { %v2685_v38 = vpop.xlane.xlu1 %2684 }
 0x65c   : > { %7004 = vrcp.f32 %v2685_v38  ;;  %6233 = vmatmul.msk.bf16.vlgmr.msra.gmra.mxu3 %vm1541_vm4, %v2736_v35  ;;  %v6624_v35 = vld [vmem:[%s11969_s5 + $0x28] sm:$0xff] }
 0x65d   : > { %v2688_v21 = vpop.xlane.xlu0 %2687 }
 0x65e   : > { %7006 = vrcp.f32 %v2688_v21  ;;  %6778 = vmatpush.bf16.msra.mxu3 %v6626_v63  ;;  %6779 = vmatpush.bf16.msra.mxu2 %v6625_v44 }
 0x65f   : > { %7008 = vrcp.f32 %v2691_v33 }
 0x662   : > { %v7005_v12 = vpop.eup %7004  ;;  %6780 = vmatpush.bf16.msra.mxu3 %v6625_v44  ;;  %6781 = vmatpush.bf16.msra.mxu2 %v6624_v35 }
 0x663   : > { %v2723_v11 = vmul.f32 %v7005_v12, %v8775_v18 }
 0x664   : > { %v7007_v27 = vpop.eup %7006 }
 0x665   : > { %v2739_v13 = vpack.c.bf16 %v2723_v11, %v2723_v11  ;;  %v2724_v2 = vmul.f32 %v7007_v27, %v8777_v22  ;;  %v7009_v53 = vpop.eup %7008  ;;  %v6623_v11 = vld [vmem:[%s11969_s5 + $0x20] sm:$0xff]  ;;  %v6622_v27 = vld [vmem:[%s11969_s5 + $0x18] sm:$0xff] }
 0x666   : > { %v2725_v39 = vmul.f32 %v7009_v53, %v8769_v46  ;;  %6782 = vmatpush.bf16.msra.mxu3 %v6624_v35  ;;  %6783 = vmatpush.bf16.msra.mxu2 %v6623_v11 }
 0x667   : > { %6236 = vmatmul.msk.bf16.vlgmr.msrb.gmra.mxu2 %vm1541_vm4, %v2739_v13  ;;  %v2740_v36 = vpack.c.bf16 %v2724_v2, %v2724_v2  ;;  %v6621_v2 = vld [vmem:[%s11969_s5 + $0x10] sm:$0xff] }
 0x668   : > { %v2811_v14 = vpop.f32.mrf.mxu0  ;;  %v2741_v18 = vpack.c.bf16 %v2725_v39, %v2725_v39 }
 0x66a   : > { %6784 = vmatpush.bf16.msra.mxu3 %v6623_v11  ;;  %6785 = vmatpush.bf16.msra.mxu2 %v6622_v27 }
 0x66c   : > { %6237 = vmatmul.msk.bf16.vlgmr.msrb.gmra.mxu3 %vm1541_vm4, %v2740_v36  ;;  %v6620_v36 = vld [vmem:[%s11969_s5 + $0x8] sm:$0xff] }
 0x66e   : > { %6786 = vmatpush.bf16.msra.mxu3 %v6622_v27  ;;  %6787 = vmatpush.bf16.msra.mxu2 %v6621_v2 }
 0x670   : > { %v2813_v57 = vpop.f32.mrf.mxu0  ;;  %v3083_v31 = vpop.permute.xlu0 %3082 }
 0x671   : > { %v2835_v58 = vpop.f32.mrf.mxu1  ;;  %v3088_v42 = vsel %vm1753_vm5, %v3083_v31, 0 }
 0x672   : > { %3097 = vmatpush.bf16.msra.mxu0 %v3088_v42  ;;  %v6809_v7 = vpack.i.bf16 %v2835_v58, %v2811_v14  ;;  %6788 = vmatpush.bf16.msra.mxu3 %v6621_v2  ;;  %v6619_v42 = vld [vmem:[%s11969_s5] sm:$0xff] }
 0x673   : > { %v3107_v0 = vpop.permute.xlu1 %3106  ;;  %6789 = vmatpush.bf16.msra.mxu2 %v6620_v36 }
 0x674   : > { %v3112_v51 = vsel %vm1753_vm5, %v3107_v0, 0 }
 0x675   : > { %3121 = vmatpush.bf16.msrb.mxu1 %v3112_v51  ;;  %6238 = vmatmul.msk.bf16.vlgmr.msra.gmra.mxu0 %vm1541_vm4, %v2741_v18 }
 0x676   : > { %3283 = vmatpush.bf16.msrb.mxu0 %v6626_v63  ;;  %6790 = vmatpush.bf16.msra.mxu3 %v6620_v36 }
 0x677   : > { %6791 = vmatpush.bf16.msra.mxu2 %v6619_v42 }
 0x679   : > { %v2837_v22 = vpop.f32.mrf.mxu1  ;;  %v2907_v43 = vpop.f32.mrf.mxu0 }
 0x67a   : > { %3284 = vmatpush.bf16.msrb.mxu0 %v6625_v44  ;;  %6792 = vmatpush.bf16.msra.mxu3 %v6619_v42 }
 0x67e   : > { %3285 = vmatpush.bf16.msrb.mxu0 %v6624_v35 }
 0x681   : > { %v2909_v15 = vpop.f32.mrf.mxu0 }
 0x682   : > { %3286 = vmatpush.bf16.msrb.mxu0 %v6623_v11 }
 0x686   : > { %3287 = vmatpush.bf16.msrb.mxu0 %v6622_v27 }
 0x687   : > { %v2763_v5 = vpop.f32.mrf.mxu2 }
 0x689   : > { %v2931_v49 = vpop.f32.mrf.mxu1 }
 0x68a   : > { %v6819_v30 = vpack.i.bf16 %v2931_v49, %v2907_v43  ;;  %3288 = vmatpush.bf16.msrb.mxu0 %v6621_v2 }
 0x68e   : > { %3289 = vmatpush.bf16.msrb.mxu0 %v6620_v36  ;;  %v12120_v36 = vld [vmem:[#allocation3_spill] sm:$0xff] }
 0x68f   : > { %v2765_v3 = vpop.f32.mrf.mxu2 }
 0x691   : > { %v2694_v46 = vpop.xlane.xlu2 %2693  ;;  %v2933_v34 = vpop.f32.mrf.mxu1 }
 0x692   : > { %7010 = vrcp.f32 %v2694_v46  ;;  %3290 = vmatpush.bf16.msrb.mxu0 %v6619_v42  ;;  %v12124_v42 = vld [vmem:[#allocation2_spill] sm:$0xff] }
 0x698   : > { %v7011_v55 = vpop.eup %7010 }
 0x699   : > { %v2726_v50 = vmul.f32 %v7011_v55, %v8804_v9 }
 0x69b   : > { %v2742_v37 = vpack.c.bf16 %v2726_v50, %v2726_v50 }
 0x69d   : > { %6239 = vmatmul.msk.bf16.vlgmr.msrb.gmra.mxu1 %vm1541_vm4, %v2742_v37 }
 0x69e   : > { %v2787_v19 = vpop.f32.mrf.mxu3 }
 0x69f   : > { %v6804_v62 = vpack.i.bf16 %v2787_v19, %v2763_v5 }
 0x6a1   : > { %6805 = vrot.lane.b32.xlu0 %v6804_v62, %s7311_s26 }
 0x6a6   : > { %v2789_v26 = vpop.f32.mrf.mxu3  ;;  %v2859_v61 = vpop.f32.mrf.mxu2 }
 0x6a9   : > { %6810 = vrot.lane.b32.xlu0 %v6809_v7, %s7311_s26 }
 0x6aa   : > { %v3003_v25 = vpop.f32.mrf.mxu0 }
 0x6ae   : > { %v2861_v45 = vpop.f32.mrf.mxu2  ;;  %v2883_v1 = vpop.f32.mrf.mxu3 }
 0x6af   : > { %v6814_v47 = vpack.i.bf16 %v2883_v1, %v2859_v61 }
 0x6b1   : > { %6820 = vrot.lane.b32.xlu0 %v6819_v30, %s7311_s26  ;;  %6815 = vrot.lane.b32.xlu1 %v6814_v47, %s7311_s26 }
 0x6b2   : > { %v3005_v9 = vpop.f32.mrf.mxu0 }
 0x6b4   : > { %v3027_v10 = vpop.f32.mrf.mxu1 }
 0x6b5   : > { %v6829_v54 = vpack.i.bf16 %v3027_v10, %v3003_v25 }
 0x6b6   : > { %v2885_v33 = vpop.f32.mrf.mxu3 }
 0x6b7   : > { %6830 = vrot.lane.b32.xlu2 %v6829_v54, %s7311_s26 }
 0x6bc   : > { %v3029_v41 = vpop.f32.mrf.mxu1 }
 0x6d7   : > { %v2955_v20 = vpop.f32.mrf.mxu2 }
 0x6df   : > { %v2957_v38 = vpop.f32.mrf.mxu2  ;;  %v2979_v21 = vpop.f32.mrf.mxu3 }
 0x6e0   : > { %v6824_v12 = vpack.i.bf16 %v2979_v21, %v2955_v20 }
 0x6e2   : > { %6825 = vrot.lane.b32.xlu1 %v6824_v12, %s7311_s26 }
 0x6e7   : > { %v2981_v13 = vpop.f32.mrf.mxu3 }
 0x6ea   : > { %v3051_v14 = vpop.f32.mrf.mxu2 }
 0x6ef   : > { %v3075_v53 = vpop.f32.mrf.mxu3 }
 0x6f0   : > { %v6834_v39 = vpack.i.bf16 %v3075_v53, %v3051_v14  ;;  %v8904_v14 = vld [vmem:[%s11970_s6] ss:$0 sm:$0xff] }
 0x6f2   : > { %v3053_v57 = vpop.f32.mrf.mxu2  ;;  %6835 = vrot.lane.b32.xlu0 %v6834_v39, %s7311_s26  ;;  %v3099_v31 = vpop.f32.mrf.mxu0 }
 0x6f3   : > { %v12122_v57 = vld [vmem:[#allocation5_spill] sm:$0xff] }
 0x6f7   : > { %v3077_v58 = vpop.f32.mrf.mxu3 }
 0x6fa   : > { %v3101_v18 = vpop.f32.mrf.mxu0 }
 0x711   : > { %v6831_v0 = vpop.permute.xlu2 %6830 }
 0x712   : > { %v6833_v51 = vunpack.i.h.bf16 %v6831_v0  ;;  %v6832_v22 = vunpack.i.l.bf16 %v6831_v0 }
 0x713   : > { %v6806_v43 = vpop.permute.xlu0 %6805 }
 0x714   : > { %v3202_v15 = vsel %vm1202_vm9, %v8580_v6, %v6833_v51  ;;  %v3201_v5 = vsel %vm1202_vm9, %v8575_v40, %v6832_v22  ;;  %v6808_v49 = vunpack.i.h.bf16 %v6806_v43  ;;  %v6807_v3 = vunpack.i.l.bf16 %v6806_v43  ;;  %v12126_v43 = vld [vmem:[#allocation7_spill] sm:$0xff] }
 0x715   : > { %v3212_v46 = vpack.c.bf16 %v3202_v15, %v3201_v5 }
 0x716   : > { %v3192_v34 = vsel %vm1202_vm9, %v8527_v4, %v6808_v49  ;;  %v3191_v55 = vsel %vm1202_vm9, %v8525_v23, %v6807_v3  ;;  %v12128_v49 = vld [vmem:[#allocation4_spill] sm:$0xff] }
 0x717   : > { %v3207_v50 = vpack.c.bf16 %v3192_v34, %v3191_v55  ;;  %3316 = vmatmul.bf16.vlgmr.msra.gmra.mxu3 %v3212_v46  ;;  %v12130_v55 = vld [vmem:[#allocation6_spill] sm:$0xff] }
 0x719   : > { %3291 = vmatmul.bf16.vlgmr.msrb.gmra.mxu0 %v3207_v50 }
 0x71a   : > { %v3123_v37 = vpop.f32.mrf.mxu1 }
 0x71b   : > { %v6839_v19 = vpack.i.bf16 %v3123_v37, %v3099_v31  ;;  %v6811_v62 = vpop.permute.xlu0 %6810 }
 0x71c   : > { %v6813_v6 = vunpack.i.h.bf16 %v6811_v62  ;;  %v6812_v26 = vunpack.i.l.bf16 %v6811_v62  ;;  %v12132_v62 = vld [vmem:[#allocation8_spill] sm:$0xff] }
 0x71d   : > { %6840 = vrot.lane.b32.xlu1 %v6839_v19, %s7311_s26 }
 0x71e   : > { %v3193_v4 = vsel %vm1202_vm9, %v8438_v28, %v6812_v26  ;;  %v3194_v23 = vsel %vm1202_vm9, %v8559_v17, %v6813_v6 }
 0x71f   : > { %v3208_v47 = vpack.c.bf16 %v3194_v23, %v3193_v4 }
 0x722   : > { %v3125_v40 = vpop.f32.mrf.mxu1 }
 0x723   : > { %v6816_v61 = vpop.permute.xlu1 %6815  ;;  %v6821_v9 = vpop.permute.xlu0 %6820  ;;  %v12134_v40 = vld [vmem:[#allocation9_spill] sm:$0xff] }
 0x724   : > { %v6818_v7 = vunpack.i.h.bf16 %v6816_v61  ;;  %v6817_v25 = vunpack.i.l.bf16 %v6816_v61  ;;  %v6823_v10 = vunpack.i.h.bf16 %v6821_v9  ;;  %v6822_v54 = vunpack.i.l.bf16 %v6821_v9  ;;  %v12135_v9 = vld [vmem:[#allocation11_spill] sm:$0xff] }
 0x726   : > { %v3196_v45 = vsel %vm1202_vm9, %v8540_v52, %v6818_v7  ;;  %v3195_v1 = vsel %vm1202_vm9, %v8538_v24, %v6817_v25  ;;  %v3197_v33 = vsel %vm1202_vm9, %v8565_v29, %v6822_v54  ;;  %v3198_v28 = vsel %vm1202_vm9, %v8569_v16, %v6823_v10 }
 0x727   : > { %v3209_v30 = vpack.c.bf16 %v3196_v45, %v3195_v1  ;;  %v3210_v17 = vpack.c.bf16 %v3198_v28, %v3197_v33 }
 0x729   : > { %3296 = vmatmul.bf16.gmra.mxu0 %v3208_v47  ;;  %3301 = vmatmul.bf16.vlgmr.msra.gmra.mxu2 %v3209_v30 }
 0x739   : > { %3306 = vmatmul.bf16.gmra.mxu2 %v3210_v17 }
 0x754   : > { %v6826_v41 = vpop.permute.xlu1 %6825 }
 0x755   : > { %v6828_v52 = vunpack.i.h.bf16 %v6826_v41  ;;  %v6827_v20 = vunpack.i.l.bf16 %v6826_v41 }
 0x757   : > { %v3199_v24 = vsel %vm1202_vm9, %v8589_v56, %v6827_v20  ;;  %v3200_v63 = vsel %vm1202_vm9, %v8587_v59, %v6828_v52  ;;  %v12137_v20 = vld [vmem:[#allocation13_spill] sm:$0xff] }
 0x758   : > { %v3211_v44 = vpack.c.bf16 %v3200_v63, %v3199_v24 }
 0x75a   : > { %3311 = vmatmul.bf16.gmra.mxu2 %v3211_v44 }
 0x764   : > { %v6836_v35 = vpop.permute.xlu0 %6835 }
 0x765   : > { %v6838_v38 = vunpack.i.h.bf16 %v6836_v35  ;;  %v6837_v21 = vunpack.i.l.bf16 %v6836_v35 }
 0x767   : > { %v3203_v29 = vsel %vm1202_vm9, %v8593_v60, %v6837_v21  ;;  %v3204_v16 = vsel %vm1202_vm9, %v8595_v48, %v6838_v38 }
 0x768   : > { %v3213_v12 = vpack.c.bf16 %v3204_v16, %v3203_v29 }
 0x76a   : > { %3321 = vmatmul.bf16.gmra.mxu3 %v3213_v12 }
 0x78f   : > { %v6841_v11 = vpop.permute.xlu1 %6840 }
 0x790   : > { %v6843_v27 = vunpack.i.h.bf16 %v6841_v11  ;;  %v6842_v13 = vunpack.i.l.bf16 %v6841_v11  ;;  %v12139_v11 = vld [vmem:[#allocation12_spill] sm:$0xff] }
 0x792   : > { %v3205_v56 = vsel %vm1202_vm9, %v8585_v8, %v6842_v13  ;;  %v3206_v59 = vsel %vm1202_vm9, %v8591_v32, %v6843_v27 }
 0x793   : > { %v3214_v2 = vpack.c.bf16 %v3206_v59, %v3205_v56 }
 0x795   : > { %3326 = vmatmul.bf16.gmra.mxu3 %v3214_v2 }
 0x796   : > { %v3292_v60 = vpop.f32.mrf.mxu0 }
 0x797   : > { %v3293_v48 = vadd.f32 %v8904_v14, %v3292_v60 }
 0x799   : > { %v8908_v53 = vadd.f32 %v12120_v36, %v3293_v48 }
 0x79a   : > { %v3317_v41 = vpop.f32.mrf.mxu3 }
 0x79b   : > { %12121 = vst [vmem:[#allocation20_spill] sm:$0xff] %v8908_v53  ;;  %3350 = vadd.xlane.f32.xlu0 %v8908_v53  ;;  %v3318_v2 = vadd.f32 %v8904_v14, %v3317_v41 }
 0x79e   : > { %v3294_v39 = vpop.f32.mrf.mxu0 }
 0x79f   : > { %v3295_v8 = vadd.f32 %v8904_v14, %v3294_v39  ;;  %v12141_v39 = vld [vmem:[#allocation10_spill] sm:$0xff] }
 0x7a1   : > { %v8913_v32 = vadd.f32 %v12122_v57, %v3295_v8  ;;  %v8990_v8 = vadd.f32 %v12141_v39, %v3318_v2  ;;  %v6652_v2 = vld [vmem:[%s11973_s9 + $0xcc] sm:$0xf] }
 0x7a2   : > { %v3319_v12 = vpop.f32.mrf.mxu3 }
 0x7a3   : > { %12123 = vst [vmem:[#allocation28_spill] sm:$0xff] %v8913_v32  ;;  %3352 = vadd.xlane.f32.xlu1 %v8913_v32 }
 0x7a4   : > { %12142 = vst [vmem:[#allocation31_spill] sm:$0xff] %v8990_v8 }
 0x7a6   : > { %v3297_v31 = vpop.f32.mrf.mxu0 }
 0x7a7   : > { %v3298_v58 = vadd.f32 %v8904_v14, %v3297_v31 }
 0x7a9   : > { %v8918_v18 = vadd.f32 %v12124_v42, %v3298_v58 }
 0x7ab   : > { %12125 = vst [vmem:[#allocation24_spill] sm:$0xff] %v8918_v18  ;;  %3354 = vadd.xlane.f32.xlu2 %v8918_v18 }
 0x7ac   : > { %v3302_v0 = vpop.f32.mrf.mxu2 }
 0x7ad   : > { %v3303_v51 = vadd.f32 %v8904_v14, %v3302_v0  ;;  %v3320_v0 = vadd.f32 %v8904_v14, %v3319_v12  ;;  %v6372_v12 = vld [vmem:[%s11973_s9 + $0xd0] sm:$0xf0] }
 0x7ae   : > { %v3299_v22 = vpop.f32.mrf.mxu0 }
 0x7af   : > { %v8923_v15 = vadd.f32 %v12126_v43, %v3303_v51  ;;  %v3300_v5 = vadd.f32 %v8904_v14, %v3299_v22  ;;  %v12143_v43 = vld [vmem:[#allocation14_spill] sm:$0xff] }
 0x7b1   : > { %12127 = vst [vmem:[#allocation19_spill] sm:$0xff] %v8923_v15  ;;  %v8927_v3 = vadd.f32 %v12128_v49, %v3300_v5  ;;  %3358 = vadd.xlane.f32.xlu1 %v8923_v15  ;;  %v9003_v5 = vadd.f32 %v12143_v43, %v3320_v0  ;;  %v6356_v0 = vld [vmem:[%s11973_s9 + $0xb0] sm:$0xf0]  ;;  %v6650_v43 = vld [vmem:[%s11973_s9 + $0xb4] sm:$0xf0] }
 0x7b3   : > { %12129 = vst [vmem:[#allocation34_spill] sm:$0xff] %v8927_v3  ;;  %3356 = vadd.xlane.f32.xlu0 %v8927_v3 }
 0x7b4   : > { %v3304_v46 = vpop.f32.mrf.mxu2  ;;  %12144 = vst [vmem:[#allocation30_spill] sm:$0xff] %v9003_v5 }
 0x7b5   : > { %v3305_v34 = vadd.f32 %v8904_v14, %v3304_v46 }
 0x7b7   : > { %v8933_v50 = vadd.f32 %v12130_v55, %v3305_v34 }
 0x7b9   : > { %12131 = vst [vmem:[#allocation32_spill] sm:$0xff] %v8933_v50 }
 0x7bb   : > { %3360 = vadd.xlane.f32.xlu0 %v8933_v50 }
 0x7bc   : > { %v3307_v37 = vpop.f32.mrf.mxu2 }
 0x7bd   : > { %v3308_v19 = vadd.f32 %v8904_v14, %v3307_v37  ;;  %v12145_v37 = vld [vmem:[#allocation16_spill] sm:$0xff] }
 0x7bf   : > { %v8938_v6 = vadd.f32 %v12132_v62, %v3308_v19  ;;  %v12147_v62 = vld [vmem:[#allocation15_spill] sm:$0xff] }
 0x7c1   : > { %12133 = vst [vmem:[#allocation27_spill] sm:$0xff] %v8938_v6 }
 0x7c3   : > { %3362 = vadd.xlane.f32.xlu0 %v8938_v6 }
 0x7c4   : > { %v3309_v25 = vpop.f32.mrf.mxu2 }
 0x7c5   : > { %v3310_v45 = vadd.f32 %v8904_v14, %v3309_v25 }
 0x7c7   : > { %v8953_v10 = vadd.f32 %v12135_v9, %v3310_v45  ;;  %v6386_v45 = vld [vmem:[%s11973_s9 + $0xe0] sm:$0xf] }
 0x7c9   : > { %12136 = vst [vmem:[#allocation26_spill] sm:$0xff] %v8953_v10 }
 0x7dd   : > { %v3312_v47 = vpop.f32.mrf.mxu2 }
 0x7de   : > { %v3313_v28 = vadd.f32 %v8904_v14, %v3312_v47  ;;  %v6655_v47 = vld [vmem:[%s11973_s9 + $0xe4] sm:$0xf] }
 0x7e0   : > { %v8964_v24 = vadd.f32 %v12137_v20, %v3313_v28  ;;  %v6658_v28 = vld [vmem:[%s11973_s9 + $0xf4] sm:$0xf0]  ;;  %v6656_v20 = vld [vmem:[%s11973_s9 + $0xec] sm:$0xf] }
 0x7e2   : > { %12138 = vst [vmem:[#allocation21_spill] sm:$0xff] %v8964_v24 }
 0x7e5   : > { %v3314_v44 = vpop.f32.mrf.mxu2 }
 0x7e6   : > { %v3315_v38 = vadd.f32 %v8904_v14, %v3314_v44 }
 0x7e8   : > { %v8975_v27 = vadd.f32 %v12139_v11, %v3315_v38  ;;  %v6653_v38 = vld [vmem:[%s11973_s9 + $0xcc] sm:$0xf0]  ;;  %v6378_v11 = vld [vmem:[%s11973_s9 + $0xc8] sm:$0xf] }
 0x7ea   : > { %12140 = vst [vmem:[#allocation22_spill] sm:$0xff] %v8975_v27 }
 0x7ed   : > { %v3322_v57 = vpop.f32.mrf.mxu3 }
 0x7ee   : > { %v3323_v34 = vadd.f32 %v8904_v14, %v3322_v57  ;;  %v6354_v57 = vld [vmem:[%s11973_s9 + $0xa0] sm:$0xf] }
 0x7f0   : > { %v9011_v19 = vadd.f32 %v12145_v37, %v3323_v34  ;;  %v6648_v34 = vld [vmem:[%s11973_s9 + $0xac] sm:$0xf] }
 0x7f2   : > { %12146 = vst [vmem:[#allocation23_spill] sm:$0xff] %v9011_v19 }
 0x7f5   : > { %v3324_v46 = vpop.f32.mrf.mxu3 }
 0x7f6   : > { %v3325_v55 = vadd.f32 %v8904_v14, %v3324_v46 }
 0x80e   : > { %v3351_v26 = vpop.xlane.xlu0 %3350 }
 0x80f   : > { %v3382_v61 = vmul.f32 %v3351_v26, %v12134_v40  ;;  %v9014_v26 = vadd.f32 %v12147_v62, %v3325_v55  ;;  %v6364_v55 = vld [vmem:[%s11973_s9 + $0xb8] sm:$0xf0]  ;;  %v6338_v62 = vld [vmem:[%s11973_s9 + $0x80] sm:$0xf] }
 0x810   : > { %v6367_v37 = vor.u32 %v6648_v34, %v6364_v55 }
 0x811   : > { %v8943_v7 = vsub.f32 %v8908_v53, %v3382_v61  ;;  %12148 = vst [vmem:[#allocation29_spill] sm:$0xff] %v9014_v26 }
 0x813   : > { %v3414_v4 = vmul.f32 %v8943_v7, %v8943_v7 }
 0x815   : > { %3430 = vadd.xlane.f32.xlu2 %v3414_v4  ;;  %v12149_v4 = vld [vmem:[#allocation18_spill] sm:$0xff] }
 0x816   : > { %v3353_v23 = vpop.xlane.xlu1 %3352 }
 0x817   : > { %v3383_v1 = vmul.f32 %v3353_v23, %v12134_v40 }
 0x818   : > { %v3327_v61 = vpop.f32.mrf.mxu3 }
 0x819   : > { %v8950_v30 = vsub.f32 %v8913_v32, %v3383_v1  ;;  %v3328_v25 = vadd.f32 %v8904_v14, %v3327_v61  ;;  %v6657_v1 = vld [vmem:[%s11973_s9 + $0xec] sm:$0xf0] }
 0x81a   : > { %v6387_v9 = vor.u32 %v6657_v1, %v6386_v45  ;;  %v6645_v61 = vld [vmem:[%s11973_s9 + $0x8c] sm:$0xf0]  ;;  %v6340_v45 = vld [vmem:[%s11973_s9 + $0x90] sm:$0xf0]  ;;  %v6346_v1 = vld [vmem:[%s11973_s9 + $0x88] sm:$0xf] }
 0x81b   : > { %v3415_v54 = vmul.f32 %v8950_v30, %v8950_v30  ;;  %v9020_v23 = vadd.f32 %v12149_v4, %v3328_v25  ;;  %v6643_v25 = vld [vmem:[%s11973_s9 + $0x84] sm:$0xf]  ;;  %v6339_v4 = vor.u32 %v6645_v61, %v6338_v62  ;;  %v6633_v62 = vld [vmem:[%s11973_s9 + $0x2c] sm:$0xf0] }
 0x81c   : > { %3918 = vmatpush.bf16.msrb.mxu3 %v6387_v9  ;;  %v6343_v9 = vor.u32 %v6643_v25, %v6340_v45  ;;  %v6631_v25 = vld [vmem:[%s11973_s9 + $0x24] sm:$0xf]  ;;  %v6298_v45 = vld [vmem:[%s11973_s9 + $0x28] sm:$0xf] }
 0x81d   : > { %3432 = vadd.xlane.f32.xlu1 %v3415_v54  ;;  %3364 = vadd.xlane.f32.xlu2 %v8953_v10  ;;  %12150 = vst [vmem:[#allocation25_spill] sm:$0xff] %v9020_v23  ;;  %v6388_v54 = vld [vmem:[%s11973_s9 + $0xf0] sm:$0xf0] }
 0x81e   : > { %v3355_v33 = vpop.xlane.xlu2 %3354 }
 0x81f   : > { %v3384_v17 = vmul.f32 %v3355_v33, %v12134_v40  ;;  %v6394_v33 = vld [vmem:[%s11973_s9 + $0xe8] sm:$0xf] }
 0x820   : > { %v6395_v41 = vor.u32 %v6658_v28, %v6394_v33  ;;  %v6644_v33 = vld [vmem:[%s11973_s9 + $0x8c] sm:$0xf]  ;;  %v6348_v28 = vld [vmem:[%s11973_s9 + $0x98] sm:$0xf0] }
 0x821   : > { %v8961_v52 = vsub.f32 %v8918_v18, %v3384_v17  ;;  %v6391_v17 = vor.u32 %v6655_v47, %v6388_v54  ;;  %v6646_v47 = vld [vmem:[%s11973_s9 + $0x94] sm:$0xf0] }
 0x822   : > { %4016 = vmatpush.bf16.msra.mxu1 %v6395_v41  ;;  %v6347_v54 = vor.u32 %v6646_v47, %v6346_v1  ;;  %v6322_v41 = vld [vmem:[%s11973_s9 + $0x60] sm:$0xf]  ;;  %v6634_v47 = vld [vmem:[%s11973_s9 + $0x34] sm:$0xf0] }
 0x823   : > { %v3416_v63 = vmul.f32 %v8961_v52, %v8961_v52  ;;  %3967 = vmatpush.bf16.msra.mxu0 %v6391_v17  ;;  %v6351_v17 = vor.u32 %v6644_v33, %v6348_v28  ;;  %v6299_v33 = vor.u32 %v6634_v47, %v6298_v45  ;;  %v3329_v47 = vpop.f32.mrf.mxu3 }
 0x824   : > { %v3359_v29 = vpop.xlane.xlu1 %3358 }
 0x825   : > { %3434 = vadd.xlane.f32.xlu1 %v3416_v63  ;;  %3366 = vadd.xlane.f32.xlu2 %v8964_v24  ;;  %v3386_v13 = vmul.f32 %v3359_v29, %v12134_v40  ;;  %v6396_v63 = vld [vmem:[%s11973_s9 + $0xf8] sm:$0xf0] }
 0x826   : > { %v3357_v35 = vpop.xlane.xlu0 %3356  ;;  %v6399_v44 = vor.u32 %v6656_v20, %v6396_v63  ;;  %v6641_v20 = vld [vmem:[%s11973_s9 + $0x6c] sm:$0xf0]  ;;  %v6639_v63 = vld [vmem:[%s11973_s9 + $0x64] sm:$0xf] }
 0x827   : > { %v3385_v21 = vmul.f32 %v3357_v35, %v12134_v40  ;;  %v8983_v60 = vsub.f32 %v8923_v15, %v3386_v13  ;;  %v6370_v35 = vld [vmem:[%s11973_s9 + $0xc0] sm:$0xf]  ;;  %v6654_v13 = vld [vmem:[%s11973_s9 + $0xd4] sm:$0xf0] }
 0x828   : > { %4065 = vmatpush.bf16.msrb.mxu2 %v6399_v44  ;;  %v6371_v29 = vor.u32 %v6653_v38, %v6370_v35  ;;  %v6323_v44 = vor.u32 %v6641_v20, %v6322_v41  ;;  %v6324_v35 = vld [vmem:[%s11973_s9 + $0x70] sm:$0xf0]  ;;  %v6330_v38 = vld [vmem:[%s11973_s9 + $0x68] sm:$0xf]  ;;  %v6629_v41 = vld [vmem:[%s11973_s9 + $0xc] sm:$0xf0] }
 0x829   : > { %v8972_v16 = vsub.f32 %v8927_v3, %v3385_v21  ;;  %v3418_v31 = vmul.f32 %v8983_v60, %v8983_v60  ;;  %v6651_v21 = vld [vmem:[%s11973_s9 + $0xc4] sm:$0xf] }
 0x82a   : > { %3919 = vmatpush.bf16.msrb.mxu3 %v6371_v29  ;;  %v6327_v29 = vor.u32 %v6639_v63, %v6324_v35  ;;  %v6627_v20 = vld [vmem:[%s11973_s9 + $0x4] sm:$0xf] }
 0x82b   : > { %v3417_v56 = vmul.f32 %v8972_v16, %v8972_v16 }
 0x82d   : > { %3368 = vadd.xlane.f32.xlu1 %v8975_v27  ;;  %3436 = vadd.xlane.f32.xlu0 %v3417_v56  ;;  %v6375_v56 = vor.u32 %v6651_v21, %v6372_v12  ;;  %v6642_v21 = vld [vmem:[%s11973_s9 + $0x74] sm:$0xf0] }
 0x82e   : > { %v3361_v59 = vpop.xlane.xlu0 %3360  ;;  %v6331_v12 = vor.u32 %v6642_v21, %v6330_v38  ;;  %v6276_v38 = vld [vmem:[%s11973_s9 + $0x10] sm:$0xf0]  ;;  %v6282_v21 = vld [vmem:[%s11973_s9 + $0x8] sm:$0xf] }
 0x82f   : > { %v3387_v48 = vmul.f32 %v3361_v59, %v12134_v40  ;;  %v6379_v59 = vor.u32 %v6654_v13, %v6378_v11  ;;  %3968 = vmatpush.bf16.msra.mxu0 %v6375_v56  ;;  %v6640_v11 = vld [vmem:[%s11973_s9 + $0x6c] sm:$0xf]  ;;  %v6332_v13 = vld [vmem:[%s11973_s9 + $0x78] sm:$0xf0] }
 0x830   : > { %v6335_v56 = vor.u32 %v6640_v11, %v6332_v13  ;;  %v6279_v13 = vor.u32 %v6627_v20, %v6276_v38 }
 0x831   : > { %v8987_v36 = vsub.f32 %v8933_v50, %v3387_v48  ;;  %v6380_v48 = vld [vmem:[%s11973_s9 + $0xd8] sm:$0xf0]  ;;  %4017 = vmatpush.bf16.msra.mxu1 %v6379_v59  ;;  %v6306_v59 = vld [vmem:[%s11973_s9 + $0x40] sm:$0xf] }
 0x832   : > { %v6383_v39 = vor.u32 %v6652_v2, %v6380_v48  ;;  %v6637_v2 = vld [vmem:[%s11973_s9 + $0x4c] sm:$0xf0]  ;;  %v6635_v48 = vld [vmem:[%s11973_s9 + $0x44] sm:$0xf] }
 0x833   : > { %v3419_v58 = vmul.f32 %v8987_v36, %v8987_v36 }
 0x834   : > { %4066 = vmatpush.bf16.msrb.mxu2 %v6383_v39 }
 0x835   : > { %3370 = vadd.xlane.f32.xlu1 %v8990_v8  ;;  %3438 = vadd.xlane.f32.xlu0 %v3418_v31  ;;  %v6649_v31 = vld [vmem:[%s11973_s9 + $0xac] sm:$0xf0] }
 0x836   : > { %3440 = vadd.xlane.f32.xlu2 %v3419_v58  ;;  %v3363_v42 = vpop.xlane.xlu0 %3362  ;;  %v6647_v58 = vld [vmem:[%s11973_s9 + $0xa4] sm:$0xf] }
 0x837   : > { %v3388_v51 = vmul.f32 %v3363_v42, %v12134_v40  ;;  %v6355_v42 = vor.u32 %v6649_v31, %v6354_v57  ;;  %v6307_v57 = vor.u32 %v6637_v2, %v6306_v59  ;;  %v6308_v31 = vld [vmem:[%s11973_s9 + $0x50] sm:$0xf0]  ;;  %v6628_v59 = vld [vmem:[%s11973_s9 + $0xc] sm:$0xf]  ;;  %v6284_v2 = vld [vmem:[%s11973_s9 + $0x18] sm:$0xf0] }
 0x838   : > { %4067 = vmatpush.bf16.msrb.mxu2 %v6367_v37  ;;  %v6290_v37 = vld [vmem:[%s11973_s9 + $0x20] sm:$0xf] }
 0x839   : > { %v9000_v22 = vsub.f32 %v8938_v6, %v3388_v51  ;;  %v6362_v51 = vld [vmem:[%s11973_s9 + $0xa8] sm:$0xf]  ;;  %3920 = vmatpush.bf16.msrb.mxu3 %v6355_v42  ;;  %v6638_v42 = vld [vmem:[%s11973_s9 + $0x54] sm:$0xf0]  ;;  %v6291_v61 = vor.u32 %v6633_v62, %v6290_v37 }
 0x83a   : > { %v6363_v46 = vor.u32 %v6650_v43, %v6362_v51  ;;  %v6311_v51 = vor.u32 %v6635_v48, %v6308_v31  ;;  %v6287_v48 = vor.u32 %v6628_v59, %v6284_v2 }
 0x83b   : > { %v3420_v49 = vmul.f32 %v9000_v22, %v9000_v22 }
 0x83c   : > { %4018 = vmatpush.bf16.msra.mxu1 %v6363_v46  ;;  %4068 = vmatpush.bf16.msrb.mxu2 %v6351_v17  ;;  %v6316_v46 = vld [vmem:[%s11973_s9 + $0x58] sm:$0xf0]  ;;  %v6274_v17 = vld [vmem:[%s11973_s9] sm:$0xf] }
 0x83d   : > { %3372 = vadd.xlane.f32.xlu0 %v9003_v5  ;;  %3921 = vmatpush.bf16.msrb.mxu3 %v6339_v4  ;;  %v6292_v4 = vld [vmem:[%s11973_s9 + $0x30] sm:$0xf0]  ;;  %v6275_v35 = vor.u32 %v6629_v41, %v6274_v17  ;;  %v3330_v41 = vadd.f32 %v8904_v14, %v3329_v47 }
 0x83e   : > { %3442 = vadd.xlane.f32.xlu2 %v3420_v49  ;;  %v6359_v49 = vor.u32 %v6647_v58, %v6356_v0  ;;  %v6314_v58 = vld [vmem:[%s11973_s9 + $0x48] sm:$0xf]  ;;  %v6295_v1 = vor.u32 %v6631_v25, %v6292_v4 }
 0x83f   : > { %v6315_v43 = vor.u32 %v6638_v42, %v6314_v58 }
 0x840   : > { %3969 = vmatpush.bf16.msra.mxu0 %v6359_v49  ;;  %4019 = vmatpush.bf16.msra.mxu1 %v6347_v54  ;;  %v6636_v49 = vld [vmem:[%s11973_s9 + $0x4c] sm:$0xf]  ;;  %v6300_v54 = vld [vmem:[%s11973_s9 + $0x38] sm:$0xf0] }
 0x841   : > { %3922 = vmatpush.bf16.msrb.mxu3 %v6323_v44  ;;  %4069 = vmatpush.bf16.msrb.mxu2 %v6335_v56  ;;  %v6319_v34 = vor.u32 %v6636_v49, %v6316_v46 }
 0x844   : > { %3970 = vmatpush.bf16.msra.mxu0 %v6343_v9  ;;  %4020 = vmatpush.bf16.msra.mxu1 %v6331_v12  ;;  %v6632_v9 = vld [vmem:[%s11973_s9 + $0x2c] sm:$0xf] }
 0x845   : > { %3374 = vadd.xlane.f32.xlu0 %v9011_v19  ;;  %3923 = vmatpush.bf16.msrb.mxu3 %v6307_v57  ;;  %v6303_v28 = vor.u32 %v6632_v9, %v6300_v54 }
 0x846   : > { %3376 = vadd.xlane.f32.xlu2 %v9014_v26  ;;  %4070 = vmatpush.bf16.msrb.mxu2 %v6319_v34 }
 0x848   : > { %3971 = vmatpush.bf16.msra.mxu0 %v6327_v29  ;;  %4021 = vmatpush.bf16.msra.mxu1 %v6315_v43  ;;  %v6630_v29 = vld [vmem:[%s11973_s9 + $0x14] sm:$0xf0] }
 0x849   : > { %3924 = vmatpush.bf16.msrb.mxu3 %v6291_v61  ;;  %v6283_v56 = vor.u32 %v6630_v29, %v6282_v21 }
 0x84a   : > { %4071 = vmatpush.bf16.msrb.mxu2 %v6303_v28 }
 0x84c   : > { %3972 = vmatpush.bf16.msra.mxu0 %v6311_v51  ;;  %4022 = vmatpush.bf16.msra.mxu1 %v6299_v33 }
 0x84d   : > { %3925 = vmatpush.bf16.msrb.mxu3 %v6275_v35 }
 0x84e   : > { %3378 = vadd.xlane.f32.xlu2 %v9020_v23  ;;  %4072 = vmatpush.bf16.msrb.mxu2 %v6287_v48 }
 0x850   : > { %3973 = vmatpush.bf16.msra.mxu0 %v6295_v1  ;;  %4023 = vmatpush.bf16.msra.mxu1 %v6283_v56 }
 0x854   : > { %3974 = vmatpush.bf16.msra.mxu0 %v6279_v13 }
 0x888   : > { %v3431_v39 = vpop.xlane.xlu2 %3430 }
 0x889   : > { %v3462_v0 = vmul.f32 %v3431_v39, %v12134_v40 }
 0x88b   : > { %v9168_v55 = vadd.f32 1e-05, %v3462_v0 }
 0x88d   : > { %7012 = vrsqrt.f32 %v9168_v55  ;;  %vm3500_vm6 = vweird.f32 %v9168_v55 }
 0x890   : > { %v3433_v63 = vpop.xlane.xlu1 %3432  ;;  %v3365_v44 = vpop.xlane.xlu2 %3364 }
 0x891   : > { %v3463_v12 = vmul.f32 %v3433_v63, %v12134_v40  ;;  %v3389_v11 = vmul.f32 %v3365_v44, %v12134_v40 }
 0x893   : > { %v7013_v39 = vpop.eup %7012  ;;  %v3479_v57 = vadd.f32 1e-05, %v3463_v12  ;;  %v9222_v31 = vsub.f32 %v8953_v10, %v3389_v11  ;;  %v12151_v11 = vld [vmem:[#allocation17_spill] sm:$0xff] }
 0x894   : > { %v3495_v58 = vmul.f32 %v7013_v39, %v9168_v55  ;;  %vm3501_vm9 = vweird.f32 %v7013_v39  ;;  %v9241_v55 = vld [vmem:[%s11971_s7] ss:$0 sm:$0xff]  ;;  %v9248_v13 = vadd.f32 %v12151_v11, %v3330_v41 }
 0x895   : > { %7014 = vrsqrt.f32 %v3479_v57  ;;  %v3421_v42 = vmul.f32 %v9222_v31, %v9222_v31  ;;  %vm3502_vm7 = vmor %vm3500_vm6, %vm3501_vm9  ;;  %vm3510_vm10 = vweird.f32 %v3479_v57 }
 0x896   : > { %v3496_v0 = vmul.f32 %v7013_v39, %v3495_v58  ;;  %12152 = vst [vmem:[#allocation33_spill] sm:$0xff] %v9248_v13 }
 0x897   : > { %3444 = vadd.xlane.f32.xlu1 %v3421_v42 }
 0x898   : > { %v3497_v51 = vmul.f32 0.5, %v3496_v0  ;;  %v3435_v43 = vpop.xlane.xlu1 %3434  ;;  %v3367_v49 = vpop.xlane.xlu2 %3366 }
 0x899   : > { %v3464_v46 = vmul.f32 %v3435_v43, %v12134_v40  ;;  %v3390_v34 = vmul.f32 %v3367_v49, %v12134_v40 }
 0x89a   : > { %v3498_v37 = vsub.f32 1.5, %v3497_v51 }
 0x89b   : > { %v7015_v62 = vpop.eup %7014  ;;  %v3480_v61 = vadd.f32 1e-05, %v3464_v46  ;;  %v9230_v25 = vsub.f32 %v8964_v24, %v3390_v34 }
 0x89c   : > { %v3499_v4 = vmul.f32 %v7013_v39, %v3498_v37  ;;  %v3505_v45 = vmul.f32 %v7015_v62, %v3479_v57  ;;  %vm3511_vm8 = vweird.f32 %v7015_v62 }
 0x89d   : > { %7016 = vrsqrt.f32 %v3480_v61  ;;  %v3422_v1 = vmul.f32 %v9230_v25, %v9230_v25  ;;  %vm3512_vm11 = vmor %vm3510_vm10, %vm3511_vm8  ;;  %vm3520_vm13 = vweird.f32 %v3480_v61 }
 0x89e   : > { %v3506_v9 = vmul.f32 %v7015_v62, %v3505_v45  ;;  %v3503_v54 = vsel %vm3502_vm7, %v7013_v39, %v3499_v4 }
 0x89f   : > { %3446 = vadd.xlane.f32.xlu1 %v3422_v1  ;;  %v3654_v44 = vmul.f32 %v3503_v54, %v8943_v7  ;;  %v9255_v7 = vld [vmem:[%s11972_s8] ss:$0 sm:$0xff] }
 0x8a0   : > { %v3507_v33 = vmul.f32 0.5, %v3506_v9  ;;  %v3369_v28 = vpop.xlane.xlu1 %3368  ;;  %v3437_v17 = vpop.xlane.xlu0 %3436 }
 0x8a1   : > { %v3391_v20 = vmul.f32 %v3369_v28, %v12134_v40  ;;  %v3465_v63 = vmul.f32 %v3437_v17, %v12134_v40  ;;  %v3673_v59 = vmul.f32 %v9241_v55, %v3654_v44 }
 0x8a2   : > { %v3508_v35 = vsub.f32 1.5, %v3507_v33 }
 0x8a3   : > { %v7017_v38 = vpop.eup %7016  ;;  %v9245_v21 = vsub.f32 %v8975_v27, %v3391_v20  ;;  %v3481_v29 = vadd.f32 1e-05, %v3465_v63  ;;  %v3692_v46 = vadd.f32 %v9255_v7, %v3673_v59 }
 0x8a4   : > { %v3509_v12 = vmul.f32 %v7015_v62, %v3508_v35  ;;  %v3515_v14 = vmul.f32 %v7017_v38, %v3480_v61  ;;  %vm3521_vm12 = vweird.f32 %v7017_v38 }
 0x8a5   : > { %7018 = vrsqrt.f32 %v3481_v29  ;;  %v3423_v56 = vmul.f32 %v9245_v21, %v9245_v21  ;;  %vm3522_vm14 = vmor %vm3520_vm13, %vm3521_vm12  ;;  %vm3530_vm0 = vweird.f32 %v3481_v29 }
 0x8a6   : > { %v3513_v2 = vsel %vm3512_vm11, %v7015_v62, %v3509_v12  ;;  %v3516_v48 = vmul.f32 %v7017_v38, %v3515_v14 }
 0x8a7   : > { %v3655_v39 = vmul.f32 %v3513_v2, %v8950_v30  ;;  %3380 = vadd.xlane.f32.xlu1 %v9248_v13  ;;  %3448 = vadd.xlane.f32.xlu0 %v3423_v56 }
 0x8a8   : > { %v3517_v57 = vmul.f32 0.5, %v3516_v48  ;;  %v3371_v58 = vpop.xlane.xlu1 %3370  ;;  %v3439_v42 = vpop.xlane.xlu0 %3438 }
 0x8a9   : > { %v3674_v0 = vmul.f32 %v9241_v55, %v3655_v39  ;;  %v3392_v51 = vmul.f32 %v3371_v58, %v12134_v40  ;;  %v3441_v43 = vpop.xlane.xlu2 %3440  ;;  %v3466_v49 = vmul.f32 %v3439_v42, %v12134_v40 }
 0x8aa   : > { %v3518_v34 = vsub.f32 1.5, %v3517_v57  ;;  %v3467_v37 = vmul.f32 %v3441_v43, %v12134_v40 }
 0x8ab   : > { %v7019_v62 = vpop.eup %7018  ;;  %v3693_v30 = vadd.f32 %v9255_v7, %v3674_v0  ;;  %v9267_v4 = vsub.f32 %v8990_v8, %v3392_v51  ;;  %v3482_v45 = vadd.f32 1e-05, %v3466_v49 }
 0x8ac   : > { %v3519_v1 = vmul.f32 %v7017_v38, %v3518_v34  ;;  %v3525_v47 = vmul.f32 %v7019_v62, %v3481_v29  ;;  %v3483_v9 = vadd.f32 1e-05, %v3467_v37  ;;  %vm3531_vm15 = vweird.f32 %v7019_v62 }
 0x8ad   : > { %7020 = vrsqrt.f32 %v3482_v45  ;;  %v3708_v54 = vpack.c.bf16 %v3693_v30, %v3692_v46  ;;  %v3424_v33 = vmul.f32 %v9267_v4, %v9267_v4  ;;  %vm3532_vm1 = vmor %vm3530_vm0, %vm3531_vm15  ;;  %vm3540_vm4 = vweird.f32 %v3482_v45 }
 0x8ae   : > { %v3526_v28 = vmul.f32 %v7019_v62, %v3525_v47  ;;  %7022 = vrsqrt.f32 %v3483_v9  ;;  %v3523_v17 = vsel %vm3522_vm14, %v7017_v38, %v3519_v1  ;;  %vm3550_vm5 = vweird.f32 %v3483_v9 }
 0x8af   : > { %3926 = vmatmul.bf16.vlgmr.msrb.gmra.mxu3 %v3708_v54  ;;  %3975 = vmatmul.bf16.vlgmr.msra.gmra.mxu0 %v3708_v54  ;;  %v3656_v44 = vmul.f32 %v3523_v17, %v8961_v52 }
 0x8b0   : > { %v3527_v41 = vmul.f32 0.5, %v3526_v28  ;;  %4024 = vmatmul.bf16.vlgmr.msra.gmra.mxu1 %v3708_v54  ;;  %4073 = vmatmul.bf16.vlgmr.msrb.gmra.mxu2 %v3708_v54  ;;  %v3373_v20 = vpop.xlane.xlu0 %3372 }
 0x8b1   : > { %3450 = vadd.xlane.f32.xlu0 %v3424_v33  ;;  %v9271_v63 = vpop.xlane.xlu2 %3442  ;;  %v3393_v61 = vmul.f32 %v3373_v20, %v12134_v40  ;;  %v3675_v57 = vmul.f32 %v9241_v55, %v3656_v44 }
 0x8b2   : > { %v3528_v35 = vsub.f32 1.5, %v3527_v41 }
 0x8b3   : > { %v7021_v12 = vpop.eup %7020  ;;  %v9276_v14 = vsub.f32 %v9003_v5, %v3393_v61  ;;  %v3694_v37 = vadd.f32 %v9255_v7, %v3675_v57 }
 0x8b4   : > { %v7023_v38 = vpop.eup %7022  ;;  %v3529_v11 = vmul.f32 %v7019_v62, %v3528_v35  ;;  %v3535_v56 = vmul.f32 %v7021_v12, %v3482_v45  ;;  %vm3541_vm2 = vweird.f32 %v7021_v12 }
 0x8b5   : > { %v3545_v59 = vmul.f32 %v7023_v38, %v3483_v9  ;;  %v3425_v2 = vmul.f32 %v9276_v14, %v9276_v14  ;;  %vm3551_vm3 = vweird.f32 %v7023_v38  ;;  %vm3542_vm9 = vmor %vm3540_vm4, %vm3541_vm2 }
 0x8b6   : > { %v3533_v48 = vsel %vm3532_vm1, %v7019_v62, %v3529_v11  ;;  %v3536_v39 = vmul.f32 %v7021_v12, %v3535_v56  ;;  %vm3552_vm6 = vmor %vm3550_vm5, %vm3551_vm3 }
 0x8b7   : > { %v3657_v52 = vmul.f32 %v3533_v48, %v8972_v16  ;;  %v3546_v58 = vmul.f32 %v7023_v38, %v3545_v59  ;;  %3452 = vadd.xlane.f32.xlu2 %v3425_v2  ;;  %v3468_v59 = vmul.f32 %v9271_v63, %v12134_v40 }
 0x8b8   : > { %v3537_v42 = vmul.f32 0.5, %v3536_v39  ;;  %v3375_v0 = vpop.xlane.xlu0 %3374 }
 0x8b9   : > { %v3547_v51 = vmul.f32 0.5, %v3546_v58  ;;  %v3377_v43 = vpop.xlane.xlu2 %3376  ;;  %v3394_v29 = vmul.f32 %v3375_v0, %v12134_v40  ;;  %v3676_v49 = vmul.f32 %v9241_v55, %v3657_v52  ;;  %v3484_v2 = vadd.f32 1e-05, %v3468_v59 }
 0x8ba   : > { %v3538_v46 = vsub.f32 1.5, %v3537_v42  ;;  %v3395_v34 = vmul.f32 %v3377_v43, %v12134_v40 }
 0x8bb   : > { %v3548_v62 = vsub.f32 1.5, %v3547_v51  ;;  %v9287_v16 = vsub.f32 %v9011_v19, %v3394_v29  ;;  %v3695_v30 = vadd.f32 %v9255_v7, %v3676_v49  ;;  %7024 = vrsqrt.f32 %v3484_v2 }
 0x8bc   : > { %v3539_v1 = vmul.f32 %v7021_v12, %v3538_v46  ;;  %v9291_v47 = vsub.f32 %v9014_v26, %v3395_v34  ;;  %vm3560_vm8 = vweird.f32 %v3484_v2 }
 0x8bd   : > { %v3549_v54 = vmul.f32 %v7023_v38, %v3548_v62  ;;  %v3709_v33 = vpack.c.bf16 %v3695_v30, %v3694_v37  ;;  %v3426_v41 = vmul.f32 %v9287_v16, %v9287_v16 }
 0x8be   : > { %v3543_v28 = vsel %vm3542_vm9, %v7021_v12, %v3539_v1  ;;  %v3427_v17 = vmul.f32 %v9291_v47, %v9291_v47 }
 0x8bf   : > { %v3553_v20 = vsel %vm3552_vm6, %v7023_v38, %v3549_v54  ;;  %3931 = vmatmul.bf16.gmra.mxu3 %v3709_v33  ;;  %3980 = vmatmul.bf16.gmra.mxu0 %v3709_v33  ;;  %v3658_v61 = vmul.f32 %v3543_v28, %v8983_v60 }
 0x8c0   : > { %3456 = vadd.xlane.f32.xlu0 %v3427_v17  ;;  %4029 = vmatmul.bf16.gmra.mxu1 %v3709_v33  ;;  %v3659_v45 = vmul.f32 %v3553_v20, %v8987_v36 }
 0x8c1   : > { %4078 = vmatmul.bf16.gmra.mxu2 %v3709_v33  ;;  %3454 = vadd.xlane.f32.xlu1 %v3426_v41  ;;  %v3379_v9 = vpop.xlane.xlu2 %3378  ;;  %v3677_v12 = vmul.f32 %v9241_v55, %v3658_v61  ;;  %v7025_v48 = vpop.eup %7024 }
 0x8c2   : > { %v3396_v44 = vmul.f32 %v3379_v9, %v12134_v40  ;;  %v3678_v38 = vmul.f32 %v9241_v55, %v3659_v45  ;;  %v3555_v39 = vmul.f32 %v7025_v48, %v3484_v2  ;;  %vm3561_vm7 = vweird.f32 %v7025_v48 }
 0x8c3   : > { %v3696_v36 = vadd.f32 %v9255_v7, %v3677_v12  ;;  %vm3562_vm10 = vmor %vm3560_vm8, %vm3561_vm7 }
 0x8c4   : > { %v9301_v35 = vsub.f32 %v9020_v23, %v3396_v44  ;;  %v3697_v60 = vadd.f32 %v9255_v7, %v3678_v38  ;;  %v3556_v57 = vmul.f32 %v7025_v48, %v3555_v39 }
 0x8c6   : > { %v3428_v11 = vmul.f32 %v9301_v35, %v9301_v35  ;;  %v3710_v56 = vpack.c.bf16 %v3697_v60, %v3696_v36  ;;  %v3557_v0 = vmul.f32 0.5, %v3556_v57 }
 0x8c8   : > { %3458 = vadd.xlane.f32.xlu2 %v3428_v11  ;;  %v3558_v51 = vsub.f32 1.5, %v3557_v0 }
 0x8ca   : > { %v3559_v34 = vmul.f32 %v7025_v48, %v3558_v51 }
 0x8cc   : > { %v3563_v62 = vsel %vm3562_vm10, %v7025_v48, %v3559_v34 }
 0x8cd   : > { %v3660_v20 = vmul.f32 %v3563_v62, %v9000_v22 }
 0x8cf   : > { %3936 = vmatmul.bf16.gmra.mxu3 %v3710_v56  ;;  %3985 = vmatmul.bf16.gmra.mxu0 %v3710_v56  ;;  %v3679_v36 = vmul.f32 %v9241_v55, %v3660_v20 }
 0x8d0   : > { %4034 = vmatmul.bf16.gmra.mxu1 %v3710_v56 }
 0x8d1   : > { %4083 = vmatmul.bf16.gmra.mxu2 %v3710_v56  ;;  %v3698_v59 = vadd.f32 %v9255_v7, %v3679_v36 }
 0x90a   : > { %v3445_v52 = vpop.xlane.xlu1 %3444 }
 0x90b   : > { %v3469_v58 = vmul.f32 %v3445_v52, %v12134_v40 }
 0x90d   : > { %v3485_v42 = vadd.f32 1e-05, %v3469_v58 }
 0x90f   : > { %7026 = vrsqrt.f32 %v3485_v42  ;;  %vm3570_vm12 = vweird.f32 %v3485_v42 }
 0x912   : > { %v3447_v43 = vpop.xlane.xlu1 %3446 }
 0x913   : > { %v3470_v29 = vmul.f32 %v3447_v43, %v12134_v40  ;;  %v3748_v43 = vld [vmem:[%s11974_s10] sm:$0xf] }
 0x914   : > { %v9332_v62 = vperm.slane %v3748_v43, 2 }
 0x915   : > { %v7027_v49 = vpop.eup %7026  ;;  %v3486_v46 = vadd.f32 1e-05, %v3470_v29 }
 0x916   : > { %v3565_v63 = vmul.f32 %v7027_v49, %v3485_v42  ;;  %vm3571_vm11 = vweird.f32 %v7027_v49 }
 0x917   : > { %7028 = vrsqrt.f32 %v3486_v46  ;;  %vm3572_vm13 = vmor %vm3570_vm12, %vm3571_vm11  ;;  %vm3580_vm2 = vweird.f32 %v3486_v46 }
 0x918   : > { %v3566_v37 = vmul.f32 %v7027_v49, %v3565_v63 }
 0x91a   : > { %v3567_v30 = vmul.f32 0.5, %v3566_v37  ;;  %v3381_v1 = vpop.xlane.xlu1 %3380  ;;  %v3449_v54 = vpop.xlane.xlu0 %3448 }
 0x91b   : > { %v3397_v33 = vmul.f32 %v3381_v1, %v12134_v40  ;;  %v3471_v28 = vmul.f32 %v3449_v54, %v12134_v40 }
 0x91c   : > { %v3568_v17 = vsub.f32 1.5, %v3567_v30 }
 0x91d   : > { %v7029_v41 = vpop.eup %7028  ;;  %v9317_v45 = vsub.f32 %v9248_v13, %v3397_v33  ;;  %v3487_v61 = vadd.f32 1e-05, %v3471_v28 }
 0x91e   : > { %v3569_v9 = vmul.f32 %v7027_v49, %v3568_v17  ;;  %v3575_v44 = vmul.f32 %v7029_v41, %v3486_v46  ;;  %vm3581_vm15 = vweird.f32 %v7029_v41 }
 0x91f   : > { %12153 = vst [vmem:[#allocation3_spill] sm:$0xff] %v9317_v45  ;;  %7030 = vrsqrt.f32 %v3487_v61  ;;  %v3429_v12 = vmul.f32 %v9317_v45, %v9317_v45  ;;  %vm3590_vm0 = vweird.f32 %v3487_v61  ;;  %vm3582_vm3 = vmor %vm3580_vm2, %vm3581_vm15 }
 0x920   : > { %v3573_v38 = vsel %vm3572_vm13, %v7027_v49, %v3569_v9  ;;  %v3576_v60 = vmul.f32 %v7029_v41, %v3575_v44  ;;  %v9329_v49 = vperm.slane %v3748_v43, 1 }
 0x921   : > { %v3661_v11 = vmul.f32 %v3573_v38, %v9222_v31  ;;  %3460 = vadd.xlane.f32.xlu1 %v3429_v12  ;;  %v9350_v38 = vperm.slane %v3748_v43, 0 }
 0x922   : > { %v3577_v39 = vmul.f32 0.5, %v3576_v60 }
 0x923   : > { %v3680_v22 = vmul.f32 %v9241_v55, %v3661_v11 }
 0x924   : > { %v3578_v31 = vsub.f32 1.5, %v3577_v39  ;;  %v3451_v1 = vpop.xlane.xlu0 %3450 }
 0x925   : > { %v7031_v56 = vpop.eup %7030  ;;  %v3699_v2 = vadd.f32 %v9255_v7, %v3680_v22  ;;  %v3472_v46 = vmul.f32 %v3451_v1, %v12134_v40  ;;  %v9355_v22 = vperm.slane %v3748_v43, 3 }
 0x926   : > { %v3585_v48 = vmul.f32 %v7031_v56, %v3487_v61  ;;  %vm3591_vm14 = vweird.f32 %v7031_v56  ;;  %v3579_v51 = vmul.f32 %v7029_v41, %v3578_v31 }
 0x927   : > { %v3711_v57 = vpack.c.bf16 %v3699_v2, %v3698_v59  ;;  %vm3592_vm1 = vmor %vm3590_vm0, %vm3591_vm14  ;;  %v9347_v9 = vadd.f32 1e-05, %v3472_v46 }
 0x928   : > { %v3586_v52 = vmul.f32 %v7031_v56, %v3585_v48  ;;  %v3583_v34 = vsel %vm3582_vm3, %v7029_v41, %v3579_v51 }
 0x929   : > { %3941 = vmatmul.bf16.gmra.mxu3 %v3711_v57  ;;  %3990 = vmatmul.bf16.gmra.mxu0 %v3711_v57  ;;  %v3662_v30 = vmul.f32 %v3583_v34, %v9230_v25  ;;  %7032 = vrsqrt.f32 %v9347_v9  ;;  %vm3600_vm5 = vweird.f32 %v9347_v9 }
 0x92a   : > { %v3587_v58 = vmul.f32 0.5, %v3586_v52  ;;  %4039 = vmatmul.bf16.gmra.mxu1 %v3711_v57  ;;  %4088 = vmatmul.bf16.gmra.mxu2 %v3711_v57  ;;  %v3453_v17 = vpop.xlane.xlu2 %3452 }
 0x92b   : > { %v3473_v61 = vmul.f32 %v3453_v17, %v12134_v40 }
 0x92c   : > { %v3588_v42 = vsub.f32 1.5, %v3587_v58  ;;  %v3976_v63 = vpop.f32.mrf.mxu0 }
 0x92d   : > { %v9336_v54 = vadd.f32 %v3976_v63, %v9329_v49  ;;  %v4025_v33 = vpop.f32.mrf.mxu1  ;;  %v9353_v60 = vadd.f32 1e-05, %v3473_v61 }
 0x92e   : > { %v3589_v0 = vmul.f32 %v7031_v56, %v3588_v42  ;;  %v9341_v20 = vadd.f32 %v4025_v33, %v9332_v62 }
 0x92f   : > { %v6401_v41 = vmul.f32 -1.702, %v9336_v54  ;;  %v9369_v42 = vpop.eup %7032  ;;  %vm3610_vm9 = vweird.f32 %v9353_v60 }
 0x930   : > { %v3593_v29 = vsel %vm3592_vm1, %v7031_v56, %v3589_v0  ;;  %v6402_v44 = vmul.f32 -1.702, %v9341_v20  ;;  %v3595_v63 = vmul.f32 %v9369_v42, %v9347_v9  ;;  %vm3601_vm4 = vweird.f32 %v9369_v42 }
 0x931   : > { %v3663_v37 = vmul.f32 %v3593_v29, %v9245_v21  ;;  %v3681_v21 = vmul.f32 %v9241_v55, %v3662_v30  ;;  %v4244_v12 = vmul.f32 1.442695, %v6401_v41  ;;  %vm9424_vm7 = vmor %vm3600_vm5, %vm3601_vm4 }
 0x932   : > { %v3927_v36 = vpop.f32.mrf.mxu3  ;;  %v4246_v59 = vmul.f32 1.442695, %v6402_v44 }
 0x933   : > { %v3682_v28 = vmul.f32 %v9241_v55, %v3663_v37  ;;  %v3700_v11 = vadd.f32 %v9255_v7, %v3681_v21  ;;  %v4074_v2 = vpop.f32.mrf.mxu2  ;;  %7034 = vpow2.f32 %v4244_v12  ;;  %v9359_v48 = vadd.f32 %v3927_v36, %v9350_v38  ;;  %v3457_v44 = vpop.xlane.xlu0 %3456 }
 0x934   : > { %v3978_v39 = vpop.f32.mrf.mxu0  ;;  %7036 = vrsqrt.f32 %v9353_v60  ;;  %v9363_v57 = vadd.f32 %v4074_v2, %v9355_v22  ;;  %v3455_v33 = vpop.xlane.xlu1 %3454  ;;  %v3596_v21 = vmul.f32 %v9369_v42, %v3595_v63 }
 0x935   : > { %v3701_v25 = vadd.f32 %v9255_v7, %v3682_v28  ;;  %7038 = vpow2.f32 %v4246_v59  ;;  %v9366_v52 = vadd.f32 %v3978_v39, %v9329_v49  ;;  %v4027_v58 = vpop.f32.mrf.mxu1  ;;  %v6400_v31 = vmul.f32 -1.702, %v9359_v48 }
 0x936   : > { %v6403_v51 = vmul.f32 -1.702, %v9363_v57  ;;  %v9373_v43 = vadd.f32 %v4027_v58, %v9332_v62  ;;  %v3597_v36 = vmul.f32 0.5, %v3596_v21  ;;  %v3475_v59 = vmul.f32 %v3457_v44, %v12134_v40 }
 0x937   : > { %v3712_v56 = vpack.c.bf16 %v3701_v25, %v3700_v11  ;;  %v6405_v29 = vmul.f32 -1.702, %v9366_v52  ;;  %v4242_v37 = vmul.f32 1.442695, %v6400_v31  ;;  %v3474_v25 = vmul.f32 %v3455_v33, %v12134_v40 }
 0x938   : > { %v4248_v28 = vmul.f32 1.442695, %v6403_v51  ;;  %v6406_v46 = vmul.f32 -1.702, %v9373_v43  ;;  %v9398_v51 = vadd.f32 1e-05, %v3475_v59 }
 0x939   : > { %3946 = vmatmul.bf16.gmra.mxu3 %v3712_v56  ;;  %3995 = vmatmul.bf16.gmra.mxu0 %v3712_v56  ;;  %v7035_v0 = vpop.eup %7034  ;;  %v4252_v41 = vmul.f32 1.442695, %v6405_v29  ;;  %7040 = vpow2.f32 %v4242_v37 }
 0x93a   : > { %4044 = vmatmul.bf16.gmra.mxu1 %v3712_v56  ;;  %4093 = vmatmul.bf16.gmra.mxu2 %v3712_v56  ;;  %v9376_v34 = vpop.eup %7036  ;;  %v9380_v1 = vadd.f32 1.0, %v7035_v0  ;;  %v4254_v12 = vmul.f32 1.442695, %v6406_v46  ;;  %v9392_v56 = vadd.f32 1e-05, %v3474_v25  ;;  %v3598_v0 = vsub.f32 1.5, %v3597_v36  ;;  %v3929_v29 = vpop.f32.mrf.mxu3 }
 0x93b   : > { %v7039_v30 = vpop.eup %7038  ;;  %v3605_v17 = vmul.f32 %v9376_v34, %v9353_v60  ;;  %v9407_v46 = vadd.f32 %v3929_v29, %v9350_v38  ;;  %v4076_v25 = vpop.f32.mrf.mxu2  ;;  %vm3611_vm6 = vweird.f32 %v9376_v34 }
 0x93c   : > { %v9386_v61 = vadd.f32 1.0, %v7039_v30  ;;  %7042 = vrcp.f32 %v9380_v1  ;;  %vm9451_vm8 = vmor %vm3610_vm9, %vm3611_vm6  ;;  %vm4454_vm10 = vweird.f32 %v9380_v1  ;;  %v3459_v27 = vpop.xlane.xlu2 %3458  ;;  %vm3620_vm2 = vweird.f32 %v9392_v56 }
 0x93d   : > { %7044 = vpow2.f32 %v4248_v28  ;;  %v3606_v11 = vmul.f32 %v9376_v34, %v3605_v17  ;;  %v4030_v5 = vpop.f32.mrf.mxu1 }
 0x93e   : > { %7046 = vpow2.f32 %v4252_v41  ;;  %v3599_v41 = vmul.f32 %v9369_v42, %v3598_v0  ;;  %v3981_v0 = vpop.f32.mrf.mxu0  ;;  %vm4469_vm12 = vweird.f32 %v9386_v61  ;;  %v9495_v24 = vadd.f32 %v4030_v5, %v9332_v62 }
 0x93f   : > { %7048 = vrcp.f32 %v9386_v61  ;;  %v7041_v2 = vpop.eup %7040  ;;  %v3607_v58 = vmul.f32 0.5, %v3606_v11 }
 0x940   : > { %7050 = vpow2.f32 %v4254_v12  ;;  %v9404_v33 = vadd.f32 1.0, %v7041_v2  ;;  %v3603_v29 = vsel %vm9424_vm7, %v9369_v42, %v3599_v41 }
 0x941   : > { %7052 = vrsqrt.f32 %v9392_v56  ;;  %v3608_v28 = vsub.f32 1.5, %v3607_v58  ;;  %v6404_v58 = vmul.f32 -1.702, %v9407_v46  ;;  %v9467_v60 = vmul.f32 %v3603_v29, %v9267_v4 }
 0x942   : > { %v9395_v39 = vpop.eup %7042  ;;  %7054 = vrsqrt.f32 %v9398_v51  ;;  %v3932_v10 = vpop.f32.mrf.mxu3  ;;  %vm4439_vm4 = vweird.f32 %v9404_v33 }
 0x943   : > { %v7045_v31 = vpop.eup %7044  ;;  %v4450_v30 = vmul.f32 %v9395_v39, %v9380_v1  ;;  %7056 = vrcp.f32 %v9404_v33  ;;  %v3609_v9 = vmul.f32 %v9376_v34, %v3608_v28  ;;  %v4475_v28 = vand.u32 2147483648, %v9386_v61 }
 0x944   : > { %v7047_v63 = vpop.eup %7046  ;;  %v9417_v12 = vadd.f32 1.0, %v7045_v31  ;;  %v9433_v31 = vadd.f32 %v4076_v25, %v9355_v22  ;;  %v4250_v23 = vmul.f32 1.442695, %v6404_v58  ;;  %vm4455_vm13 = vweird.f32 %v9395_v39 }
 0x945   : > { %v9400_v37 = vpop.eup %7048  ;;  %v9412_v21 = vadd.f32 1.0, %v7047_v63  ;;  %v4451_v36 = vsub.f32 1.0, %v4450_v30  ;;  %v4458_v63 = vand.u32 2147483647, %v9380_v1  ;;  %v4460_v30 = vand.u32 2147483648, %v9380_v1  ;;  %vm9515_vm0 = vmor %vm4454_vm10, %vm4455_vm13 }
 0x946   : > { %v7051_v17 = vpop.eup %7050  ;;  %v4465_v44 = vmul.f32 %v9400_v37, %v9386_v61  ;;  %v3613_v59 = vsel %vm9451_vm8, %v9376_v34, %v3609_v9  ;;  %v6407_v26 = vmul.f32 -1.702, %v9433_v31  ;;  %v9477_v9 = vor.u32 1.1754944e-38, %v4475_v28 }
 0x947   : > { %v9419_v11 = vpop.eup %7052  ;;  %v9429_v2 = vadd.f32 1.0, %v7051_v17  ;;  %7058 = vrcp.f32 %v9412_v21  ;;  %v4452_v41 = vmul.f32 %v9395_v39, %v4451_v36  ;;  %v4461_v36 = vor.u32 1.1754944e-38, %v4460_v30 }
 0x948   : > { %v4466_v13 = vsub.f32 1.0, %v4465_v44  ;;  %7060 = vrcp.f32 %v9417_v12  ;;  %v3615_v17 = vmul.f32 %v9419_v11, %v9392_v56  ;;  %v9445_v25 = vpop.eup %7054  ;;  %v9457_v44 = vadd.f32 %v3981_v0, %v9329_v49 }
 0x949   : > { %7062 = vrcp.f32 %v9429_v2  ;;  %v9464_v19 = vpop.eup %7056  ;;  %v4473_v0 = vand.u32 2147483647, %v9386_v61  ;;  %vm9471_vm11 = vcmp.eq.f32.partialorder %v4458_v63, 8.507059e+37  ;;  %v3625_v4 = vmul.f32 %v9445_v25, %v9398_v51 }
 0x94a   : > { %v4467_v34 = vmul.f32 %v9400_v37, %v4466_v13  ;;  %v3616_v58 = vmul.f32 %v9419_v11, %v3615_v17  ;;  %v9485_v30 = vmul.f32 %v3613_v59, %v9276_v14  ;;  %v4453_v63 = vadd.f32 %v9395_v39, %v4452_v41 }
 0x94b   : > { %v6409_v13 = vmul.f32 -1.702, %v9457_v44  ;;  %v4435_v28 = vmul.f32 %v9464_v19, %v9404_v33  ;;  %7064 = vpow2.f32 %v4250_v23  ;;  %v4256_v17 = vmul.f32 1.442695, %v6407_v26 }
 0x94c   : > { %vm4470_vm14 = vweird.f32 %v9400_v37  ;;  %v4445_v41 = vand.u32 2147483648, %v9404_v33  ;;  %v4490_v59 = vand.u32 2147483648, %v9417_v12  ;;  %v4468_v50 = vadd.f32 %v9400_v37, %v4467_v34 }
 0x94d   : > { %v9482_v29 = vpop.eup %7058  ;;  %vm9504_vm15 = vcmp.eq.f32.partialorder %v4473_v0, 8.507059e+37  ;;  %v3617_v26 = vmul.f32 0.5, %v3616_v58  ;;  %v3626_v5 = vmul.f32 %v9445_v25, %v3625_v4  ;;  %v3476_v34 = vmul.f32 %v3459_v27, %v12134_v40  ;;  %vm9544_vm3 = vmor %vm4469_vm12, %vm4470_vm14 }
 0x94e   : > { %v9490_v42 = vpop.eup %7060  ;;  %v4510_v15 = vmul.f32 %v9482_v29, %v9412_v21  ;;  %v4260_v3 = vmul.f32 1.442695, %v6409_v13  ;;  %v9523_v58 = vadd.f32 %v3932_v10, %v9350_v38  ;;  %v4457_v4 = vsel %vm9515_vm0, %v9395_v39, %v4453_v63 }
 0x94f   : > { %v9501_v6 = vpop.eup %7062  ;;  %v4480_v0 = vmul.f32 %v9490_v42, %v9417_v12  ;;  %v4436_v18 = vsub.f32 1.0, %v4435_v28  ;;  %7066 = vpow2.f32 %v4256_v17  ;;  %v6410_v1 = vmul.f32 -1.702, %v9495_v24  ;;  %v4079_v28 = vpop.f32.mrf.mxu2 }
 0x950   : > { %v9529_v32 = vor.u32 1.1754944e-38, %v4445_v41  ;;  %v4488_v53 = vand.u32 2147483647, %v9417_v12  ;;  %vm3621_vm1 = vweird.f32 %v9419_v11  ;;  %v4525_v27 = vmul.f32 %v9501_v6, %v9429_v2 }
 0x951   : > { %v7065_v13 = vpop.eup %7064  ;;  %v9535_v10 = vor.u32 1.1754944e-38, %v4490_v59  ;;  %v3618_v45 = vsub.f32 1.5, %v3617_v26  ;;  %v3627_v39 = vmul.f32 0.5, %v3626_v5  ;;  %v4511_v63 = vsub.f32 1.0, %v4510_v15  ;;  %v3983_v15 = vpop.f32.mrf.mxu0  ;;  %vm9603_vm12 = vmor %vm3620_vm2, %vm3621_vm1 }
 0x952   : > { %v4462_v17 = vsel %vm9471_vm11, %v4461_v36, %v4457_v4  ;;  %v9549_v41 = vadd.f32 1e-05, %v3476_v34  ;;  %7068 = vpow2.f32 %v4260_v3  ;;  %v6408_v59 = vmul.f32 -1.702, %v9523_v58 }
 0x953   : > { %v4472_v8 = vsel %vm9544_vm3, %v9400_v37, %v4468_v50  ;;  %v4437_v36 = vmul.f32 %v9464_v19, %v4436_v18  ;;  %v4481_v26 = vsub.f32 1.0, %v4480_v0  ;;  %v4262_v61 = vmul.f32 1.442695, %v6410_v1 }
 0x954   : > { %vm4440_vm5 = vweird.f32 %v9464_v19  ;;  %v4526_v5 = vsub.f32 1.0, %v4525_v27  ;;  %v9557_v4 = vadd.f32 1.0, %v7065_v13  ;;  %v9560_v34 = vadd.f32 %v4079_v28, %v9355_v22 }
 0x955   : > { %v7067_v3 = vpop.eup %7066  ;;  %vm4484_vm9 = vweird.f32 %v9417_v12  ;;  %vm4485_vm6 = vweird.f32 %v9490_v42  ;;  %v3628_v40 = vsub.f32 1.5, %v3627_v39  ;;  %v4512_v50 = vmul.f32 %v9482_v29, %v4511_v63  ;;  %vm9616_vm14 = vmor %vm4439_vm4, %vm4440_vm5 }
 0x956   : > { %v9566_v18 = vadd.f32 %v3983_v15, %v9329_v49  ;;  %v9569_v37 = vmul.f32 %v4462_v17, %v9336_v54  ;;  %v9574_v0 = vsel %vm9504_vm15, %v9477_v9, %v4472_v8  ;;  %vm3631_vm7 = vweird.f32 %v9445_v25  ;;  %v4032_v15 = vpop.f32.mrf.mxu1  ;;  %vm9657_vm3 = vmor %vm4484_vm9, %vm4485_vm6 }
 0x957   : > { %7070 = vrsqrt.f32 %v9549_v41  ;;  %v4258_v1 = vmul.f32 1.442695, %v6408_v59  ;;  %v4438_v27 = vadd.f32 %v9464_v19, %v4437_v36  ;;  %v4482_v13 = vmul.f32 %v9490_v42, %v4481_v26 }
 0x958   : > { %12166 = vst [vmem:[#allocation5_spill] sm:$0xff] %v9569_v37  ;;  %v9581_v39 = vmul.f32 %v9419_v11, %v3618_v45  ;;  %7072 = vpow2.f32 %v4262_v61  ;;  %v7069_v54 = vpop.eup %7068  ;;  %vm3630_vm8 = vweird.f32 %v9398_v51  ;;  %v4527_v23 = vmul.f32 %v9501_v6, %v4526_v5 }
 0x959   : > { %7074 = vrcp.f32 %v9557_v4  ;;  %v9586_v9 = vadd.f32 1.0, %v7067_v3  ;;  %v6411_v63 = vmul.f32 -1.702, %v9560_v34  ;;  %v12167_v28 = vand.u32 2147483647, %v9404_v33  ;;  %vm9686_vm9 = vmor %vm3630_vm8, %vm3631_vm7 }
 0x95a   : > { %v4513_v45 = vadd.f32 %v9482_v29, %v4512_v50  ;;  %vm4515_vm11 = vweird.f32 %v9482_v29  ;;  %v4518_v14 = vand.u32 2147483647, %v9412_v21  ;;  %v6413_v59 = vmul.f32 -1.702, %v9566_v18 }
 0x95b   : > { %vm9591_vm10 = vcmp.eq.f32.partialorder %v12167_v28, 8.507059e+37  ;;  %v9608_v36 = vmul.f32 %v9445_v25, %v3628_v40  ;;  %vm4514_vm13 = vweird.f32 %v9412_v21  ;;  %v4520_v26 = vand.u32 2147483648, %v9412_v21 }
 0x95c   : > { %7076 = vpow2.f32 %v4258_v1  ;;  %v4483_v56 = vadd.f32 %v9490_v42, %v4482_v13  ;;  %vm9621_vm15 = vcmp.eq.f32.partialorder %v4488_v53, 8.507059e+37  ;;  %v3623_v40 = vsel %vm9603_vm12, %v9419_v11, %v9581_v39  ;;  %vm9636_vm1 = vmor %vm4514_vm13, %vm4515_vm11 }
 0x95d   : > { %vm4530_vm0 = vweird.f32 %v9501_v6  ;;  %v9630_v21 = vadd.f32 1.0, %v7069_v54  ;;  %v9632_v33 = vpop.eup %7070  ;;  %v4528_v53 = vadd.f32 %v9501_v6, %v4527_v23  ;;  %7078 = vrcp.f32 %v9586_v9 }
 0x95e   : > { %v4264_v50 = vmul.f32 1.442695, %v6411_v63  ;;  %v9643_v1 = vadd.f32 %v4032_v15, %v9332_v62  ;;  %v7073_v11 = vpop.eup %7072  ;;  %v4442_v13 = vsel %vm9616_vm14, %v9464_v19, %v4438_v27  ;;  %v4517_v39 = vsel %vm9636_vm1, %v9482_v29, %v4513_v45 }
 0x95f   : > { %vm4519_vm2 = vcmp.eq.f32.partialorder %v4518_v14, 8.507059e+37  ;;  %v4268_v54 = vmul.f32 1.442695, %v6413_v59  ;;  %v9651_v28 = vpop.eup %7074  ;;  %v4521_v63 = vor.u32 1.1754944e-38, %v4520_v26  ;;  %vm4529_vm4 = vweird.f32 %v9429_v2 }
 0x960   : > { %v4533_v19 = vand.u32 2147483647, %v9429_v2  ;;  %v4535_v27 = vand.u32 2147483648, %v9429_v2  ;;  %v4487_v29 = vsel %vm9657_vm3, %v9490_v42, %v4483_v56  ;;  %vm9669_vm5 = vmor %vm4529_vm4, %vm4530_vm0  ;;  %v3635_v12 = vmul.f32 %v9632_v33, %v9549_v41 }
 0x961   : > { %7080 = vrcp.f32 %v9630_v21  ;;  %v3683_v14 = vmul.f32 %v9241_v55, %v9467_v60  ;;  %v4522_v2 = vsel %vm4519_vm2, %v4521_v63, %v4517_v39  ;;  %v4532_v42 = vsel %vm9669_vm5, %v9501_v6, %v4528_v53 }
 0x962   : > { %v7077_v59 = vpop.eup %7076  ;;  %7082 = vpow2.f32 %v4264_v50  ;;  %v6414_v15 = vmul.f32 -1.702, %v9643_v1  ;;  %v4495_v60 = vmul.f32 %v9651_v28, %v9557_v4  ;;  %v9692_v26 = vadd.f32 1.0, %v7073_v11 }
 0x963   : > { %7084 = vpow2.f32 %v4268_v54  ;;  %v3684_v6 = vmul.f32 %v9241_v55, %v9485_v30  ;;  %v9696_v61 = vpop.eup %7078  ;;  %v4447_v56 = vsel %vm9591_vm10, %v9529_v32, %v4442_v13  ;;  %v3633_v51 = vsel %vm9686_vm9, %v9445_v25, %v9608_v36 }
 0x964   : > { %vm4534_vm6 = vcmp.eq.f32.partialorder %v4533_v19, 8.507059e+37  ;;  %v4536_v3 = vor.u32 1.1754944e-38, %v4535_v27  ;;  %v3636_v53 = vmul.f32 %v9632_v33, %v3635_v12  ;;  %v9706_v50 = vadd.f32 1.0, %v7077_v59 }
 0x965   : > { %v3702_v11 = vadd.f32 %v9255_v7, %v3683_v14  ;;  %v3703_v55 = vadd.f32 %v9255_v7, %v3684_v6  ;;  %v4492_v30 = vsel %vm9621_vm15, %v9535_v10, %v4487_v29  ;;  %v9714_v32 = vmul.f32 %v4522_v2, %v9366_v52 }
 0x966   : > { %v4537_v17 = vsel %vm4534_vm6, %v4536_v3, %v4532_v42  ;;  %v4270_v13 = vmul.f32 1.442695, %v6414_v15  ;;  %v4496_v36 = vsub.f32 1.0, %v4495_v60  ;;  %v4540_v39 = vmul.f32 %v9696_v61, %v9586_v9 }
 0x967   : > { %12184 = vst [vmem:[#allocation2_spill] sm:$0xff] %v9714_v32  ;;  %v9716_v25 = vpop.eup %7080  ;;  %7086 = vrcp.f32 %v9692_v26  ;;  %v3713_v54 = vpack.c.bf16 %v3703_v55, %v3702_v11  ;;  %v9723_v7 = vmul.f32 %v9574_v0, %v9341_v20  ;;  %v9726_v10 = vmul.f32 %v4447_v56, %v9359_v48  ;;  %v3934_v20 = vpop.f32.mrf.mxu3 }
 0x968   : > { %v7083_v23 = vpop.eup %7082  ;;  %v9729_v52 = vmul.f32 %v3623_v40, %v9287_v16  ;;  %v9732_v5 = vmul.f32 %v3633_v51, %v9291_v47  ;;  %v9735_v19 = vmul.f32 %v4537_v17, %v9373_v43  ;;  %v4503_v27 = vand.u32 2147483647, %v9557_v4  ;;  %v4081_v43 = vpop.f32.mrf.mxu2 }
 0x969   : > { %12185 = vst [vmem:[#allocation7_spill] sm:$0xff] %v9723_v7  ;;  %v7085_v63 = vpop.eup %7084  ;;  %v3637_v29 = vmul.f32 0.5, %v3636_v53  ;;  %7088 = vrcp.f32 %v9706_v50  ;;  %3951 = vmatmul.bf16.gmra.mxu3 %v3713_v54  ;;  %4000 = vmatmul.bf16.gmra.mxu0 %v3713_v54  ;;  %v9740_v48 = vmul.f32 %v4492_v30, %v9363_v57  ;;  %v4505_v16 = vand.u32 2147483648, %v9557_v4  ;;  %v3986_v55 = vpop.f32.mrf.mxu0 }
 0x96a   : > { %12186 = vst [vmem:[#allocation4_spill] sm:$0xff] %v9726_v10  ;;  %v4570_v47 = vmul.f32 %v9716_v25, %v9630_v21  ;;  %7090 = vpow2.f32 %v4270_v13  ;;  %4049 = vmatmul.bf16.gmra.mxu1 %v3713_v54  ;;  %4098 = vmatmul.bf16.gmra.mxu2 %v3713_v54  ;;  %v4497_v40 = vmul.f32 %v9651_v28, %v4496_v36  ;;  %v4541_v45 = vsub.f32 1.0, %v4540_v39 }
 0x96b   : > { %12187 = vst [vmem:[#allocation6_spill] sm:$0xff] %v9735_v19  ;;  %vm3640_vm7 = vweird.f32 %v9549_v41  ;;  %v9749_v12 = vadd.f32 1.0, %v7083_v23  ;;  %vm4499_vm8 = vweird.f32 %v9557_v4  ;;  %vm3641_vm10 = vweird.f32 %v9632_v33 }
 0x96c   : > { %12188 = vst [vmem:[#allocation8_spill] sm:$0xff] %v9740_v48  ;;  %v9753_v57 = vadd.f32 1.0, %v7085_v63  ;;  %v9756_v14 = vadd.f32 %v3934_v20, %v9350_v38  ;;  %vm9762_vm11 = vcmp.eq.f32.partialorder %v4503_v27, 8.507059e+37  ;;  %v3638_v15 = vsub.f32 1.5, %v3637_v29  ;;  %vm9814_vm2 = vmor %vm3640_vm7, %vm3641_vm10 }
 0x96d   : > { %v9758_v59 = vpop.eup %7086  ;;  %v9767_v8 = vadd.f32 %v4081_v43, %v9355_v22  ;;  %v4506_v60 = vor.u32 1.1754944e-38, %v4505_v16  ;;  %v4548_v6 = vand.u32 2147483647, %v9586_v9  ;;  %v4550_v56 = vand.u32 2147483648, %v9586_v9 }
 0x96e   : > { %v4571_v51 = vsub.f32 1.0, %v4570_v47  ;;  %v4498_v53 = vadd.f32 %v9651_v28, %v4497_v40  ;;  %vm4500_vm12 = vweird.f32 %v9651_v28  ;;  %v4542_v11 = vmul.f32 %v9696_v61, %v4541_v45  ;;  %v4035_v45 = vpop.f32.mrf.mxu1 }
 0x96f   : > { %v9771_v3 = vpop.eup %7088  ;;  %7092 = vrcp.f32 %v9749_v12  ;;  %v4580_v17 = vand.u32 2147483648, %v9630_v21  ;;  %v4585_v13 = vmul.f32 %v9758_v59, %v9692_v26  ;;  %v6412_v36 = vmul.f32 -1.702, %v9756_v14  ;;  %vm9788_vm14 = vmor %vm4499_vm8, %vm4500_vm12 }
 0x970   : > { %v7091_v30 = vpop.eup %7090  ;;  %7094 = vrcp.f32 %v9753_v57  ;;  %vm4544_vm13 = vweird.f32 %v9586_v9  ;;  %v3639_v39 = vmul.f32 %v9632_v33, %v3638_v15  ;;  %v4578_v54 = vand.u32 2147483647, %v9630_v21  ;;  %v4084_v63 = vpop.f32.mrf.mxu2 }
 0x971   : > { %v6415_v23 = vmul.f32 -1.702, %v9767_v8  ;;  %vm4545_vm15 = vweird.f32 %v9696_v61  ;;  %vm9793_vm0 = vcmp.eq.f32.partialorder %v4548_v6, 8.507059e+37  ;;  %v4551_v29 = vor.u32 1.1754944e-38, %v4550_v56 }
 0x972   : > { %v4572_v20 = vmul.f32 %v9716_v25, %v4571_v51  ;;  %vm4574_vm1 = vweird.f32 %v9630_v21  ;;  %v9800_v16 = vadd.f32 %v3986_v55, %v9329_v49  ;;  %v4502_v4 = vsel %vm9788_vm14, %v9651_v28, %v4498_v53  ;;  %v3937_v53 = vpop.f32.mrf.mxu3  ;;  %vm9834_vm4 = vmor %vm4544_vm13, %vm4545_vm15 }
 0x973   : > { %v4543_v47 = vadd.f32 %v9696_v61, %v4542_v11  ;;  %v4555_v43 = vmul.f32 %v9771_v3, %v9706_v50  ;;  %v9808_v40 = vadd.f32 1.0, %v7091_v30  ;;  %v4581_v6 = vor.u32 1.1754944e-38, %v4580_v17 }
 0x974   : > { %v4586_v56 = vsub.f32 1.0, %v4585_v13  ;;  %v4593_v28 = vand.u32 2147483647, %v9692_v26  ;;  %v4266_v51 = vmul.f32 1.442695, %v6412_v36  ;;  %v3643_v55 = vsel %vm9814_vm2, %v9632_v33, %v3639_v39 }
 0x975   : > { %v9819_v11 = vpop.eup %7092  ;;  %vm4575_vm3 = vweird.f32 %v9716_v25  ;;  %v4595_v41 = vand.u32 2147483648, %v9692_v26  ;;  %v4272_v30 = vmul.f32 1.442695, %v6415_v23  ;;  %v4507_v17 = vsel %vm9762_vm11, %v4506_v60, %v4502_v4 }
 0x976   : > { %v9826_v2 = vpop.eup %7094  ;;  %v4573_v33 = vadd.f32 %v9716_v25, %v4572_v20  ;;  %vm9839_vm5 = vcmp.eq.f32.partialorder %v4578_v54, 8.507059e+37  ;;  %vm4589_vm9 = vweird.f32 %v9692_v26  ;;  %v6417_v39 = vmul.f32 -1.702, %v9800_v16  ;;  %vm9883_vm8 = vmor %vm4574_vm1, %vm4575_vm3 }
 0x977   : > { %v9846_v42 = vadd.f32 %v4035_v45, %v9332_v62  ;;  %v4547_v9 = vsel %vm9834_vm4, %v9696_v61, %v4543_v47  ;;  %v4556_v60 = vsub.f32 1.0, %v4555_v43  ;;  %7096 = vrcp.f32 %v9808_v40 }
 0x978   : > { %v9853_v23 = vadd.f32 %v3937_v53, %v9350_v38  ;;  %v4587_v54 = vmul.f32 %v9758_v59, %v4586_v56  ;;  %v4600_v20 = vmul.f32 %v9819_v11, %v9749_v12  ;;  %7098 = vpow2.f32 %v4266_v51 }
 0x979   : > { %v9859_v4 = vadd.f32 %v4084_v63, %v9355_v22  ;;  %v9862_v45 = vmul.f32 %v3643_v55, %v9301_v35  ;;  %vm4559_vm6 = vweird.f32 %v9706_v50  ;;  %v4565_v61 = vand.u32 2147483648, %v9706_v50 }
 0x97a   : > { %v4630_v47 = vmul.f32 %v9826_v2, %v9753_v57  ;;  %7100 = vpow2.f32 %v4272_v30  ;;  %v9869_v43 = vmul.f32 %v4507_v17, %v9407_v46  ;;  %vm9871_vm7 = vcmp.eq.f32.partialorder %v4593_v28, 8.507059e+37 }
 0x97b   : > { %v4563_v56 = vand.u32 2147483647, %v9706_v50  ;;  %v4276_v51 = vmul.f32 1.442695, %v6417_v39  ;;  %v6418_v35 = vmul.f32 -1.702, %v9846_v42  ;;  %v4552_v53 = vsel %vm9793_vm0, %v4551_v29, %v4547_v9 }
 0x97c   : > { %12201 = vst [vmem:[#allocation11_spill] sm:$0xff] %v9869_v43  ;;  %vm4590_vm10 = vweird.f32 %v9758_v59  ;;  %v4557_v46 = vmul.f32 %v9771_v3, %v4556_v60  ;;  %v6416_v28 = vmul.f32 -1.702, %v9853_v23  ;;  %v4577_v30 = vsel %vm9883_vm8, %v9716_v25, %v4573_v33 }
 0x97d   : > { %v4588_v27 = vadd.f32 %v9758_v59, %v4587_v54  ;;  %v4601_v29 = vsub.f32 1.0, %v4600_v20  ;;  %v6419_v63 = vmul.f32 -1.702, %v9859_v4  ;;  %v9895_v21 = vpop.eup %7096  ;;  %v4596_v17 = vor.u32 1.1754944e-38, %v4595_v41  ;;  %v3988_v54 = vpop.f32.mrf.mxu0  ;;  %vm9913_vm13 = vmor %vm4589_vm9, %vm4590_vm10 }
 0x97e   : > { %vm4560_vm11 = vweird.f32 %v9771_v3  ;;  %v9898_v13 = vor.u32 1.1754944e-38, %v4565_v61  ;;  %v4631_v39 = vsub.f32 1.0, %v4630_v47  ;;  %v7099_v9 = vpop.eup %7098  ;;  %vm4604_vm12 = vweird.f32 %v9749_v12 }
 0x97f   : > { %v4608_v25 = vand.u32 2147483647, %v9749_v12  ;;  %7102 = vpow2.f32 %v4276_v51  ;;  %v4278_v33 = vmul.f32 1.442695, %v6418_v35  ;;  %v9905_v55 = vmul.f32 %v4552_v53, %v9433_v31  ;;  %vm9939_vm15 = vmor %vm4559_vm6, %vm4560_vm11 }
 0x980   : > { %v7101_v20 = vpop.eup %7100  ;;  %v4582_v41 = vsel %vm9839_vm5, %v4581_v6, %v4577_v30  ;;  %v4558_v47 = vadd.f32 %v9771_v3, %v4557_v46  ;;  %v4274_v51 = vmul.f32 1.442695, %v6416_v28  ;;  %v4592_v35 = vsel %vm9913_vm13, %v9758_v59, %v4588_v27  ;;  %v4037_v59 = vpop.f32.mrf.mxu1 }
 0x981   : > { %12206 = vst [vmem:[#allocation13_spill] sm:$0xff] %v9905_v55  ;;  %vm9921_vm14 = vcmp.eq.f32.partialorder %v4563_v56, 8.507059e+37  ;;  %v4602_v6 = vmul.f32 %v9819_v11, %v4601_v29  ;;  %v4610_v36 = vand.u32 2147483648, %v9749_v12  ;;  %v4280_v26 = vmul.f32 1.442695, %v6419_v63 }
 0x982   : > { %v4632_v53 = vmul.f32 %v9826_v2, %v4631_v39  ;;  %v4645_v30 = vmul.f32 %v9895_v21, %v9808_v40  ;;  %v9930_v46 = vadd.f32 1.0, %v7099_v9  ;;  %v9933_v28 = vadd.f32 %v3988_v54, %v9329_v49  ;;  %v9952_v63 = vld [vmem:[%s11971_s7] ss:$0 sm:$0xff] }
 0x983   : > { %vm9943_vm0 = vcmp.eq.f32.partialorder %v4608_v25, 8.507059e+37  ;;  %v9947_v29 = vadd.f32 1.0, %v7101_v20  ;;  %7104 = vpow2.f32 %v4278_v33  ;;  %v3685_v39 = vmul.f32 %v9952_v63, %v9729_v52 }
 0x984   : > { %v3686_v50 = vmul.f32 %v9952_v63, %v9732_v5  ;;  %v4597_v9 = vsel %vm9871_vm7, %v4596_v17, %v4592_v35  ;;  %v4562_v25 = vsel %vm9939_vm15, %v9771_v3, %v4558_v47  ;;  %v4638_v33 = vand.u32 2147483647, %v9753_v57  ;;  %v9977_v17 = vld [vmem:[%s11972_s8] ss:$0 sm:$0xff] }
 0x985   : > { %7106 = vpow2.f32 %v4274_v51  ;;  %v7103_v54 = vpop.eup %7102  ;;  %v4603_v20 = vadd.f32 %v9819_v11, %v4602_v6  ;;  %vm4605_vm1 = vweird.f32 %v9819_v11  ;;  %v9967_v52 = vadd.f32 %v4037_v59, %v9332_v62  ;;  %v6682_v6 = vld [vmem:[%s11975_s11 + $0xb8] sm:$0xff] }
 0x986   : > { %7108 = vpow2.f32 %v4280_v26  ;;  %vm4635_vm2 = vweird.f32 %v9826_v2  ;;  %v4646_v5 = vsub.f32 1.0, %v4645_v30  ;;  %v6421_v15 = vmul.f32 -1.702, %v9933_v28  ;;  %vm9988_vm3 = vmor %vm4604_vm12, %vm4605_vm1  ;;  %5848 = vmatpush.bf16.msrb.mxu1 %v6682_v6 }
 0x987   : > { %7110 = vrcp.f32 %v9930_v46  ;;  %v4633_v3 = vadd.f32 %v9826_v2, %v4632_v53  ;;  %v3704_v61 = vadd.f32 %v9977_v17, %v3685_v39  ;;  %v3705_v47 = vadd.f32 %v9977_v17, %v3686_v50 }
 0x988   : > { %7112 = vrcp.f32 %v9947_v29  ;;  %v9984_v35 = vmul.f32 %v4582_v41, %v9457_v44  ;;  %v4640_v26 = vand.u32 2147483648, %v9753_v57  ;;  %v9993_v53 = vadd.f32 1.0, %v7103_v54 }
 0x989   : > { %v7105_v30 = vpop.eup %7104  ;;  %v4607_v59 = vsel %vm9988_vm3, %v9819_v11, %v4603_v20  ;;  %v4611_v56 = vor.u32 1.1754944e-38, %v4610_v36  ;;  %vm4634_vm4 = vweird.f32 %v9753_v57  ;;  %v6422_v44 = vmul.f32 -1.702, %v9967_v52 }
 0x98a   : > { %v10001_v12 = vmul.f32 %v4597_v9, %v9495_v24  ;;  %v4567_v39 = vsel %vm9921_vm14, %v9898_v13, %v4562_v25  ;;  %vm10008_vm5 = vmor %vm4634_vm4, %vm4635_vm2  ;;  %v4647_v11 = vmul.f32 %v9895_v21, %v4646_v5  ;;  %v4284_v36 = vmul.f32 1.442695, %v6421_v15 }
 0x98b   : > { %v7107_v41 = vpop.eup %7106  ;;  %v4637_v54 = vsel %vm10008_vm5, %v9826_v2, %v4633_v3  ;;  %vm4639_vm9 = vcmp.eq.f32.partialorder %v4638_v33, 8.507059e+37  ;;  %v4653_v24 = vand.u32 2147483647, %v9808_v40  ;;  %v3714_v9 = vpack.c.bf16 %v3705_v47, %v3704_v61  ;;  %v6674_v47 = vld [vmem:[%s11975_s11 + $0x78] sm:$0xff] }
 0x98c   : > { %v7109_v57 = vpop.eup %7108  ;;  %v4612_v13 = vsel %vm9943_vm0, %v4611_v56, %v4607_v59  ;;  %v4641_v25 = vor.u32 1.1754944e-38, %v4640_v26  ;;  %7114 = vrcp.f32 %v9993_v53  ;;  %v10022_v20 = vadd.f32 1.0, %v7105_v30  ;;  %5799 = vmatpush.bf16.msrb.mxu0 %v6674_v47 }
 0x98d   : > { %v10017_v31 = vpop.eup %7110  ;;  %v10027_v15 = vmul.f32 %v4567_v39, %v9523_v58  ;;  %vm4649_vm6 = vweird.f32 %v9808_v40  ;;  %v4655_v2 = vand.u32 2147483648, %v9808_v40  ;;  %v4286_v33 = vmul.f32 1.442695, %v6422_v44  ;;  %3956 = vmatmul.bf16.gmra.mxu3 %v3714_v9  ;;  %4005 = vmatmul.bf16.gmra.mxu0 %v3714_v9  ;;  %v6666_v58 = vld [vmem:[%s11975_s11 + $0x38] sm:$0xff] }
 0x98e   : > { %v10024_v5 = vpop.eup %7112  ;;  %v4642_v3 = vsel %vm4639_vm9, %v4641_v25, %v4637_v54  ;;  %v4648_v27 = vadd.f32 %v9895_v21, %v4647_v11  ;;  %vm4650_vm7 = vweird.f32 %v9895_v21  ;;  %7116 = vpow2.f32 %v4284_v36  ;;  %4054 = vmatmul.bf16.gmra.mxu1 %v3714_v9  ;;  %4103 = vmatmul.bf16.gmra.mxu2 %v3714_v9  ;;  %v6690_v44 = vld [vmem:[%s11975_s11 + $0xf8] sm:$0xff]  ;;  %v3939_v11 = vpop.f32.mrf.mxu3 }
 0x98f   : > { %v10043_v26 = vmul.f32 %v4612_v13, %v9560_v34  ;;  %vm10045_vm8 = vcmp.eq.f32.partialorder %v4653_v24, 8.507059e+37  ;;  %v4625_v59 = vand.u32 2147483648, %v9930_v46  ;;  %v10050_v56 = vadd.f32 1.0, %v7107_v41  ;;  %5750 = vmatpush.bf16.msra.mxu3 %v6666_v58  ;;  %vm10069_vm10 = vmor %vm4649_vm6, %vm4650_vm7  ;;  %v4086_v24 = vpop.f32.mrf.mxu2  ;;  %v12223_v9 = vld [vmem:[#allocation9_spill] sm:$0xff]  ;;  %5897 = vmatpush.bf16.msra.mxu2 %v6690_v44 }
 0x990   : > { %v4615_v39 = vmul.f32 %v10017_v31, %v9930_v46  ;;  %v4660_v50 = vmul.f32 %v10024_v5, %v9947_v29  ;;  %7118 = vrcp.f32 %v10022_v20  ;;  %v10060_v34 = vadd.f32 1.0, %v7109_v57 }
 0x991   : > { %v10063_v41 = vmul.f32 %v4642_v3, %v9566_v18  ;;  %v4656_v54 = vor.u32 1.1754944e-38, %v4655_v2  ;;  %7120 = vpow2.f32 %v4286_v33  ;;  %v4652_v18 = vsel %vm10069_vm10, %v9895_v21, %v4648_v27  ;;  %v6665_v21 = vld [vmem:[%s11975_s11 + $0x30] sm:$0xff] }
 0x992   : > { %v10074_v13 = vpop.eup %7114  ;;  %v4623_v25 = vand.u32 2147483647, %v9930_v46  ;;  %v4668_v40 = vand.u32 2147483647, %v9947_v29  ;;  %v4670_v3 = vand.u32 2147483648, %v9947_v29  ;;  %v10082_v2 = vor.u32 1.1754944e-38, %v4625_v59 }
 0x993   : > { %7122 = vrcp.f32 %v10050_v56  ;;  %v10086_v33 = vadd.f32 %v3939_v11, %v9350_v38  ;;  %v6673_v27 = vld [vmem:[%s11975_s11 + $0x70] sm:$0xff]  ;;  %v4616_v44 = vsub.f32 1.0, %v4615_v39  ;;  %v4661_v59 = vsub.f32 1.0, %v4660_v50  ;;  %5751 = vmatpush.bf16.msra.mxu3 %v6665_v21 }
 0x994   : > { %v3461_v61 = vpop.xlane.xlu1 %3460  ;;  %v7117_v6 = vpop.eup %7116  ;;  %7124 = vrcp.f32 %v10060_v34  ;;  %v10098_v36 = vadd.f32 %v4086_v24, %v9355_v22  ;;  %v6681_v11 = vld [vmem:[%s11975_s11 + $0xb0] sm:$0xff]  ;;  %vm4619_vm11 = vweird.f32 %v9930_v46  ;;  %v4690_v39 = vmul.f32 %v10074_v13, %v9993_v53  ;;  %5800 = vmatpush.bf16.msrb.mxu0 %v6673_v27 }
 0x995   : > { %v3477_v57 = vmul.f32 %v3461_v61, %v12223_v9  ;;  %v6689_v9 = vld [vmem:[%s11975_s11 + $0xf0] sm:$0xff]  ;;  %vm4664_vm12 = vweird.f32 %v9947_v29  ;;  %v10118_v51 = vor.u32 1.1754944e-38, %v4670_v3  ;;  %v4698_v30 = vand.u32 2147483647, %v9993_v53  ;;  %5849 = vmatpush.bf16.msrb.mxu1 %v6681_v11 }
 0x996   : > { %12224 = vst [vmem:[#allocation12_spill] sm:$0xff] %v10098_v36  ;;  %v10115_v24 = vpop.eup %7118  ;;  %5898 = vmatpush.bf16.msra.mxu2 %v6689_v9  ;;  %v4715_v21 = vand.u32 2147483648, %v10022_v20  ;;  %v10127_v27 = vadd.f32 1.0, %v7117_v6  ;;  %v6420_v60 = vmul.f32 -1.702, %v10086_v33  ;;  %v4617_v48 = vmul.f32 %v10017_v31, %v4616_v44 }
 0x997   : > { %v10088_v61 = vadd.f32 1e-05, %v3477_v57  ;;  %v4657_v57 = vsel %vm10045_vm8, %v4656_v54, %v4652_v18  ;;  %v4700_v54 = vand.u32 2147483648, %v9993_v53  ;;  %v7121_v0 = vpop.eup %7120  ;;  %v4662_v55 = vmul.f32 %v10024_v5, %v4661_v59 }
 0x998   : > { %v10131_v3 = vmul.f32 %v4657_v57, %v9643_v1  ;;  %vm4620_vm13 = vweird.f32 %v10017_v31  ;;  %v4691_v9 = vsub.f32 1.0, %v4690_v39  ;;  %v4705_v6 = vmul.f32 %v10115_v24, %v10022_v20 }
 0x999   : > { %7126 = vrsqrt.f32 %v10088_v61  ;;  %v10136_v11 = vpop.eup %7122  ;;  %vm10144_vm14 = vcmp.eq.f32.partialorder %v4623_v25, 8.507059e+37  ;;  %vm4665_vm15 = vweird.f32 %v10024_v5  ;;  %vm10149_vm0 = vcmp.eq.f32.partialorder %v4668_v40, 8.507059e+37  ;;  %vm10176_vm3 = vmor %vm4619_vm11, %vm4620_vm13 }
 0x99a   : > { %v10142_v7 = vpop.eup %7124  ;;  %v10153_v59 = vor.u32 1.1754944e-38, %v4700_v54  ;;  %v10155_v57 = vadd.f32 1.0, %v7121_v0  ;;  %vm4694_vm1 = vweird.f32 %v9993_v53  ;;  %vm4695_vm2 = vweird.f32 %v10074_v13  ;;  %vm10188_vm4 = vmor %vm4664_vm12, %vm4665_vm15 }
 0x99b   : > { %v10162_v25 = vor.u32 1.1754944e-38, %v4715_v21  ;;  %7128 = vrcp.f32 %v10127_v27  ;;  %v4282_v40 = vmul.f32 1.442695, %v6420_v60  ;;  %v4618_v37 = vadd.f32 %v10017_v31, %v4617_v48  ;;  %vm10235_vm12 = vmor %vm4694_vm1, %vm4695_vm2 }
 0x99c   : > { %v4663_v54 = vadd.f32 %v10024_v5, %v4662_v55  ;;  %v4692_v43 = vmul.f32 %v10074_v13, %v4691_v9  ;;  %v4720_v60 = vmul.f32 %v10142_v7, %v10060_v34  ;;  %7130 = vrcp.f32 %v10155_v57 }
 0x99d   : > { %vm10192_vm5 = vcmp.eq.f32.partialorder %v4698_v30, 8.507059e+37  ;;  %vm4709_vm9 = vweird.f32 %v10022_v20  ;;  %vm4710_vm6 = vweird.f32 %v10115_v24  ;;  %7132 = vpow2.f32 %v4282_v40 }
 0x99e   : > { %v4622_v29 = vsel %vm10176_vm3, %v10017_v31, %v4618_v37  ;;  %v4667_v30 = vsel %vm10188_vm4, %v10024_v5, %v4663_v54  ;;  %vm4679_vm7 = vweird.f32 %v10050_v56  ;;  %v4721_v48 = vsub.f32 1.0, %v4720_v60  ;;  %v6663_v5 = vld [vmem:[%s11975_s11 + $0x20] sm:$0xff] }
 0x99f   : > { %v10158_v19 = vpop.eup %7126  ;;  %v4672_v31 = vsel %vm10149_vm0, %v10118_v51, %v4667_v30  ;;  %vm4724_vm10 = vweird.f32 %v10060_v34  ;;  %v4730_v1 = vand.u32 2147483648, %v10060_v34  ;;  %vm3650_vm13 = vweird.f32 %v10088_v61  ;;  %vm10290_vm0 = vmor %vm4709_vm9, %vm4710_vm6 }
 0x9a0   : > { %v3645_v0 = vmul.f32 %v10158_v19, %v10088_v61  ;;  %vm3651_vm11 = vweird.f32 %v10158_v19  ;;  %vm4680_vm15 = vweird.f32 %v10136_v11  ;;  %vm4725_vm2 = vweird.f32 %v10142_v7 }
 0x9a1   : > { %v4731_v51 = vor.u32 1.1754944e-38, %v4730_v1  ;;  %vm4754_vm4 = vweird.f32 %v10127_v27  ;;  %vm10339_vm9 = vmor %vm4724_vm10, %vm4725_vm2 }
 0x9a2   : > { %v3646_v55 = vmul.f32 %v10158_v19, %v3645_v0  ;;  %v10208_v0 = vpop.eup %7128 }
 0x9a3   : > { %v4750_v44 = vmul.f32 %v10208_v0, %v10127_v27  ;;  %vm4755_vm6 = vweird.f32 %v10208_v0 }
 0x9a5   : > { %v4751_v61 = vsub.f32 1.0, %v4750_v44 }
 0x9a6   : > { %v3991_v58 = vpop.f32.mrf.mxu0 }
 0x9a7   : > { %v4040_v47 = vpop.f32.mrf.mxu1  ;;  %v10113_v50 = vadd.f32 %v3991_v58, %v9329_v49 }
 0x9a8   : > { %v10123_v18 = vadd.f32 %v4040_v47, %v9332_v62  ;;  %v6423_v47 = vmul.f32 -1.702, %v10098_v36  ;;  %v4693_v36 = vadd.f32 %v10074_v13, %v4692_v43  ;;  %v12237_v43 = vand.u32 2147483647, %v10022_v20 }
 0x9a9   : > { %12225 = vst [vmem:[#allocation10_spill] sm:$0xff] %v10113_v50  ;;  %v6425_v58 = vmul.f32 -1.702, %v10113_v50  ;;  %v4675_v50 = vmul.f32 %v10136_v11, %v10050_v56 }
 0x9aa   : > { %12226 = vst [vmem:[#allocation14_spill] sm:$0xff] %v10123_v18  ;;  %v6426_v39 = vmul.f32 -1.702, %v10123_v18  ;;  %v4288_v32 = vmul.f32 1.442695, %v6423_v47  ;;  %v4706_v18 = vsub.f32 1.0, %v4705_v6  ;;  %v4697_v60 = vsel %vm10235_vm12, %v10074_v13, %v4693_v36 }
 0x9ab   : > { %v4292_v21 = vmul.f32 1.442695, %v6425_v58  ;;  %v4676_v40 = vsub.f32 1.0, %v4675_v50  ;;  %vm10222_vm8 = vcmp.eq.f32.partialorder %v12237_v43, 8.507059e+37  ;;  %v6672_v58 = vld [vmem:[%s11975_s11 + $0x68] sm:$0xff]  ;;  %v10260_v13 = vmul.f32 %v4672_v31, %v9767_v8 }
 0x9ac   : > { %v3942_v10 = vpop.f32.mrf.mxu3  ;;  %v4294_v47 = vmul.f32 1.442695, %v6426_v39  ;;  %7134 = vpow2.f32 %v4288_v32  ;;  %v3647_v39 = vmul.f32 0.5, %v3646_v55  ;;  %v4707_v9 = vmul.f32 %v10115_v24, %v4706_v18  ;;  %v10229_v18 = vpop.eup %7130  ;;  %5801 = vmatpush.bf16.msrb.mxu0 %v6672_v58 }
 0x9ad   : > { %v10200_v6 = vadd.f32 %v3942_v10, %v9350_v38  ;;  %7136 = vpow2.f32 %v4292_v21  ;;  %v4685_v10 = vand.u32 2147483648, %v10050_v56  ;;  %v4627_v32 = vsel %vm10144_vm14, %v10082_v2, %v4622_v29  ;;  %v7133_v21 = vpop.eup %7132  ;;  %vm10267_vm14 = vmor %vm3650_vm13, %vm3651_vm11 }
 0x9ae   : > { %v3648_v37 = vsub.f32 1.5, %v3647_v39  ;;  %7138 = vpow2.f32 %v4294_v47  ;;  %v4728_v2 = vand.u32 2147483647, %v10060_v34  ;;  %v4708_v53 = vadd.f32 %v10115_v24, %v4707_v9  ;;  %v6664_v47 = vld [vmem:[%s11975_s11 + $0x28] sm:$0xff] }
 0x9af   : > { %v6424_v50 = vmul.f32 -1.702, %v10200_v6  ;;  %v4677_v55 = vmul.f32 %v10136_v11, %v4676_v40  ;;  %v10257_v30 = vmul.f32 %v4627_v32, %v9756_v14  ;;  %v10262_v36 = vor.u32 1.1754944e-38, %v4685_v10  ;;  %v6680_v39 = vld [vmem:[%s11975_s11 + $0xa8] sm:$0xff]  ;;  %5752 = vmatpush.bf16.msra.mxu3 %v6664_v47 }
 0x9b0   : > { %v3649_v54 = vmul.f32 %v10158_v19, %v3648_v37  ;;  %v4722_v9 = vmul.f32 %v10142_v7, %v4721_v48  ;;  %v6688_v14 = vld [vmem:[%s11975_s11 + $0xe8] sm:$0xff]  ;;  %v4765_v40 = vmul.f32 %v10229_v18, %v10155_v57  ;;  %v4089_v37 = vpop.f32.mrf.mxu2  ;;  %v4702_v31 = vsel %vm10192_vm5, %v10153_v59, %v4697_v60  ;;  %5850 = vmatpush.bf16.msrb.mxu1 %v6680_v39  ;;  %vm10325_vm5 = vmor %vm4679_vm7, %vm4680_vm15 }
 0x9b1   : > { %v4290_v48 = vmul.f32 1.442695, %v6424_v50  ;;  %5899 = vmatpush.bf16.msra.mxu2 %v6688_v14  ;;  %v3993_v50 = vpop.f32.mrf.mxu0  ;;  %v4712_v46 = vsel %vm10290_vm0, %v10115_v24, %v4708_v53  ;;  %v4678_v59 = vadd.f32 %v10136_v11, %v4677_v55  ;;  %vm10307_vm3 = vcmp.eq.f32.partialorder %v4728_v2, 8.507059e+37  ;;  %v12251_v24 = vld [vmem:[#allocation3_spill] sm:$0xff]  ;;  %v4042_v14 = vpop.f32.mrf.mxu1  ;;  %vm10402_vm7 = vmor %vm4754_vm4, %vm4755_vm6 }
 0x9b2   : > { %v7135_v29 = vpop.eup %7134  ;;  %v3653_v10 = vsel %vm10267_vm14, %v10158_v19, %v3649_v54  ;;  %v10294_v19 = vadd.f32 1.0, %v7133_v21  ;;  %v12246_v54 = vand.u32 2147483647, %v10050_v56  ;;  %v4723_v21 = vadd.f32 %v10142_v7, %v4722_v9 }
 0x9b3   : > { %v7137_v8 = vpop.eup %7136  ;;  %v10311_v44 = vadd.f32 1.0, %v7135_v29  ;;  %v3669_v60 = vmul.f32 %v3653_v10, %v12251_v24  ;;  %v10319_v55 = vadd.f32 %v4089_v37, %v9355_v22  ;;  %v4766_v47 = vsub.f32 1.0, %v4765_v40  ;;  %v6671_v10 = vld [vmem:[%s11975_s11 + $0x60] sm:$0xff]  ;;  %5753 = vmatpush.bf16.msra.mxu3 %v6663_v5 }
 0x9b4   : > { %v7139_v32 = vpop.eup %7138  ;;  %vm10302_vm1 = vcmp.eq.f32.partialorder %v12246_v54, 8.507059e+37  ;;  %v10316_v53 = vadd.f32 1.0, %v7137_v8  ;;  %7140 = vpow2.f32 %v4290_v48  ;;  %v10332_v29 = vadd.f32 %v3993_v50, %v9329_v49  ;;  %v6687_v37 = vld [vmem:[%s11975_s11 + $0xe0] sm:$0xff]  ;;  %5802 = vmatpush.bf16.msrb.mxu0 %v6671_v10 }
 0x9b5   : > { %v10329_v58 = vadd.f32 1.0, %v7139_v32  ;;  %v4717_v9 = vsel %vm10222_vm8, %v10162_v25, %v4712_v46  ;;  %v4752_v56 = vmul.f32 %v10208_v0, %v4751_v61  ;;  %7142 = vrcp.f32 %v10294_v19  ;;  %5900 = vmatpush.bf16.msra.mxu2 %v6687_v37  ;;  %v6662_v37 = vld [vmem:[%s11975_s11 + $0x18] sm:$0xff] }
 0x9b6   : > { %v3687_v8 = vmul.f32 %v9952_v63, %v9862_v45  ;;  %v4682_v40 = vsel %vm10325_vm5, %v10136_v11, %v4678_v59  ;;  %v4758_v25 = vand.u32 2147483647, %v10127_v27  ;;  %v4760_v34 = vand.u32 2147483648, %v10127_v27  ;;  %v6679_v45 = vld [vmem:[%s11975_s11 + $0xa0] sm:$0xff] }
 0x9b7   : > { %7144 = vrcp.f32 %v10311_v44  ;;  %v4727_v11 = vsel %vm10339_vm9, %v10142_v7, %v4723_v21  ;;  %v6427_v48 = vmul.f32 -1.702, %v10319_v55  ;;  %v3688_v32 = vmul.f32 %v9952_v63, %v3669_v60  ;;  %5851 = vmatpush.bf16.msrb.mxu1 %v6679_v45  ;;  %5754 = vmatpush.bf16.msra.mxu3 %v6662_v37 }
 0x9b8   : > { %7146 = vrcp.f32 %v10316_v53  ;;  %v4767_v43 = vmul.f32 %v10229_v18, %v4766_v47  ;;  %v6429_v61 = vmul.f32 -1.702, %v10332_v29  ;;  %v10375_v50 = vadd.f32 %v4042_v14, %v9332_v62  ;;  %v4091_v45 = vpop.f32.mrf.mxu2 }
 0x9b9   : > { %7148 = vrcp.f32 %v10329_v58  ;;  %v4753_v7 = vadd.f32 %v10208_v0, %v4752_v56  ;;  %v3706_v46 = vadd.f32 %v9977_v17, %v3687_v8  ;;  %v3707_v63 = vadd.f32 %v9977_v17, %v3688_v32  ;;  %v6670_v32 = vld [vmem:[%s11975_s11 + $0x58] sm:$0xff] }
 0x9ba   : > { %v7141_v59 = vpop.eup %7140  ;;  %v10382_v54 = vmul.f32 %v4702_v31, %v9800_v16  ;;  %v10385_v21 = vmul.f32 %v4717_v9, %v9846_v42  ;;  %v4773_v24 = vand.u32 2147483647, %v10155_v57  ;;  %v4775_v60 = vand.u32 2147483648, %v10155_v57  ;;  %v3944_v16 = vpop.f32.mrf.mxu3  ;;  %5803 = vmatpush.bf16.msrb.mxu0 %v6670_v32 }
 0x9bb   : > { %v10389_v2 = vpop.eup %7142  ;;  %v4687_v47 = vsel %vm10302_vm1, %v10262_v36, %v4682_v40  ;;  %v4732_v17 = vsel %vm10307_vm3, %v4731_v51, %v4727_v11  ;;  %v4296_v39 = vmul.f32 1.442695, %v6427_v48  ;;  %v3715_v56 = vpack.c.bf16 %v3707_v63, %v3706_v46  ;;  %v6686_v46 = vld [vmem:[%s11975_s11 + $0xd8] sm:$0xff]  ;;  %v3996_v63 = vpop.f32.mrf.mxu0 }
 0x9bc   : > { %12256 = vst [vmem:[#allocation16_spill] sm:$0xff] %v10382_v54  ;;  %v4768_v9 = vadd.f32 %v10229_v18, %v4767_v43  ;;  %vm4770_vm8 = vweird.f32 %v10229_v18  ;;  %v4300_v36 = vmul.f32 1.442695, %v6429_v61  ;;  %v6430_v51 = vmul.f32 -1.702, %v10375_v50  ;;  %v6678_v43 = vld [vmem:[%s11975_s11 + $0x98] sm:$0xff]  ;;  %5901 = vmatpush.bf16.msra.mxu2 %v6686_v46  ;;  %v4045_v32 = vpop.f32.mrf.mxu1 }
 0x9bd   : > { %12257 = vst [vmem:[#allocation15_spill] sm:$0xff] %v10385_v21  ;;  %v10396_v31 = vpop.eup %7144  ;;  %v4757_v1 = vsel %vm10402_vm7, %v10208_v0, %v4753_v7  ;;  %vm10414_vm10 = vcmp.eq.f32.partialorder %v4758_v25, 8.507059e+37  ;;  %v4761_v27 = vor.u32 1.1754944e-38, %v4760_v34  ;;  %v10418_v8 = vadd.f32 1.0, %v7141_v59  ;;  %3961 = vmatmul.bf16.gmra.mxu3 %v3715_v56  ;;  %4010 = vmatmul.bf16.gmra.mxu0 %v3715_v56  ;;  %v12309_v21 = vld [vmem:[#allocation6_spill] sm:$0xff]  ;;  %v12313_v54 = vld [vmem:[#allocation8_spill] sm:$0xff] }
 0x9be   : > { %v10409_v20 = vpop.eup %7146  ;;  %v10423_v5 = vmul.f32 %v4687_v47, %v9853_v23  ;;  %vm4769_vm11 = vweird.f32 %v10155_v57  ;;  %vm10426_vm12 = vcmp.eq.f32.partialorder %v4773_v24, 8.507059e+37  ;;  %4059 = vmatmul.bf16.gmra.mxu1 %v3715_v56  ;;  %4108 = vmatmul.bf16.gmra.mxu2 %v3715_v56  ;;  %v10431_v0 = vadd.f32 %v3944_v16, %v9350_v38 }
 0x9bf   : > { %v10420_v40 = vpop.eup %7148  ;;  %v10434_v25 = vmul.f32 %v4732_v17, %v9859_v4  ;;  %vm10438_vm13 = vmor %vm4769_vm11, %vm4770_vm8  ;;  %v4776_v23 = vor.u32 1.1754944e-38, %v4775_v60  ;;  %v4735_v57 = vmul.f32 %v10389_v2, %v10294_v19  ;;  %7150 = vpow2.f32 %v4296_v39  ;;  %5852 = vmatpush.bf16.msrb.mxu1 %v6678_v43 }
 0x9c0   : > { %v4762_v11 = vsel %vm10414_vm10, %v4761_v27, %v4757_v1  ;;  %v4772_v4 = vsel %vm10438_vm13, %v10229_v18, %v4768_v9  ;;  %7152 = vpow2.f32 %v4300_v36  ;;  %v4302_v48 = vmul.f32 1.442695, %v6430_v51 }
 0x9c1   : > { %12264 = vst [vmem:[#allocation18_spill] sm:$0xff] %v10434_v25  ;;  %v4780_v61 = vmul.f32 %v10396_v31, %v10311_v44  ;;  %v4810_v18 = vmul.f32 %v10409_v20, %v10316_v53  ;;  %v4825_v7 = vmul.f32 %v10420_v40, %v10329_v58  ;;  %7154 = vrcp.f32 %v10418_v8  ;;  %v12307_v25 = vld [vmem:[#allocation5_spill] sm:$0xff] }
 0x9c2   : > { %v4745_v59 = vand.u32 2147483648, %v10294_v19  ;;  %v6428_v24 = vmul.f32 -1.702, %v10431_v0  ;;  %v10471_v60 = vadd.f32 %v4091_v45, %v9355_v22  ;;  %v10476_v17 = vmul.f32 %v4762_v11, %v9933_v28 }
 0x9c3   : > { %v4736_v39 = vsub.f32 1.0, %v4735_v57  ;;  %v4777_v42 = vsel %vm10426_vm12, %v4776_v23, %v4772_v4  ;;  %7156 = vpow2.f32 %v4302_v48  ;;  %v10485_v9 = vadd.f32 %v3996_v63, %v9329_v49 }
 0x9c4   : > { %12267 = vst [vmem:[#allocation17_spill] sm:$0xff] %v10476_v17  ;;  %vm4739_vm14 = vweird.f32 %v10294_v19  ;;  %v4743_v51 = vand.u32 2147483647, %v10294_v19  ;;  %v4781_v1 = vsub.f32 1.0, %v4780_v61  ;;  %v4811_v14 = vsub.f32 1.0, %v4810_v18 }
 0x9c5   : > { %v7151_v36 = vpop.eup %7150  ;;  %v4826_v27 = vsub.f32 1.0, %v4825_v7  ;;  %v10491_v57 = vor.u32 1.1754944e-38, %v4745_v59  ;;  %vm4784_vm15 = vweird.f32 %v10311_v44  ;;  %v4298_v10 = vmul.f32 1.442695, %v6428_v24 }
 0x9c6   : > { %v7153_v34 = vpop.eup %7152  ;;  %v6431_v23 = vmul.f32 -1.702, %v10471_v60  ;;  %v10498_v11 = vmul.f32 %v4777_v42, %v9967_v52  ;;  %v4737_v4 = vmul.f32 %v10389_v2, %v4736_v39  ;;  %v4788_v48 = vand.u32 2147483647, %v10311_v44 }
 0x9c7   : > { %v10495_v45 = vpop.eup %7154  ;;  %v4790_v37 = vand.u32 2147483648, %v10311_v44  ;;  %vm4740_vm0 = vweird.f32 %v10389_v2  ;;  %v10504_v43 = vadd.f32 1.0, %v7151_v36  ;;  %v6433_v61 = vmul.f32 -1.702, %v10485_v9 }
 0x9c8   : > { %12268 = vst [vmem:[#allocation9_spill] sm:$0xff] %v10498_v11  ;;  %v4782_v7 = vmul.f32 %v10396_v31, %v4781_v1  ;;  %v4812_v52 = vmul.f32 %v10409_v20, %v4811_v14  ;;  %v4827_v46 = vmul.f32 %v10420_v40, %v4826_v27  ;;  %v10512_v63 = vadd.f32 1.0, %v7153_v34  ;;  %v6669_v34 = vld [vmem:[%s11975_s11 + $0x50] sm:$0xff]  ;;  %vm10551_vm5 = vmor %vm4739_vm14, %vm4740_vm0 }
 0x9c9   : > { %v7157_v59 = vpop.eup %7156  ;;  %v4795_v24 = vmul.f32 %v10495_v45, %v10418_v8  ;;  %7158 = vpow2.f32 %v4298_v10  ;;  %v4304_v39 = vmul.f32 1.442695, %v6431_v23  ;;  %v10517_v42 = vadd.f32 %v4045_v32, %v9332_v62  ;;  %v6677_v10 = vld [vmem:[%s11975_s11 + $0x90] sm:$0xff]  ;;  %5804 = vmatpush.bf16.msrb.mxu0 %v6669_v34 }
 0x9ca   : > { %v4738_v36 = vadd.f32 %v10389_v2, %v4737_v4  ;;  %vm10520_vm1 = vcmp.eq.f32.partialorder %v4743_v51, 8.507059e+37  ;;  %vm4785_vm2 = vweird.f32 %v10396_v31  ;;  %v4818_v1 = vand.u32 2147483647, %v10316_v53  ;;  %v6661_v51 = vld [vmem:[%s11975_s11 + $0x10] sm:$0xff]  ;;  %5853 = vmatpush.bf16.msrb.mxu1 %v6677_v10 }
 0x9cb   : > { %v4820_v14 = vand.u32 2147483648, %v10316_v53  ;;  %vm4815_vm3 = vweird.f32 %v10409_v20  ;;  %vm4830_vm4 = vweird.f32 %v10420_v40  ;;  %7160 = vrcp.f32 %v10504_v43  ;;  %5755 = vmatpush.bf16.msra.mxu3 %v6661_v51  ;;  %vm10561_vm9 = vmor %vm4784_vm15, %vm4785_vm2 }
 0x9cc   : > { %v4308_v27 = vmul.f32 1.442695, %v6433_v61  ;;  %v4783_v23 = vadd.f32 %v10396_v31, %v4782_v7  ;;  %v4813_v4 = vadd.f32 %v10409_v20, %v4812_v52  ;;  %7162 = vrcp.f32 %v10512_v63  ;;  %v6685_v61 = vld [vmem:[%s11975_s11 + $0xd0] sm:$0xff] }
 0x9cd   : > { %v10542_v32 = vadd.f32 1.0, %v7157_v59  ;;  %v4828_v7 = vadd.f32 %v10420_v40, %v4827_v46  ;;  %v4796_v16 = vsub.f32 1.0, %v4795_v24  ;;  %7164 = vpow2.f32 %v4304_v39  ;;  %5902 = vmatpush.bf16.msra.mxu2 %v6685_v61 }
 0x9ce   : > { %v6434_v52 = vmul.f32 -1.702, %v10517_v42  ;;  %vm10565_vm6 = vcmp.eq.f32.partialorder %v4788_v48, 8.507059e+37  ;;  %vm4814_vm7 = vweird.f32 %v10316_v53  ;;  %v4833_v46 = vand.u32 2147483647, %v10329_v58  ;;  %v3947_v53 = vpop.f32.mrf.mxu3  ;;  %v6660_v48 = vld [vmem:[%s11975_s11 + $0x8] sm:$0xff] }
 0x9cf   : > { %v4835_v24 = vand.u32 2147483648, %v10329_v58  ;;  %v7159_v39 = vpop.eup %7158  ;;  %v4791_v51 = vor.u32 1.1754944e-38, %v4790_v37  ;;  %vm10574_vm8 = vmor %vm4814_vm7, %vm4815_vm3  ;;  %vm10578_vm10 = vcmp.eq.f32.partialorder %v4818_v1, 8.507059e+37  ;;  %vm4829_vm11 = vweird.f32 %v10329_v58  ;;  %v4094_v1 = vpop.f32.mrf.mxu2  ;;  %5756 = vmatpush.bf16.msra.mxu3 %v6660_v48 }
 0x9d0   : > { %7166 = vpow2.f32 %v4308_v27  ;;  %v4742_v34 = vsel %vm10551_vm5, %v10389_v2, %v4738_v36  ;;  %v4787_v37 = vsel %vm10561_vm9, %v10396_v31, %v4783_v23  ;;  %v4821_v10 = vor.u32 1.1754944e-38, %v4820_v14  ;;  %vm10591_vm12 = vmor %vm4829_vm11, %vm4830_vm4 }
 0x9d1   : > { %7168 = vrcp.f32 %v10542_v32  ;;  %v10596_v58 = vpop.eup %7160  ;;  %v4817_v28 = vsel %vm10574_vm8, %v10409_v20, %v4813_v4  ;;  %v4832_v2 = vsel %vm10591_vm12, %v10420_v40, %v4828_v7  ;;  %v4797_v31 = vmul.f32 %v10495_v45, %v4796_v16 }
 0x9d2   : > { %v4310_v36 = vmul.f32 1.442695, %v6434_v52  ;;  %v10605_v14 = vpop.eup %7162  ;;  %vm4834_vm13 = vcmp.eq.f32.partialorder %v4833_v46, 8.507059e+37  ;;  %v4836_v27 = vor.u32 1.1754944e-38, %v4835_v24  ;;  %v10607_v23 = vadd.f32 1.0, %v7159_v39 }
 0x9d3   : > { %v10610_v61 = vadd.f32 %v3947_v53, %v9350_v38  ;;  %v7165_v59 = vpop.eup %7164  ;;  %v4747_v20 = vsel %vm10520_vm1, %v10491_v57, %v4742_v34  ;;  %vm4799_vm14 = vweird.f32 %v10418_v8  ;;  %v4803_v40 = vand.u32 2147483647, %v10418_v8  ;;  %v12284_v53 = vld [vmem:[#allocation12_spill] sm:$0xff] }
 0x9d4   : > { %v4805_v16 = vand.u32 2147483648, %v10418_v8  ;;  %v4792_v4 = vsel %vm10565_vm6, %v4791_v51, %v4787_v37  ;;  %v4822_v7 = vsel %vm10578_vm10, %v4821_v10, %v4817_v28  ;;  %v4837_v52 = vsel %vm4834_vm13, %v4836_v27, %v4832_v2  ;;  %v6668_v28 = vld [vmem:[%s11975_s11 + $0x48] sm:$0xff]  ;;  %v4047_v8 = vpop.f32.mrf.mxu1  ;;  %v6667_v37 = vld [vmem:[%s11975_s11 + $0x40] sm:$0xff] }
 0x9d5   : > { %12283 = vst [vmem:[#allocation3_spill] sm:$0xff] %v10610_v61  ;;  %vm4800_vm15 = vweird.f32 %v10495_v45  ;;  %v4798_v24 = vadd.f32 %v10495_v45, %v4797_v31  ;;  %v4840_v57 = vmul.f32 %v10596_v58, %v10504_v43  ;;  %v4870_v18 = vmul.f32 %v10605_v14, %v10512_v63  ;;  %v6676_v2 = vld [vmem:[%s11975_s11 + $0x88] sm:$0xff]  ;;  %5805 = vmatpush.bf16.msrb.mxu0 %v6668_v28 }
 0x9d6   : > { %v7167_v46 = vpop.eup %7166  ;;  %7170 = vpow2.f32 %v4310_v36  ;;  %v10631_v19 = vmul.f32 %v4747_v20, %v10086_v33  ;;  %v10634_v51 = vadd.f32 1.0, %v7165_v59  ;;  %v6432_v44 = vmul.f32 -1.702, %v10610_v61  ;;  %v6684_v31 = vld [vmem:[%s11975_s11 + $0xc8] sm:$0xff]  ;;  %v12288_v36 = vld [vmem:[#allocation10_spill] sm:$0xff]  ;;  %vm10667_vm1 = vmor %vm4799_vm14, %vm4800_vm15  ;;  %5854 = vmatpush.bf16.msrb.mxu1 %v6676_v2 }
 0x9d7   : > { %v10628_v39 = vpop.eup %7168  ;;  %7172 = vrcp.f32 %v10607_v23  ;;  %v10641_v34 = vmul.f32 %v4792_v4, %v12284_v53  ;;  %vm10643_vm0 = vcmp.eq.f32.partialorder %v4803_v40, 8.507059e+37  ;;  %v4806_v10 = vor.u32 1.1754944e-38, %v4805_v16  ;;  %v12290_v59 = vld [vmem:[#allocation14_spill] sm:$0xff]  ;;  %v3998_v53 = vpop.f32.mrf.mxu0  ;;  %5903 = vmatpush.bf16.msra.mxu2 %v6684_v31 }
 0x9d8   : > { %v4850_v33 = vand.u32 2147483648, %v10504_v43  ;;  %v10658_v27 = vmul.f32 %v4822_v7, %v12288_v36  ;;  %v10661_v20 = vmul.f32 %v4837_v52, %v12290_v59  ;;  %v4848_v16 = vand.u32 2147483647, %v10504_v43 }
 0x9d9   : > { %12285 = vst [vmem:[#allocation12_spill] sm:$0xff] %v10641_v34  ;;  %v10672_v4 = vadd.f32 1.0, %v7167_v46  ;;  %v4802_v7 = vsel %vm10667_vm1, %v10495_v45, %v4798_v24  ;;  %v4841_v52 = vsub.f32 1.0, %v4840_v57  ;;  %v4871_v36 = vsub.f32 1.0, %v4870_v18  ;;  %v6659_v18 = vld [vmem:[%s11975_s11] sm:$0xff]  ;;  %5806 = vmatpush.bf16.msrb.mxu0 %v6667_v37 }
 0x9da   : > { %12289 = vst [vmem:[#allocation10_spill] sm:$0xff] %v10658_v27  ;;  %v4885_v59 = vmul.f32 %v10628_v39, %v10542_v32  ;;  %7174 = vrcp.f32 %v10634_v51  ;;  %v4306_v56 = vmul.f32 1.442695, %v6432_v44  ;;  %v10681_v46 = vadd.f32 %v4094_v1, %v9355_v22  ;;  %5757 = vmatpush.bf16.msra.mxu3 %v6659_v18 }
 0x9db   : > { %12291 = vst [vmem:[#allocation14_spill] sm:$0xff] %v10661_v20  ;;  %vm4844_vm2 = vweird.f32 %v10504_v43  ;;  %v10686_v45 = vor.u32 1.1754944e-38, %v4850_v33  ;;  %v10689_v24 = vadd.f32 %v3998_v53, %v9329_v49  ;;  %v4807_v1 = vsel %vm10643_vm0, %v4806_v10, %v4802_v7  ;;  %v6675_v10 = vld [vmem:[%s11975_s11 + $0x80] sm:$0xff]  ;;  %v3949_v7 = vpop.f32.mrf.mxu3 }
 0x9dc   : > { %12294 = vst [vmem:[#allocation35_spill] sm:$0xff] %v10681_v46  ;;  %v7171_v40 = vpop.eup %7170  ;;  %v4878_v28 = vand.u32 2147483647, %v10512_v63  ;;  %7176 = vrcp.f32 %v10672_v4  ;;  %v10702_v33 = vadd.f32 %v4047_v8, %v9332_v62  ;;  %v4842_v2 = vmul.f32 %v10596_v58, %v4841_v52  ;;  %5855 = vmatpush.bf16.msrb.mxu1 %v6675_v10 }
 0x9dd   : > { %12295 = vst [vmem:[#allocation36_spill] sm:$0xff] %v10689_v24  ;;  %v10695_v44 = vpop.eup %7172  ;;  %v4872_v31 = vmul.f32 %v10605_v14, %v4871_v36  ;;  %v4880_v53 = vand.u32 2147483648, %v10512_v63  ;;  %v4886_v57 = vsub.f32 1.0, %v4885_v59  ;;  %v10716_v8 = vadd.f32 1.0, %v7171_v40  ;;  %v6683_v36 = vld [vmem:[%s11975_s11 + $0xc0] sm:$0xff] }
 0x9de   : > { %12296 = vst [vmem:[#allocation37_spill] sm:$0xff] %v10702_v33  ;;  %7178 = vpow2.f32 %v4306_v56  ;;  %v6435_v52 = vmul.f32 -1.702, %v10681_v46  ;;  %v10723_v59 = vadd.f32 %v3949_v7, %v9350_v38  ;;  %v10726_v48 = vmul.f32 %v4807_v1, %v10200_v6  ;;  %5904 = vmatpush.bf16.msra.mxu2 %v6683_v36  ;;  %v4096_v46 = vpop.f32.mrf.mxu2  ;;  %v12304_v36 = vld [vmem:[#allocation4_spill] sm:$0xff] }
 0x9df   : > { %vm10728_vm3 = vcmp.eq.f32.partialorder %v4848_v16, 8.507059e+37  ;;  %vm4874_vm4 = vweird.f32 %v10512_v63  ;;  %v4855_v56 = vmul.f32 %v10695_v44, %v10607_v23  ;;  %v6437_v40 = vmul.f32 -1.702, %v10689_v24 }
 0x9e0   : > { %12297 = vst [vmem:[#allocation38_spill] sm:$0xff] %v10723_v59  ;;  %v10736_v20 = vpop.eup %7174  ;;  %vm4845_vm5 = vweird.f32 %v10596_v58  ;;  %v4893_v6 = vand.u32 2147483647, %v10542_v32  ;;  %v4895_v16 = vand.u32 2147483648, %v10542_v32  ;;  %v6438_v1 = vmul.f32 -1.702, %v10702_v33 }
 0x9e1   : > { %12298 = vst [vmem:[#allocation39_spill] sm:$0xff] %v10726_v48  ;;  %v4843_v7 = vadd.f32 %v10596_v58, %v4842_v2  ;;  %vm4875_vm9 = vweird.f32 %v10605_v14  ;;  %vm10744_vm6 = vcmp.eq.f32.partialorder %v4878_v28, 8.507059e+37  ;;  %v4881_v18 = vor.u32 1.1754944e-38, %v4880_v53  ;;  %v12303_v2 = vld [vmem:[#allocation11_spill] sm:$0xff]  ;;  %v12306_v28 = vld [vmem:[#allocation2_spill] sm:$0xff]  ;;  %vm10773_vm8 = vmor %vm4844_vm2, %vm4845_vm5 }
 0x9e2   : > { %v6436_v37 = vmul.f32 -1.702, %v10723_v59  ;;  %v10749_v27 = vpop.eup %7176  ;;  %v4873_v48 = vadd.f32 %v10605_v14, %v4872_v31  ;;  %v4887_v33 = vmul.f32 %v10628_v39, %v4886_v57  ;;  %7180 = vrcp.f32 %v10716_v8  ;;  %v12310_v57 = vld [vmem:[#allocation7_spill] sm:$0xff]  ;;  %vm10792_vm11 = vmor %vm4874_vm4, %vm4875_vm9 }
 0x9e3   : > { %v4312_v10 = vmul.f32 1.442695, %v6435_v52  ;;  %v12305_v61 = vpack.c.bf16 %v12303_v2, %v12304_v36  ;;  %v12308_v34 = vpack.c.bf16 %v12306_v28, %v12307_v25  ;;  %vm4889_vm7 = vweird.f32 %v10542_v32  ;;  %v12312_v52 = vld [vmem:[#allocation13_spill] sm:$0xff] }
 0x9e4   : > { %v4856_v53 = vsub.f32 1.0, %v4855_v56  ;;  %v4900_v59 = vmul.f32 %v10736_v20, %v10634_v51  ;;  %v4316_v31 = vmul.f32 1.442695, %v6437_v40  ;;  %v12311_v11 = vpack.c.bf16 %v12309_v21, %v12310_v57 }
 0x9e5   : > { %5758 = vmatmul.bf16.vlgmr.msra.gmra.mxu3 %v12305_v61  ;;  %5807 = vmatmul.bf16.vlgmr.msrb.gmra.mxu0 %v12308_v34  ;;  %v12314_v17 = vpack.c.bf16 %v12312_v52, %v12313_v54  ;;  %v7179_v61 = vpop.eup %7178  ;;  %vm10777_vm10 = vcmp.eq.f32.partialorder %v4893_v6, 8.507059e+37  ;;  %v4896_v56 = vor.u32 1.1754944e-38, %v4895_v16  ;;  %v4863_v21 = vand.u32 2147483647, %v10607_v23 }
 0x9e6   : > { %5856 = vmatmul.bf16.vlgmr.msrb.gmra.mxu1 %v12311_v11  ;;  %v4318_v11 = vmul.f32 1.442695, %v6438_v1  ;;  %v10783_v54 = vadd.f32 %v4096_v46, %v9355_v22  ;;  %vm4890_vm12 = vweird.f32 %v10628_v39  ;;  %v4930_v40 = vmul.f32 %v10749_v27, %v10672_v4 }
 0x9e7   : > { %5905 = vmatmul.bf16.vlgmr.msra.gmra.mxu2 %v12314_v17  ;;  %v4847_v17 = vsel %vm10773_vm8, %v10596_v58, %v4843_v7  ;;  %v4314_v6 = vmul.f32 1.442695, %v6436_v37  ;;  %v4877_v46 = vsel %vm10792_vm11, %v10605_v14, %v4873_v48  ;;  %v4888_v58 = vadd.f32 %v10628_v39, %v4887_v33  ;;  %vm10818_vm14 = vmor %vm4889_vm7, %vm4890_vm12 }
 0x9e8   : > { %7182 = vpow2.f32 %v4312_v10  ;;  %v6439_v16 = vmul.f32 -1.702, %v10783_v54  ;;  %v4857_v63 = vmul.f32 %v10695_v44, %v4856_v53  ;;  %v4901_v1 = vsub.f32 1.0, %v4900_v59  ;;  %v10807_v2 = vpop.eup %7180 }
 0x9e9   : > { %v10805_v7 = vadd.f32 1.0, %v7179_v61  ;;  %7184 = vpow2.f32 %v4316_v31  ;;  %v4852_v37 = vsel %vm10728_vm3, %v10686_v45, %v4847_v17  ;;  %vm4859_vm13 = vweird.f32 %v10607_v23 }
 0x9ea   : > { %v4865_v14 = vand.u32 2147483648, %v10607_v23  ;;  %7186 = vpow2.f32 %v4318_v11  ;;  %vm4860_vm15 = vweird.f32 %v10695_v44  ;;  %vm10823_vm0 = vcmp.eq.f32.partialorder %v4863_v21, 8.507059e+37 }
 0x9eb   : > { %v4908_v47 = vand.u32 2147483647, %v10634_v51  ;;  %v4931_v45 = vsub.f32 1.0, %v4930_v40  ;;  %7188 = vpow2.f32 %v4314_v6  ;;  %v4882_v59 = vsel %vm10744_vm6, %v4881_v18, %v4877_v46  ;;  %vm10859_vm3 = vmor %vm4859_vm13, %vm4860_vm15 }
 0x9ec   : > { %v4892_v32 = vsel %vm10818_vm14, %v10628_v39, %v4888_v58  ;;  %v4910_v10 = vand.u32 2147483648, %v10634_v51  ;;  %v4320_v36 = vmul.f32 1.442695, %v6439_v16  ;;  %v4858_v28 = vadd.f32 %v10695_v44, %v4857_v63  ;;  %v4001_v58 = vpop.f32.mrf.mxu0 }
 0x9ed   : > { %v4902_v53 = vmul.f32 %v10736_v20, %v4901_v1  ;;  %v4945_v31 = vmul.f32 %v10807_v2, %v10716_v8  ;;  %7190 = vrcp.f32 %v10805_v7  ;;  %v10840_v24 = vmul.f32 %v4852_v37, %v10319_v55  ;;  %v4050_v1 = vpop.f32.mrf.mxu1 }
 0x9ee   : > { %v7183_v57 = vpop.eup %7182  ;;  %v4866_v18 = vor.u32 1.1754944e-38, %v4865_v14  ;;  %vm4904_vm1 = vweird.f32 %v10634_v51  ;;  %v4938_v39 = vand.u32 2147483647, %v10672_v4  ;;  %v4897_v61 = vsel %vm10777_vm10, %v4896_v56, %v4892_v32 }
 0x9ef   : > { %v7185_v52 = vpop.eup %7184  ;;  %vm10846_vm2 = vcmp.eq.f32.partialorder %v4908_v47, 8.507059e+37  ;;  %v4932_v21 = vmul.f32 %v10749_v27, %v4931_v45  ;;  %v4940_v11 = vand.u32 2147483648, %v10672_v4  ;;  %v10853_v55 = vmul.f32 %v4882_v59, %v10332_v29 }
 0x9f0   : > { %v7187_v17 = vpop.eup %7186  ;;  %vm4905_vm4 = vweird.f32 %v10736_v20  ;;  %v4911_v34 = vor.u32 1.1754944e-38, %v4910_v10  ;;  %7192 = vpow2.f32 %v4320_v36  ;;  %v4862_v40 = vsel %vm10859_vm3, %v10695_v44, %v4858_v28 }
 0x9f1   : > { %v7189_v56 = vpop.eup %7188  ;;  %v4903_v29 = vadd.f32 %v10736_v20, %v4902_v53  ;;  %v4946_v6 = vsub.f32 1.0, %v4945_v31  ;;  %v10868_v46 = vadd.f32 1.0, %v7183_v57  ;;  %v10871_v23 = vmul.f32 %v4897_v61, %v10375_v50  ;;  %vm10892_vm7 = vmor %vm4904_vm1, %vm4905_vm4  ;;  %v3952_v57 = vpop.f32.mrf.mxu3 }
 0x9f2   : > { %vm4934_vm5 = vweird.f32 %v10672_v4  ;;  %vm10874_vm9 = vcmp.eq.f32.partialorder %v4938_v39, 8.507059e+37  ;;  %v10878_v63 = vadd.f32 1.0, %v7185_v52  ;;  %v4933_v44 = vadd.f32 %v10749_v27, %v4932_v21  ;;  %v4099_v52 = vpop.f32.mrf.mxu2 }
 0x9f3   : > { %v10880_v37 = vpop.eup %7190  ;;  %vm4935_vm6 = vweird.f32 %v10749_v27  ;;  %v4941_v14 = vor.u32 1.1754944e-38, %v4940_v11  ;;  %v10884_v48 = vadd.f32 1.0, %v7187_v17  ;;  %v4867_v50 = vsel %vm10823_vm0, %v4866_v18, %v4862_v40 }
 0x9f4   : > { %v10896_v45 = vadd.f32 1.0, %v7189_v56  ;;  %v10899_v59 = vadd.f32 %v4001_v58, %v9329_v49  ;;  %v10902_v32 = vadd.f32 %v4050_v1, %v9332_v62  ;;  %v12333_v33 = vpack.c.bf16 %v10257_v30, %v10027_v15  ;;  %vm10923_vm8 = vmor %vm4934_vm5, %vm4935_vm6 }
 0x9f5   : > { %v4907_v51 = vsel %vm10892_vm7, %v10736_v20, %v4903_v29  ;;  %v4947_v10 = vmul.f32 %v10807_v2, %v4946_v6  ;;  %v4953_v36 = vand.u32 2147483647, %v10716_v8  ;;  %7194 = vrcp.f32 %v10868_v46 }
 0x9f6   : > { %5763 = vmatmul.bf16.gmra.mxu3 %v12333_v33  ;;  %v12334_v28 = vpack.c.bf16 %v10063_v41, %v9984_v35  ;;  %v12335_v53 = vpack.c.bf16 %v10131_v3, %v10001_v12  ;;  %v7193_v15 = vpop.eup %7192  ;;  %v4915_v20 = vmul.f32 %v10880_v37, %v10805_v7  ;;  %7196 = vrcp.f32 %v10878_v63 }
 0x9f7   : > { %v6441_v35 = vmul.f32 -1.702, %v10899_v59  ;;  %v6442_v41 = vmul.f32 -1.702, %v10902_v32  ;;  %v12338_v12 = vpack.c.bf16 %v10260_v13, %v10043_v26  ;;  %v4937_v3 = vsel %vm10923_vm8, %v10749_v27, %v4933_v44  ;;  %v4003_v44 = vpop.f32.mrf.mxu0 }
 0x9f8   : > { %5812 = vmatmul.bf16.gmra.mxu0 %v12334_v28  ;;  %5861 = vmatmul.bf16.gmra.mxu1 %v12335_v53  ;;  %v4955_v4 = vand.u32 2147483648, %v10716_v8  ;;  %7198 = vrcp.f32 %v10884_v48  ;;  %v10940_v31 = vadd.f32 1.0, %v7193_v15  ;;  %v4912_v18 = vsel %vm10846_vm2, %v4911_v34, %v4907_v51 }
 0x9f9   : > { %5910 = vmatmul.bf16.gmra.mxu2 %v12338_v12  ;;  %7200 = vrcp.f32 %v10896_v45  ;;  %v4324_v39 = vmul.f32 1.442695, %v6441_v35  ;;  %v10946_v26 = vadd.f32 %v3952_v57, %v9350_v38  ;;  %v10949_v13 = vmul.f32 %v4867_v50, %v10431_v0 }
 0x9fa   : > { %v4948_v27 = vadd.f32 %v10807_v2, %v4947_v10  ;;  %vm4949_vm10 = vweird.f32 %v10716_v8  ;;  %vm4950_vm11 = vweird.f32 %v10807_v2  ;;  %v4942_v61 = vsel %vm10874_vm9, %v4941_v14, %v4937_v3 }
 0x9fb   : > { %vm10956_vm12 = vcmp.eq.f32.partialorder %v4953_v36, 8.507059e+37  ;;  %v4916_v21 = vsub.f32 1.0, %v4915_v20  ;;  %v4326_v11 = vmul.f32 1.442695, %v6442_v41  ;;  %v10960_v17 = vpop.eup %7194  ;;  %v10963_v0 = vmul.f32 %v4912_v18, %v10471_v60  ;;  %vm10969_vm13 = vmor %vm4949_vm10, %vm4950_vm11  ;;  %v4052_v36 = vpop.f32.mrf.mxu1 }
 0x9fc   : > { %v4956_v43 = vor.u32 1.1754944e-38, %v4955_v4  ;;  %v4925_v8 = vand.u32 2147483648, %v10805_v7  ;;  %7202 = vrcp.f32 %v10940_v31  ;;  %v10967_v34 = vpop.eup %7196  ;;  %v4923_v40 = vand.u32 2147483647, %v10805_v7  ;;  %v3954_v4 = vpop.f32.mrf.mxu3 }
 0x9fd   : > { %7204 = vpow2.f32 %v4324_v39  ;;  %v6440_v29 = vmul.f32 -1.702, %v10946_v26  ;;  %v10976_v6 = vadd.f32 %v4099_v52, %v9355_v22  ;;  %v10981_v58 = vmul.f32 %v4942_v61, %v10485_v9 }
 0x9fe   : > { %v10978_v60 = vpop.eup %7198  ;;  %v4952_v16 = vsel %vm10969_vm13, %v10807_v2, %v4948_v27  ;;  %vm4919_vm14 = vweird.f32 %v10805_v7  ;;  %v4970_v1 = vand.u32 2147483648, %v10868_v46  ;;  %v4917_v50 = vmul.f32 %v10880_v37, %v4916_v21  ;;  %v12352_v7 = vld [vmem:[#allocation15_spill] sm:$0xff] }
 0x9ff   : > { %v10988_v14 = vpop.eup %7200  ;;  %v4960_v47 = vmul.f32 %v10960_v17, %v10868_v46  ;;  %7206 = vpow2.f32 %v4326_v11  ;;  %v4322_v33 = vmul.f32 1.442695, %v6440_v29  ;;  %v4926_v9 = vor.u32 1.1754944e-38, %v4925_v8  ;;  %v4101_v29 = vpop.f32.mrf.mxu2 }
 0xa00   : > { %v4968_v51 = vand.u32 2147483647, %v10868_v46  ;;  %v4990_v2 = vmul.f32 %v10967_v34, %v10878_v63  ;;  %v5000_v10 = vand.u32 2147483648, %v10878_v63  ;;  %v4957_v28 = vsel %vm10956_vm12, %v4956_v43, %v4952_v16 }
 0xa01   : > { %vm10999_vm15 = vcmp.eq.f32.partialorder %v4923_v40, 8.507059e+37  ;;  %v5005_v15 = vmul.f32 %v10978_v60, %v10884_v48  ;;  %v6443_v30 = vmul.f32 -1.702, %v10976_v6  ;;  %v11007_v20 = vadd.f32 %v4003_v44, %v9329_v49 }
 0xa02   : > { %v11009_v35 = vpop.eup %7202  ;;  %vm4920_vm0 = vweird.f32 %v10880_v37  ;;  %v11012_v41 = vor.u32 1.1754944e-38, %v4970_v1  ;;  %v4998_v12 = vand.u32 2147483647, %v10878_v63  ;;  %v4975_v3 = vmul.f32 %v10988_v14, %v10896_v45 }
 0xa03   : > { %v7205_v57 = vpop.eup %7204  ;;  %v4918_v18 = vadd.f32 %v10880_v37, %v4917_v50  ;;  %v4961_v39 = vsub.f32 1.0, %v4960_v47  ;;  %7208 = vpow2.f32 %v4322_v33  ;;  %v11019_v27 = vadd.f32 %v4052_v36, %v9332_v62  ;;  %vm11040_vm2 = vmor %vm4919_vm14, %vm4920_vm0  ;;  %v12351_v33 = vld [vmem:[#allocation9_spill] sm:$0xff] }
 0xa04   : > { %v11022_v52 = vmul.f32 %v4957_v28, %v10517_v42  ;;  %v4991_v61 = vsub.f32 1.0, %v4990_v2  ;;  %v11024_v25 = vor.u32 1.1754944e-38, %v5000_v10  ;;  %v11026_v21 = vadd.f32 1.0, %v7205_v57 }
 0xa05   : > { %v7207_v11 = vpop.eup %7206  ;;  %vm4964_vm1 = vweird.f32 %v10868_v46  ;;  %v5006_v43 = vsub.f32 1.0, %v5005_v15  ;;  %v4328_v8 = vmul.f32 1.442695, %v6443_v30  ;;  %v6445_v56 = vmul.f32 -1.702, %v11007_v20  ;;  %v12354_v30 = vld [vmem:[#allocation12_spill] sm:$0xff] }
 0xa06   : > { %v11031_v40 = vadd.f32 %v3954_v4, %v9350_v38  ;;  %v12345_v42 = vpack.c.bf16 %v10631_v19, %v10423_v5  ;;  %vm4965_vm3 = vweird.f32 %v10960_v17  ;;  %vm4994_vm4 = vweird.f32 %v10878_v63  ;;  %v12348_v5 = vld [vmem:[#allocation17_spill] sm:$0xff]  ;;  %v12349_v19 = vld [vmem:[#allocation16_spill] sm:$0xff] }
 0xa07   : > { %v5013_v1 = vand.u32 2147483647, %v10884_v48  ;;  %v4976_v44 = vsub.f32 1.0, %v4975_v3  ;;  %v5020_v50 = vmul.f32 %v11009_v35, %v10940_v31  ;;  %v12350_v47 = vpack.c.bf16 %v12348_v5, %v12349_v19  ;;  %v12355_v3 = vld [vmem:[#allocation18_spill] sm:$0xff]  ;;  %vm11106_vm11 = vmor %vm4964_vm1, %vm4965_vm3 }
 0xa08   : > { %5768 = vmatmul.bf16.gmra.mxu3 %v12345_v42  ;;  %v12353_v2 = vpack.c.bf16 %v12351_v33, %v12352_v7  ;;  %v4922_v10 = vsel %vm11040_vm2, %v10880_v37, %v4918_v18  ;;  %v4962_v36 = vmul.f32 %v10960_v17, %v4961_v39  ;;  %vm5009_vm5 = vweird.f32 %v10884_v48 }
 0xa09   : > { %5817 = vmatmul.bf16.gmra.mxu0 %v12350_v47  ;;  %v5015_v28 = vand.u32 2147483648, %v10884_v48  ;;  %v6446_v15 = vmul.f32 -1.702, %v11019_v27  ;;  %v12356_v4 = vpack.c.bf16 %v12354_v30, %v12355_v3  ;;  %v4992_v57 = vmul.f32 %v10967_v34, %v4991_v61  ;;  %v7209_v18 = vpop.eup %7208  ;;  %v12366_v30 = vld [vmem:[#allocation3_spill] sm:$0xff] }
 0xa0a   : > { %5866 = vmatmul.bf16.gmra.mxu1 %v12353_v2  ;;  %7210 = vrcp.f32 %v11026_v21  ;;  %v11067_v42 = vadd.f32 1.0, %v7207_v11  ;;  %v11070_v37 = vadd.f32 %v4101_v29, %v9355_v22  ;;  %v5007_v39 = vmul.f32 %v10978_v60, %v5006_v43  ;;  %v4006_v46 = vpop.f32.mrf.mxu0 }
 0xa0b   : > { %5915 = vmatmul.bf16.gmra.mxu2 %v12356_v4  ;;  %7212 = vpow2.f32 %v4328_v8  ;;  %v4332_v16 = vmul.f32 1.442695, %v6445_v56  ;;  %v6444_v5 = vmul.f32 -1.702, %v11031_v40  ;;  %v4927_v19 = vsel %vm10999_vm15, %v4926_v9, %v4922_v10 }
 0xa0c   : > { %12357 = vst [vmem:[#allocation11_spill] sm:$0xff] %v11070_v37  ;;  %vm11076_vm9 = vcmp.eq.f32.partialorder %v4968_v51, 8.507059e+37  ;;  %vm4995_vm6 = vweird.f32 %v10967_v34  ;;  %vm11081_vm7 = vcmp.eq.f32.partialorder %v4998_v12, 8.507059e+37  ;;  %v4977_v11 = vmul.f32 %v10988_v14, %v4976_v44 }
 0xa0d   : > { %v5021_v43 = vsub.f32 1.0, %v5020_v50  ;;  %v4963_v8 = vadd.f32 %v10960_v17, %v4962_v36  ;;  %v4983_v56 = vand.u32 2147483647, %v10896_v45  ;;  %v4985_v53 = vand.u32 2147483648, %v10896_v45  ;;  %vm11120_vm13 = vmor %vm4994_vm4, %vm4995_vm6 }
 0xa0e   : > { %v4334_v9 = vmul.f32 1.442695, %v6446_v15  ;;  %v4993_v51 = vadd.f32 %v10967_v34, %v4992_v57  ;;  %vm11090_vm8 = vcmp.eq.f32.partialorder %v5013_v1, 8.507059e+37  ;;  %7214 = vrcp.f32 %v11067_v42 }
 0xa0f   : > { %v11095_v12 = vadd.f32 1.0, %v7209_v18  ;;  %v6447_v44 = vmul.f32 -1.702, %v11070_v37  ;;  %v5008_v50 = vadd.f32 %v10978_v60, %v5007_v39  ;;  %vm5010_vm10 = vweird.f32 %v10978_v60 }
 0xa10   : > { %7216 = vpow2.f32 %v4332_v16  ;;  %v4330_v33 = vmul.f32 1.442695, %v6444_v5  ;;  %v11100_v7 = vpop.eup %7210  ;;  %v5016_v2 = vor.u32 1.1754944e-38, %v5015_v28  ;;  %v4978_v10 = vadd.f32 %v10988_v14, %v4977_v11  ;;  %vm11139_vm0 = vmor %vm5009_vm5, %vm5010_vm10  ;;  %v12381_v28 = vld [vmem:[#allocation37_spill] sm:$0xff] }
 0xa11   : > { %vm4980_vm12 = vweird.f32 %v10988_v14  ;;  %v5022_v36 = vmul.f32 %v11009_v35, %v5021_v43  ;;  %v7213_v15 = vpop.eup %7212  ;;  %v11114_v3 = vmul.f32 %v4927_v19, %v12366_v30  ;;  %vm4979_vm14 = vweird.f32 %v10896_v45 }
 0xa12   : > { %vm11125_vm15 = vcmp.eq.f32.partialorder %v4983_v56, 8.507059e+37  ;;  %7218 = vpow2.f32 %v4334_v9  ;;  %v4967_v4 = vsel %vm11106_vm11, %v10960_v17, %v4963_v8  ;;  %v4997_v57 = vsel %vm11120_vm13, %v10967_v34, %v4993_v51  ;;  %vm11147_vm1 = vmor %vm4979_vm14, %vm4980_vm12  ;;  %v12375_v56 = vld [vmem:[#allocation39_spill] sm:$0xff]  ;;  %v12376_v9 = vld [vmem:[#allocation10_spill] sm:$0xff] }
 0xa13   : > { %7220 = vrcp.f32 %v11095_v12  ;;  %v4336_v45 = vmul.f32 1.442695, %v6447_v44  ;;  %v5012_v18 = vsel %vm11139_vm0, %v10978_v60, %v5008_v50  ;;  %v4986_v34 = vor.u32 1.1754944e-38, %v4985_v53 }
 0xa14   : > { %v5050_v39 = vmul.f32 %v11100_v7, %v11026_v21  ;;  %7222 = vpow2.f32 %v4330_v33  ;;  %v11153_v48 = vpop.eup %7214  ;;  %v4982_v16 = vsel %vm11147_vm1, %v10988_v14, %v4978_v10  ;;  %v5023_v5 = vadd.f32 %v11009_v35, %v5022_v36 }
 0xa15   : > { %vm5025_vm2 = vweird.f32 %v11009_v35  ;;  %v11160_v60 = vadd.f32 1.0, %v7213_v15  ;;  %v4972_v11 = vsel %vm11076_vm9, %v11012_v41, %v4967_v4  ;;  %v5002_v43 = vsel %vm11081_vm7, %v11024_v25, %v4997_v57 }
 0xa16   : > { %v7217_v19 = vpop.eup %7216  ;;  %vm5024_vm3 = vweird.f32 %v10940_v31  ;;  %v5030_v8 = vand.u32 2147483648, %v10940_v31  ;;  %v5028_v14 = vand.u32 2147483647, %v10940_v31  ;;  %7224 = vpow2.f32 %v4336_v45  ;;  %v4055_v45 = vpop.f32.mrf.mxu1 }
 0xa17   : > { %v5470_v53 = vpack.c.bf16 %v10949_v13, %v12375_v56  ;;  %v5471_v51 = vpack.c.bf16 %v10853_v55, %v12376_v9  ;;  %v5017_v41 = vsel %vm11090_vm8, %v5016_v2, %v5012_v18  ;;  %v4987_v25 = vsel %vm11125_vm15, %v4986_v34, %v4982_v16  ;;  %vm11179_vm4 = vmor %vm5024_vm3, %vm5025_vm2  ;;  %v12379_v13 = vld [vmem:[#allocation35_spill] sm:$0xff]  ;;  %v12380_v2 = vld [vmem:[#allocation36_spill] sm:$0xff]  ;;  %v3957_v56 = vpop.f32.mrf.mxu3 }
 0xa18   : > { %v7219_v44 = vpop.eup %7218  ;;  %v5051_v61 = vsub.f32 1.0, %v5050_v39  ;;  %v5065_v31 = vmul.f32 %v11153_v48, %v11067_v42  ;;  %v11188_v33 = vmul.f32 %v4972_v11, %v12379_v13  ;;  %v5027_v55 = vsel %vm11179_vm4, %v11009_v35, %v5023_v5  ;;  %v12382_v35 = vld [vmem:[#allocation38_spill] sm:$0xff] }
 0xa19   : > { %v11185_v50 = vpop.eup %7220  ;;  %7226 = vrcp.f32 %v11160_v60  ;;  %v11194_v29 = vadd.f32 1.0, %v7217_v19  ;;  %5773 = vmatmul.bf16.gmra.mxu3 %v5470_v53  ;;  %5822 = vmatmul.bf16.gmra.mxu0 %v5471_v51  ;;  %v11197_v10 = vmul.f32 %v5002_v43, %v12380_v2  ;;  %v5031_v36 = vor.u32 1.1754944e-38, %v5030_v8 }
 0xa1a   : > { %v7223_v1 = vpop.eup %7222  ;;  %v5060_v15 = vand.u32 2147483648, %v11026_v21  ;;  %v5075_v30 = vand.u32 2147483648, %v11067_v42  ;;  %v11202_v4 = vmul.f32 %v5017_v41, %v12381_v28  ;;  %v11205_v57 = vmul.f32 %v4987_v25, %v12382_v35 }
 0xa1b   : > { %vm5029_vm5 = vcmp.eq.f32.partialorder %v5028_v14, 8.507059e+37  ;;  %v5058_v63 = vand.u32 2147483647, %v11026_v21  ;;  %v5052_v17 = vmul.f32 %v11100_v7, %v5051_v61  ;;  %v5066_v34 = vsub.f32 1.0, %v5065_v31 }
 0xa1c   : > { %v5032_v18 = vsel %vm5029_vm5, %v5031_v36, %v5027_v55  ;;  %v11209_v39 = vadd.f32 1.0, %v7219_v44  ;;  %v7225_v16 = vpop.eup %7224  ;;  %vm5054_vm9 = vweird.f32 %v11026_v21  ;;  %v5035_v5 = vmul.f32 %v11185_v50, %v11095_v12 }
 0xa1d   : > { %7228 = vrcp.f32 %v11194_v29  ;;  %v11215_v19 = vadd.f32 1.0, %v7223_v1  ;;  %v5061_v11 = vor.u32 1.1754944e-38, %v5060_v15  ;;  %vm5069_vm6 = vweird.f32 %v11067_v42  ;;  %v4104_v15 = vpop.f32.mrf.mxu2 }
 0xa1e   : > { %v5073_v43 = vand.u32 2147483647, %v11067_v42  ;;  %v11219_v8 = vor.u32 1.1754944e-38, %v5075_v30  ;;  %v5045_v14 = vand.u32 2147483648, %v11095_v12  ;;  %v11225_v9 = vmul.f32 %v5032_v18, %v10783_v54 }
 0xa1f   : > { %v11222_v53 = vpop.eup %7226  ;;  %vm5055_vm7 = vweird.f32 %v11100_v7  ;;  %vm11228_vm8 = vcmp.eq.f32.partialorder %v5058_v63, 8.507059e+37  ;;  %v5043_v44 = vand.u32 2147483647, %v11095_v12  ;;  %v11233_v41 = vadd.f32 1.0, %v7225_v16 }
 0xa20   : > { %v5053_v25 = vadd.f32 %v11100_v7, %v5052_v17  ;;  %v5067_v47 = vmul.f32 %v11153_v48, %v5066_v34  ;;  %v5090_v61 = vand.u32 2147483648, %v11160_v60  ;;  %7230 = vrcp.f32 %v11209_v39  ;;  %vm11260_vm10 = vmor %vm5054_vm9, %vm5055_vm7  ;;  %v4008_v17 = vpop.f32.mrf.mxu0 }
 0xa21   : > { %v5036_v54 = vsub.f32 1.0, %v5035_v5  ;;  %7232 = vrcp.f32 %v11215_v19  ;;  %v11241_v31 = vadd.f32 %v4006_v46, %v9329_v49  ;;  %v11244_v13 = vadd.f32 %v4055_v45, %v9332_v62  ;;  %v3959_v46 = vpop.f32.mrf.mxu3 }
 0xa22   : > { %v11246_v55 = vor.u32 1.1754944e-38, %v5045_v14  ;;  %v5080_v1 = vmul.f32 %v11222_v53, %v11160_v60  ;;  %v5120_v2 = vand.u32 2147483648, %v11194_v29  ;;  %v11252_v36 = vadd.f32 %v3957_v56, %v9350_v38 }
 0xa23   : > { %12385 = vst [vmem:[#allocation4_spill] sm:$0xff] %v11241_v31  ;;  %v11254_v30 = vpop.eup %7228  ;;  %vm5070_vm11 = vweird.f32 %v11153_v48  ;;  %vm5039_vm12 = vweird.f32 %v11095_v12  ;;  %v5088_v28 = vand.u32 2147483647, %v11160_v60  ;;  %7234 = vrcp.f32 %v11233_v41 }
 0xa24   : > { %12386 = vst [vmem:[#allocation2_spill] sm:$0xff] %v11244_v13  ;;  %v5057_v63 = vsel %vm11260_vm10, %v11100_v7, %v5053_v25  ;;  %v5068_v21 = vadd.f32 %v11153_v48, %v5067_v47  ;;  %vm11273_vm13 = vcmp.eq.f32.partialorder %v5073_v43, 8.507059e+37  ;;  %vm5040_vm14 = vweird.f32 %v11185_v50  ;;  %v4057_v7 = vpop.f32.mrf.mxu1  ;;  %vm11299_vm15 = vmor %vm5069_vm6, %vm5070_vm11 }
 0xa25   : > { %12387 = vst [vmem:[#allocation5_spill] sm:$0xff] %v11252_v36  ;;  %v11278_v18 = vor.u32 1.1754944e-38, %v5090_v61  ;;  %v5037_v34 = vmul.f32 %v11185_v50, %v5036_v54  ;;  %v6449_v16 = vmul.f32 -1.702, %v11241_v31  ;;  %v6450_v5 = vmul.f32 -1.702, %v11244_v13  ;;  %vm11342_vm4 = vmor %vm5039_vm12, %vm5040_vm14 }
 0xa26   : > { %v11284_v14 = vadd.f32 %v4104_v15, %v9355_v22  ;;  %v11286_v56 = vpop.eup %7230  ;;  %v5081_v43 = vsub.f32 1.0, %v5080_v1  ;;  %v5110_v25 = vmul.f32 %v11254_v30, %v11194_v29  ;;  %v11290_v47 = vor.u32 1.1754944e-38, %v5120_v2 }
 0xa27   : > { %v6448_v61 = vmul.f32 -1.702, %v11252_v36  ;;  %v11293_v54 = vpop.eup %7232  ;;  %v4340_v35 = vmul.f32 1.442695, %v6449_v16  ;;  %v4342_v1 = vmul.f32 1.442695, %v6450_v5  ;;  %v11305_v2 = vadd.f32 %v4008_v17, %v9329_v49 }
 0xa28   : > { %v6451_v13 = vmul.f32 -1.702, %v11284_v14  ;;  %v5062_v36 = vsel %vm11228_vm8, %v5061_v11, %v5057_v63  ;;  %v5072_v31 = vsel %vm11299_vm15, %v11153_v48, %v5068_v21  ;;  %vm5085_vm0 = vweird.f32 %v11222_v53 }
 0xa29   : > { %v4338_v42 = vmul.f32 1.442695, %v6448_v61  ;;  %v11314_v37 = vadd.f32 %v4057_v7, %v9332_v62  ;;  %v11316_v16 = vpop.eup %7234  ;;  %v5038_v5 = vadd.f32 %v11185_v50, %v5037_v34  ;;  %vm11319_vm1 = vcmp.eq.f32.partialorder %v5043_v44, 8.507059e+37 }
 0xa2a   : > { %7236 = vpow2.f32 %v4340_v35  ;;  %v6453_v11 = vmul.f32 -1.702, %v11305_v2  ;;  %v11325_v51 = vadd.f32 %v3959_v46, %v9350_v38  ;;  %v5082_v48 = vmul.f32 %v11222_v53, %v5081_v43 }
 0xa2b   : > { %vm5084_vm2 = vweird.f32 %v11160_v60  ;;  %v5111_v63 = vsub.f32 1.0, %v5110_v25  ;;  %v5125_v21 = vmul.f32 %v11286_v56, %v11209_v39  ;;  %v5095_v44 = vmul.f32 %v11293_v54, %v11215_v19 }
 0xa2c   : > { %vm5115_vm3 = vweird.f32 %v11254_v30  ;;  %7238 = vpow2.f32 %v4342_v1  ;;  %v4344_v35 = vmul.f32 1.442695, %v6451_v13  ;;  %v6454_v34 = vmul.f32 -1.702, %v11314_v37  ;;  %vm11385_vm6 = vmor %vm5084_vm2, %vm5085_vm0 }
 0xa2d   : > { %v11336_v7 = vmul.f32 %v5062_v36, %v10899_v59  ;;  %v5140_v25 = vmul.f32 %v11316_v16, %v11233_v41  ;;  %7240 = vpow2.f32 %v4338_v42  ;;  %v4348_v61 = vmul.f32 1.442695, %v6453_v11  ;;  %v12400_v11 = vld [vmem:[#allocation14_spill] sm:$0xff] }
 0xa2e   : > { %v5077_v13 = vsel %vm11273_vm13, %v11219_v8, %v5072_v31  ;;  %v5042_v59 = vsel %vm11342_vm4, %v11185_v50, %v5038_v5  ;;  %vm5114_vm5 = vweird.f32 %v11194_v29  ;;  %v4350_v12 = vmul.f32 1.442695, %v6454_v34 }
 0xa2f   : > { %v6452_v36 = vmul.f32 -1.702, %v11325_v51  ;;  %v5083_v46 = vadd.f32 %v11222_v53, %v5082_v48  ;;  %vm11357_vm9 = vcmp.eq.f32.partialorder %v5088_v28, 8.507059e+37  ;;  %v5112_v1 = vmul.f32 %v11254_v30, %v5111_v63  ;;  %vm11419_vm12 = vmor %vm5114_vm5, %vm5115_vm3 }
 0xa30   : > { %v5126_v42 = vsub.f32 1.0, %v5125_v21  ;;  %v5096_v45 = vsub.f32 1.0, %v5095_v44  ;;  %v7237_v8 = vpop.eup %7236  ;;  %7242 = vpow2.f32 %v4344_v35  ;;  %v5472_v50 = vpack.c.bf16 %v10871_v23, %v12400_v11 }
 0xa31   : > { %v4346_v31 = vmul.f32 1.442695, %v6452_v36  ;;  %v5473_v5 = vpack.c.bf16 %v10963_v0, %v10840_v24  ;;  %v5141_v34 = vsub.f32 1.0, %v5140_v25  ;;  %v11366_v43 = vadd.f32 1.0, %v7237_v8 }
 0xa32   : > { %7244 = vpow2.f32 %v4348_v61  ;;  %v5474_v28 = vpack.c.bf16 %v11205_v57, %v11114_v3  ;;  %v7239_v48 = vpop.eup %7238  ;;  %v5133_v63 = vand.u32 2147483647, %v11209_v39  ;;  %v5135_v21 = vand.u32 2147483648, %v11209_v39  ;;  %5871 = vmatmul.bf16.gmra.mxu1 %v5472_v50 }
 0xa33   : > { %7246 = vpow2.f32 %v4350_v12  ;;  %5920 = vmatmul.bf16.gmra.mxu2 %v5473_v5  ;;  %v5475_v23 = vpack.c.bf16 %v11197_v10, %v10981_v58  ;;  %v7241_v44 = vpop.eup %7240  ;;  %v11375_v24 = vmul.f32 %v5077_v13, %v10902_v32  ;;  %v5047_v0 = vsel %vm11319_vm1, %v11246_v55, %v5042_v59 }
 0xa34   : > { %v5127_v3 = vmul.f32 %v11286_v56, %v5126_v42  ;;  %7248 = vpow2.f32 %v4346_v31  ;;  %5778 = vmatmul.bf16.gmra.mxu3 %v5474_v28  ;;  %v5113_v58 = vadd.f32 %v11254_v30, %v5112_v1  ;;  %vm5129_vm7 = vweird.f32 %v11209_v39  ;;  %v4106_v31 = vpop.f32.mrf.mxu2 }
 0xa35   : > { %v5097_v32 = vmul.f32 %v11293_v54, %v5096_v45  ;;  %7250 = vrcp.f32 %v11366_v43  ;;  %5827 = vmatmul.bf16.gmra.mxu0 %v5475_v23  ;;  %v5087_v10 = vsel %vm11385_vm6, %v11222_v53, %v5083_v46  ;;  %v12403_v55 = vand.u32 2147483647, %v11194_v29 }
 0xa36   : > { %vm5099_vm10 = vweird.f32 %v11215_v19  ;;  %v5142_v17 = vmul.f32 %v11316_v16, %v5141_v34  ;;  %v11404_v35 = vadd.f32 1.0, %v7241_v44  ;;  %v7243_v25 = vpop.eup %7242  ;;  %v11407_v61 = vmul.f32 %v5047_v0, %v10946_v26 }
 0xa37   : > { %vm11398_vm8 = vcmp.eq.f32.partialorder %v12403_v55, 8.507059e+37  ;;  %vm11409_vm11 = vcmp.eq.f32.partialorder %v5133_v63, 8.507059e+37  ;;  %v5136_v53 = vor.u32 1.1754944e-38, %v5135_v21  ;;  %v11413_v59 = vadd.f32 1.0, %v7239_v48 }
 0xa38   : > { %v7245_v12 = vpop.eup %7244  ;;  %v5128_v46 = vadd.f32 %v11286_v56, %v5127_v3  ;;  %vm5130_vm13 = vweird.f32 %v11286_v56  ;;  %v5103_v26 = vand.u32 2147483647, %v11215_v19  ;;  %v5105_v1 = vand.u32 2147483648, %v11215_v19 }
 0xa39   : > { %v7247_v42 = vpop.eup %7246  ;;  %v5092_v45 = vsel %vm11357_vm9, %v11278_v18, %v5087_v10  ;;  %v5117_v29 = vsel %vm11419_vm12, %v11254_v30, %v5113_v58  ;;  %v5098_v8 = vadd.f32 %v11293_v54, %v5097_v32  ;;  %vm5100_vm14 = vweird.f32 %v11293_v54  ;;  %vm11445_vm1 = vmor %vm5129_vm7, %vm5130_vm13 }
 0xa3a   : > { %v7249_v11 = vpop.eup %7248  ;;  %v5143_v50 = vadd.f32 %v11316_v16, %v5142_v17  ;;  %vm5144_vm15 = vweird.f32 %v11233_v41  ;;  %vm5145_vm0 = vweird.f32 %v11316_v16  ;;  %7252 = vrcp.f32 %v11404_v35  ;;  %vm11459_vm2 = vmor %vm5099_vm10, %vm5100_vm14 }
 0xa3b   : > { %v11439_v15 = vpop.eup %7250  ;;  %v5148_v18 = vand.u32 2147483647, %v11233_v41  ;;  %v5150_v5 = vand.u32 2147483648, %v11233_v41  ;;  %7254 = vrcp.f32 %v11413_v59  ;;  %v11452_v34 = vadd.f32 1.0, %v7245_v12  ;;  %vm11477_vm4 = vmor %vm5144_vm15, %vm5145_vm0 }
 0xa3c   : > { %v5132_v28 = vsel %vm11445_vm1, %v11286_v56, %v5128_v46  ;;  %v11463_v48 = vadd.f32 1.0, %v7243_v25  ;;  %v11465_v63 = vadd.f32 1.0, %v7247_v42  ;;  %v11468_v21 = vadd.f32 %v4106_v31, %v9355_v22 }
 0xa3d   : > { %v5102_v23 = vsel %vm11459_vm2, %v11293_v54, %v5098_v8  ;;  %vm5104_vm3 = vcmp.eq.f32.partialorder %v5103_v26, 8.507059e+37  ;;  %v5106_v44 = vor.u32 1.1754944e-38, %v5105_v1  ;;  %7256 = vrcp.f32 %v11452_v34 }
 0xa3e   : > { %v5147_v56 = vsel %vm11477_vm4, %v11316_v16, %v5143_v50  ;;  %v5170_v0 = vmul.f32 %v11439_v15, %v11366_v43  ;;  %7258 = vrcp.f32 %v11465_v63  ;;  %v11488_v54 = vadd.f32 1.0, %v7249_v11 }
 0xa3f   : > { %v11491_v3 = vmul.f32 %v5092_v45, %v10976_v6  ;;  %v5122_v41 = vsel %vm11398_vm8, %v11290_v47, %v5117_v29  ;;  %v5137_v57 = vsel %vm11409_vm11, %v5136_v53, %v5132_v28  ;;  %v5151_v58 = vor.u32 1.1754944e-38, %v5150_v5 }
 0xa40   : > { %v11498_v32 = vpop.eup %7252  ;;  %v5107_v16 = vsel %vm5104_vm3, %v5106_v44, %v5102_v23  ;;  %vm5149_vm5 = vcmp.eq.f32.partialorder %v5148_v18, 8.507059e+37  ;;  %7260 = vrcp.f32 %v11463_v48  ;;  %v6455_v10 = vmul.f32 -1.702, %v11468_v21 }
 0xa41   : > { %v11502_v55 = vpop.eup %7254  ;;  %v5152_v6 = vsel %vm5149_vm5, %v5151_v58, %v5147_v56  ;;  %v5180_v17 = vand.u32 2147483648, %v11366_v43  ;;  %v5476_v47 = vpack.c.bf16 %v11202_v4, %v11022_v52  ;;  %v5477_v60 = vpack.c.bf16 %v11225_v9, %v11188_v33 }
 0xa42   : > { %v11510_v25 = vmul.f32 %v5122_v41, %v11007_v20  ;;  %v11513_v13 = vmul.f32 %v5137_v57, %v11019_v27  ;;  %v5171_v53 = vsub.f32 1.0, %v5170_v0  ;;  %7262 = vrcp.f32 %v11488_v54  ;;  %v12416_v27 = vld [vmem:[#allocation11_spill] sm:$0xff] }
 0xa43   : > { %v11516_v12 = vpop.eup %7256  ;;  %v5438_v36 = vmul.f32 %v5107_v16, %v11031_v40  ;;  %v5178_v46 = vand.u32 2147483647, %v11366_v43  ;;  %v5195_v52 = vand.u32 2147483648, %v11413_v59  ;;  %v5155_v33 = vmul.f32 %v11498_v32, %v11404_v35  ;;  %5876 = vmatmul.bf16.gmra.mxu1 %v5476_v47  ;;  %5925 = vmatmul.bf16.gmra.mxu2 %v5477_v60 }
 0xa44   : > { %v11523_v20 = vpop.eup %7258  ;;  %v11526_v4 = vmul.f32 %v5152_v6, %v12416_v27  ;;  %vm5174_vm9 = vweird.f32 %v11366_v43  ;;  %v5185_v9 = vmul.f32 %v11502_v55, %v11413_v59  ;;  %v5165_v40 = vand.u32 2147483648, %v11404_v35  ;;  %v4011_v27 = vpop.f32.mrf.mxu0 }
 0xa45   : > { %v5230_v26 = vmul.f32 %v11516_v12, %v11452_v34  ;;  %v11534_v1 = vor.u32 1.1754944e-38, %v5180_v17  ;;  %v5193_v42 = vand.u32 2147483647, %v11413_v59  ;;  %v5245_v45 = vmul.f32 %v11523_v20, %v11465_v63 }
 0xa46   : > { %v4352_v29 = vmul.f32 1.442695, %v6455_v10  ;;  %v11539_v8 = vpop.eup %7260  ;;  %v5172_v31 = vmul.f32 %v11439_v15, %v5171_v53  ;;  %v5163_v11 = vand.u32 2147483647, %v11404_v35  ;;  %v5240_v30 = vand.u32 2147483648, %v11452_v34 }
 0xa47   : > { %v5231_v50 = vsub.f32 1.0, %v5230_v26  ;;  %v11544_v18 = vor.u32 1.1754944e-38, %v5195_v52  ;;  %v5156_v5 = vsub.f32 1.0, %v5155_v33  ;;  %v5208_v28 = vand.u32 2147483647, %v11463_v48 }
 0xa48   : > { %v5238_v39 = vand.u32 2147483647, %v11452_v34  ;;  %v11548_v23 = vpop.eup %7262  ;;  %vm5175_vm6 = vweird.f32 %v11439_v15  ;;  %v5186_v44 = vsub.f32 1.0, %v5185_v9  ;;  %v11551_v19 = vor.u32 1.1754944e-38, %v5165_v40 }
 0xa49   : > { %v5246_v56 = vsub.f32 1.0, %v5245_v45  ;;  %vm5159_vm7 = vweird.f32 %v11404_v35  ;;  %v11556_v0 = vmul.f32 %v11539_v8, %v11463_v48  ;;  %v5232_v41 = vmul.f32 %v11516_v12, %v5231_v50  ;;  %vm11583_vm14 = vmor %vm5174_vm9, %vm5175_vm6 }
 0xa4a   : > { %vm5234_vm8 = vweird.f32 %v11452_v34  ;;  %v5215_v57 = vmul.f32 %v11548_v23, %v11488_v54  ;;  %v11563_v58 = vadd.f32 %v11439_v15, %v5172_v31  ;;  %vm5160_vm10 = vweird.f32 %v11498_v32  ;;  %v4060_v31 = vpop.f32.mrf.mxu1 }
 0xa4b   : > { %v5241_v16 = vor.u32 1.1754944e-38, %v5240_v30  ;;  %vm5249_vm11 = vweird.f32 %v11465_v63  ;;  %vm5190_vm12 = vweird.f32 %v11502_v55  ;;  %v5157_v10 = vmul.f32 %v11498_v32, %v5156_v5 }
 0xa4c   : > { %vm11569_vm13 = vcmp.eq.f32.partialorder %v5238_v39, 8.507059e+37  ;;  %v5253_v17 = vand.u32 2147483647, %v11465_v63  ;;  %v5216_v47 = vsub.f32 1.0, %v5215_v57  ;;  %7264 = vpow2.f32 %v4352_v29  ;;  %v4013_v40 = vpop.f32.mrf.mxu0 }
 0xa4d   : > { %v5187_v60 = vmul.f32 %v11502_v55, %v5186_v44  ;;  %v5247_v53 = vmul.f32 %v11523_v20, %v5246_v56  ;;  %v5478_v52 = vpack.c.bf16 %v5438_v36, %v11407_v61  ;;  %v5479_v33 = vpack.c.bf16 %v11510_v25, %v11336_v7  ;;  %v12439_v56 = vld [vmem:[#allocation2_spill] sm:$0xff] }
 0xa4e   : > { %vm11587_vm15 = vcmp.eq.f32.partialorder %v5178_v46, 8.507059e+37  ;;  %vm5189_vm0 = vweird.f32 %v11413_v59  ;;  %v5201_v61 = vsub.f32 1.0, %v11556_v0  ;;  %v5233_v36 = vadd.f32 %v11516_v12, %v5232_v41 }
 0xa4f   : > { %vm5235_vm1 = vweird.f32 %v11516_v12  ;;  %v5217_v7 = vmul.f32 %v11548_v23, %v5216_v47  ;;  %v5177_v43 = vsel %vm11583_vm14, %v11439_v15, %v11563_v58  ;;  %vm11600_vm2 = vcmp.eq.f32.partialorder %v5163_v11, 8.507059e+37  ;;  %5783 = vmatmul.bf16.gmra.mxu3 %v5478_v52  ;;  %5832 = vmatmul.bf16.gmra.mxu0 %v5479_v33  ;;  %vm11650_vm14 = vmor %vm5159_vm7, %vm5160_vm10 }
 0xa50   : > { %v5255_v46 = vand.u32 2147483648, %v11465_v63  ;;  %vm5219_vm3 = vweird.f32 %v11488_v54  ;;  %vm5220_vm4 = vweird.f32 %v11548_v23  ;;  %v5158_v26 = vadd.f32 %v11498_v32, %v5157_v10  ;;  %vm11615_vm5 = vmor %vm5234_vm8, %vm5235_vm1 }
 0xa51   : > { %v5218_v45 = vadd.f32 %v11548_v23, %v5217_v7  ;;  %v5225_v29 = vand.u32 2147483648, %v11488_v54  ;;  %v11611_v15 = vadd.f32 %v4011_v27, %v9329_v49  ;;  %v5248_v50 = vadd.f32 %v11523_v20, %v5247_v53  ;;  %vm11636_vm8 = vmor %vm5219_vm3, %vm5220_vm4  ;;  %v4109_v27 = vpop.f32.mrf.mxu2 }
 0xa52   : > { %vm5250_vm9 = vweird.f32 %v11523_v20  ;;  %v5223_v30 = vand.u32 2147483647, %v11488_v54  ;;  %v11623_v5 = vadd.f32 %v4060_v31, %v9332_v62  ;;  %v7265_v39 = vpop.eup %7264  ;;  %vm11625_vm6 = vcmp.eq.f32.partialorder %v5193_v42, 8.507059e+37 }
 0xa53   : > { %v5237_v34 = vsel %vm11615_vm5, %v11516_v12, %v5233_v36  ;;  %v5480_v0 = vpack.c.bf16 %v11513_v13, %v11375_v24  ;;  %v5481_v42 = vpack.c.bf16 %v11526_v4, %v11491_v3  ;;  %v6457_v41 = vmul.f32 -1.702, %v11611_v15  ;;  %v3962_v13 = vpop.f32.mrf.mxu3  ;;  %vm11667_vm7 = vmor %vm5249_vm11, %vm5250_vm9 }
 0xa54   : > { %v5188_v57 = vadd.f32 %v11502_v55, %v5187_v60  ;;  %v5222_v12 = vsel %vm11636_vm8, %v11548_v23, %v5218_v45  ;;  %v11657_v24 = vadd.f32 1.0, %v7265_v39  ;;  %v6458_v3 = vmul.f32 -1.702, %v11623_v5  ;;  %v4062_v45 = vpop.f32.mrf.mxu1 }
 0xa55   : > { %v5162_v4 = vsel %vm11650_vm14, %v11498_v32, %v5158_v26  ;;  %v5226_v58 = vor.u32 1.1754944e-38, %v5225_v29  ;;  %5881 = vmatmul.bf16.gmra.mxu1 %v5480_v0  ;;  %5930 = vmatmul.bf16.gmra.mxu2 %v5481_v42  ;;  %v4356_v23 = vmul.f32 1.442695, %v6457_v41  ;;  %v11672_v10 = vadd.f32 %v3962_v13, %v9350_v38 }
 0xa56   : > { %vm5204_vm10 = vweird.f32 %v11463_v48  ;;  %v5242_v32 = vsel %vm11569_vm13, %v5241_v16, %v5237_v34  ;;  %v5252_v47 = vsel %vm11667_vm7, %v11523_v20, %v5248_v50  ;;  %vm5224_vm11 = vcmp.eq.f32.partialorder %v5223_v30, 8.507059e+37  ;;  %vm11689_vm13 = vmor %vm5189_vm0, %vm5190_vm12 }
 0xa57   : > { %7266 = vrcp.f32 %v11657_v24  ;;  %v5227_v60 = vsel %vm5224_vm11, %v5226_v58, %v5222_v12  ;;  %v4358_v53 = vmul.f32 1.442695, %v6458_v3  ;;  %v6456_v52 = vmul.f32 -1.702, %v11672_v10 }
 0xa58   : > { %7268 = vpow2.f32 %v4356_v23  ;;  %v5182_v33 = vsel %vm11587_vm15, %v11534_v1, %v5177_v43  ;;  %v5202_v20 = vmul.f32 %v11539_v8, %v5201_v61  ;;  %vm5254_vm1 = vcmp.eq.f32.partialorder %v5253_v17, 8.507059e+37  ;;  %v12437_v17 = vld [vmem:[#allocation4_spill] sm:$0xff] }
 0xa59   : > { %v5256_v6 = vor.u32 1.1754944e-38, %v5255_v46  ;;  %v5192_v9 = vsel %vm11689_vm13, %v11502_v55, %v5188_v57  ;;  %v5167_v1 = vsel %vm11600_vm2, %v11551_v19, %v5162_v4  ;;  %7270 = vpow2.f32 %v4358_v53  ;;  %v12438_v46 = vld [vmem:[#allocation5_spill] sm:$0xff] }
 0xa5a   : > { %v4354_v59 = vmul.f32 1.442695, %v6456_v52  ;;  %v5447_v36 = vmul.f32 %v5242_v32, %v11305_v2  ;;  %v5446_v61 = vmul.f32 %v5227_v60, %v11325_v51  ;;  %v11705_v63 = vadd.f32 %v4013_v40, %v9329_v49 }
 0xa5b   : > { %v5257_v7 = vsel %vm5254_vm1, %v5256_v6, %v5252_v47  ;;  %v5443_v43 = vmul.f32 %v5182_v33, %v12437_v17  ;;  %vm5205_vm12 = vweird.f32 %v11539_v8  ;;  %v5210_v55 = vand.u32 2147483648, %v11463_v48  ;;  %v3964_v33 = vpop.f32.mrf.mxu3 }
 0xa5c   : > { %v11711_v25 = vadd.f32 %v4109_v27, %v9355_v22  ;;  %v5197_v2 = vsel %vm11625_vm6, %v11544_v18, %v5192_v9  ;;  %v5442_v26 = vmul.f32 %v5167_v1, %v12438_v46  ;;  %v5203_v51 = vadd.f32 %v11539_v8, %v5202_v20  ;;  %vm11731_vm15 = vmor %vm5204_vm10, %vm5205_vm12 }
 0xa5d   : > { %v7267_v19 = vpop.eup %7266  ;;  %v6461_v49 = vmul.f32 -1.702, %v11705_v63  ;;  %v5448_v31 = vmul.f32 %v5257_v7, %v11314_v37  ;;  %7272 = vpow2.f32 %v4354_v59  ;;  %v11722_v50 = vadd.f32 %v4062_v45, %v9332_v62 }
 0xa5e   : > { %v7269_v29 = vpop.eup %7268  ;;  %v5260_v11 = vmul.f32 %v7267_v19, %v11657_v24  ;;  %v5482_v30 = vpack.c.bf16 %v5446_v61, %v5442_v26  ;;  %v5483_v39 = vpack.c.bf16 %v5447_v36, %v5443_v43  ;;  %v5444_v0 = vmul.f32 %v5197_v2, %v12439_v56 }
 0xa5f   : > { %v11724_v44 = vadd.f32 1.0, %v7269_v29  ;;  %v4364_v18 = vmul.f32 1.442695, %v6461_v49  ;;  %v7271_v34 = vpop.eup %7270  ;;  %v6459_v62 = vmul.f32 -1.702, %v11711_v25  ;;  %v5207_v57 = vsel %vm11731_vm15, %v11539_v8, %v5203_v51 }
 0xa60   : > { %v5261_v42 = vsub.f32 1.0, %v5260_v11  ;;  %v6462_v41 = vmul.f32 -1.702, %v11722_v50  ;;  %v5268_v54 = vand.u32 2147483647, %v11657_v24  ;;  %v5270_v12 = vand.u32 2147483648, %v11657_v24  ;;  %5788 = vmatmul.bf16.gmra.mxu3 %v5482_v30  ;;  %5837 = vmatmul.bf16.gmra.mxu0 %v5483_v39 }
 0xa61   : > { %7274 = vrcp.f32 %v11724_v44  ;;  %vm5265_vm0 = vweird.f32 %v7267_v19  ;;  %v11743_v13 = vadd.f32 1.0, %v7271_v34  ;;  %vm5209_vm2 = vcmp.eq.f32.partialorder %v5208_v28, 8.507059e+37 }
 0xa62   : > { %v5262_v3 = vmul.f32 %v7267_v19, %v5261_v42  ;;  %7276 = vpow2.f32 %v4364_v18  ;;  %v5211_v4 = vor.u32 1.1754944e-38, %v5210_v55  ;;  %v5484_v35 = vpack.c.bf16 %v5448_v31, %v5444_v0 }
 0xa63   : > { %v4366_v58 = vmul.f32 1.442695, %v6462_v41  ;;  %v7273_v8 = vpop.eup %7272  ;;  %vm5264_vm3 = vweird.f32 %v11657_v24  ;;  %7278 = vrcp.f32 %v11743_v13  ;;  %v4360_v32 = vmul.f32 1.442695, %v6459_v62 }
 0xa64   : > { %v5263_v23 = vadd.f32 %v7267_v19, %v5262_v3  ;;  %v5212_v47 = vsel %vm5209_vm2, %v5211_v4, %v5207_v57  ;;  %vm5266_vm4 = vmor %vm5264_vm3, %vm5265_vm0  ;;  %v5271_v60 = vor.u32 1.1754944e-38, %v5270_v12  ;;  %vm5269_vm5 = vcmp.eq.f32.partialorder %v5268_v54, 8.507059e+37  ;;  %v5808_v57 = vpop.f32.mrf.mxu0  ;;  %v5857_v54 = vpop.f32.mrf.mxu1 }
 0xa65   : > { %5886 = vmatmul.bf16.gmra.mxu1 %v5484_v35  ;;  %v11751_v28 = vadd.f32 1.0, %v7273_v8  ;;  %7280 = vpow2.f32 %v4366_v58  ;;  %v5445_v20 = vmul.f32 %v5212_v47, %v11284_v14  ;;  %v11762_v59 = vadd.f32 %v3964_v33, %v9350_v38 }
 0xa66   : > { %v5267_v53 = vsel %vm5266_vm4, %v7267_v19, %v5263_v23  ;;  %7282 = vpow2.f32 %v4360_v32  ;;  %v5298_v38 = vand.u32 2147483647, %v11724_v44  ;;  %v5300_v55 = vand.u32 2147483648, %v11724_v44  ;;  %v4111_v19 = vpop.f32.mrf.mxu2 }
 0xa67   : > { %v11749_v52 = vpop.eup %7274  ;;  %v5272_v48 = vsel %vm5269_vm5, %v5271_v60, %v5267_v53  ;;  %7284 = vrcp.f32 %v11751_v28  ;;  %v6460_v61 = vmul.f32 -1.702, %v11762_v59  ;;  %vm5294_vm9 = vweird.f32 %v11724_v44 }
 0xa68   : > { %v7277_v16 = vpop.eup %7276  ;;  %v5449_v24 = vmul.f32 %v5272_v48, %v11468_v21  ;;  %v5290_v6 = vmul.f32 %v11749_v52, %v11724_v44  ;;  %v5313_v51 = vand.u32 2147483647, %v11743_v13  ;;  %v5315_v49 = vand.u32 2147483648, %v11743_v13  ;;  %v11813_v44 = vld [vmem:[%s11976_s12] ss:$0 sm:$0xff]  ;;  %v5759_v58 = vpop.f32.mrf.mxu3 }
 0xa69   : > { %v11757_v27 = vpop.eup %7278  ;;  %v11759_v1 = vadd.f32 1.0, %v7277_v16  ;;  %v4362_v45 = vmul.f32 1.442695, %v6460_v61  ;;  %vm5295_vm6 = vweird.f32 %v11749_v52  ;;  %vm11786_vm8 = vcmp.eq.f32.partialorder %v5298_v38, 8.507059e+37 }
 0xa6a   : > { %v5485_v9 = vpack.c.bf16 %v5449_v24, %v5445_v20  ;;  %v5291_v40 = vsub.f32 1.0, %v5290_v6  ;;  %v5305_v36 = vmul.f32 %v11757_v27, %v11743_v13  ;;  %v5301_v39 = vor.u32 1.1754944e-38, %v5300_v55  ;;  %vm11798_vm7 = vmor %vm5294_vm9, %vm5295_vm6 }
 0xa6b   : > { %7286 = vrcp.f32 %v11759_v1  ;;  %v7281_v14 = vpop.eup %7280  ;;  %vm5309_vm14 = vweird.f32 %v11743_v13  ;;  %v5358_v56 = vand.u32 2147483647, %v11759_v1  ;;  %v5360_v0 = vand.u32 2147483648, %v11759_v1 }
 0xa6c   : > { %5935 = vmatmul.bf16.gmra.mxu2 %v5485_v9  ;;  %v7283_v21 = vpop.eup %7282  ;;  %v11768_v7 = vadd.f32 1.0, %v7281_v14  ;;  %v5292_v17 = vmul.f32 %v11749_v52, %v5291_v40  ;;  %v5306_v43 = vsub.f32 1.0, %v5305_v36  ;;  %vm5310_vm10 = vweird.f32 %v11757_v27 }
 0xa6d   : > { %v11774_v2 = vpop.eup %7284  ;;  %v11776_v46 = vadd.f32 1.0, %v7283_v21  ;;  %vm11803_vm11 = vcmp.eq.f32.partialorder %v5313_v51, 8.507059e+37  ;;  %v5316_v62 = vor.u32 1.1754944e-38, %v5315_v49  ;;  %v11808_v41 = vadd.f32 %v4111_v19, %v9355_v22  ;;  %vm11826_vm12 = vmor %vm5309_vm14, %vm5310_vm10  ;;  %v5810_v19 = vpop.f32.mrf.mxu0 }
 0xa6e   : > { %7288 = vrcp.f32 %v11768_v7  ;;  %v5293_v29 = vadd.f32 %v11749_v52, %v5292_v17  ;;  %v5307_v31 = vmul.f32 %v11757_v27, %v5306_v43  ;;  %v5275_v18 = vmul.f32 %v11774_v2, %v11751_v28  ;;  %v5906_v32 = vpop.f32.mrf.mxu2 }
 0xa6f   : > { %7290 = vrcp.f32 %v11776_v46  ;;  %vm5354_vm1 = vweird.f32 %v11759_v1  ;;  %v6463_v23 = vmul.f32 -1.702, %v11808_v41  ;;  %vm5359_vm15 = vcmp.eq.f32.partialorder %v5358_v56, 8.507059e+37 }
 0xa70   : > { %7292 = vpow2.f32 %v4362_v45  ;;  %v5297_v3 = vsel %vm11798_vm7, %v11749_v52, %v5293_v29  ;;  %v5308_v4 = vadd.f32 %v11757_v27, %v5307_v31  ;;  %v5276_v8 = vsub.f32 1.0, %v5275_v18  ;;  %v5761_v29 = vpop.f32.mrf.mxu3 }
 0xa71   : > { %v7287_v26 = vpop.eup %7286  ;;  %v5361_v53 = vor.u32 1.1754944e-38, %v5360_v0  ;;  %v5760_v52 = vadd.f32 %v11813_v44, %v5759_v58  ;;  %v5302_v48 = vsel %vm11786_vm8, %v5301_v39, %v5297_v3  ;;  %v5373_v16 = vand.u32 2147483647, %v11768_v7 }
 0xa72   : > { %v5350_v11 = vmul.f32 %v7287_v26, %v11759_v1  ;;  %vm5355_vm13 = vweird.f32 %v7287_v26  ;;  %v4368_v20 = vmul.f32 1.442695, %v6463_v23  ;;  %v5312_v13 = vsel %vm11826_vm12, %v11757_v27, %v5308_v4 }
 0xa73   : > { %vm5356_vm0 = vmor %vm5354_vm1, %vm5355_vm13  ;;  %v5375_v9 = vand.u32 2147483648, %v11768_v7  ;;  %v5809_v1 = vadd.f32 %v5808_v57, %v5760_v52  ;;  %v5277_v21 = vmul.f32 %v11774_v2, %v5276_v8  ;;  %v5451_v38 = vmul.f32 %v5302_v48, %v11611_v15 }
 0xa74   : > { %v5351_v34 = vsub.f32 1.0, %v5350_v11  ;;  %v7289_v12 = vpop.eup %7288  ;;  %7294 = vpow2.f32 %v4368_v20  ;;  %vm5369_vm3 = vweird.f32 %v11768_v7  ;;  %v5317_v51 = vsel %vm11803_vm11, %v5316_v62, %v5312_v13 }
 0xa75   : > { %v5365_v22 = vmul.f32 %v7289_v12, %v11768_v7  ;;  %v11834_v24 = vpop.eup %7290  ;;  %vm5370_vm2 = vweird.f32 %v7289_v12  ;;  %v5858_v43 = vadd.f32 %v5857_v54, %v5809_v1  ;;  %v5376_v49 = vor.u32 1.1754944e-38, %v5375_v9 }
 0xa76   : > { %v5352_v35 = vmul.f32 %v7287_v26, %v5351_v34  ;;  %v7293_v40 = vpop.eup %7292  ;;  %v5320_v27 = vmul.f32 %v11834_v24, %v11776_v46  ;;  %vm5371_vm4 = vmor %vm5369_vm3, %vm5370_vm2  ;;  %vm5374_vm5 = vcmp.eq.f32.partialorder %v5373_v16, 8.507059e+37  ;;  %v5762_v15 = vadd.f32 %v11813_v44, %v5761_v29  ;;  %v5908_v11 = vpop.f32.mrf.mxu2 }
 0xa77   : > { %v5366_v33 = vsub.f32 1.0, %v5365_v22  ;;  %v11842_v17 = vadd.f32 1.0, %v7293_v40  ;;  %vm5280_vm9 = vweird.f32 %v11774_v2  ;;  %v5285_v7 = vand.u32 2147483648, %v11751_v28 }
 0xa78   : > { %v5353_v60 = vadd.f32 %v7287_v26, %v5352_v35  ;;  %v5907_v18 = vadd.f32 %v5906_v32, %v5858_v43  ;;  %v5452_v56 = vmul.f32 %v5317_v51, %v11623_v5  ;;  %v5278_v0 = vadd.f32 %v11774_v2, %v5277_v21  ;;  %v5813_v32 = vpop.f32.mrf.mxu0 }
 0xa79   : > { %v5367_v14 = vmul.f32 %v7289_v12, %v5366_v33  ;;  %7296 = vrcp.f32 %v11842_v17  ;;  %v5811_v42 = vadd.f32 %v5810_v19, %v5762_v15  ;;  %v5321_v62 = vsub.f32 1.0, %v5320_v27  ;;  %v5764_v52 = vpop.f32.mrf.mxu3  ;;  %v12454_v33 = vld [vmem:[#allocation28_spill] sm:$0xff] }
 0xa7a   : > { %v5357_v6 = vsel %vm5356_vm0, %v7287_v26, %v5353_v60  ;;  %v5859_v26 = vpop.f32.mrf.mxu1  ;;  %v7295_v34 = vpop.eup %7294  ;;  %vm5279_vm8 = vweird.f32 %v11751_v28  ;;  %v5283_v54 = vand.u32 2147483647, %v11751_v28  ;;  %v7312_v28 = vmov 0.0  }
 0xa7b   : > { %v5362_v36 = vsel %vm5359_vm15, %v5361_v53, %v5357_v6  ;;  %v5368_v55 = vadd.f32 %v7289_v12, %v5367_v14  ;;  %v11858_v57 = vadd.f32 1.0, %v7295_v34  ;;  %vm11864_vm14 = vmor %vm5279_vm8, %vm5280_vm9  ;;  %v5286_v60 = vor.u32 1.1754944e-38, %v5285_v7 }
 0xa7c   : > { %v5455_v61 = vmul.f32 %v5362_v36, %v11705_v63  ;;  %v12450_v63 = vlaneseq  ;;  %v5282_v58 = vsel %vm11864_vm14, %v11774_v2, %v5278_v0  ;;  %v5322_v53 = vmul.f32 %v11834_v24, %v5321_v62 }
 0xa7d   : > { %v5372_v31 = vsel %vm5371_vm4, %v7289_v12, %v5368_v55  ;;  %v5860_v12 = vadd.f32 %v5859_v26, %v5811_v42  ;;  %7298 = vrcp.f32 %v11858_v57  ;;  %vm5284_vm7 = vcmp.eq.f32.partialorder %v5283_v54, 8.507059e+37 }
 0xa7e   : > { %v5963_v45 = vshrl.u32 %v12450_v63, 7  ;;  %v5487_v30 = vpack.c.bf16 %v5455_v61, %v5451_v38  ;;  %v5377_v39 = vsel %vm5374_vm5, %v5376_v49, %v5372_v31  ;;  %v5765_v2 = vadd.f32 %v11813_v44, %v5764_v52  ;;  %v5911_v20 = vpop.f32.mrf.mxu2 }
 0xa7f   : > { %v5456_v37 = vmul.f32 %v5377_v39, %v11722_v50  ;;  %v7297_v4 = vpop.eup %7296  ;;  %v12453_v50 = vld [vmem:[#allocation20_spill] sm:$0xff]  ;;  %v5909_v23 = vadd.f32 %v5908_v11, %v5860_v12  ;;  %v5287_v13 = vsel %vm5284_vm7, %v5286_v60, %v5282_v58  ;;  %v5343_v6 = vand.u32 2147483647, %v11842_v17 }
 0xa80   : > { %5842 = vmatmul.bf16.gmra.mxu0 %v5487_v30  ;;  %vm5964_vm6 = vcmp.lt.s32.totalorder %v5963_v45, 5  ;;  %v5946_v35 = vadd.f32 %v5907_v18, %v12453_v50  ;;  %v5335_v8 = vmul.f32 %v7297_v4, %v11842_v17  ;;  %v5345_v9 = vand.u32 2147483648, %v11842_v17  ;;  %v5815_v29 = vpop.f32.mrf.mxu0  ;;  %v12457_v50 = vld [vmem:[#allocation24_spill] sm:$0xff] }
 0xa81   : > { %v5488_v3 = vpack.c.bf16 %v5456_v37, %v5452_v56  ;;  %v11874_v22 = vsel %vm5964_vm6, 1.0, %v7312_v28  ;;  %v5947_v16 = vadd.f32 %v5909_v23, %v12454_v33  ;;  %vm5340_vm10 = vweird.f32 %v7297_v4  ;;  %v5766_v30 = vpop.f32.mrf.mxu3  ;;  %v12458_v28 = vld [vmem:[#allocation34_spill] sm:$0xff] }
 0xa82   : > { %v5862_v47 = vpop.f32.mrf.mxu1  ;;  %v5336_v48 = vsub.f32 1.0, %v5335_v8  ;;  %v5967_v1 = vmul.f32 %v11874_v22, %v5946_v35  ;;  %v5814_v14 = vadd.f32 %v5813_v32, %v5765_v2  ;;  %v5323_v61 = vadd.f32 %v11834_v24, %v5322_v53 }
 0xa83   : > { %5891 = vmatmul.bf16.gmra.mxu1 %v5488_v3  ;;  %v5968_v36 = vmul.f32 %v11874_v22, %v5947_v16  ;;  %v7299_v21 = vpop.eup %7298  ;;  %vm5324_vm11 = vweird.f32 %v11776_v46  ;;  %vm5325_vm13 = vweird.f32 %v11834_v24  ;;  %vm5339_vm1 = vweird.f32 %v11842_v17 }
 0xa84   : > { %v5337_v40 = vmul.f32 %v7297_v4, %v5336_v48  ;;  %v5380_v38 = vmul.f32 %v7299_v21, %v11858_v57  ;;  %v5450_v55 = vmul.f32 %v5287_v13, %v11672_v10  ;;  %v5328_v19 = vand.u32 2147483647, %v11776_v46  ;;  %vm5341_vm12 = vmor %vm5339_vm1, %vm5340_vm10 }
 0xa85   : > { %v6726_v27 = vpack.c.bf16 %v5968_v36, %v5967_v1  ;;  %v5330_v26 = vand.u32 2147483648, %v11776_v46  ;;  %v5346_v51 = vor.u32 1.1754944e-38, %v5345_v9  ;;  %vm11899_vm15 = vmor %vm5324_vm11, %vm5325_vm13  ;;  %vm5344_vm0 = vcmp.eq.f32.partialorder %v5343_v6, 8.507059e+37  ;;  %v12459_v36 = vld [vmem:[#allocation19_spill] sm:$0xff] }
 0xa86   : > { %v5338_v43 = vadd.f32 %v7297_v4, %v5337_v40  ;;  %v5381_v45 = vsub.f32 1.0, %v5380_v38  ;;  %v5863_v17 = vadd.f32 %v5862_v47, %v5814_v14  ;;  %v5327_v10 = vsel %vm11899_vm15, %v11834_v24, %v5323_v61  ;;  %v5913_v56 = vpop.f32.mrf.mxu2 }
 0xa87   : > { %6727 = vst [vmem:[%s11888_s30] sm:$0xff] %v6726_v27   ;;  %v5388_v46 = vand.u32 2147483647, %v11858_v57  ;;  %v5390_v15 = vand.u32 2147483648, %v11858_v57  ;;  %vm5385_vm2 = vweird.f32 %v7299_v21  ;;  %v5767_v18 = vadd.f32 %v11813_v44, %v5766_v30 }
 0xa88   : > { %v5342_v63 = vsel %vm5341_vm12, %v7297_v4, %v5338_v43  ;;  %v5382_v39 = vmul.f32 %v7299_v21, %v5381_v45  ;;  %vm5329_vm3 = vcmp.eq.f32.partialorder %v5328_v19, 8.507059e+37  ;;  %v5331_v34 = vor.u32 1.1754944e-38, %v5330_v26  ;;  %v5818_v58 = vpop.f32.mrf.mxu0  ;;  %v12460_v43 = vld [vmem:[#allocation32_spill] sm:$0xff] }
 0xa89   : > { %v5347_v31 = vsel %vm5344_vm0, %v5346_v51, %v5342_v63  ;;  %vm5384_vm4 = vweird.f32 %v11858_v57  ;;  %v5912_v24 = vadd.f32 %v5911_v20, %v5863_v17  ;;  %v5816_v37 = vadd.f32 %v5815_v29, %v5767_v18 }
 0xa8a   : > { %v5864_v11 = vpop.f32.mrf.mxu1  ;;  %v5454_v7 = vmul.f32 %v5347_v31, %v11762_v59  ;;  %v5383_v0 = vadd.f32 %v7299_v21, %v5382_v39  ;;  %v5332_v62 = vsel %vm5329_vm3, %v5331_v34, %v5327_v10  ;;  %vm5386_vm5 = vmor %vm5384_vm4, %vm5385_vm2  ;;  %v5391_v54 = vor.u32 1.1754944e-38, %v5390_v15  ;;  %v12461_v34 = vld [vmem:[#allocation27_spill] sm:$0xff] }
 0xa8b   : > { %vm5389_vm9 = vcmp.eq.f32.partialorder %v5388_v46, 8.507059e+37  ;;  %v5865_v3 = vadd.f32 %v5864_v11, %v5816_v37  ;;  %v5453_v4 = vmul.f32 %v5332_v62, %v11711_v25  ;;  %v5948_v57 = vadd.f32 %v5912_v24, %v12457_v50  ;;  %v5769_v8 = vpop.f32.mrf.mxu3  ;;  %v12462_v62 = vld [vmem:[#allocation26_spill] sm:$0xff] }
 0xa8c   : > { %v5486_v42 = vpack.c.bf16 %v5454_v7, %v5450_v55  ;;  %v5387_v12 = vsel %vm5386_vm5, %v7299_v21, %v5383_v0  ;;  %v5770_v47 = vadd.f32 %v11813_v44, %v5769_v8 }
 0xa8d   : > { %v5392_v59 = vsel %vm5389_vm9, %v5391_v54, %v5387_v12  ;;  %v5914_v35 = vadd.f32 %v5913_v56, %v5865_v3  ;;  %v5969_v53 = vmul.f32 %v11874_v22, %v5948_v57 }
 0xa8e   : > { %5793 = vmatmul.bf16.gmra.mxu3 %v5486_v42  ;;  %v5457_v5 = vmul.f32 %v5392_v59, %v11808_v41  ;;  %v5819_v25 = vadd.f32 %v5818_v58, %v5770_v47  ;;  %v5916_v48 = vpop.f32.mrf.mxu2 }
 0xa8f   : > { %v5949_v23 = vadd.f32 %v5914_v35, %v12458_v28 }
 0xa90   : > { %v5489_v32 = vpack.c.bf16 %v5457_v5, %v5453_v4  ;;  %v5820_v16 = vpop.f32.mrf.mxu0 }
 0xa91   : > { %v5970_v52 = vmul.f32 %v11874_v22, %v5949_v23 }
 0xa92   : > { %v5867_v60 = vpop.f32.mrf.mxu1  ;;  %5940 = vmatmul.bf16.gmra.mxu2 %v5489_v32 }
 0xa93   : > { %v6731_v33 = vpack.c.bf16 %v5970_v52, %v5969_v53  ;;  %v5868_v41 = vadd.f32 %v5867_v60, %v5819_v25  ;;  %v5771_v2 = vpop.f32.mrf.mxu3  ;;  %v12463_v60 = vld [vmem:[#allocation21_spill] sm:$0xff]  ;;  %v12464_v25 = vld [vmem:[#allocation22_spill] sm:$0xff] }
 0xa94   : > { %v5772_v20 = vadd.f32 %v11813_v44, %v5771_v2 }
 0xa95   : > { %6770 = vst [vmem:[%s11888_s30 + $0x8] sm:$0xff] %v6731_v33   ;;  %v5917_v13 = vadd.f32 %v5916_v48, %v5868_v41 }
 0xa96   : > { %v5821_v6 = vadd.f32 %v5820_v16, %v5772_v20  ;;  %v5918_v40 = vpop.f32.mrf.mxu2 }
 0xa97   : > { %v5950_v14 = vadd.f32 %v5917_v13, %v12459_v36 }
 0xa98   : > { %v5823_v27 = vpop.f32.mrf.mxu0 }
 0xa99   : > { %v5971_v55 = vmul.f32 %v11874_v22, %v5950_v14 }
 0xa9a   : > { %v5869_v9 = vpop.f32.mrf.mxu1 }
 0xa9b   : > { %v5870_v1 = vadd.f32 %v5869_v9, %v5821_v6 }
 0xa9c   : > { %v5774_v61 = vpop.f32.mrf.mxu3 }
 0xa9d   : > { %v5919_v21 = vadd.f32 %v5918_v40, %v5870_v1  ;;  %v5775_v49 = vadd.f32 %v11813_v44, %v5774_v61 }
 0xa9f   : > { %v5951_v38 = vadd.f32 %v5919_v21, %v12460_v43  ;;  %v5824_v17 = vadd.f32 %v5823_v27, %v5775_v49  ;;  %v12466_v49 = vld [vmem:[#allocation30_spill] sm:$0xff] }
 0xaa0   : > { %v5825_v45 = vpop.f32.mrf.mxu0 }
 0xaa1   : > { %v5972_v19 = vmul.f32 %v11874_v22, %v5951_v38 }
 0xaa3   : > { %v6736_v26 = vpack.c.bf16 %v5972_v19, %v5971_v55  ;;  %v12465_v55 = vld [vmem:[#allocation31_spill] sm:$0xff] }
 0xaa4   : > { %v5776_v51 = vpop.f32.mrf.mxu3 }
 0xaa5   : > { %6771 = vst [vmem:[%s11888_s30 + $0x10] sm:$0xff] %v6736_v26   ;;  %v5777_v29 = vadd.f32 %v11813_v44, %v5776_v51 }
 0xaa7   : > { %v5826_v46 = vadd.f32 %v5825_v45, %v5777_v29 }
 0xaaf   : > { %v5872_v63 = vpop.f32.mrf.mxu1 }
 0xab0   : > { %v5873_v31 = vadd.f32 %v5872_v63, %v5824_v17 }
 0xab2   : > { %v5828_v30 = vpop.f32.mrf.mxu0 }
 0xab6   : > { %v5921_v10 = vpop.f32.mrf.mxu2 }
 0xab7   : > { %v5779_v15 = vpop.f32.mrf.mxu3  ;;  %v5874_v11 = vpop.f32.mrf.mxu1  ;;  %v5922_v7 = vadd.f32 %v5921_v10, %v5873_v31 }
 0xab8   : > { %v5875_v39 = vadd.f32 %v5874_v11, %v5826_v46  ;;  %v5780_v24 = vadd.f32 %v11813_v44, %v5779_v15 }
 0xab9   : > { %v5952_v56 = vadd.f32 %v5922_v7, %v12461_v34 }
 0xaba   : > { %v5829_v59 = vadd.f32 %v5828_v30, %v5780_v24  ;;  %v5830_v5 = vpop.f32.mrf.mxu0 }
 0xabb   : > { %v5973_v12 = vmul.f32 %v11874_v22, %v5952_v56 }
 0xabe   : > { %v5923_v18 = vpop.f32.mrf.mxu2 }
 0xabf   : > { %v5924_v0 = vadd.f32 %v5923_v18, %v5875_v39  ;;  %v5781_v42 = vpop.f32.mrf.mxu3 }
 0xac0   : > { %v5877_v37 = vpop.f32.mrf.mxu1  ;;  %v5782_v4 = vadd.f32 %v11813_v44, %v5781_v42  ;;  %v12467_v42 = vld [vmem:[#allocation23_spill] sm:$0xff] }
 0xac1   : > { %v5953_v54 = vadd.f32 %v5924_v0, %v12462_v62  ;;  %v5878_v35 = vadd.f32 %v5877_v37, %v5829_v59 }
 0xac2   : > { %v5831_v58 = vadd.f32 %v5830_v5, %v5782_v4 }
 0xac3   : > { %v5974_v3 = vmul.f32 %v11874_v22, %v5953_v54 }
 0xac5   : > { %v6741_v50 = vpack.c.bf16 %v5974_v3, %v5973_v12  ;;  %v12468_v12 = vld [vmem:[#allocation29_spill] sm:$0xff] }
 0xac6   : > { %v5926_v57 = vpop.f32.mrf.mxu2 }
 0xac7   : > { %6772 = vst [vmem:[%s11888_s30 + $0x18] sm:$0xff] %v6741_v50   ;;  %v5927_v28 = vadd.f32 %v5926_v57, %v5878_v35 }
 0xac8   : > { %v5879_v8 = vpop.f32.mrf.mxu1 }
 0xac9   : > { %v5880_v23 = vadd.f32 %v5879_v8, %v5831_v58  ;;  %v5954_v53 = vadd.f32 %v5927_v28, %v12463_v60 }
 0xacb   : > { %v5975_v2 = vmul.f32 %v11874_v22, %v5954_v53 }
 0xacc   : > { %v5833_v47 = vpop.f32.mrf.mxu0 }
 0xace   : > { %v5928_v32 = vpop.f32.mrf.mxu2 }
 0xacf   : > { %v5929_v52 = vadd.f32 %v5928_v32, %v5880_v23 }
 0xad1   : > { %v5955_v48 = vadd.f32 %v5929_v52, %v12464_v25 }
 0xad2   : > { %v5784_v33 = vpop.f32.mrf.mxu3  ;;  %v5882_v41 = vpop.f32.mrf.mxu1 }
 0xad3   : > { %v5785_v16 = vadd.f32 %v11813_v44, %v5784_v33  ;;  %v5976_v20 = vmul.f32 %v11874_v22, %v5955_v48 }
 0xad4   : > { %v5835_v40 = vpop.f32.mrf.mxu0 }
 0xad5   : > { %v5834_v13 = vadd.f32 %v5833_v47, %v5785_v16  ;;  %v6746_v6 = vpack.c.bf16 %v5976_v20, %v5975_v2  ;;  %v12470_v20 = vld [vmem:[#allocation33_spill] sm:$0xff] }
 0xad7   : > { %6773 = vst [vmem:[%s11888_s30 + $0x20] sm:$0xff] %v6746_v6   ;;  %v5883_v1 = vadd.f32 %v5882_v41, %v5834_v13  ;;  %v12469_v41 = vld [vmem:[#allocation25_spill] sm:$0xff] }
 0xad8   : > { %v5931_v9 = vpop.f32.mrf.mxu2 }
 0xad9   : > { %v5932_v21 = vadd.f32 %v5931_v9, %v5883_v1 }
 0xada   : > { %v5786_v36 = vpop.f32.mrf.mxu3  ;;  %v5884_v61 = vpop.f32.mrf.mxu1 }
 0xadb   : > { %v5787_v14 = vadd.f32 %v11813_v44, %v5786_v36  ;;  %v5956_v19 = vadd.f32 %v5932_v21, %v12465_v55 }
 0xadd   : > { %v5836_v43 = vadd.f32 %v5835_v40, %v5787_v14  ;;  %v5838_v45 = vpop.f32.mrf.mxu0  ;;  %v5977_v17 = vmul.f32 %v11874_v22, %v5956_v19 }
 0xadf   : > { %v5885_v38 = vadd.f32 %v5884_v61, %v5836_v43 }
 0xae0   : > { %v5933_v27 = vpop.f32.mrf.mxu2 }
 0xae1   : > { %v5934_v26 = vadd.f32 %v5933_v27, %v5885_v38 }
 0xae2   : > { %v5887_v46 = vpop.f32.mrf.mxu1 }
 0xae3   : > { %v5789_v51 = vpop.f32.mrf.mxu3  ;;  %v5957_v63 = vadd.f32 %v5934_v26, %v12466_v49 }
 0xae4   : > { %v5790_v10 = vadd.f32 %v11813_v44, %v5789_v51 }
 0xae5   : > { %v5978_v29 = vmul.f32 %v11874_v22, %v5957_v63  ;;  %v5840_v39 = vpop.f32.mrf.mxu0 }
 0xae6   : > { %v5839_v15 = vadd.f32 %v5838_v45, %v5790_v10 }
 0xae7   : > { %v6751_v31 = vpack.c.bf16 %v5978_v29, %v5977_v17 }
 0xae8   : > { %v5888_v18 = vadd.f32 %v5887_v46, %v5839_v15 }
 0xae9   : > { %6774 = vst [vmem:[%s11888_s30 + $0x28] sm:$0xff] %v6751_v31  }
 0xaea   : > { %v5889_v56 = vpop.f32.mrf.mxu1 }
 0xaeb   : > { %v5791_v11 = vpop.f32.mrf.mxu3 }
 0xaec   : > { %v5792_v30 = vadd.f32 %v11813_v44, %v5791_v11 }
 0xaee   : > { %v5841_v34 = vadd.f32 %v5840_v39, %v5792_v30 }
 0xaef   : > { %v5936_v7 = vpop.f32.mrf.mxu2 }
 0xaf0   : > { %v5937_v0 = vadd.f32 %v5936_v7, %v5888_v18  ;;  %v5890_v24 = vadd.f32 %v5889_v56, %v5841_v34 }
 0xaf2   : > { %v5958_v62 = vadd.f32 %v5937_v0, %v12467_v42 }
 0xaf4   : > { %v5979_v59 = vmul.f32 %v11874_v22, %v5958_v62 }
 0xaf7   : > { %v5938_v37 = vpop.f32.mrf.mxu2 }
 0xaf8   : > { %v5939_v54 = vadd.f32 %v5938_v37, %v5890_v24 }
 0xafa   : > { %v5959_v3 = vadd.f32 %v5939_v54, %v12468_v12 }
 0xafc   : > { %v5980_v4 = vmul.f32 %v11874_v22, %v5959_v3 }
 0xafd   : > { %v5843_v50 = vpop.f32.mrf.mxu0 }
 0xafe   : > { %v6756_v5 = vpack.c.bf16 %v5980_v4, %v5979_v59 }
 0xb00   : > { %6775 = vst [vmem:[%s11888_s30 + $0x30] sm:$0xff] %v6756_v5   ;;  %v5892_v58 = vpop.f32.mrf.mxu1 }
 0xb05   : > { %v5845_v60 = vpop.f32.mrf.mxu0 }
 0xb08   : > { %v5894_v25 = vpop.f32.mrf.mxu1 }
 0xb11   : > { %v5794_v57 = vpop.f32.mrf.mxu3 }
 0xb12   : > { %v5795_v35 = vadd.f32 %v11813_v44, %v5794_v57 }
 0xb14   : > { %v5844_v8 = vadd.f32 %v5843_v50, %v5795_v35 }
 0xb15   : > { %v5941_v28 = vpop.f32.mrf.mxu2 }
 0xb16   : > { %v5893_v23 = vadd.f32 %v5892_v58, %v5844_v8 }
 0xb18   : > { %v5942_v53 = vadd.f32 %v5941_v28, %v5893_v23 }
 0xb19   : > { %v5796_v32 = vpop.f32.mrf.mxu3 }
 0xb1a   : > { %v5797_v47 = vadd.f32 %v11813_v44, %v5796_v32  ;;  %v5960_v16 = vadd.f32 %v5942_v53, %v12469_v41 }
 0xb1c   : > { %v5846_v52 = vadd.f32 %v5845_v60, %v5797_v47  ;;  %v5981_v6 = vmul.f32 %v11874_v22, %v5960_v16 }
 0xb1d   : > { %v5943_v33 = vpop.f32.mrf.mxu2 }
 0xb1e   : > { %v5895_v48 = vadd.f32 %v5894_v25, %v5846_v52 }
 0xb20   : > { %v5944_v2 = vadd.f32 %v5943_v33, %v5895_v48 }
 0xb22   : > { %v5961_v13 = vadd.f32 %v5944_v2, %v12470_v20 }
 0xb24   : > { %v5982_v9 = vmul.f32 %v11874_v22, %v5961_v13 }
 0xb26   : > { %v6761_v1 = vpack.c.bf16 %v5982_v9, %v5981_v6 }
 0xb28   : > { %6776 = vst [vmem:[%s11888_s30 + $0x38] sm:$0xff] %v6761_v1  }
 0xb29 PF: > { %s23_s25 = sadd.s32 1, %s7308_s25  }
 0xb2a   : > { %p20_p4 = scmp.ge.s32.totalorder %s23_s25, 4  }
 0xb2c   :  { %22 = sbr.rel (!%p20_p4) target bundleno = 1 (0x1), region = 102 }

</bundles_post_ra>
